<compile_context>
chip_gen: v6e
topology: v6e:2x2x1
jax: 0.10.0
libtpu: 0.0.40
codegen_flags: <defaults>
</compile_context>

<pallas_src>
import functools

import numpy as np

import jax
import jax.numpy as jnp
from jax.experimental import pallas as pl
from jax.experimental.pallas import tpu as pltpu

LANE = 128
NODE_ALIGN = 256   # pad N to multiples of 256: full 2x256 MXU tiles (v6e/v7x)
TM_CAP = 1024      # row-strip cap (h restream traffic ∝ 1/tm)
TK_CAP = 512       # reduction-tile cap

# A is streamed as 1-byte 0/1.  On v5e (near compute-bound, no bf16 VPU) the
# in-kernel int8->bf16 upcast can cost real VALU cycles; flip this to
# jnp.bfloat16 there if the convert shows up as the saturated slot.
A_DTYPE = jnp.int8


# ----------------------------------------------------------------------------
# helpers
# ----------------------------------------------------------------------------
def _round_up(x, m):
    return ((x + m - 1) // m) * m


def _pad2d(x, rows, cols):
    return jnp.pad(x, ((0, rows - x.shape[0]), (0, cols - x.shape[1])))


def _divisor_tiles(n_pad, cap):
    return [t for t in range(NODE_ALIGN, min(cap, n_pad) + 1, NODE_ALIGN)
            if n_pad % t == 0]


def _pick_tm(n_pad, cap=TM_CAP):
    cands = _divisor_tiles(n_pad, cap)
    if not cands:
        return n_pad
    best = max(cands)
    strips = n_pad // best
    if strips > 1 and strips % 2 == 1:
        # v7x has 2 TensorCores: prefer an even row-strip count when it costs
        # at most a 2x smaller tm (no-op on v5e/v6e and for single-strip runs).
        even = [t for t in cands if (n_pad // t) % 2 == 0 and 2 * t >= best]
        if even:
            return max(even)
    return best


def _pick_tk(n_pad, cap=TK_CAP):
    cands = _divisor_tiles(n_pad, cap)
    return max(cands) if cands else n_pad


def _vmem_limit(nbytes):
    # Generous headroom for the double-buffered pipeline, but stay well within
    # v7x's 64 MiB physical VMEM.
    return int(min(max(2 * nbytes + (8 << 20), 32 << 20), 48 << 20))


# ----------------------------------------------------------------------------
# Pallas kernels
# ----------------------------------------------------------------------------
def _dense_kernel(x_ref, w_ref, b_ref, o_ref):
    # out = X @ W + b   (row-tiled; bf16 inputs, f32 accumulation)
    out = jnp.dot(x_ref[...], w_ref[...], preferred_element_type=jnp.float32)
    o_ref[...] = (out + b_ref[...]).astype(o_ref.dtype)


def _aggregate_kernel(a_ref, h_ref, nk_ref, ni_ref, b_ref, o_ref, acc_ref, *,
                      relu):
    # acc[i] = sum_k A[i,k] @ (norm[k] * h[k]);  out = norm[i] * acc + b
    k = pl.program_id(1)

    @pl.when(k == 0)
    def _():
        acc_ref[...] = jnp.zeros_like(acc_ref)

    a = a_ref[...].astype(jnp.bfloat16)                        # 0/1, exact
    hs = (h_ref[...].astype(jnp.float32) * nk_ref[...]).astype(jnp.bfloat16)
    acc_ref[...] += jnp.dot(a, hs, preferred_element_type=jnp.float32)

    @pl.when(k == pl.num_programs(1) - 1)
    def _():
        out = acc_ref[...] * ni_ref[...] + b_ref[...]
        if relu:
            out = jnp.maximum(out, 0.0)
        o_ref[...] = out.astype(o_ref.dtype)


def _aggregate_matmul_kernel(a_ref, h_ref, nk_ref, ni_ref, w_ref, b_ref,
                             o_ref, acc_ref, *, relu):
    # acc[i] = sum_k A[i,k] @ (norm[k] * h[k]);  out = (norm[i] * acc) @ W + b
    k = pl.program_id(1)

    @pl.when(k == 0)
    def _():
        acc_ref[...] = jnp.zeros_like(acc_ref)

    a = a_ref[...].astype(jnp.bfloat16)                        # 0/1, exact
    hs = (h_ref[...].astype(jnp.float32) * nk_ref[...]).astype(jnp.bfloat16)
    acc_ref[...] += jnp.dot(a, hs, preferred_element_type=jnp.float32)

    @pl.when(k == pl.num_programs(1) - 1)
    def _():
        agg = (acc_ref[...] * ni_ref[...]).astype(w_ref.dtype)
        out = jnp.dot(agg, w_ref[...],
                      preferred_element_type=jnp.float32) + b_ref[...]
        if relu:
            out = jnp.maximum(out, 0.0)
        o_ref[...] = out.astype(o_ref.dtype)


# ----------------------------------------------------------------------------
# pallas_call wrappers
# ----------------------------------------------------------------------------
def pallas_dense(x, w, b, *, tm, out_dtype):
    n_pad, fin_pad = x.shape
    fout_pad = w.shape[1]
    ob = np.dtype(out_dtype).itemsize
    vmem = (2 * tm * fin_pad * x.dtype.itemsize
            + 2 * fin_pad * fout_pad * w.dtype.itemsize
            + 2 * fout_pad * 4 + 2 * tm * fout_pad * ob)
    cost = pl.CostEstimate(
        flops=2 * n_pad * fin_pad * fout_pad, transcendentals=0,
        bytes_accessed=(n_pad * fin_pad * x.dtype.itemsize
                        + fin_pad * fout_pad * w.dtype.itemsize
                        + n_pad * fout_pad * ob))
    return pl.pallas_call(
        _dense_kernel,
        out_shape=jax.ShapeDtypeStruct((n_pad, fout_pad), out_dtype),
        grid_spec=pltpu.PrefetchScalarGridSpec(
            num_scalar_prefetch=0,
            grid=(n_pad // tm,),
            in_specs=[pl.BlockSpec((tm, fin_pad), lambda i: (i, 0)),
                      pl.BlockSpec((fin_pad, fout_pad), lambda i: (0, 0)),
                      pl.BlockSpec((1, fout_pad), lambda i: (0, 0))],
            out_specs=pl.BlockSpec((tm, fout_pad), lambda i: (i, 0)),
        ),
        compiler_params=pltpu.CompilerParams(
            dimension_semantics=("parallel",),
            vmem_limit_bytes=_vmem_limit(vmem)),
        cost_estimate=cost,
    )(x, w, b)


def _pallas_aggregate(a, h, norm, b, *, tm, tk, relu, out_dtype):
    n_pad = a.shape[0]
    f_pad = h.shape[1]
    ob = np.dtype(out_dtype).itemsize
    vmem = (2 * tm * tk * a.dtype.itemsize
            + 2 * tk * f_pad * h.dtype.itemsize
            + 2 * (tm + tk) * 4 + 2 * f_pad * 4
            + 2 * tm * f_pad * ob + tm * f_pad * 4)
    cost = pl.CostEstimate(
        flops=2 * n_pad * n_pad * f_pad, transcendentals=0,
        bytes_accessed=(n_pad * n_pad * a.dtype.itemsize
                        + (n_pad // tm) * n_pad * f_pad * h.dtype.itemsize
                        + n_pad * f_pad * ob))
    return pl.pallas_call(
        functools.partial(_aggregate_kernel, relu=relu),
        out_shape=jax.ShapeDtypeStruct((n_pad, f_pad), out_dtype),
        grid_spec=pltpu.PrefetchScalarGridSpec(
            num_scalar_prefetch=0,
            grid=(n_pad // tm, n_pad // tk),
            in_specs=[pl.BlockSpec((tm, tk), lambda i, k: (i, k)),
                      pl.BlockSpec((tk, f_pad), lambda i, k: (k, 0)),
                      pl.BlockSpec((tk, 1), lambda i, k: (k, 0)),
                      pl.BlockSpec((tm, 1), lambda i, k: (i, 0)),
                      pl.BlockSpec((1, f_pad), lambda i, k: (0, 0))],
            out_specs=pl.BlockSpec((tm, f_pad), lambda i, k: (i, 0)),
            scratch_shapes=[pltpu.VMEM((tm, f_pad), jnp.float32)],
        ),
        compiler_params=pltpu.CompilerParams(
            dimension_semantics=("parallel", "arbitrary"),
            vmem_limit_bytes=_vmem_limit(vmem)),
        cost_estimate=cost,
    )(a, h, norm, norm, b)


def _pallas_aggregate_matmul(a, h, norm, w, b, *, tm, tk, relu, out_dtype):
    n_pad = a.shape[0]
    fin_pad, fout_pad = w.shape
    ob = np.dtype(out_dtype).itemsize
    vmem = (2 * tm * tk * a.dtype.itemsize
            + 2 * tk * fin_pad * h.dtype.itemsize
            + 2 * (tm + tk) * 4
            + 2 * fin_pad * fout_pad * w.dtype.itemsize + 2 * fout_pad * 4
            + 2 * tm * fout_pad * ob + tm * fin_pad * 4)
    cost = pl.CostEstimate(
        flops=2 * n_pad * n_pad * fin_pad + 2 * n_pad * fin_pad * fout_pad,
        transcendentals=0,
        bytes_accessed=(n_pad * n_pad * a.dtype.itemsize
                        + (n_pad // tm) * n_pad * fin_pad * h.dtype.itemsize
                        + n_pad * fout_pad * ob))
    return pl.pallas_call(
        functools.partial(_aggregate_matmul_kernel, relu=relu),
        out_shape=jax.ShapeDtypeStruct((n_pad, fout_pad), out_dtype),
        grid_spec=pltpu.PrefetchScalarGridSpec(
            num_scalar_prefetch=0,
            grid=(n_pad // tm, n_pad // tk),
            in_specs=[pl.BlockSpec((tm, tk), lambda i, k: (i, k)),
                      pl.BlockSpec((tk, fin_pad), lambda i, k: (k, 0)),
                      pl.BlockSpec((tk, 1), lambda i, k: (k, 0)),
                      pl.BlockSpec((tm, 1), lambda i, k: (i, 0)),
                      pl.BlockSpec((fin_pad, fout_pad), lambda i, k: (0, 0)),
                      pl.BlockSpec((1, fout_pad), lambda i, k: (0, 0))],
            out_specs=pl.BlockSpec((tm, fout_pad), lambda i, k: (i, 0)),
            scratch_shapes=[pltpu.VMEM((tm, fin_pad), jnp.float32)],
        ),
        compiler_params=pltpu.CompilerParams(
            dimension_semantics=("parallel", "arbitrary"),
            vmem_limit_bytes=_vmem_limit(vmem)),
        cost_estimate=cost,
    )(a, h, norm, norm, w, b)


def pallas_graphconv(a_raw, h, norm, w, b, *, tm, tk, relu, out_dtype):
    """h' = norm ⊙ (A @ (norm ⊙ h)) @ W + b  (== (A-agg of h@W) when fout<fin)."""
    fin_pad, fout_pad = w.shape
    if fout_pad < fin_pad:
        # Transform first: narrower result lanes through the big A contraction.
        # TODO(synk): fuse this pre-transform into the previous layer's finalize
        #             to avoid one (N, fout) HBM round trip.
        zero_b = jnp.zeros((1, fout_pad), jnp.float32)
        hw = pallas_dense(h, w, zero_b, tm=tm, out_dtype=jnp.bfloat16)
        return _pallas_aggregate(a_raw, hw, norm, b, tm=tm, tk=tk,
                                 relu=relu, out_dtype=out_dtype)
    return _pallas_aggregate_matmul(a_raw, h, norm, w, b, tm=tm, tk=tk,
                                    relu=relu, out_dtype=out_dtype)


# ----------------------------------------------------------------------------
# GCN model (parameter setup + forward orchestration)
# ----------------------------------------------------------------------------
def init_gcn_params(key, in_feats, n_hidden, n_classes, n_layers):
    """Deterministic parameter init matching GCN.__init__ shapes."""
    params = {}
    key, k_w, k_b = jax.random.split(key, 3)
    params["lin_w"] = 0.1 * jax.random.normal(k_w, (in_feats, n_hidden), jnp.float32)
    params["lin_b"] = 0.1 * jax.random.normal(k_b, (n_hidden,), jnp.float32)

    # GraphConv layers: n_layers x (hidden->hidden, relu) + (hidden->classes)
    dims = [(n_hidden, n_hidden)] * n_layers + [(n_hidden, n_classes)]
    gc_w, gc_b = [], []
    for (fi, fo) in dims:
        key, k_w, k_b = jax.random.split(key, 3)
        gc_w.append(0.1 * jax.random.normal(k_w, (fi, fo), jnp.float32))
        gc_b.append(0.1 * jax.random.normal(k_b, (fo,), jnp.float32))
    params["gc_w"] = gc_w
    params["gc_b"] = gc_b
    return params


def gcn_forward(params, adj, features):
    n = adj.shape[0]
    in_feats = features.shape[1]
    n_hidden = params["lin_w"].shape[1]
    n_classes = params["gc_w"][-1].shape[1]

    n_pad = _round_up(max(n, NODE_ALIGN), NODE_ALIGN)
    tm = _pick_tm(n_pad)
    tk = _pick_tk(n_pad)

    # A stays raw 0/1, streamed in 1-byte form (halves the dominant HBM stream
    # vs. a bf16 normalized adjacency); the symmetric deg^{-1/2} normalization
    # is kept in f32 and folded onto the feature side inside the kernels.
    a_raw = _pad2d(adj, n_pad, n_pad).astype(A_DTYPE)
    deg = jnp.clip(jnp.sum(adj, axis=1), 1.0, None)
    norm = (deg ** -0.5).astype(jnp.float32)
    norm = jnp.pad(norm, (0, n_pad - n)).reshape(n_pad, 1)   # padded rows -> 0

    # nn.Linear(in_feats, n_hidden) -- lane-padded, bf16 activations.
    fin_pad = _round_up(in_feats, LANE)
    hid_pad = _round_up(n_hidden, LANE)
    x = _pad2d(features, n_pad, fin_pad).astype(jnp.bfloat16)
    w_lin = _pad2d(params["lin_w"], fin_pad, hid_pad).astype(jnp.bfloat16)
    b_lin = jnp.pad(params["lin_b"], (0, hid_pad - n_hidden)).reshape(1, hid_pad)
    h = pallas_dense(x, w_lin, b_lin, tm=tm, out_dtype=jnp.bfloat16)

    n_gc = len(params["gc_w"])
    emb_pad = None
    for i in range(n_gc):
        is_last = i == n_gc - 1
        if is_last:
            emb_pad = h           # mirrors `self.emb = h` before the last layer
        # i != 0: dropout(h) -> identity in eval mode (see TODO above)
        fi, fo = params["gc_w"][i].shape
        fi_pad, fo_pad = _round_up(fi, LANE), _round_up(fo, LANE)
        w = _pad2d(params["gc_w"][i], fi_pad, fo_pad).astype(jnp.bfloat16)
        b = jnp.pad(params["gc_b"][i], (0, fo_pad - fo)).reshape(1, fo_pad)
        h = pallas_graphconv(
            a_raw, h, norm, w, b, tm=tm, tk=tk, relu=not is_last,
            out_dtype=jnp.float32 if is_last else jnp.bfloat16)

    logits = h[:n, :n_classes]
    emb = emb_pad[:n, :n_hidden].astype(jnp.float32)
    return logits, emb


def gcn_reference(params, adj, features):
    """Pure-JAX f32 reference (same math, no padding / no low precision)."""
    deg = jnp.clip(jnp.sum(adj, axis=1), 1.0, None)
    norm = (deg ** -0.5)[:, None]
    h = features @ params["lin_w"] + params["lin_b"]
    n_gc = len(params["gc_w"])
    emb = None
    for i in range(n_gc):
        if i == n_gc - 1:
            emb = h
        agg = (adj @ (h * norm)) * norm
        h = agg @ params["gc_w"][i] + params["gc_b"][i]
        if i != n_gc - 1:
            h = jnp.maximum(h, 0.0)
    return h, emb


# ----------------------------------------------------------------------------
if __name__ == "__main__":
    # Small synthetic problem: 300 nodes, in_feats=48, n_hidden=256,
    # n_classes=7, n_layers=2 (=> 3 GraphConv layers), dropout eval -> identity.
    # N pads to 512 -> tm=tk=512 -> each GraphConv is a single (1,1) grid step
    # (small-graph fast path); both the aggregate and the W-before-A reorder
    # (last layer) code paths are exercised.
    N, IN_FEATS, N_HIDDEN, N_CLASSES, N_LAYERS = 300, 48, 256, 7, 2

    key = jax.random.PRNGKey(0)
    key, k_feat, k_adj = jax.random.split(key, 3)

    features = jax.random.normal(k_feat, (N, IN_FEATS), jnp.float32)

    # Deterministic random undirected graph with self-loops (dense adjacency).
    a = (jax.random.uniform(k_adj, (N, N)) < 0.05).astype(jnp.float32)
    adj = jnp.clip(a + a.T + jnp.eye(N, dtype=jnp.float32), 0.0, 1.0)

    params = init_gcn_params(key, IN_FEATS, N_HIDDEN, N_CLASSES, N_LAYERS)

    logits, emb = jax.jit(gcn_forward)(params, adj, features)
    jax.block_until_ready((logits, emb))

    assert logits.shape == (N, N_CLASSES)
    assert emb.shape == (N, N_HIDDEN)

    # Tolerance check against the pure-JAX f32 reference (bf16 activations,
    # exact 0/1 A, f32 norm scaling / accumulation).
    ref_logits, ref_emb = gcn_reference(params, adj, features)

    def rel_l2(x, y):
        return float(jnp.linalg.norm(x - y) / (jnp.linalg.norm(y) + 1e-6))

    assert rel_l2(logits, ref_logits) < 5e-2
    assert rel_l2(emb, ref_emb) < 5e-2

    print("KERNEL_OK")
</pallas_src>

<mosaic_0001>
module attributes {stable_mosaic.version = 11 : i64} {
  func.func @_dense_kernel(%arg0: i32, %arg1: memref<512x128xbf16, #tpu.memory_space<vmem>>, %arg2: memref<128x256xbf16, #tpu.memory_space<vmem>>, %arg3: memref<1x256xf32, #tpu.memory_space<vmem>>, %arg4: memref<512x256xbf16, #tpu.memory_space<vmem>>) attributes {dimension_semantics = [#tpu.dimension_semantics<parallel>], iteration_bounds = array<i64: 1>, scalar_prefetch = 0 : i64, scratch_operands = 0 : i64, tpu.core_type = #tpu.core_type<tc>, window_params = [{transform_indices = @transform_0, window_bounds = array<i64: 512, 128>}, {pipeline_mode = #tpu.pipeline_mode<synchronous>, transform_indices = @transform_1, window_bounds = array<i64: 128, 256>}, {pipeline_mode = #tpu.pipeline_mode<synchronous>, transform_indices = @transform_2, window_bounds = array<i64: 1, 256>}, {transform_indices = @transform_3, window_bounds = array<i64: 512, 256>}]} {
    %c0 = arith.constant 0 : index
    %c0_0 = arith.constant 0 : index
    %0 = vector.load %arg1[%c0, %c0_0] : memref<512x128xbf16, #tpu.memory_space<vmem>>, vector<512x128xbf16>
    %c0_1 = arith.constant 0 : index
    %c0_2 = arith.constant 0 : index
    %1 = vector.load %arg2[%c0_1, %c0_2] : memref<128x256xbf16, #tpu.memory_space<vmem>>, vector<128x256xbf16>
    %cst = arith.constant dense<0.000000e+00> : vector<512x256xf32>
    %2 = tpu.matmul %0, %1, %cst {dimension_numbers = #tpu.dot_dimension_numbers<[1], [0], [0], [1], [0, 0, 1, 1], [], []>} : vector<512x128xbf16>, vector<128x256xbf16>, vector<512x256xf32> -> vector<512x256xf32>
    %c0_3 = arith.constant 0 : index
    %c0_4 = arith.constant 0 : index
    %3 = vector.load %arg3[%c0_3, %c0_4] : memref<1x256xf32, #tpu.memory_space<vmem>>, vector<1x256xf32>
    %4 = vector.broadcast %3 : vector<1x256xf32> to vector<512x256xf32>
    %5 = arith.addf %2, %4 : vector<512x256xf32>
    %6 = arith.truncf %5 : vector<512x256xf32> to vector<512x256xbf16>
    %c0_5 = arith.constant 0 : index
    %c0_6 = arith.constant 0 : index
    %7 = vector.load %arg4[%c0_5, %c0_6] : memref<512x256xbf16, #tpu.memory_space<vmem>>, vector<512x256xbf16>
    tpu.vector_store %arg4[%c0_5, %c0_6], %6 {strides = array<i32>} : memref<512x256xbf16, #tpu.memory_space<vmem>>, vector<512x256xbf16>,
    return
  }
  func.func @transform_0(%arg0: i32) -> (i32, i32) {
    %c0_i32 = arith.constant 0 : i32
    %c0_i32_0 = arith.constant 0 : i32
    return %arg0, %c0_i32 : i32, i32
  }
  func.func @transform_1(%arg0: i32) -> (i32, i32) {
    %c0_i32 = arith.constant 0 : i32
    %c0_i32_0 = arith.constant 0 : i32
    %c0_i32_1 = arith.constant 0 : i32
    return %c0_i32, %c0_i32_0 : i32, i32
  }
  func.func @transform_2(%arg0: i32) -> (i32, i32) {
    %c0_i32 = arith.constant 0 : i32
    %c0_i32_0 = arith.constant 0 : i32
    %c0_i32_1 = arith.constant 0 : i32
    return %c0_i32, %c0_i32_0 : i32, i32
  }
  func.func @transform_3(%arg0: i32) -> (i32, i32) {
    %c0_i32 = arith.constant 0 : i32
    %c0_i32_0 = arith.constant 0 : i32
    return %arg0, %c0_i32 : i32, i32
  }
}

module attributes {stable_mosaic.version = 11 : i64} {
  func.func @_aggregate_matmul_kernel(%arg0: i32, %arg1: i32, %arg2: memref<512x512xi8, #tpu.memory_space<vmem>>, %arg3: memref<512x256xbf16, #tpu.memory_space<vmem>>, %arg4: memref<512x1xf32, #tpu.memory_space<vmem>>, %arg5: memref<512x1xf32, #tpu.memory_space<vmem>>, %arg6: memref<256x256xbf16, #tpu.memory_space<vmem>>, %arg7: memref<1x256xf32, #tpu.memory_space<vmem>>, %arg8: memref<512x256xbf16, #tpu.memory_space<vmem>>, %arg9: memref<512x256xf32, #tpu.memory_space<vmem>>) attributes {dimension_semantics = [#tpu.dimension_semantics<parallel>, #tpu.dimension_semantics<arbitrary>], iteration_bounds = array<i64: 1, 1>, scalar_prefetch = 0 : i64, scratch_operands = 1 : i64, tpu.core_type = #tpu.core_type<tc>, window_params = [{transform_indices = @transform_0, window_bounds = array<i64: 512, 512>}, {transform_indices = @transform_1, window_bounds = array<i64: 512, 256>}, {transform_indices = @transform_2, window_bounds = array<i64: 512, 1>}, {transform_indices = @transform_3, window_bounds = array<i64: 512, 1>}, {pipeline_mode = #tpu.pipeline_mode<synchronous>, transform_indices = @transform_4, window_bounds = array<i64: 256, 256>}, {pipeline_mode = #tpu.pipeline_mode<synchronous>, transform_indices = @transform_5, window_bounds = array<i64: 1, 256>}, {transform_indices = @transform_6, window_bounds = array<i64: 512, 256>}]} {
    %c0_i32 = arith.constant 0 : i32
    %0 = arith.cmpi eq, %arg1, %c0_i32 : i32
    %1 = arith.extui %0 : i1 to i32
    %c0_i32_0 = arith.constant 0 : i32
    %2 = arith.cmpi ne, %1, %c0_i32_0 : i32
    scf.if %2 {
      %cst_12 = arith.constant 0.000000e+00 : f32
      %18 = vector.broadcast %cst_12 : f32 to vector<512x256xf32>
      %c0_13 = arith.constant 0 : index
      %c0_14 = arith.constant 0 : index
      %19 = vector.load %arg9[%c0_13, %c0_14] : memref<512x256xf32, #tpu.memory_space<vmem>>, vector<512x256xf32>
      tpu.vector_store %arg9[%c0_13, %c0_14], %18 {strides = array<i32>} : memref<512x256xf32, #tpu.memory_space<vmem>>, vector<512x256xf32>,
    } else {
    }
    %c0 = arith.constant 0 : index
    %c0_1 = arith.constant 0 : index
    %3 = vector.load %arg2[%c0, %c0_1] : memref<512x512xi8, #tpu.memory_space<vmem>>, vector<512x512xi8>
    %4 = arith.sitofp %3 : vector<512x512xi8> to vector<512x512xbf16>
    %c0_2 = arith.constant 0 : index
    %c0_3 = arith.constant 0 : index
    %5 = vector.load %arg3[%c0_2, %c0_3] : memref<512x256xbf16, #tpu.memory_space<vmem>>, vector<512x256xbf16>
    %6 = arith.extf %5 : vector<512x256xbf16> to vector<512x256xf32>
    %c0_4 = arith.constant 0 : index
    %c0_5 = arith.constant 0 : index
    %7 = vector.load %arg4[%c0_4, %c0_5] : memref<512x1xf32, #tpu.memory_space<vmem>>, vector<512x1xf32>
    %8 = vector.broadcast %7 : vector<512x1xf32> to vector<512x256xf32>
    %9 = arith.mulf %6, %8 : vector<512x256xf32>
    %10 = arith.truncf %9 : vector<512x256xf32> to vector<512x256xbf16>
    %c0_6 = arith.constant 0 : index
    %c0_7 = arith.constant 0 : index
    %11 = vector.load %arg9[%c0_6, %c0_7] : memref<512x256xf32, #tpu.memory_space<vmem>>, vector<512x256xf32>
    %cst = arith.constant dense<0.000000e+00> : vector<512x256xf32>
    %12 = tpu.matmul %4, %10, %cst {dimension_numbers = #tpu.dot_dimension_numbers<[1], [0], [0], [1], [0, 0, 1, 1], [], []>} : vector<512x512xbf16>, vector<512x256xbf16>, vector<512x256xf32> -> vector<512x256xf32>
    %13 = arith.addf %11, %12 : vector<512x256xf32>
    %c0_8 = arith.constant 0 : index
    %c0_9 = arith.constant 0 : index
    %14 = vector.load %arg9[%c0_8, %c0_9] : memref<512x256xf32, #tpu.memory_space<vmem>>, vector<512x256xf32>
    tpu.vector_store %arg9[%c0_8, %c0_9], %13 {strides = array<i32>} : memref<512x256xf32, #tpu.memory_space<vmem>>, vector<512x256xf32>,
    %c0_i32_10 = arith.constant 0 : i32
    %15 = arith.cmpi eq, %arg1, %c0_i32_10 : i32
    %16 = arith.extui %15 : i1 to i32
    %c0_i32_11 = arith.constant 0 : i32
    %17 = arith.cmpi ne, %16, %c0_i32_11 : i32
    scf.if %17 {
      %c0_12 = arith.constant 0 : index
      %c0_13 = arith.constant 0 : index
      %18 = vector.load %arg9[%c0_12, %c0_13] : memref<512x256xf32, #tpu.memory_space<vmem>>, vector<512x256xf32>
      %c0_14 = arith.constant 0 : index
      %c0_15 = arith.constant 0 : index
      %19 = vector.load %arg5[%c0_14, %c0_15] : memref<512x1xf32, #tpu.memory_space<vmem>>, vector<512x1xf32>
      %20 = vector.broadcast %19 : vector<512x1xf32> to vector<512x256xf32>
      %21 = arith.mulf %18, %20 : vector<512x256xf32>
      %22 = arith.truncf %21 : vector<512x256xf32> to vector<512x256xbf16>
      %c0_16 = arith.constant 0 : index
      %c0_17 = arith.constant 0 : index
      %23 = vector.load %arg6[%c0_16, %c0_17] : memref<256x256xbf16, #tpu.memory_space<vmem>>, vector<256x256xbf16>
      %cst_18 = arith.constant dense<0.000000e+00> : vector<512x256xf32>
      %24 = tpu.matmul %22, %23, %cst_18 {dimension_numbers = #tpu.dot_dimension_numbers<[1], [0], [0], [1], [0, 0, 1, 1], [], []>} : vector<512x256xbf16>, vector<256x256xbf16>, vector<512x256xf32> -> vector<512x256xf32>
      %c0_19 = arith.constant 0 : index
      %c0_20 = arith.constant 0 : index
      %25 = vector.load %arg7[%c0_19, %c0_20] : memref<1x256xf32, #tpu.memory_space<vmem>>, vector<1x256xf32>
      %26 = vector.broadcast %25 : vector<1x256xf32> to vector<512x256xf32>
      %27 = arith.addf %24, %26 : vector<512x256xf32>
      %cst_21 = arith.constant 0.000000e+00 : f32
      %28 = vector.broadcast %cst_21 : f32 to vector<512x256xf32>
      %29 = arith.maximumf %27, %28 : vector<512x256xf32>
      %30 = arith.truncf %29 : vector<512x256xf32> to vector<512x256xbf16>
      %c0_22 = arith.constant 0 : index
      %c0_23 = arith.constant 0 : index
      %31 = vector.load %arg8[%c0_22, %c0_23] : memref<512x256xbf16, #tpu.memory_space<vmem>>, vector<512x256xbf16>
      tpu.vector_store %arg8[%c0_22, %c0_23], %30 {strides = array<i32>} : memref<512x256xbf16, #tpu.memory_space<vmem>>, vector<512x256xbf16>,
    } else {
    }
    return
  }
  func.func @transform_0(%arg0: i32, %arg1: i32) -> (i32, i32) {
    %c0_i32 = arith.constant 0 : i32
    return %arg0, %arg1 : i32, i32
  }
  func.func @transform_1(%arg0: i32, %arg1: i32) -> (i32, i32) {
    %c0_i32 = arith.constant 0 : i32
    %c0_i32_0 = arith.constant 0 : i32
    return %arg1, %c0_i32 : i32, i32
  }
  func.func @transform_2(%arg0: i32, %arg1: i32) -> (i32, i32) {
    %c0_i32 = arith.constant 0 : i32
    %c0_i32_0 = arith.constant 0 : i32
    return %arg1, %c0_i32 : i32, i32
  }
  func.func @transform_3(%arg0: i32, %arg1: i32) -> (i32, i32) {
    %c0_i32 = arith.constant 0 : i32
    %c0_i32_0 = arith.constant 0 : i32
    return %arg0, %c0_i32 : i32, i32
  }
  func.func @transform_4(%arg0: i32, %arg1: i32) -> (i32, i32) {
    %c0_i32 = arith.constant 0 : i32
    %c0_i32_0 = arith.constant 0 : i32
    %c0_i32_1 = arith.constant 0 : i32
    return %c0_i32, %c0_i32_0 : i32, i32
  }
  func.func @transform_5(%arg0: i32, %arg1: i32) -> (i32, i32) {
    %c0_i32 = arith.constant 0 : i32
    %c0_i32_0 = arith.constant 0 : i32
    %c0_i32_1 = arith.constant 0 : i32
    return %c0_i32, %c0_i32_0 : i32, i32
  }
  func.func @transform_6(%arg0: i32, %arg1: i32) -> (i32, i32) {
    %c0_i32 = arith.constant 0 : i32
    %c0_i32_0 = arith.constant 0 : i32
    return %arg0, %c0_i32 : i32, i32
  }
}

module attributes {stable_mosaic.version = 11 : i64} {
  func.func @_dense_kernel(%arg0: i32, %arg1: memref<512x256xbf16, #tpu.memory_space<vmem>>, %arg2: memref<256x128xbf16, #tpu.memory_space<vmem>>, %arg3: memref<1x128xf32, #tpu.memory_space<vmem>>, %arg4: memref<512x128xbf16, #tpu.memory_space<vmem>>) attributes {dimension_semantics = [#tpu.dimension_semantics<parallel>], iteration_bounds = array<i64: 1>, scalar_prefetch = 0 : i64, scratch_operands = 0 : i64, tpu.core_type = #tpu.core_type<tc>, window_params = [{transform_indices = @transform_0, window_bounds = array<i64: 512, 256>}, {pipeline_mode = #tpu.pipeline_mode<synchronous>, transform_indices = @transform_1, window_bounds = array<i64: 256, 128>}, {pipeline_mode = #tpu.pipeline_mode<synchronous>, transform_indices = @transform_2, window_bounds = array<i64: 1, 128>}, {transform_indices = @transform_3, window_bounds = array<i64: 512, 128>}]} {
    %c0 = arith.constant 0 : index
    %c0_0 = arith.constant 0 : index
    %0 = vector.load %arg1[%c0, %c0_0] : memref<512x256xbf16, #tpu.memory_space<vmem>>, vector<512x256xbf16>
    %c0_1 = arith.constant 0 : index
    %c0_2 = arith.constant 0 : index
    %1 = vector.load %arg2[%c0_1, %c0_2] : memref<256x128xbf16, #tpu.memory_space<vmem>>, vector<256x128xbf16>
    %cst = arith.constant dense<0.000000e+00> : vector<512x128xf32>
    %2 = tpu.matmul %0, %1, %cst {dimension_numbers = #tpu.dot_dimension_numbers<[1], [0], [0], [1], [0, 0, 1, 1], [], []>} : vector<512x256xbf16>, vector<256x128xbf16>, vector<512x128xf32> -> vector<512x128xf32>
    %c0_3 = arith.constant 0 : index
    %c0_4 = arith.constant 0 : index
    %3 = vector.load %arg3[%c0_3, %c0_4] : memref<1x128xf32, #tpu.memory_space<vmem>>, vector<1x128xf32>
    %4 = vector.broadcast %3 : vector<1x128xf32> to vector<512x128xf32>
    %5 = arith.addf %2, %4 : vector<512x128xf32>
    %6 = arith.truncf %5 : vector<512x128xf32> to vector<512x128xbf16>
    %c0_5 = arith.constant 0 : index
    %c0_6 = arith.constant 0 : index
    %7 = vector.load %arg4[%c0_5, %c0_6] : memref<512x128xbf16, #tpu.memory_space<vmem>>, vector<512x128xbf16>
    tpu.vector_store %arg4[%c0_5, %c0_6], %6 {strides = array<i32>} : memref<512x128xbf16, #tpu.memory_space<vmem>>, vector<512x128xbf16>,
    return
  }
  func.func @transform_0(%arg0: i32) -> (i32, i32) {
    %c0_i32 = arith.constant 0 : i32
    %c0_i32_0 = arith.constant 0 : i32
    return %arg0, %c0_i32 : i32, i32
  }
  func.func @transform_1(%arg0: i32) -> (i32, i32) {
    %c0_i32 = arith.constant 0 : i32
    %c0_i32_0 = arith.constant 0 : i32
    %c0_i32_1 = arith.constant 0 : i32
    return %c0_i32, %c0_i32_0 : i32, i32
  }
  func.func @transform_2(%arg0: i32) -> (i32, i32) {
    %c0_i32 = arith.constant 0 : i32
    %c0_i32_0 = arith.constant 0 : i32
    %c0_i32_1 = arith.constant 0 : i32
    return %c0_i32, %c0_i32_0 : i32, i32
  }
  func.func @transform_3(%arg0: i32) -> (i32, i32) {
    %c0_i32 = arith.constant 0 : i32
    %c0_i32_0 = arith.constant 0 : i32
    return %arg0, %c0_i32 : i32, i32
  }
}

module attributes {stable_mosaic.version = 11 : i64} {
  func.func @_aggregate_kernel(%arg0: i32, %arg1: i32, %arg2: memref<512x512xi8, #tpu.memory_space<vmem>>, %arg3: memref<512x128xbf16, #tpu.memory_space<vmem>>, %arg4: memref<512x1xf32, #tpu.memory_space<vmem>>, %arg5: memref<512x1xf32, #tpu.memory_space<vmem>>, %arg6: memref<1x128xf32, #tpu.memory_space<vmem>>, %arg7: memref<512x128xf32, #tpu.memory_space<vmem>>, %arg8: memref<512x128xf32, #tpu.memory_space<vmem>>) attributes {dimension_semantics = [#tpu.dimension_semantics<parallel>, #tpu.dimension_semantics<arbitrary>], iteration_bounds = array<i64: 1, 1>, scalar_prefetch = 0 : i64, scratch_operands = 1 : i64, tpu.core_type = #tpu.core_type<tc>, window_params = [{transform_indices = @transform_0, window_bounds = array<i64: 512, 512>}, {transform_indices = @transform_1, window_bounds = array<i64: 512, 128>}, {transform_indices = @transform_2, window_bounds = array<i64: 512, 1>}, {transform_indices = @transform_3, window_bounds = array<i64: 512, 1>}, {pipeline_mode = #tpu.pipeline_mode<synchronous>, transform_indices = @transform_4, window_bounds = array<i64: 1, 128>}, {transform_indices = @transform_5, window_bounds = array<i64: 512, 128>}]} {
    %c0_i32 = arith.constant 0 : i32
    %0 = arith.cmpi eq, %arg1, %c0_i32 : i32
    %1 = arith.extui %0 : i1 to i32
    %c0_i32_0 = arith.constant 0 : i32
    %2 = arith.cmpi ne, %1, %c0_i32_0 : i32
    scf.if %2 {
      %cst_12 = arith.constant 0.000000e+00 : f32
      %18 = vector.broadcast %cst_12 : f32 to vector<512x128xf32>
      %c0_13 = arith.constant 0 : index
      %c0_14 = arith.constant 0 : index
      %19 = vector.load %arg8[%c0_13, %c0_14] : memref<512x128xf32, #tpu.memory_space<vmem>>, vector<512x128xf32>
      tpu.vector_store %arg8[%c0_13, %c0_14], %18 {strides = array<i32>} : memref<512x128xf32, #tpu.memory_space<vmem>>, vector<512x128xf32>,
    } else {
    }
    %c0 = arith.constant 0 : index
    %c0_1 = arith.constant 0 : index
    %3 = vector.load %arg2[%c0, %c0_1] : memref<512x512xi8, #tpu.memory_space<vmem>>, vector<512x512xi8>
    %4 = arith.sitofp %3 : vector<512x512xi8> to vector<512x512xbf16>
    %c0_2 = arith.constant 0 : index
    %c0_3 = arith.constant 0 : index
    %5 = vector.load %arg3[%c0_2, %c0_3] : memref<512x128xbf16, #tpu.memory_space<vmem>>, vector<512x128xbf16>
    %6 = arith.extf %5 : vector<512x128xbf16> to vector<512x128xf32>
    %c0_4 = arith.constant 0 : index
    %c0_5 = arith.constant 0 : index
    %7 = vector.load %arg4[%c0_4, %c0_5] : memref<512x1xf32, #tpu.memory_space<vmem>>, vector<512x1xf32>
    %8 = vector.broadcast %7 : vector<512x1xf32> to vector<512x128xf32>
    %9 = arith.mulf %6, %8 : vector<512x128xf32>
    %10 = arith.truncf %9 : vector<512x128xf32> to vector<512x128xbf16>
    %c0_6 = arith.constant 0 : index
    %c0_7 = arith.constant 0 : index
    %11 = vector.load %arg8[%c0_6, %c0_7] : memref<512x128xf32, #tpu.memory_space<vmem>>, vector<512x128xf32>
    %cst = arith.constant dense<0.000000e+00> : vector<512x128xf32>
    %12 = tpu.matmul %4, %10, %cst {dimension_numbers = #tpu.dot_dimension_numbers<[1], [0], [0], [1], [0, 0, 1, 1], [], []>} : vector<512x512xbf16>, vector<512x128xbf16>, vector<512x128xf32> -> vector<512x128xf32>
    %13 = arith.addf %11, %12 : vector<512x128xf32>
    %c0_8 = arith.constant 0 : index
    %c0_9 = arith.constant 0 : index
    %14 = vector.load %arg8[%c0_8, %c0_9] : memref<512x128xf32, #tpu.memory_space<vmem>>, vector<512x128xf32>
    tpu.vector_store %arg8[%c0_8, %c0_9], %13 {strides = array<i32>} : memref<512x128xf32, #tpu.memory_space<vmem>>, vector<512x128xf32>,
    %c0_i32_10 = arith.constant 0 : i32
    %15 = arith.cmpi eq, %arg1, %c0_i32_10 : i32
    %16 = arith.extui %15 : i1 to i32
    %c0_i32_11 = arith.constant 0 : i32
    %17 = arith.cmpi ne, %16, %c0_i32_11 : i32
    scf.if %17 {
      %c0_12 = arith.constant 0 : index
      %c0_13 = arith.constant 0 : index
      %18 = vector.load %arg8[%c0_12, %c0_13] : memref<512x128xf32, #tpu.memory_space<vmem>>, vector<512x128xf32>
      %c0_14 = arith.constant 0 : index
      %c0_15 = arith.constant 0 : index
      %19 = vector.load %arg5[%c0_14, %c0_15] : memref<512x1xf32, #tpu.memory_space<vmem>>, vector<512x1xf32>
      %20 = vector.broadcast %19 : vector<512x1xf32> to vector<512x128xf32>
      %21 = arith.mulf %18, %20 : vector<512x128xf32>
      %c0_16 = arith.constant 0 : index
      %c0_17 = arith.constant 0 : index
      %22 = vector.load %arg6[%c0_16, %c0_17] : memref<1x128xf32, #tpu.memory_space<vmem>>, vector<1x128xf32>
      %23 = vector.broadcast %22 : vector<1x128xf32> to vector<512x128xf32>
      %24 = arith.addf %21, %23 : vector<512x128xf32>
      %c0_18 = arith.constant 0 : index
      %c0_19 = arith.constant 0 : index
      %25 = vector.load %arg7[%c0_18, %c0_19] : memref<512x128xf32, #tpu.memory_space<vmem>>, vector<512x128xf32>
      tpu.vector_store %arg7[%c0_18, %c0_19], %24 {strides = array<i32>} : memref<512x128xf32, #tpu.memory_space<vmem>>, vector<512x128xf32>,
    } else {
    }
    return
  }
  func.func @transform_0(%arg0: i32, %arg1: i32) -> (i32, i32) {
    %c0_i32 = arith.constant 0 : i32
    return %arg0, %arg1 : i32, i32
  }
  func.func @transform_1(%arg0: i32, %arg1: i32) -> (i32, i32) {
    %c0_i32 = arith.constant 0 : i32
    %c0_i32_0 = arith.constant 0 : i32
    return %arg1, %c0_i32 : i32, i32
  }
  func.func @transform_2(%arg0: i32, %arg1: i32) -> (i32, i32) {
    %c0_i32 = arith.constant 0 : i32
    %c0_i32_0 = arith.constant 0 : i32
    return %arg1, %c0_i32 : i32, i32
  }
  func.func @transform_3(%arg0: i32, %arg1: i32) -> (i32, i32) {
    %c0_i32 = arith.constant 0 : i32
    %c0_i32_0 = arith.constant 0 : i32
    return %arg0, %c0_i32 : i32, i32
  }
  func.func @transform_4(%arg0: i32, %arg1: i32) -> (i32, i32) {
    %c0_i32 = arith.constant 0 : i32
    %c0_i32_0 = arith.constant 0 : i32
    %c0_i32_1 = arith.constant 0 : i32
    return %c0_i32, %c0_i32_0 : i32, i32
  }
  func.func @transform_5(%arg0: i32, %arg1: i32) -> (i32, i32) {
    %c0_i32 = arith.constant 0 : i32
    %c0_i32_0 = arith.constant 0 : i32
    return %arg0, %c0_i32 : i32, i32
  }
}

</mosaic_0001>

<bundles_post_ra>
// kernel: gcn_forward.5
= control target key start
LH: loop header
LB: loop body
LE: loop exit
PB: predicated region body
PF: predicated region fallthrough
CT: control target
= control target key end

     0   :  { %v1433_v1 = vmov 0   ;;  %v97_v49 = vlaneseq  ;;  %s1957_s1 = inlined_call_operand.vmem [shape: bf16[128,256], index: 1, kind: input, shape index: {}]   ;;  %s1958_s0 = inlined_call_operand.vmem [shape: bf16[512,128], index: 0, kind: input, shape index: {}]   ;;  %s1959_s2 = inlined_call_operand.vmem [shape: f32[1,256], index: 2, kind: input, shape index: {}]   ;;  %s1960_s3 = inlined_call_operand.vmem [shape: bf16[512,256], index: 3, kind: output, shape index: {}]  }
   0x1   :  { %v1377_v0 = vld [vmem:[%s1957_s1 + $0x74] ss:$8 sps:$4 sm:$0xff]   ;;  %411 = vmatprep.mubr.bf16.mxu0 %v1433_v1  ;;  %571 = vmatprep.mubr.bf16.mxu1 %v1433_v1  ;;  %v1379_v2 = vld [vmem:[%s1957_s1 + $0x70] ss:$8 sps:$4 sm:$0xff]   ;;  %v1380_v3 = vld [vmem:[%s1957_s1 + $0x64] ss:$8 sps:$4 sm:$0xff]  }
   0x2   :  { %379 = vmatprep.subr.bf16.mxu0 %v1377_v0  ;;  %1360 = vmatprep.subr.bf16.mxu1 %v1377_v0  ;;  %v1382_v4 = vld [vmem:[%s1957_s1 + $0x60] ss:$8 sps:$4 sm:$0xff]   ;;  %v1383_v5 = vld [vmem:[%s1957_s1 + $0x54] ss:$8 sps:$4 sm:$0xff]   ;;  %v1385_v6 = vld [vmem:[%s1957_s1 + $0x50] ss:$8 sps:$4 sm:$0xff]  }
   0x3   :  { %380 = vmatpush1.bf16.msra.mxu0 %v1379_v2  ;;  %1368 = vmatpush1.bf16.msra.mxu1 %v1379_v2  ;;  %v1386_v7 = vld [vmem:[%s1957_s1 + $0x44] ss:$8 sps:$4 sm:$0xff]   ;;  %v1388_v8 = vld [vmem:[%s1957_s1 + $0x40] ss:$8 sps:$4 sm:$0xff]   ;;  %v1389_v9 = vld [vmem:[%s1957_s1 + $0x34] ss:$8 sps:$4 sm:$0xff]  }
   0x4   :  { %381 = vmatprep.subr.bf16.mxu0 %v1380_v3  ;;  %1361 = vmatprep.subr.bf16.mxu1 %v1380_v3  ;;  %v1391_v10 = vld [vmem:[%s1957_s1 + $0x30] ss:$8 sps:$4 sm:$0xff]   ;;  %v1392_v11 = vld [vmem:[%s1957_s1 + $0x24] ss:$8 sps:$4 sm:$0xff]   ;;  %v1394_v12 = vld [vmem:[%s1957_s1 + $0x20] ss:$8 sps:$4 sm:$0xff]  }
   0x5   :  { %v1395_v13 = vld [vmem:[%s1957_s1 + $0x14] ss:$8 sps:$4 sm:$0xff]   ;;  %v1397_v14 = vld [vmem:[%s1957_s1 + $0x10] ss:$8 sps:$4 sm:$0xff]   ;;  %v1398_v15 = vld [vmem:[%s1957_s1 + $0x4] ss:$8 sps:$4 sm:$0xff]  }
   0x6   :  { %v1400_v16 = vld [vmem:[%s1957_s1] ss:$8 sps:$4 sm:$0xff]   ;;  %v1405_v21 = vld [vmem:[%s1958_s0 + $0x10] sm:$0xff]   ;;  %v1407_v23 = vld [vmem:[%s1958_s0 + $0x18] sm:$0xff]   ;;  %v98_v50 = vshrl.u32 %v97_v49, 7 }
   0x7   :  { %382 = vmatpush1.bf16.msra.mxu0 %v1382_v4  ;;  %1369 = vmatpush1.bf16.msra.mxu1 %v1382_v4  ;;  %v1401_v17 = vld [vmem:[%s1958_s0] sm:$0xff]   ;;  %v1403_v19 = vld [vmem:[%s1958_s0 + $0x8] sm:$0xff]   ;;  %v1406_v22 = vld [vmem:[%s1958_s0 + $0x90] sm:$0xff]  }
   0x8   :  { %383 = vmatprep.subr.bf16.mxu0 %v1383_v5  ;;  %1362 = vmatprep.subr.bf16.mxu1 %v1383_v5  ;;  %v1402_v18 = vld [vmem:[%s1958_s0 + $0x80] sm:$0xff]   ;;  %v1404_v20 = vld [vmem:[%s1958_s0 + $0x88] sm:$0xff]   ;;  %v1408_v24 = vld [vmem:[%s1958_s0 + $0x98] sm:$0xff]   ;;  %v99_v51 = vsub.s32 0, %v98_v50  ;;  %v103_v52 = vsub.s32 1, %v98_v50 }
   0x9   :  { %v1409_v25 = vld [vmem:[%s1958_s0 + $0x20] sm:$0xff]   ;;  %v1411_v27 = vld [vmem:[%s1958_s0 + $0x28] sm:$0xff]   ;;  %v1413_v29 = vld [vmem:[%s1958_s0 + $0x30] sm:$0xff]  }
   0xa   :  { %v1410_v26 = vld [vmem:[%s1958_s0 + $0xa0] sm:$0xff]   ;;  %v1412_v28 = vld [vmem:[%s1958_s0 + $0xa8] sm:$0xff]   ;;  %v1414_v30 = vld [vmem:[%s1958_s0 + $0xb0] sm:$0xff]  }
   0xb   :  { %384 = vmatpush1.bf16.msra.mxu0 %v1385_v6  ;;  %1370 = vmatpush1.bf16.msra.mxu1 %v1385_v6  ;;  %v1415_v31 = vld [vmem:[%s1958_s0 + $0x38] sm:$0xff]   ;;  %v1417_v33 = vld [vmem:[%s1958_s0 + $0x40] sm:$0xff]   ;;  %v1419_v35 = vld [vmem:[%s1958_s0 + $0x48] sm:$0xff]  }
   0xc   :  { %385 = vmatprep.subr.bf16.mxu0 %v1386_v7  ;;  %1363 = vmatprep.subr.bf16.mxu1 %v1386_v7  ;;  %v1416_v32 = vld [vmem:[%s1958_s0 + $0xb8] sm:$0xff]   ;;  %v1418_v34 = vld [vmem:[%s1958_s0 + $0xc0] sm:$0xff]   ;;  %v1420_v36 = vld [vmem:[%s1958_s0 + $0xc8] sm:$0xff]  }
   0xd   :  { %v1421_v37 = vld [vmem:[%s1958_s0 + $0x50] sm:$0xff]   ;;  %v1423_v39 = vld [vmem:[%s1958_s0 + $0x58] sm:$0xff]   ;;  %v1425_v41 = vld [vmem:[%s1958_s0 + $0x60] sm:$0xff]  }
   0xe   :  { %v1422_v38 = vld [vmem:[%s1958_s0 + $0xd0] sm:$0xff]   ;;  %v1424_v40 = vld [vmem:[%s1958_s0 + $0xd8] sm:$0xff]   ;;  %v1426_v42 = vld [vmem:[%s1958_s0 + $0xe0] sm:$0xff]  }
   0xf   :  { %386 = vmatpush1.bf16.msra.mxu0 %v1388_v8  ;;  %1371 = vmatpush1.bf16.msra.mxu1 %v1388_v8  ;;  %v1427_v43 = vld [vmem:[%s1958_s0 + $0x68] sm:$0xff]   ;;  %v1429_v45 = vld [vmem:[%s1958_s0 + $0x70] sm:$0xff]   ;;  %v1431_v47 = vld [vmem:[%s1958_s0 + $0x78] sm:$0xff]  }
  0x10   :  { %387 = vmatprep.subr.bf16.mxu0 %v1389_v9  ;;  %1364 = vmatprep.subr.bf16.mxu1 %v1389_v9  ;;  %v1428_v44 = vld [vmem:[%s1958_s0 + $0xe8] sm:$0xff]   ;;  %v1430_v46 = vld [vmem:[%s1958_s0 + $0xf0] sm:$0xff]   ;;  %v1432_v48 = vld [vmem:[%s1958_s0 + $0xf8] sm:$0xff]  }
  0x11   :  { %v95_v53 = vld [vmem:[%s1959_s2] sm:$0x3] }
  0x12   :  { %v1633_v54 = vrot.slane %v95_v53, %v99_v51  ;;  %v1635_v55 = vrot.slane %v95_v53, %v103_v52 }
  0x13   :  { %388 = vmatpush1.bf16.msra.mxu0 %v1391_v10  ;;  %1372 = vmatpush1.bf16.msra.mxu1 %v1391_v10 }
  0x14   :  { %389 = vmatprep.subr.bf16.mxu0 %v1392_v11  ;;  %1365 = vmatprep.subr.bf16.mxu1 %v1392_v11 }
  0x17   :  { %390 = vmatpush1.bf16.msra.mxu0 %v1394_v12  ;;  %1373 = vmatpush1.bf16.msra.mxu1 %v1394_v12 }
  0x18   :  { %391 = vmatprep.subr.bf16.mxu0 %v1395_v13  ;;  %1366 = vmatprep.subr.bf16.mxu1 %v1395_v13 }
  0x1b   :  { %392 = vmatpush1.bf16.msra.mxu0 %v1397_v14  ;;  %1374 = vmatpush1.bf16.msra.mxu1 %v1397_v14 }
  0x1c   :  { %393 = vmatprep.subr.bf16.mxu0 %v1398_v15  ;;  %1367 = vmatprep.subr.bf16.mxu1 %v1398_v15 }
  0x1f   :  { %394 = vmatpush1.bf16.msra.mxu0 %v1400_v16  ;;  %1375 = vmatpush1.bf16.msra.mxu1 %v1400_v16 }
  0x22   :  { %412 = vmatmul.mubr.bf16.vlgmr.msra.gmra.mxu0 %v1401_v17  ;;  %572 = vmatmul.mubr.bf16.vlgmr.msra.gmra.mxu1 %v1402_v18 }
  0x23   :  { %421 = vmatprep.mubr.bf16.mxu0 %v1433_v1  ;;  %581 = vmatprep.mubr.bf16.mxu1 %v1433_v1 }
  0x2a   :  { %422 = vmatmul.mubr.bf16.gmra.mxu0 %v1403_v19  ;;  %582 = vmatmul.mubr.bf16.gmra.mxu1 %v1404_v20 }
  0x2b   :  { %431 = vmatprep.mubr.bf16.mxu0 %v1433_v1  ;;  %591 = vmatprep.mubr.bf16.mxu1 %v1433_v1 }
  0x32   :  { %432 = vmatmul.mubr.bf16.gmra.mxu0 %v1405_v21  ;;  %592 = vmatmul.mubr.bf16.gmra.mxu1 %v1406_v22 }
  0x33   :  { %441 = vmatprep.mubr.bf16.mxu0 %v1433_v1  ;;  %601 = vmatprep.mubr.bf16.mxu1 %v1433_v1 }
  0x3a   :  { %442 = vmatmul.mubr.bf16.gmra.mxu0 %v1407_v23  ;;  %602 = vmatmul.mubr.bf16.gmra.mxu1 %v1408_v24 }
  0x3b   :  { %451 = vmatprep.mubr.bf16.mxu0 %v1433_v1  ;;  %611 = vmatprep.mubr.bf16.mxu1 %v1433_v1 }
  0x42   :  { %452 = vmatmul.mubr.bf16.gmra.mxu0 %v1409_v25  ;;  %612 = vmatmul.mubr.bf16.gmra.mxu1 %v1410_v26 }
  0x43   :  { %461 = vmatprep.mubr.bf16.mxu0 %v1433_v1  ;;  %621 = vmatprep.mubr.bf16.mxu1 %v1433_v1 }
  0x4a   :  { %462 = vmatmul.mubr.bf16.gmra.mxu0 %v1411_v27  ;;  %622 = vmatmul.mubr.bf16.gmra.mxu1 %v1412_v28 }
  0x4b   :  { %471 = vmatprep.mubr.bf16.mxu0 %v1433_v1  ;;  %631 = vmatprep.mubr.bf16.mxu1 %v1433_v1 }
  0x52   :  { %472 = vmatmul.mubr.bf16.gmra.mxu0 %v1413_v29  ;;  %632 = vmatmul.mubr.bf16.gmra.mxu1 %v1414_v30 }
  0x53   :  { %481 = vmatprep.mubr.bf16.mxu0 %v1433_v1  ;;  %641 = vmatprep.mubr.bf16.mxu1 %v1433_v1 }
  0x5a   :  { %482 = vmatmul.mubr.bf16.gmra.mxu0 %v1415_v31  ;;  %642 = vmatmul.mubr.bf16.gmra.mxu1 %v1416_v32 }
  0x5b   :  { %491 = vmatprep.mubr.bf16.mxu0 %v1433_v1  ;;  %651 = vmatprep.mubr.bf16.mxu1 %v1433_v1 }
  0x62   :  { %492 = vmatmul.mubr.bf16.gmra.mxu0 %v1417_v33  ;;  %652 = vmatmul.mubr.bf16.gmra.mxu1 %v1418_v34 }
  0x63   :  { %501 = vmatprep.mubr.bf16.mxu0 %v1433_v1  ;;  %661 = vmatprep.mubr.bf16.mxu1 %v1433_v1 }
  0x6a   :  { %502 = vmatmul.mubr.bf16.gmra.mxu0 %v1419_v35  ;;  %662 = vmatmul.mubr.bf16.gmra.mxu1 %v1420_v36 }
  0x6b   :  { %511 = vmatprep.mubr.bf16.mxu0 %v1433_v1  ;;  %671 = vmatprep.mubr.bf16.mxu1 %v1433_v1 }
  0x72   :  { %512 = vmatmul.mubr.bf16.gmra.mxu0 %v1421_v37  ;;  %672 = vmatmul.mubr.bf16.gmra.mxu1 %v1422_v38 }
  0x73   :  { %521 = vmatprep.mubr.bf16.mxu0 %v1433_v1  ;;  %681 = vmatprep.mubr.bf16.mxu1 %v1433_v1 }
  0x7a   :  { %522 = vmatmul.mubr.bf16.gmra.mxu0 %v1423_v39  ;;  %682 = vmatmul.mubr.bf16.gmra.mxu1 %v1424_v40 }
  0x7b   :  { %531 = vmatprep.mubr.bf16.mxu0 %v1433_v1  ;;  %691 = vmatprep.mubr.bf16.mxu1 %v1433_v1 }
  0x82   :  { %532 = vmatmul.mubr.bf16.gmra.mxu0 %v1425_v41  ;;  %692 = vmatmul.mubr.bf16.gmra.mxu1 %v1426_v42 }
  0x83   :  { %541 = vmatprep.mubr.bf16.mxu0 %v1433_v1  ;;  %701 = vmatprep.mubr.bf16.mxu1 %v1433_v1 }
  0x8a   :  { %542 = vmatmul.mubr.bf16.gmra.mxu0 %v1427_v43  ;;  %702 = vmatmul.mubr.bf16.gmra.mxu1 %v1428_v44 }
  0x8b   :  { %551 = vmatprep.mubr.bf16.mxu0 %v1433_v1  ;;  %711 = vmatprep.mubr.bf16.mxu1 %v1433_v1 }
  0x92   :  { %552 = vmatmul.mubr.bf16.gmra.mxu0 %v1429_v45  ;;  %712 = vmatmul.mubr.bf16.gmra.mxu1 %v1430_v46 }
  0x93   :  { %561 = vmatprep.mubr.bf16.mxu0 %v1433_v1  ;;  %721 = vmatprep.mubr.bf16.mxu1 %v1433_v1 }
  0x9a   :  { %562 = vmatmul.mubr.bf16.gmra.mxu0 %v1431_v47  ;;  %722 = vmatmul.mubr.bf16.gmra.mxu1 %v1432_v48 }
  0xe2   :  { %v413_v56 = vpop.f32.mrf.mxu0  ;;  %v573_v57 = vpop.f32.mrf.mxu1 }
  0xe3   :  { %v414_v60 = vadd.f32 %v413_v56, %v1633_v54  ;;  %v574_v61 = vadd.f32 %v573_v57, %v1633_v54 }
  0xe4   :  { %v415_v58 = vpop.f32.mrf.mxu0  ;;  %v575_v59 = vpop.f32.mrf.mxu1 }
  0xe5   :  { %v416_v62 = vadd.f32 %v415_v58, %v1635_v55  ;;  %v576_v63 = vadd.f32 %v575_v59, %v1635_v55 }
  0xe6   :  { %v417_v0 = vpop.f32.mrf.mxu0  ;;  %v577_v1 = vpop.f32.mrf.mxu1 }
  0xe7   :  { %v1296_v2 = vpack.c.bf16 %v416_v62, %v414_v60  ;;  %v1328_v3 = vpack.c.bf16 %v576_v63, %v574_v61  ;;  %v418_v6 = vadd.f32 %v417_v0, %v1633_v54  ;;  %v578_v7 = vadd.f32 %v577_v1, %v1633_v54 }
  0xe8   :  { %v419_v4 = vpop.f32.mrf.mxu0  ;;  %v579_v5 = vpop.f32.mrf.mxu1 }
  0xe9   :  { %1116 = vst [vmem:[%s1960_s3] sm:$0xff] %v1296_v2  ;;  %1148 = vst [vmem:[%s1960_s3 + $0x100] sm:$0xff] %v1328_v3  ;;  %v420_v8 = vadd.f32 %v419_v4, %v1635_v55  ;;  %v580_v9 = vadd.f32 %v579_v5, %v1635_v55 }
  0xea   :  { %v423_v10 = vpop.f32.mrf.mxu0  ;;  %v583_v11 = vpop.f32.mrf.mxu1 }
  0xeb   :  { %v1297_v12 = vpack.c.bf16 %v420_v8, %v418_v6  ;;  %v1329_v13 = vpack.c.bf16 %v580_v9, %v578_v7  ;;  %v424_v16 = vadd.f32 %v423_v10, %v1633_v54  ;;  %v584_v17 = vadd.f32 %v583_v11, %v1633_v54 }
  0xec   :  { %v425_v14 = vpop.f32.mrf.mxu0  ;;  %v585_v15 = vpop.f32.mrf.mxu1 }
  0xed   :  { %1117 = vst [vmem:[%s1960_s3 + $0x8] sm:$0xff] %v1297_v12  ;;  %1149 = vst [vmem:[%s1960_s3 + $0x108] sm:$0xff] %v1329_v13  ;;  %v426_v18 = vadd.f32 %v425_v14, %v1635_v55  ;;  %v586_v19 = vadd.f32 %v585_v15, %v1635_v55 }
  0xee   :  { %v427_v20 = vpop.f32.mrf.mxu0  ;;  %v587_v21 = vpop.f32.mrf.mxu1 }
  0xef   :  { %v1298_v22 = vpack.c.bf16 %v426_v18, %v424_v16  ;;  %v1330_v23 = vpack.c.bf16 %v586_v19, %v584_v17  ;;  %v428_v26 = vadd.f32 %v427_v20, %v1633_v54  ;;  %v588_v27 = vadd.f32 %v587_v21, %v1633_v54 }
  0xf0   :  { %v429_v24 = vpop.f32.mrf.mxu0  ;;  %v589_v25 = vpop.f32.mrf.mxu1 }
  0xf1   :  { %1118 = vst [vmem:[%s1960_s3 + $0x10] sm:$0xff] %v1298_v22  ;;  %1150 = vst [vmem:[%s1960_s3 + $0x110] sm:$0xff] %v1330_v23  ;;  %v430_v28 = vadd.f32 %v429_v24, %v1635_v55  ;;  %v590_v29 = vadd.f32 %v589_v25, %v1635_v55 }
  0xf2   :  { %v433_v30 = vpop.f32.mrf.mxu0  ;;  %v593_v31 = vpop.f32.mrf.mxu1 }
  0xf3   :  { %v1299_v32 = vpack.c.bf16 %v430_v28, %v428_v26  ;;  %v1331_v33 = vpack.c.bf16 %v590_v29, %v588_v27  ;;  %v434_v36 = vadd.f32 %v433_v30, %v1633_v54  ;;  %v594_v37 = vadd.f32 %v593_v31, %v1633_v54 }
  0xf4   :  { %v435_v34 = vpop.f32.mrf.mxu0  ;;  %v595_v35 = vpop.f32.mrf.mxu1 }
  0xf5   :  { %1119 = vst [vmem:[%s1960_s3 + $0x18] sm:$0xff] %v1299_v32  ;;  %1151 = vst [vmem:[%s1960_s3 + $0x118] sm:$0xff] %v1331_v33  ;;  %v436_v38 = vadd.f32 %v435_v34, %v1635_v55  ;;  %v596_v39 = vadd.f32 %v595_v35, %v1635_v55 }
  0xf6   :  { %v437_v40 = vpop.f32.mrf.mxu0  ;;  %v597_v41 = vpop.f32.mrf.mxu1 }
  0xf7   :  { %v1300_v42 = vpack.c.bf16 %v436_v38, %v434_v36  ;;  %v1332_v43 = vpack.c.bf16 %v596_v39, %v594_v37  ;;  %v438_v46 = vadd.f32 %v437_v40, %v1633_v54  ;;  %v598_v47 = vadd.f32 %v597_v41, %v1633_v54 }
  0xf8   :  { %v439_v44 = vpop.f32.mrf.mxu0  ;;  %v599_v45 = vpop.f32.mrf.mxu1 }
  0xf9   :  { %1120 = vst [vmem:[%s1960_s3 + $0x20] sm:$0xff] %v1300_v42  ;;  %1152 = vst [vmem:[%s1960_s3 + $0x120] sm:$0xff] %v1332_v43  ;;  %v440_v48 = vadd.f32 %v439_v44, %v1635_v55  ;;  %v600_v49 = vadd.f32 %v599_v45, %v1635_v55 }
  0xfa   :  { %v443_v50 = vpop.f32.mrf.mxu0  ;;  %v603_v51 = vpop.f32.mrf.mxu1 }
  0xfb   :  { %v1301_v52 = vpack.c.bf16 %v440_v48, %v438_v46  ;;  %v1333_v53 = vpack.c.bf16 %v600_v49, %v598_v47  ;;  %v444_v58 = vadd.f32 %v443_v50, %v1633_v54  ;;  %v604_v59 = vadd.f32 %v603_v51, %v1633_v54 }
  0xfc   :  { %v445_v56 = vpop.f32.mrf.mxu0  ;;  %v605_v57 = vpop.f32.mrf.mxu1 }
  0xfd   :  { %1121 = vst [vmem:[%s1960_s3 + $0x28] sm:$0xff] %v1301_v52  ;;  %1153 = vst [vmem:[%s1960_s3 + $0x128] sm:$0xff] %v1333_v53  ;;  %v446_v60 = vadd.f32 %v445_v56, %v1635_v55  ;;  %v606_v61 = vadd.f32 %v605_v57, %v1635_v55 }
  0xfe   :  { %v447_v62 = vpop.f32.mrf.mxu0  ;;  %v607_v63 = vpop.f32.mrf.mxu1 }
  0xff   :  { %v1302_v0 = vpack.c.bf16 %v446_v60, %v444_v58  ;;  %v1334_v1 = vpack.c.bf16 %v606_v61, %v604_v59  ;;  %v448_v4 = vadd.f32 %v447_v62, %v1633_v54  ;;  %v608_v5 = vadd.f32 %v607_v63, %v1633_v54 }
 0x100   :  { %v449_v2 = vpop.f32.mrf.mxu0  ;;  %v609_v3 = vpop.f32.mrf.mxu1 }
 0x101   :  { %1122 = vst [vmem:[%s1960_s3 + $0x30] sm:$0xff] %v1302_v0  ;;  %1154 = vst [vmem:[%s1960_s3 + $0x130] sm:$0xff] %v1334_v1  ;;  %v450_v6 = vadd.f32 %v449_v2, %v1635_v55  ;;  %v610_v7 = vadd.f32 %v609_v3, %v1635_v55 }
 0x102   :  { %v453_v8 = vpop.f32.mrf.mxu0  ;;  %v613_v9 = vpop.f32.mrf.mxu1 }
 0x103   :  { %v1303_v10 = vpack.c.bf16 %v450_v6, %v448_v4  ;;  %v1335_v11 = vpack.c.bf16 %v610_v7, %v608_v5  ;;  %v454_v14 = vadd.f32 %v453_v8, %v1633_v54  ;;  %v614_v15 = vadd.f32 %v613_v9, %v1633_v54 }
 0x104   :  { %v455_v12 = vpop.f32.mrf.mxu0  ;;  %v615_v13 = vpop.f32.mrf.mxu1 }
 0x105   :  { %1123 = vst [vmem:[%s1960_s3 + $0x38] sm:$0xff] %v1303_v10  ;;  %1155 = vst [vmem:[%s1960_s3 + $0x138] sm:$0xff] %v1335_v11  ;;  %v456_v16 = vadd.f32 %v455_v12, %v1635_v55  ;;  %v616_v17 = vadd.f32 %v615_v13, %v1635_v55 }
 0x106   :  { %v457_v18 = vpop.f32.mrf.mxu0  ;;  %v617_v19 = vpop.f32.mrf.mxu1 }
 0x107   :  { %v1304_v20 = vpack.c.bf16 %v456_v16, %v454_v14  ;;  %v1336_v21 = vpack.c.bf16 %v616_v17, %v614_v15  ;;  %v458_v24 = vadd.f32 %v457_v18, %v1633_v54  ;;  %v618_v25 = vadd.f32 %v617_v19, %v1633_v54 }
 0x108   :  { %v459_v22 = vpop.f32.mrf.mxu0  ;;  %v619_v23 = vpop.f32.mrf.mxu1 }
 0x109   :  { %1124 = vst [vmem:[%s1960_s3 + $0x40] sm:$0xff] %v1304_v20  ;;  %1156 = vst [vmem:[%s1960_s3 + $0x140] sm:$0xff] %v1336_v21  ;;  %v460_v26 = vadd.f32 %v459_v22, %v1635_v55  ;;  %v620_v27 = vadd.f32 %v619_v23, %v1635_v55 }
 0x10a   :  { %v463_v28 = vpop.f32.mrf.mxu0  ;;  %v623_v29 = vpop.f32.mrf.mxu1 }
 0x10b   :  { %v1305_v30 = vpack.c.bf16 %v460_v26, %v458_v24  ;;  %v1337_v31 = vpack.c.bf16 %v620_v27, %v618_v25  ;;  %v464_v34 = vadd.f32 %v463_v28, %v1633_v54  ;;  %v624_v35 = vadd.f32 %v623_v29, %v1633_v54 }
 0x10c   :  { %v465_v32 = vpop.f32.mrf.mxu0  ;;  %v625_v33 = vpop.f32.mrf.mxu1 }
 0x10d   :  { %1125 = vst [vmem:[%s1960_s3 + $0x48] sm:$0xff] %v1305_v30  ;;  %1157 = vst [vmem:[%s1960_s3 + $0x148] sm:$0xff] %v1337_v31  ;;  %v466_v36 = vadd.f32 %v465_v32, %v1635_v55  ;;  %v626_v37 = vadd.f32 %v625_v33, %v1635_v55 }
 0x10e   :  { %v467_v38 = vpop.f32.mrf.mxu0  ;;  %v627_v39 = vpop.f32.mrf.mxu1 }
 0x10f   :  { %v1306_v40 = vpack.c.bf16 %v466_v36, %v464_v34  ;;  %v1338_v41 = vpack.c.bf16 %v626_v37, %v624_v35  ;;  %v468_v44 = vadd.f32 %v467_v38, %v1633_v54  ;;  %v628_v45 = vadd.f32 %v627_v39, %v1633_v54 }
 0x110   :  { %v469_v42 = vpop.f32.mrf.mxu0  ;;  %v629_v43 = vpop.f32.mrf.mxu1 }
 0x111   :  { %1126 = vst [vmem:[%s1960_s3 + $0x50] sm:$0xff] %v1306_v40  ;;  %1158 = vst [vmem:[%s1960_s3 + $0x150] sm:$0xff] %v1338_v41  ;;  %v470_v46 = vadd.f32 %v469_v42, %v1635_v55  ;;  %v630_v47 = vadd.f32 %v629_v43, %v1635_v55 }
 0x112   :  { %v473_v48 = vpop.f32.mrf.mxu0  ;;  %v633_v49 = vpop.f32.mrf.mxu1 }
 0x113   :  { %v1307_v50 = vpack.c.bf16 %v470_v46, %v468_v44  ;;  %v1339_v51 = vpack.c.bf16 %v630_v47, %v628_v45  ;;  %v474_v56 = vadd.f32 %v473_v48, %v1633_v54  ;;  %v634_v57 = vadd.f32 %v633_v49, %v1633_v54 }
 0x114   :  { %v475_v52 = vpop.f32.mrf.mxu0  ;;  %v635_v53 = vpop.f32.mrf.mxu1 }
 0x115   :  { %1127 = vst [vmem:[%s1960_s3 + $0x58] sm:$0xff] %v1307_v50  ;;  %1159 = vst [vmem:[%s1960_s3 + $0x158] sm:$0xff] %v1339_v51  ;;  %v476_v58 = vadd.f32 %v475_v52, %v1635_v55  ;;  %v636_v59 = vadd.f32 %v635_v53, %v1635_v55 }
 0x116   :  { %v477_v60 = vpop.f32.mrf.mxu0  ;;  %v637_v61 = vpop.f32.mrf.mxu1 }
 0x117   :  { %v1308_v62 = vpack.c.bf16 %v476_v58, %v474_v56  ;;  %v1340_v63 = vpack.c.bf16 %v636_v59, %v634_v57  ;;  %v478_v2 = vadd.f32 %v477_v60, %v1633_v54  ;;  %v638_v3 = vadd.f32 %v637_v61, %v1633_v54 }
 0x118   :  { %v479_v0 = vpop.f32.mrf.mxu0  ;;  %v639_v1 = vpop.f32.mrf.mxu1 }
 0x119   :  { %1128 = vst [vmem:[%s1960_s3 + $0x60] sm:$0xff] %v1308_v62  ;;  %1160 = vst [vmem:[%s1960_s3 + $0x160] sm:$0xff] %v1340_v63  ;;  %v480_v4 = vadd.f32 %v479_v0, %v1635_v55  ;;  %v640_v5 = vadd.f32 %v639_v1, %v1635_v55 }
 0x11a   :  { %v483_v6 = vpop.f32.mrf.mxu0  ;;  %v643_v7 = vpop.f32.mrf.mxu1 }
 0x11b   :  { %v1309_v8 = vpack.c.bf16 %v480_v4, %v478_v2  ;;  %v1341_v9 = vpack.c.bf16 %v640_v5, %v638_v3  ;;  %v484_v12 = vadd.f32 %v483_v6, %v1633_v54  ;;  %v644_v13 = vadd.f32 %v643_v7, %v1633_v54 }
 0x11c   :  { %v485_v10 = vpop.f32.mrf.mxu0  ;;  %v645_v11 = vpop.f32.mrf.mxu1 }
 0x11d   :  { %1129 = vst [vmem:[%s1960_s3 + $0x68] sm:$0xff] %v1309_v8  ;;  %1161 = vst [vmem:[%s1960_s3 + $0x168] sm:$0xff] %v1341_v9  ;;  %v486_v14 = vadd.f32 %v485_v10, %v1635_v55  ;;  %v646_v15 = vadd.f32 %v645_v11, %v1635_v55 }
 0x11e   :  { %v487_v16 = vpop.f32.mrf.mxu0  ;;  %v647_v17 = vpop.f32.mrf.mxu1 }
 0x11f   :  { %v1310_v18 = vpack.c.bf16 %v486_v14, %v484_v12  ;;  %v1342_v19 = vpack.c.bf16 %v646_v15, %v644_v13  ;;  %v488_v22 = vadd.f32 %v487_v16, %v1633_v54  ;;  %v648_v23 = vadd.f32 %v647_v17, %v1633_v54 }
 0x120   :  { %v489_v20 = vpop.f32.mrf.mxu0  ;;  %v649_v21 = vpop.f32.mrf.mxu1 }
 0x121   :  { %1130 = vst [vmem:[%s1960_s3 + $0x70] sm:$0xff] %v1310_v18  ;;  %1162 = vst [vmem:[%s1960_s3 + $0x170] sm:$0xff] %v1342_v19  ;;  %v490_v24 = vadd.f32 %v489_v20, %v1635_v55  ;;  %v650_v25 = vadd.f32 %v649_v21, %v1635_v55 }
 0x122   :  { %v493_v26 = vpop.f32.mrf.mxu0  ;;  %v653_v27 = vpop.f32.mrf.mxu1 }
 0x123   :  { %v1311_v28 = vpack.c.bf16 %v490_v24, %v488_v22  ;;  %v1343_v29 = vpack.c.bf16 %v650_v25, %v648_v23  ;;  %v494_v32 = vadd.f32 %v493_v26, %v1633_v54  ;;  %v654_v33 = vadd.f32 %v653_v27, %v1633_v54 }
 0x124   :  { %v495_v30 = vpop.f32.mrf.mxu0  ;;  %v655_v31 = vpop.f32.mrf.mxu1 }
 0x125   :  { %1131 = vst [vmem:[%s1960_s3 + $0x78] sm:$0xff] %v1311_v28  ;;  %1163 = vst [vmem:[%s1960_s3 + $0x178] sm:$0xff] %v1343_v29  ;;  %v496_v34 = vadd.f32 %v495_v30, %v1635_v55  ;;  %v656_v35 = vadd.f32 %v655_v31, %v1635_v55 }
 0x126   :  { %v497_v36 = vpop.f32.mrf.mxu0  ;;  %v657_v37 = vpop.f32.mrf.mxu1 }
 0x127   :  { %v1312_v38 = vpack.c.bf16 %v496_v34, %v494_v32  ;;  %v1344_v39 = vpack.c.bf16 %v656_v35, %v654_v33  ;;  %v498_v42 = vadd.f32 %v497_v36, %v1633_v54  ;;  %v658_v43 = vadd.f32 %v657_v37, %v1633_v54 }
 0x128   :  { %v499_v40 = vpop.f32.mrf.mxu0  ;;  %v659_v41 = vpop.f32.mrf.mxu1 }
 0x129   :  { %1132 = vst [vmem:[%s1960_s3 + $0x80] sm:$0xff] %v1312_v38  ;;  %1164 = vst [vmem:[%s1960_s3 + $0x180] sm:$0xff] %v1344_v39  ;;  %v500_v44 = vadd.f32 %v499_v40, %v1635_v55  ;;  %v660_v45 = vadd.f32 %v659_v41, %v1635_v55 }
 0x12a   :  { %v503_v46 = vpop.f32.mrf.mxu0  ;;  %v663_v47 = vpop.f32.mrf.mxu1 }
 0x12b   :  { %v1313_v48 = vpack.c.bf16 %v500_v44, %v498_v42  ;;  %v1345_v49 = vpack.c.bf16 %v660_v45, %v658_v43  ;;  %v504_v52 = vadd.f32 %v503_v46, %v1633_v54  ;;  %v664_v53 = vadd.f32 %v663_v47, %v1633_v54 }
 0x12c   :  { %v505_v50 = vpop.f32.mrf.mxu0  ;;  %v665_v51 = vpop.f32.mrf.mxu1 }
 0x12d   :  { %1133 = vst [vmem:[%s1960_s3 + $0x88] sm:$0xff] %v1313_v48  ;;  %1165 = vst [vmem:[%s1960_s3 + $0x188] sm:$0xff] %v1345_v49  ;;  %v506_v56 = vadd.f32 %v505_v50, %v1635_v55  ;;  %v666_v57 = vadd.f32 %v665_v51, %v1635_v55 }
 0x12e   :  { %v507_v58 = vpop.f32.mrf.mxu0  ;;  %v667_v59 = vpop.f32.mrf.mxu1 }
 0x12f   :  { %v1314_v60 = vpack.c.bf16 %v506_v56, %v504_v52  ;;  %v1346_v61 = vpack.c.bf16 %v666_v57, %v664_v53  ;;  %v508_v0 = vadd.f32 %v507_v58, %v1633_v54  ;;  %v668_v1 = vadd.f32 %v667_v59, %v1633_v54 }
 0x130   :  { %v509_v62 = vpop.f32.mrf.mxu0  ;;  %v669_v63 = vpop.f32.mrf.mxu1 }
 0x131   :  { %1134 = vst [vmem:[%s1960_s3 + $0x90] sm:$0xff] %v1314_v60  ;;  %1166 = vst [vmem:[%s1960_s3 + $0x190] sm:$0xff] %v1346_v61  ;;  %v510_v2 = vadd.f32 %v509_v62, %v1635_v55  ;;  %v670_v3 = vadd.f32 %v669_v63, %v1635_v55 }
 0x132   :  { %v513_v4 = vpop.f32.mrf.mxu0  ;;  %v673_v5 = vpop.f32.mrf.mxu1 }
 0x133   :  { %v1315_v6 = vpack.c.bf16 %v510_v2, %v508_v0  ;;  %v1347_v7 = vpack.c.bf16 %v670_v3, %v668_v1  ;;  %v514_v10 = vadd.f32 %v513_v4, %v1633_v54  ;;  %v674_v11 = vadd.f32 %v673_v5, %v1633_v54 }
 0x134   :  { %v515_v8 = vpop.f32.mrf.mxu0  ;;  %v675_v9 = vpop.f32.mrf.mxu1 }
 0x135   :  { %1135 = vst [vmem:[%s1960_s3 + $0x98] sm:$0xff] %v1315_v6  ;;  %1167 = vst [vmem:[%s1960_s3 + $0x198] sm:$0xff] %v1347_v7  ;;  %v516_v12 = vadd.f32 %v515_v8, %v1635_v55  ;;  %v676_v13 = vadd.f32 %v675_v9, %v1635_v55 }
 0x136   :  { %v517_v14 = vpop.f32.mrf.mxu0  ;;  %v677_v15 = vpop.f32.mrf.mxu1 }
 0x137   :  { %v1316_v16 = vpack.c.bf16 %v516_v12, %v514_v10  ;;  %v1348_v17 = vpack.c.bf16 %v676_v13, %v674_v11  ;;  %v518_v20 = vadd.f32 %v517_v14, %v1633_v54  ;;  %v678_v21 = vadd.f32 %v677_v15, %v1633_v54 }
 0x138   :  { %v519_v18 = vpop.f32.mrf.mxu0  ;;  %v679_v19 = vpop.f32.mrf.mxu1 }
 0x139   :  { %1136 = vst [vmem:[%s1960_s3 + $0xa0] sm:$0xff] %v1316_v16  ;;  %1168 = vst [vmem:[%s1960_s3 + $0x1a0] sm:$0xff] %v1348_v17  ;;  %v520_v22 = vadd.f32 %v519_v18, %v1635_v55  ;;  %v680_v23 = vadd.f32 %v679_v19, %v1635_v55 }
 0x13a   :  { %v523_v24 = vpop.f32.mrf.mxu0  ;;  %v683_v25 = vpop.f32.mrf.mxu1 }
 0x13b   :  { %v1317_v26 = vpack.c.bf16 %v520_v22, %v518_v20  ;;  %v1349_v27 = vpack.c.bf16 %v680_v23, %v678_v21  ;;  %v524_v30 = vadd.f32 %v523_v24, %v1633_v54  ;;  %v684_v31 = vadd.f32 %v683_v25, %v1633_v54 }
 0x13c   :  { %v525_v28 = vpop.f32.mrf.mxu0  ;;  %v685_v29 = vpop.f32.mrf.mxu1 }
 0x13d   :  { %1137 = vst [vmem:[%s1960_s3 + $0xa8] sm:$0xff] %v1317_v26  ;;  %1169 = vst [vmem:[%s1960_s3 + $0x1a8] sm:$0xff] %v1349_v27  ;;  %v526_v32 = vadd.f32 %v525_v28, %v1635_v55  ;;  %v686_v33 = vadd.f32 %v685_v29, %v1635_v55 }
 0x13e   :  { %v527_v34 = vpop.f32.mrf.mxu0  ;;  %v687_v35 = vpop.f32.mrf.mxu1 }
 0x13f   :  { %v1318_v36 = vpack.c.bf16 %v526_v32, %v524_v30  ;;  %v1350_v37 = vpack.c.bf16 %v686_v33, %v684_v31  ;;  %v528_v40 = vadd.f32 %v527_v34, %v1633_v54  ;;  %v688_v41 = vadd.f32 %v687_v35, %v1633_v54 }
 0x140   :  { %v529_v38 = vpop.f32.mrf.mxu0  ;;  %v689_v39 = vpop.f32.mrf.mxu1 }
 0x141   :  { %1138 = vst [vmem:[%s1960_s3 + $0xb0] sm:$0xff] %v1318_v36  ;;  %1170 = vst [vmem:[%s1960_s3 + $0x1b0] sm:$0xff] %v1350_v37  ;;  %v530_v42 = vadd.f32 %v529_v38, %v1635_v55  ;;  %v690_v43 = vadd.f32 %v689_v39, %v1635_v55 }
 0x142   :  { %v533_v44 = vpop.f32.mrf.mxu0  ;;  %v693_v45 = vpop.f32.mrf.mxu1 }
 0x143   :  { %v1319_v46 = vpack.c.bf16 %v530_v42, %v528_v40  ;;  %v1351_v47 = vpack.c.bf16 %v690_v43, %v688_v41  ;;  %v534_v50 = vadd.f32 %v533_v44, %v1633_v54  ;;  %v694_v51 = vadd.f32 %v693_v45, %v1633_v54 }
 0x144   :  { %v535_v48 = vpop.f32.mrf.mxu0  ;;  %v695_v49 = vpop.f32.mrf.mxu1 }
 0x145   :  { %1139 = vst [vmem:[%s1960_s3 + $0xb8] sm:$0xff] %v1319_v46  ;;  %1171 = vst [vmem:[%s1960_s3 + $0x1b8] sm:$0xff] %v1351_v47  ;;  %v536_v52 = vadd.f32 %v535_v48, %v1635_v55  ;;  %v696_v53 = vadd.f32 %v695_v49, %v1635_v55 }
 0x146   :  { %v537_v56 = vpop.f32.mrf.mxu0  ;;  %v697_v57 = vpop.f32.mrf.mxu1 }
 0x147   :  { %v1320_v58 = vpack.c.bf16 %v536_v52, %v534_v50  ;;  %v1352_v59 = vpack.c.bf16 %v696_v53, %v694_v51  ;;  %v538_v62 = vadd.f32 %v537_v56, %v1633_v54  ;;  %v698_v63 = vadd.f32 %v697_v57, %v1633_v54 }
 0x148   :  { %v539_v60 = vpop.f32.mrf.mxu0  ;;  %v699_v61 = vpop.f32.mrf.mxu1 }
 0x149   :  { %1140 = vst [vmem:[%s1960_s3 + $0xc0] sm:$0xff] %v1320_v58  ;;  %1172 = vst [vmem:[%s1960_s3 + $0x1c0] sm:$0xff] %v1352_v59  ;;  %v540_v0 = vadd.f32 %v539_v60, %v1635_v55  ;;  %v700_v1 = vadd.f32 %v699_v61, %v1635_v55 }
 0x14a   :  { %v543_v2 = vpop.f32.mrf.mxu0  ;;  %v703_v3 = vpop.f32.mrf.mxu1 }
 0x14b   :  { %v1321_v4 = vpack.c.bf16 %v540_v0, %v538_v62  ;;  %v1353_v5 = vpack.c.bf16 %v700_v1, %v698_v63  ;;  %v544_v8 = vadd.f32 %v543_v2, %v1633_v54  ;;  %v704_v9 = vadd.f32 %v703_v3, %v1633_v54 }
 0x14c   :  { %v545_v6 = vpop.f32.mrf.mxu0  ;;  %v705_v7 = vpop.f32.mrf.mxu1 }
 0x14d   :  { %1141 = vst [vmem:[%s1960_s3 + $0xc8] sm:$0xff] %v1321_v4  ;;  %1173 = vst [vmem:[%s1960_s3 + $0x1c8] sm:$0xff] %v1353_v5  ;;  %v546_v10 = vadd.f32 %v545_v6, %v1635_v55  ;;  %v706_v11 = vadd.f32 %v705_v7, %v1635_v55 }
 0x14e   :  { %v547_v12 = vpop.f32.mrf.mxu0  ;;  %v707_v13 = vpop.f32.mrf.mxu1 }
 0x14f   :  { %v1322_v14 = vpack.c.bf16 %v546_v10, %v544_v8  ;;  %v1354_v15 = vpack.c.bf16 %v706_v11, %v704_v9  ;;  %v548_v18 = vadd.f32 %v547_v12, %v1633_v54  ;;  %v708_v19 = vadd.f32 %v707_v13, %v1633_v54 }
 0x150   :  { %v549_v16 = vpop.f32.mrf.mxu0  ;;  %v709_v17 = vpop.f32.mrf.mxu1 }
 0x151   :  { %1142 = vst [vmem:[%s1960_s3 + $0xd0] sm:$0xff] %v1322_v14  ;;  %1174 = vst [vmem:[%s1960_s3 + $0x1d0] sm:$0xff] %v1354_v15  ;;  %v550_v20 = vadd.f32 %v549_v16, %v1635_v55  ;;  %v710_v21 = vadd.f32 %v709_v17, %v1635_v55 }
 0x152   :  { %v553_v22 = vpop.f32.mrf.mxu0  ;;  %v713_v23 = vpop.f32.mrf.mxu1 }
 0x153   :  { %v1323_v24 = vpack.c.bf16 %v550_v20, %v548_v18  ;;  %v1355_v25 = vpack.c.bf16 %v710_v21, %v708_v19  ;;  %v554_v28 = vadd.f32 %v553_v22, %v1633_v54  ;;  %v714_v29 = vadd.f32 %v713_v23, %v1633_v54 }
 0x154   :  { %v555_v26 = vpop.f32.mrf.mxu0  ;;  %v715_v27 = vpop.f32.mrf.mxu1 }
 0x155   :  { %1143 = vst [vmem:[%s1960_s3 + $0xd8] sm:$0xff] %v1323_v24  ;;  %1175 = vst [vmem:[%s1960_s3 + $0x1d8] sm:$0xff] %v1355_v25  ;;  %v556_v30 = vadd.f32 %v555_v26, %v1635_v55  ;;  %v716_v31 = vadd.f32 %v715_v27, %v1635_v55 }
 0x156   :  { %v557_v32 = vpop.f32.mrf.mxu0  ;;  %v717_v33 = vpop.f32.mrf.mxu1 }
 0x157   :  { %v1324_v34 = vpack.c.bf16 %v556_v30, %v554_v28  ;;  %v1356_v35 = vpack.c.bf16 %v716_v31, %v714_v29  ;;  %v558_v38 = vadd.f32 %v557_v32, %v1633_v54  ;;  %v718_v39 = vadd.f32 %v717_v33, %v1633_v54 }
 0x158   :  { %v559_v36 = vpop.f32.mrf.mxu0  ;;  %v719_v37 = vpop.f32.mrf.mxu1 }
 0x159   :  { %1144 = vst [vmem:[%s1960_s3 + $0xe0] sm:$0xff] %v1324_v34  ;;  %1176 = vst [vmem:[%s1960_s3 + $0x1e0] sm:$0xff] %v1356_v35  ;;  %v560_v40 = vadd.f32 %v559_v36, %v1635_v55  ;;  %v720_v41 = vadd.f32 %v719_v37, %v1635_v55 }
 0x15a   :  { %v563_v42 = vpop.f32.mrf.mxu0  ;;  %v723_v43 = vpop.f32.mrf.mxu1 }
 0x15b   :  { %v1325_v44 = vpack.c.bf16 %v560_v40, %v558_v38  ;;  %v1357_v45 = vpack.c.bf16 %v720_v41, %v718_v39  ;;  %v564_v48 = vadd.f32 %v563_v42, %v1633_v54  ;;  %v724_v49 = vadd.f32 %v723_v43, %v1633_v54 }
 0x15c   :  { %v565_v46 = vpop.f32.mrf.mxu0  ;;  %v725_v47 = vpop.f32.mrf.mxu1 }
 0x15d   :  { %1145 = vst [vmem:[%s1960_s3 + $0xe8] sm:$0xff] %v1325_v44  ;;  %1177 = vst [vmem:[%s1960_s3 + $0x1e8] sm:$0xff] %v1357_v45  ;;  %v566_v50 = vadd.f32 %v565_v46, %v1635_v55  ;;  %v726_v51 = vadd.f32 %v725_v47, %v1635_v55 }
 0x15e   :  { %v567_v52 = vpop.f32.mrf.mxu0  ;;  %v727_v53 = vpop.f32.mrf.mxu1 }
 0x15f   :  { %v1326_v56 = vpack.c.bf16 %v566_v50, %v564_v48  ;;  %v1358_v57 = vpack.c.bf16 %v726_v51, %v724_v49  ;;  %v568_v60 = vadd.f32 %v567_v52, %v1633_v54  ;;  %v728_v61 = vadd.f32 %v727_v53, %v1633_v54 }
 0x160   :  { %v569_v58 = vpop.f32.mrf.mxu0  ;;  %v729_v59 = vpop.f32.mrf.mxu1 }
 0x161   :  { %1146 = vst [vmem:[%s1960_s3 + $0xf0] sm:$0xff] %v1326_v56  ;;  %1178 = vst [vmem:[%s1960_s3 + $0x1f0] sm:$0xff] %v1358_v57  ;;  %v570_v62 = vadd.f32 %v569_v58, %v1635_v55  ;;  %v730_v63 = vadd.f32 %v729_v59, %v1635_v55 }
 0x163   :  { %v1327_v0 = vpack.c.bf16 %v570_v62, %v568_v60  ;;  %v1359_v1 = vpack.c.bf16 %v730_v63, %v728_v61 }
 0x165   :  { %1147 = vst [vmem:[%s1960_s3 + $0xf8] sm:$0xff] %v1327_v0  ;;  %1179 = vst [vmem:[%s1960_s3 + $0x1f8] sm:$0xff] %v1359_v1 }

// kernel: gcn_forward.8
= control target key start
LH: loop header
LB: loop body
LE: loop exit
PB: predicated region body
PF: predicated region fallthrough
CT: control target
= control target key end

     0   :  { %v1692_v0 = vmov 0   ;;  %s2150_s1 = inlined_call_operand.vmem [shape: bf16[256,128], index: 1, kind: input, shape index: {}]   ;;  %s2151_s0 = inlined_call_operand.vmem [shape: bf16[512,256], index: 0, kind: input, shape index: {}]   ;;  %s2152_s2 = inlined_call_operand.vmem [shape: f32[1,128], index: 2, kind: input, shape index: {}]   ;;  %s2153_s3 = inlined_call_operand.vmem [shape: bf16[512,128], index: 3, kind: output, shape index: {}]  }
   0x1   :  { %534 = vmatprep.subr.bf16.mxu0 %v1692_v0  ;;  %1547 = vmatprep.subr.bf16.mxu1 %v1692_v0  ;;  %v1580_v1 = vld [vmem:[%s2150_s1 + $0x38] sm:$0xff]   ;;  %v1581_v2 = vld [vmem:[%s2150_s1 + $0x30] sm:$0xff]   ;;  %v1582_v3 = vld [vmem:[%s2150_s1 + $0x28] sm:$0xff]  }
   0x2   :  { %535 = vmatpush1.bf16.msra.mxu0 %v1580_v1  ;;  %1563 = vmatpush1.bf16.msra.mxu1 %v1580_v1  ;;  %v1583_v4 = vld [vmem:[%s2150_s1 + $0x20] sm:$0xff]   ;;  %v1584_v5 = vld [vmem:[%s2150_s1 + $0x18] sm:$0xff]   ;;  %v1585_v7 = vld [vmem:[%s2150_s1 + $0x10] sm:$0xff]  }
   0x3   :  { %536 = vmatprep.subr.bf16.mxu0 %v1692_v0  ;;  %1548 = vmatprep.subr.bf16.mxu1 %v1692_v0  ;;  %v1598_v6 = vld [vmem:[%s2151_s0 + $0x4] ss:$8 sps:$4 sm:$0xff]   ;;  %v1588_v11 = vld [vmem:[%s2150_s1 + $0x78] sm:$0xff]   ;;  %v1589_v12 = vld [vmem:[%s2150_s1 + $0x70] sm:$0xff]  }
   0x4   :  { %v1601_v8 = vld [vmem:[%s2151_s0 + $0x104] ss:$8 sps:$4 sm:$0xff]   ;;  %566 = vmatprep.mubr.bf16.mxu0 %v1598_v6  ;;  %v1592_v15 = vld [vmem:[%s2150_s1 + $0x58] sm:$0xff]   ;;  %v1593_v16 = vld [vmem:[%s2150_s1 + $0x50] sm:$0xff]  }
   0x5   :  { %694 = vmatprep.mubr.bf16.mxu1 %v1601_v8  ;;  %v1586_v9 = vld [vmem:[%s2150_s1 + $0x8] sm:$0xff]   ;;  %v1587_v10 = vld [vmem:[%s2150_s1] sm:$0xff]   ;;  %v1602_v21 = vld [vmem:[%s2151_s0 + $0x14] ss:$8 sps:$4 sm:$0xff]  }
   0x6   :  { %537 = vmatpush1.bf16.msra.mxu0 %v1581_v2  ;;  %1564 = vmatpush1.bf16.msra.mxu1 %v1581_v2  ;;  %v1590_v13 = vld [vmem:[%s2150_s1 + $0x68] sm:$0xff]   ;;  %v1591_v14 = vld [vmem:[%s2150_s1 + $0x60] sm:$0xff]   ;;  %v1604_v22 = vld [vmem:[%s2151_s0 + $0x114] ss:$8 sps:$4 sm:$0xff]  }
   0x7   :  { %538 = vmatprep.subr.bf16.mxu0 %v1692_v0  ;;  %1549 = vmatprep.subr.bf16.mxu1 %v1692_v0  ;;  %v1594_v17 = vld [vmem:[%s2150_s1 + $0x48] sm:$0xff]   ;;  %v1595_v18 = vld [vmem:[%s2150_s1 + $0x40] sm:$0xff]   ;;  %v1606_v23 = vld [vmem:[%s2151_s0 + $0x10] ss:$8 sps:$4 sm:$0xff]  }
   0x8   :  { %v1596_v19 = vld [vmem:[%s2151_s0] ss:$8 sps:$4 sm:$0xff]   ;;  %v1607_v24 = vld [vmem:[%s2151_s0 + $0x110] ss:$8 sps:$4 sm:$0xff]   ;;  %v1608_v25 = vld [vmem:[%s2151_s0 + $0x24] ss:$8 sps:$4 sm:$0xff]  }
   0x9   :  { %v1599_v20 = vld [vmem:[%s2151_s0 + $0x100] ss:$8 sps:$4 sm:$0xff]   ;;  %v1610_v26 = vld [vmem:[%s2151_s0 + $0x124] ss:$8 sps:$4 sm:$0xff]   ;;  %v1614_v29 = vld [vmem:[%s2151_s0 + $0x34] ss:$8 sps:$4 sm:$0xff]  }
   0xa   :  { %539 = vmatpush1.bf16.msra.mxu0 %v1582_v3  ;;  %1565 = vmatpush1.bf16.msra.mxu1 %v1582_v3  ;;  %v1612_v27 = vld [vmem:[%s2151_s0 + $0x20] ss:$8 sps:$4 sm:$0xff]   ;;  %v1616_v30 = vld [vmem:[%s2151_s0 + $0x134] ss:$8 sps:$4 sm:$0xff]   ;;  %v1618_v31 = vld [vmem:[%s2151_s0 + $0x30] ss:$8 sps:$4 sm:$0xff]  }
   0xb   :  { %540 = vmatprep.subr.bf16.mxu0 %v1692_v0  ;;  %1550 = vmatprep.subr.bf16.mxu1 %v1692_v0  ;;  %v1613_v28 = vld [vmem:[%s2151_s0 + $0x120] ss:$8 sps:$4 sm:$0xff]   ;;  %v1619_v32 = vld [vmem:[%s2151_s0 + $0x130] ss:$8 sps:$4 sm:$0xff]   ;;  %v1620_v33 = vld [vmem:[%s2151_s0 + $0x44] ss:$8 sps:$4 sm:$0xff]  }
   0xc   :  { %v1622_v34 = vld [vmem:[%s2151_s0 + $0x144] ss:$8 sps:$4 sm:$0xff]   ;;  %v1624_v35 = vld [vmem:[%s2151_s0 + $0x40] ss:$8 sps:$4 sm:$0xff]   ;;  %v1626_v37 = vld [vmem:[%s2151_s0 + $0x54] ss:$8 sps:$4 sm:$0xff]  }
   0xd   :  { %v1625_v36 = vld [vmem:[%s2151_s0 + $0x140] ss:$8 sps:$4 sm:$0xff]   ;;  %v1628_v38 = vld [vmem:[%s2151_s0 + $0x154] ss:$8 sps:$4 sm:$0xff]   ;;  %v1630_v39 = vld [vmem:[%s2151_s0 + $0x50] ss:$8 sps:$4 sm:$0xff]  }
   0xe   :  { %541 = vmatpush1.bf16.msra.mxu0 %v1583_v4  ;;  %1566 = vmatpush1.bf16.msra.mxu1 %v1583_v4  ;;  %v1631_v40 = vld [vmem:[%s2151_s0 + $0x150] ss:$8 sps:$4 sm:$0xff]   ;;  %v1632_v41 = vld [vmem:[%s2151_s0 + $0x64] ss:$8 sps:$4 sm:$0xff]   ;;  %v1636_v43 = vld [vmem:[%s2151_s0 + $0x60] ss:$8 sps:$4 sm:$0xff]  }
   0xf   :  { %542 = vmatprep.subr.bf16.mxu0 %v1692_v0  ;;  %1551 = vmatprep.subr.bf16.mxu1 %v1692_v0  ;;  %v1634_v42 = vld [vmem:[%s2151_s0 + $0x164] ss:$8 sps:$4 sm:$0xff]   ;;  %v1637_v44 = vld [vmem:[%s2151_s0 + $0x160] ss:$8 sps:$4 sm:$0xff]   ;;  %v1638_v45 = vld [vmem:[%s2151_s0 + $0x74] ss:$8 sps:$4 sm:$0xff]  }
  0x10   :  { %v1640_v46 = vld [vmem:[%s2151_s0 + $0x174] ss:$8 sps:$4 sm:$0xff]   ;;  %v1642_v47 = vld [vmem:[%s2151_s0 + $0x70] ss:$8 sps:$4 sm:$0xff]   ;;  %v1644_v49 = vld [vmem:[%s2151_s0 + $0x84] ss:$8 sps:$4 sm:$0xff]  }
  0x11   :  { %v1643_v48 = vld [vmem:[%s2151_s0 + $0x170] ss:$8 sps:$4 sm:$0xff]   ;;  %v1646_v50 = vld [vmem:[%s2151_s0 + $0x184] ss:$8 sps:$4 sm:$0xff]   ;;  %v1648_v51 = vld [vmem:[%s2151_s0 + $0x80] ss:$8 sps:$4 sm:$0xff]  }
  0x12   :  { %543 = vmatpush1.bf16.msra.mxu0 %v1584_v5  ;;  %1567 = vmatpush1.bf16.msra.mxu1 %v1584_v5  ;;  %v1649_v52 = vld [vmem:[%s2151_s0 + $0x180] ss:$8 sps:$4 sm:$0xff]   ;;  %v1650_v53 = vld [vmem:[%s2151_s0 + $0x94] ss:$8 sps:$4 sm:$0xff]   ;;  %v1654_v55 = vld [vmem:[%s2151_s0 + $0x90] ss:$8 sps:$4 sm:$0xff]  }
  0x13   :  { %544 = vmatprep.subr.bf16.mxu0 %v1692_v0  ;;  %1552 = vmatprep.subr.bf16.mxu1 %v1692_v0  ;;  %v1652_v54 = vld [vmem:[%s2151_s0 + $0x194] ss:$8 sps:$4 sm:$0xff]   ;;  %v1655_v56 = vld [vmem:[%s2151_s0 + $0x190] ss:$8 sps:$4 sm:$0xff]   ;;  %v1656_v57 = vld [vmem:[%s2151_s0 + $0xa4] ss:$8 sps:$4 sm:$0xff]  }
  0x14   :  { %v1658_v58 = vld [vmem:[%s2151_s0 + $0x1a4] ss:$8 sps:$4 sm:$0xff]   ;;  %v1660_v59 = vld [vmem:[%s2151_s0 + $0xa0] ss:$8 sps:$4 sm:$0xff]   ;;  %v1662_v61 = vld [vmem:[%s2151_s0 + $0xb4] ss:$8 sps:$4 sm:$0xff]  }
  0x15   :  { %v1661_v60 = vld [vmem:[%s2151_s0 + $0x1a0] ss:$8 sps:$4 sm:$0xff]   ;;  %v1664_v62 = vld [vmem:[%s2151_s0 + $0x1b4] ss:$8 sps:$4 sm:$0xff]   ;;  %v1666_v63 = vld [vmem:[%s2151_s0 + $0xb0] ss:$8 sps:$4 sm:$0xff]  }
  0x16   :  { %545 = vmatpush1.bf16.msra.mxu0 %v1585_v7  ;;  %1568 = vmatpush1.bf16.msra.mxu1 %v1585_v7  ;;  %v1668_v1 = vld [vmem:[%s2151_s0 + $0xc4] ss:$8 sps:$4 sm:$0xff]   ;;  %v1672_v3 = vld [vmem:[%s2151_s0 + $0xc0] ss:$8 sps:$4 sm:$0xff]   ;;  %v1674_v5 = vld [vmem:[%s2151_s0 + $0xd4] ss:$8 sps:$4 sm:$0xff]  }
  0x17   :  { %546 = vmatprep.subr.bf16.mxu0 %v1692_v0  ;;  %1553 = vmatprep.subr.bf16.mxu1 %v1692_v0  ;;  %v1670_v2 = vld [vmem:[%s2151_s0 + $0x1c4] ss:$8 sps:$4 sm:$0xff]   ;;  %v1673_v4 = vld [vmem:[%s2151_s0 + $0x1c0] ss:$8 sps:$4 sm:$0xff]   ;;  %v1676_v6 = vld [vmem:[%s2151_s0 + $0x1d4] ss:$8 sps:$4 sm:$0xff]  }
  0x18   :  { %v1678_v7 = vld [vmem:[%s2151_s0 + $0xd0] ss:$8 sps:$4 sm:$0xff]  }
  0x19   :  { %v1679_v8 = vld [vmem:[%s2151_s0 + $0x1d0] ss:$8 sps:$4 sm:$0xff]  }
  0x1a   :  { %547 = vmatpush1.bf16.msra.mxu0 %v1586_v9  ;;  %1569 = vmatpush1.bf16.msra.mxu1 %v1586_v9  ;;  %v1680_v9 = vld [vmem:[%s2151_s0 + $0xe4] ss:$8 sps:$4 sm:$0xff]  }
  0x1b   :  { %548 = vmatprep.subr.bf16.mxu0 %v1692_v0  ;;  %1554 = vmatprep.subr.bf16.mxu1 %v1692_v0 }
  0x1e   :  { %549 = vmatpush1.bf16.msra.mxu0 %v1587_v10  ;;  %1570 = vmatpush1.bf16.msra.mxu1 %v1587_v10  ;;  %v1682_v10 = vld [vmem:[%s2151_s0 + $0x1e4] ss:$8 sps:$4 sm:$0xff]  }
  0x1f   :  { %550 = vmatprep.subr.bf16.mxu0 %v1692_v0  ;;  %1555 = vmatprep.subr.bf16.mxu1 %v1692_v0 }
  0x22   :  { %551 = vmatpush2.bf16.msra.mxu0 %v1588_v11  ;;  %1571 = vmatpush2.bf16.msra.mxu1 %v1588_v11  ;;  %v1684_v11 = vld [vmem:[%s2151_s0 + $0xe0] ss:$8 sps:$4 sm:$0xff]  }
  0x23   :  { %552 = vmatprep.subr.bf16.mxu0 %v1692_v0  ;;  %1556 = vmatprep.subr.bf16.mxu1 %v1692_v0 }
  0x26   :  { %553 = vmatpush2.bf16.msra.mxu0 %v1589_v12  ;;  %1572 = vmatpush2.bf16.msra.mxu1 %v1589_v12  ;;  %v1685_v12 = vld [vmem:[%s2151_s0 + $0x1e0] ss:$8 sps:$4 sm:$0xff]  }
  0x27   :  { %554 = vmatprep.subr.bf16.mxu0 %v1692_v0  ;;  %1557 = vmatprep.subr.bf16.mxu1 %v1692_v0 }
  0x2a   :  { %555 = vmatpush2.bf16.msra.mxu0 %v1590_v13  ;;  %1573 = vmatpush2.bf16.msra.mxu1 %v1590_v13  ;;  %v1686_v13 = vld [vmem:[%s2151_s0 + $0xf4] ss:$8 sps:$4 sm:$0xff]  }
  0x2b   :  { %556 = vmatprep.subr.bf16.mxu0 %v1692_v0  ;;  %1558 = vmatprep.subr.bf16.mxu1 %v1692_v0 }
  0x2e   :  { %557 = vmatpush2.bf16.msra.mxu0 %v1591_v14  ;;  %1574 = vmatpush2.bf16.msra.mxu1 %v1591_v14  ;;  %v1688_v14 = vld [vmem:[%s2151_s0 + $0x1f4] ss:$8 sps:$4 sm:$0xff]  }
  0x2f   :  { %558 = vmatprep.subr.bf16.mxu0 %v1692_v0  ;;  %1559 = vmatprep.subr.bf16.mxu1 %v1692_v0 }
  0x32   :  { %559 = vmatpush2.bf16.msra.mxu0 %v1592_v15  ;;  %1575 = vmatpush2.bf16.msra.mxu1 %v1592_v15  ;;  %v1690_v15 = vld [vmem:[%s2151_s0 + $0xf0] ss:$8 sps:$4 sm:$0xff]  }
  0x33   :  { %560 = vmatprep.subr.bf16.mxu0 %v1692_v0  ;;  %1560 = vmatprep.subr.bf16.mxu1 %v1692_v0 }
  0x36   :  { %561 = vmatpush2.bf16.msra.mxu0 %v1593_v16  ;;  %1576 = vmatpush2.bf16.msra.mxu1 %v1593_v16  ;;  %v1691_v16 = vld [vmem:[%s2151_s0 + $0x1f0] ss:$8 sps:$4 sm:$0xff]  }
  0x37   :  { %562 = vmatprep.subr.bf16.mxu0 %v1692_v0  ;;  %1561 = vmatprep.subr.bf16.mxu1 %v1692_v0 }
  0x3a   :  { %563 = vmatpush2.bf16.msra.mxu0 %v1594_v17  ;;  %1577 = vmatpush2.bf16.msra.mxu1 %v1594_v17 }
  0x3b   :  { %564 = vmatprep.subr.bf16.mxu0 %v1692_v0  ;;  %1562 = vmatprep.subr.bf16.mxu1 %v1692_v0  ;;  %v1667_v0 = vld [vmem:[%s2151_s0 + $0x1b0] ss:$8 sps:$4 sm:$0xff]  }
  0x3e   :  { %565 = vmatpush2.bf16.msra.mxu0 %v1595_v18  ;;  %1578 = vmatpush2.bf16.msra.mxu1 %v1595_v18 }
  0x41   :  { %567 = vmatmul.mubr.bf16.vlgmr.msra.gmra.mxu0 %v1596_v19  ;;  %695 = vmatmul.mubr.bf16.vlgmr.msra.gmra.mxu1 %v1599_v20  ;;  %v1988_v19 = vld [vmem:[%s2152_s2] ss:$0 sm:$0xff] }
  0x42   :  { %574 = vmatprep.mubr.bf16.mxu0 %v1602_v21  ;;  %702 = vmatprep.mubr.bf16.mxu1 %v1604_v22 }
  0x49   :  { %575 = vmatmul.mubr.bf16.gmra.mxu0 %v1606_v23  ;;  %703 = vmatmul.mubr.bf16.gmra.mxu1 %v1607_v24 }
  0x4a   :  { %582 = vmatprep.mubr.bf16.mxu0 %v1608_v25  ;;  %710 = vmatprep.mubr.bf16.mxu1 %v1610_v26 }
  0x51   :  { %583 = vmatmul.mubr.bf16.gmra.mxu0 %v1612_v27  ;;  %711 = vmatmul.mubr.bf16.gmra.mxu1 %v1613_v28 }
  0x52   :  { %590 = vmatprep.mubr.bf16.mxu0 %v1614_v29  ;;  %718 = vmatprep.mubr.bf16.mxu1 %v1616_v30 }
  0x59   :  { %591 = vmatmul.mubr.bf16.gmra.mxu0 %v1618_v31  ;;  %719 = vmatmul.mubr.bf16.gmra.mxu1 %v1619_v32 }
  0x5a   :  { %598 = vmatprep.mubr.bf16.mxu0 %v1620_v33  ;;  %726 = vmatprep.mubr.bf16.mxu1 %v1622_v34 }
  0x61   :  { %599 = vmatmul.mubr.bf16.gmra.mxu0 %v1624_v35  ;;  %727 = vmatmul.mubr.bf16.gmra.mxu1 %v1625_v36 }
  0x62   :  { %606 = vmatprep.mubr.bf16.mxu0 %v1626_v37  ;;  %734 = vmatprep.mubr.bf16.mxu1 %v1628_v38 }
  0x69   :  { %607 = vmatmul.mubr.bf16.gmra.mxu0 %v1630_v39  ;;  %735 = vmatmul.mubr.bf16.gmra.mxu1 %v1631_v40 }
  0x6a   :  { %614 = vmatprep.mubr.bf16.mxu0 %v1632_v41  ;;  %742 = vmatprep.mubr.bf16.mxu1 %v1634_v42 }
  0x71   :  { %615 = vmatmul.mubr.bf16.gmra.mxu0 %v1636_v43  ;;  %743 = vmatmul.mubr.bf16.gmra.mxu1 %v1637_v44 }
  0x72   :  { %622 = vmatprep.mubr.bf16.mxu0 %v1638_v45  ;;  %750 = vmatprep.mubr.bf16.mxu1 %v1640_v46 }
  0x79   :  { %623 = vmatmul.mubr.bf16.gmra.mxu0 %v1642_v47  ;;  %751 = vmatmul.mubr.bf16.gmra.mxu1 %v1643_v48 }
  0x7a   :  { %630 = vmatprep.mubr.bf16.mxu0 %v1644_v49  ;;  %758 = vmatprep.mubr.bf16.mxu1 %v1646_v50 }
  0x81   :  { %631 = vmatmul.mubr.bf16.gmra.mxu0 %v1648_v51  ;;  %759 = vmatmul.mubr.bf16.gmra.mxu1 %v1649_v52 }
  0x82   :  { %638 = vmatprep.mubr.bf16.mxu0 %v1650_v53  ;;  %766 = vmatprep.mubr.bf16.mxu1 %v1652_v54 }
  0x89   :  { %639 = vmatmul.mubr.bf16.gmra.mxu0 %v1654_v55  ;;  %767 = vmatmul.mubr.bf16.gmra.mxu1 %v1655_v56 }
  0x8a   :  { %646 = vmatprep.mubr.bf16.mxu0 %v1656_v57  ;;  %774 = vmatprep.mubr.bf16.mxu1 %v1658_v58 }
  0x91   :  { %647 = vmatmul.mubr.bf16.gmra.mxu0 %v1660_v59  ;;  %775 = vmatmul.mubr.bf16.gmra.mxu1 %v1661_v60 }
  0x92   :  { %654 = vmatprep.mubr.bf16.mxu0 %v1662_v61  ;;  %782 = vmatprep.mubr.bf16.mxu1 %v1664_v62 }
  0x99   :  { %655 = vmatmul.mubr.bf16.gmra.mxu0 %v1666_v63  ;;  %783 = vmatmul.mubr.bf16.gmra.mxu1 %v1667_v0 }
  0x9a   :  { %662 = vmatprep.mubr.bf16.mxu0 %v1668_v1  ;;  %790 = vmatprep.mubr.bf16.mxu1 %v1670_v2 }
  0xa1   :  { %663 = vmatmul.mubr.bf16.gmra.mxu0 %v1672_v3  ;;  %791 = vmatmul.mubr.bf16.gmra.mxu1 %v1673_v4 }
  0xa2   :  { %670 = vmatprep.mubr.bf16.mxu0 %v1674_v5  ;;  %798 = vmatprep.mubr.bf16.mxu1 %v1676_v6 }
  0xa9   :  { %671 = vmatmul.mubr.bf16.gmra.mxu0 %v1678_v7  ;;  %799 = vmatmul.mubr.bf16.gmra.mxu1 %v1679_v8 }
  0xaa   :  { %678 = vmatprep.mubr.bf16.mxu0 %v1680_v9  ;;  %806 = vmatprep.mubr.bf16.mxu1 %v1682_v10 }
  0xb1   :  { %679 = vmatmul.mubr.bf16.gmra.mxu0 %v1684_v11  ;;  %807 = vmatmul.mubr.bf16.gmra.mxu1 %v1685_v12 }
  0xb2   :  { %686 = vmatprep.mubr.bf16.mxu0 %v1686_v13  ;;  %814 = vmatprep.mubr.bf16.mxu1 %v1688_v14 }
  0xb9   :  { %687 = vmatmul.mubr.bf16.gmra.mxu0 %v1690_v15  ;;  %815 = vmatmul.mubr.bf16.gmra.mxu1 %v1691_v16 }
 0x101   :  { %v568_v17 = vpop.f32.mrf.mxu0  ;;  %v696_v18 = vpop.f32.mrf.mxu1 }
 0x102   :  { %v569_v24 = vadd.f32 %v1988_v19, %v568_v17  ;;  %v697_v25 = vadd.f32 %v1988_v19, %v696_v18 }
 0x103   :  { %v570_v20 = vpop.f32.mrf.mxu0  ;;  %v698_v21 = vpop.f32.mrf.mxu1 }
 0x105   :  { %v571_v22 = vpop.f32.mrf.mxu0  ;;  %v699_v23 = vpop.f32.mrf.mxu1 }
 0x106   :  { %v572_v26 = vadd.f32 %v1988_v19, %v571_v22  ;;  %v700_v27 = vadd.f32 %v1988_v19, %v699_v23 }
 0x107   :  { %v573_v28 = vpop.f32.mrf.mxu0  ;;  %v701_v29 = vpop.f32.mrf.mxu1 }
 0x108   :  { %v1359_v30 = vpack.c.bf16 %v572_v26, %v569_v24  ;;  %v1439_v31 = vpack.c.bf16 %v700_v27, %v697_v25 }
 0x109   :  { %v576_v32 = vpop.f32.mrf.mxu0  ;;  %v704_v33 = vpop.f32.mrf.mxu1 }
 0x10a   :  { %1360 = vst [vmem:[%s2153_s3] sm:$0xff] %v1359_v30   ;;  %1531 = vst [vmem:[%s2153_s3 + $0x80] sm:$0xff] %v1439_v31   ;;  %v577_v38 = vadd.f32 %v1988_v19, %v576_v32  ;;  %v705_v39 = vadd.f32 %v1988_v19, %v704_v33 }
 0x10b   :  { %v578_v34 = vpop.f32.mrf.mxu0  ;;  %v706_v35 = vpop.f32.mrf.mxu1 }
 0x10d   :  { %v579_v36 = vpop.f32.mrf.mxu0  ;;  %v707_v37 = vpop.f32.mrf.mxu1 }
 0x10e   :  { %v580_v40 = vadd.f32 %v1988_v19, %v579_v36  ;;  %v708_v41 = vadd.f32 %v1988_v19, %v707_v37 }
 0x10f   :  { %v581_v42 = vpop.f32.mrf.mxu0  ;;  %v709_v43 = vpop.f32.mrf.mxu1 }
 0x110   :  { %v1364_v44 = vpack.c.bf16 %v580_v40, %v577_v38  ;;  %v1444_v45 = vpack.c.bf16 %v708_v41, %v705_v39 }
 0x111   :  { %v584_v46 = vpop.f32.mrf.mxu0  ;;  %v712_v47 = vpop.f32.mrf.mxu1 }
 0x112   :  { %1516 = vst [vmem:[%s2153_s3 + $0x8] sm:$0xff] %v1364_v44   ;;  %1532 = vst [vmem:[%s2153_s3 + $0x88] sm:$0xff] %v1444_v45   ;;  %v585_v52 = vadd.f32 %v1988_v19, %v584_v46  ;;  %v713_v53 = vadd.f32 %v1988_v19, %v712_v47 }
 0x113   :  { %v586_v48 = vpop.f32.mrf.mxu0  ;;  %v714_v49 = vpop.f32.mrf.mxu1 }
 0x115   :  { %v587_v50 = vpop.f32.mrf.mxu0  ;;  %v715_v51 = vpop.f32.mrf.mxu1 }
 0x116   :  { %v588_v54 = vadd.f32 %v1988_v19, %v587_v50  ;;  %v716_v55 = vadd.f32 %v1988_v19, %v715_v51 }
 0x117   :  { %v589_v56 = vpop.f32.mrf.mxu0  ;;  %v717_v57 = vpop.f32.mrf.mxu1 }
 0x118   :  { %v1369_v58 = vpack.c.bf16 %v588_v54, %v585_v52  ;;  %v1449_v59 = vpack.c.bf16 %v716_v55, %v713_v53 }
 0x119   :  { %v592_v60 = vpop.f32.mrf.mxu0  ;;  %v720_v61 = vpop.f32.mrf.mxu1 }
 0x11a   :  { %1517 = vst [vmem:[%s2153_s3 + $0x10] sm:$0xff] %v1369_v58   ;;  %1533 = vst [vmem:[%s2153_s3 + $0x90] sm:$0xff] %v1449_v59   ;;  %v593_v2 = vadd.f32 %v1988_v19, %v592_v60  ;;  %v721_v3 = vadd.f32 %v1988_v19, %v720_v61 }
 0x11b   :  { %v594_v62 = vpop.f32.mrf.mxu0  ;;  %v722_v63 = vpop.f32.mrf.mxu1 }
 0x11d   :  { %v595_v0 = vpop.f32.mrf.mxu0  ;;  %v723_v1 = vpop.f32.mrf.mxu1 }
 0x11e   :  { %v596_v4 = vadd.f32 %v1988_v19, %v595_v0  ;;  %v724_v5 = vadd.f32 %v1988_v19, %v723_v1 }
 0x11f   :  { %v597_v6 = vpop.f32.mrf.mxu0  ;;  %v725_v7 = vpop.f32.mrf.mxu1 }
 0x120   :  { %v1374_v8 = vpack.c.bf16 %v596_v4, %v593_v2  ;;  %v1454_v9 = vpack.c.bf16 %v724_v5, %v721_v3 }
 0x121   :  { %v600_v10 = vpop.f32.mrf.mxu0  ;;  %v728_v11 = vpop.f32.mrf.mxu1 }
 0x122   :  { %1518 = vst [vmem:[%s2153_s3 + $0x18] sm:$0xff] %v1374_v8   ;;  %1534 = vst [vmem:[%s2153_s3 + $0x98] sm:$0xff] %v1454_v9   ;;  %v601_v16 = vadd.f32 %v1988_v19, %v600_v10  ;;  %v729_v17 = vadd.f32 %v1988_v19, %v728_v11 }
 0x123   :  { %v602_v12 = vpop.f32.mrf.mxu0  ;;  %v730_v13 = vpop.f32.mrf.mxu1 }
 0x125   :  { %v603_v14 = vpop.f32.mrf.mxu0  ;;  %v731_v15 = vpop.f32.mrf.mxu1 }
 0x126   :  { %v604_v18 = vadd.f32 %v1988_v19, %v603_v14  ;;  %v732_v20 = vadd.f32 %v1988_v19, %v731_v15 }
 0x127   :  { %v605_v21 = vpop.f32.mrf.mxu0  ;;  %v733_v22 = vpop.f32.mrf.mxu1 }
 0x128   :  { %v1379_v23 = vpack.c.bf16 %v604_v18, %v601_v16  ;;  %v1459_v24 = vpack.c.bf16 %v732_v20, %v729_v17 }
 0x129   :  { %v608_v25 = vpop.f32.mrf.mxu0  ;;  %v736_v26 = vpop.f32.mrf.mxu1 }
 0x12a   :  { %1519 = vst [vmem:[%s2153_s3 + $0x20] sm:$0xff] %v1379_v23   ;;  %1535 = vst [vmem:[%s2153_s3 + $0xa0] sm:$0xff] %v1459_v24   ;;  %v609_v31 = vadd.f32 %v1988_v19, %v608_v25  ;;  %v737_v32 = vadd.f32 %v1988_v19, %v736_v26 }
 0x12b   :  { %v610_v27 = vpop.f32.mrf.mxu0  ;;  %v738_v28 = vpop.f32.mrf.mxu1 }
 0x12d   :  { %v611_v29 = vpop.f32.mrf.mxu0  ;;  %v739_v30 = vpop.f32.mrf.mxu1 }
 0x12e   :  { %v612_v33 = vadd.f32 %v1988_v19, %v611_v29  ;;  %v740_v34 = vadd.f32 %v1988_v19, %v739_v30 }
 0x12f   :  { %v613_v35 = vpop.f32.mrf.mxu0  ;;  %v741_v36 = vpop.f32.mrf.mxu1 }
 0x130   :  { %v1384_v37 = vpack.c.bf16 %v612_v33, %v609_v31  ;;  %v1464_v38 = vpack.c.bf16 %v740_v34, %v737_v32 }
 0x131   :  { %v616_v39 = vpop.f32.mrf.mxu0  ;;  %v744_v40 = vpop.f32.mrf.mxu1 }
 0x132   :  { %1520 = vst [vmem:[%s2153_s3 + $0x28] sm:$0xff] %v1384_v37   ;;  %1536 = vst [vmem:[%s2153_s3 + $0xa8] sm:$0xff] %v1464_v38   ;;  %v617_v45 = vadd.f32 %v1988_v19, %v616_v39  ;;  %v745_v46 = vadd.f32 %v1988_v19, %v744_v40 }
 0x133   :  { %v618_v41 = vpop.f32.mrf.mxu0  ;;  %v746_v42 = vpop.f32.mrf.mxu1 }
 0x135   :  { %v619_v43 = vpop.f32.mrf.mxu0  ;;  %v747_v44 = vpop.f32.mrf.mxu1 }
 0x136   :  { %v620_v47 = vadd.f32 %v1988_v19, %v619_v43  ;;  %v748_v48 = vadd.f32 %v1988_v19, %v747_v44 }
 0x137   :  { %v621_v49 = vpop.f32.mrf.mxu0  ;;  %v749_v50 = vpop.f32.mrf.mxu1 }
 0x138   :  { %v1389_v51 = vpack.c.bf16 %v620_v47, %v617_v45  ;;  %v1469_v52 = vpack.c.bf16 %v748_v48, %v745_v46 }
 0x139   :  { %v624_v53 = vpop.f32.mrf.mxu0  ;;  %v752_v54 = vpop.f32.mrf.mxu1 }
 0x13a   :  { %1521 = vst [vmem:[%s2153_s3 + $0x30] sm:$0xff] %v1389_v51   ;;  %1537 = vst [vmem:[%s2153_s3 + $0xb0] sm:$0xff] %v1469_v52   ;;  %v625_v59 = vadd.f32 %v1988_v19, %v624_v53  ;;  %v753_v60 = vadd.f32 %v1988_v19, %v752_v54 }
 0x13b   :  { %v626_v55 = vpop.f32.mrf.mxu0  ;;  %v754_v56 = vpop.f32.mrf.mxu1 }
 0x13d   :  { %v627_v57 = vpop.f32.mrf.mxu0  ;;  %v755_v58 = vpop.f32.mrf.mxu1 }
 0x13e   :  { %v628_v61 = vadd.f32 %v1988_v19, %v627_v57  ;;  %v756_v62 = vadd.f32 %v1988_v19, %v755_v58 }
 0x13f   :  { %v629_v63 = vpop.f32.mrf.mxu0  ;;  %v757_v0 = vpop.f32.mrf.mxu1 }
 0x140   :  { %v1394_v1 = vpack.c.bf16 %v628_v61, %v625_v59  ;;  %v1474_v2 = vpack.c.bf16 %v756_v62, %v753_v60 }
 0x141   :  { %v632_v3 = vpop.f32.mrf.mxu0  ;;  %v760_v4 = vpop.f32.mrf.mxu1 }
 0x142   :  { %1522 = vst [vmem:[%s2153_s3 + $0x38] sm:$0xff] %v1394_v1   ;;  %1538 = vst [vmem:[%s2153_s3 + $0xb8] sm:$0xff] %v1474_v2   ;;  %v633_v9 = vadd.f32 %v1988_v19, %v632_v3  ;;  %v761_v10 = vadd.f32 %v1988_v19, %v760_v4 }
 0x143   :  { %v634_v5 = vpop.f32.mrf.mxu0  ;;  %v762_v6 = vpop.f32.mrf.mxu1 }
 0x145   :  { %v635_v7 = vpop.f32.mrf.mxu0  ;;  %v763_v8 = vpop.f32.mrf.mxu1 }
 0x146   :  { %v636_v11 = vadd.f32 %v1988_v19, %v635_v7  ;;  %v764_v12 = vadd.f32 %v1988_v19, %v763_v8 }
 0x147   :  { %v637_v13 = vpop.f32.mrf.mxu0  ;;  %v765_v14 = vpop.f32.mrf.mxu1 }
 0x148   :  { %v1399_v15 = vpack.c.bf16 %v636_v11, %v633_v9  ;;  %v1479_v16 = vpack.c.bf16 %v764_v12, %v761_v10 }
 0x149   :  { %v640_v17 = vpop.f32.mrf.mxu0  ;;  %v768_v18 = vpop.f32.mrf.mxu1 }
 0x14a   :  { %1523 = vst [vmem:[%s2153_s3 + $0x40] sm:$0xff] %v1399_v15   ;;  %1539 = vst [vmem:[%s2153_s3 + $0xc0] sm:$0xff] %v1479_v16   ;;  %v641_v24 = vadd.f32 %v1988_v19, %v640_v17  ;;  %v769_v25 = vadd.f32 %v1988_v19, %v768_v18 }
 0x14b   :  { %v642_v20 = vpop.f32.mrf.mxu0  ;;  %v770_v21 = vpop.f32.mrf.mxu1 }
 0x14d   :  { %v643_v22 = vpop.f32.mrf.mxu0  ;;  %v771_v23 = vpop.f32.mrf.mxu1 }
 0x14e   :  { %v644_v26 = vadd.f32 %v1988_v19, %v643_v22  ;;  %v772_v27 = vadd.f32 %v1988_v19, %v771_v23 }
 0x14f   :  { %v645_v28 = vpop.f32.mrf.mxu0  ;;  %v773_v29 = vpop.f32.mrf.mxu1 }
 0x150   :  { %v1404_v30 = vpack.c.bf16 %v644_v26, %v641_v24  ;;  %v1484_v31 = vpack.c.bf16 %v772_v27, %v769_v25 }
 0x151   :  { %v648_v32 = vpop.f32.mrf.mxu0  ;;  %v776_v33 = vpop.f32.mrf.mxu1 }
 0x152   :  { %1524 = vst [vmem:[%s2153_s3 + $0x48] sm:$0xff] %v1404_v30   ;;  %1540 = vst [vmem:[%s2153_s3 + $0xc8] sm:$0xff] %v1484_v31   ;;  %v649_v38 = vadd.f32 %v1988_v19, %v648_v32  ;;  %v777_v39 = vadd.f32 %v1988_v19, %v776_v33 }
 0x153   :  { %v650_v34 = vpop.f32.mrf.mxu0  ;;  %v778_v35 = vpop.f32.mrf.mxu1 }
 0x155   :  { %v651_v36 = vpop.f32.mrf.mxu0  ;;  %v779_v37 = vpop.f32.mrf.mxu1 }
 0x156   :  { %v652_v40 = vadd.f32 %v1988_v19, %v651_v36  ;;  %v780_v41 = vadd.f32 %v1988_v19, %v779_v37 }
 0x157   :  { %v653_v42 = vpop.f32.mrf.mxu0  ;;  %v781_v43 = vpop.f32.mrf.mxu1 }
 0x158   :  { %v1409_v44 = vpack.c.bf16 %v652_v40, %v649_v38  ;;  %v1489_v45 = vpack.c.bf16 %v780_v41, %v777_v39 }
 0x159   :  { %v656_v46 = vpop.f32.mrf.mxu0  ;;  %v784_v47 = vpop.f32.mrf.mxu1 }
 0x15a   :  { %1525 = vst [vmem:[%s2153_s3 + $0x50] sm:$0xff] %v1409_v44   ;;  %1541 = vst [vmem:[%s2153_s3 + $0xd0] sm:$0xff] %v1489_v45   ;;  %v657_v52 = vadd.f32 %v1988_v19, %v656_v46  ;;  %v785_v53 = vadd.f32 %v1988_v19, %v784_v47 }
 0x15b   :  { %v658_v48 = vpop.f32.mrf.mxu0  ;;  %v786_v49 = vpop.f32.mrf.mxu1 }
 0x15d   :  { %v659_v50 = vpop.f32.mrf.mxu0  ;;  %v787_v51 = vpop.f32.mrf.mxu1 }
 0x15e   :  { %v660_v54 = vadd.f32 %v1988_v19, %v659_v50  ;;  %v788_v55 = vadd.f32 %v1988_v19, %v787_v51 }
 0x15f   :  { %v661_v56 = vpop.f32.mrf.mxu0  ;;  %v789_v57 = vpop.f32.mrf.mxu1 }
 0x160   :  { %v1414_v58 = vpack.c.bf16 %v660_v54, %v657_v52  ;;  %v1494_v59 = vpack.c.bf16 %v788_v55, %v785_v53 }
 0x161   :  { %v664_v60 = vpop.f32.mrf.mxu0  ;;  %v792_v61 = vpop.f32.mrf.mxu1 }
 0x162   :  { %1526 = vst [vmem:[%s2153_s3 + $0x58] sm:$0xff] %v1414_v58   ;;  %1542 = vst [vmem:[%s2153_s3 + $0xd8] sm:$0xff] %v1494_v59   ;;  %v665_v2 = vadd.f32 %v1988_v19, %v664_v60  ;;  %v793_v3 = vadd.f32 %v1988_v19, %v792_v61 }
 0x163   :  { %v666_v62 = vpop.f32.mrf.mxu0  ;;  %v794_v63 = vpop.f32.mrf.mxu1 }
 0x165   :  { %v667_v0 = vpop.f32.mrf.mxu0  ;;  %v795_v1 = vpop.f32.mrf.mxu1 }
 0x166   :  { %v668_v4 = vadd.f32 %v1988_v19, %v667_v0  ;;  %v796_v5 = vadd.f32 %v1988_v19, %v795_v1 }
 0x167   :  { %v669_v6 = vpop.f32.mrf.mxu0  ;;  %v797_v7 = vpop.f32.mrf.mxu1 }
 0x168   :  { %v1419_v8 = vpack.c.bf16 %v668_v4, %v665_v2  ;;  %v1499_v9 = vpack.c.bf16 %v796_v5, %v793_v3 }
 0x169   :  { %v672_v10 = vpop.f32.mrf.mxu0  ;;  %v800_v11 = vpop.f32.mrf.mxu1 }
 0x16a   :  { %1527 = vst [vmem:[%s2153_s3 + $0x60] sm:$0xff] %v1419_v8   ;;  %1543 = vst [vmem:[%s2153_s3 + $0xe0] sm:$0xff] %v1499_v9   ;;  %v673_v16 = vadd.f32 %v1988_v19, %v672_v10  ;;  %v801_v17 = vadd.f32 %v1988_v19, %v800_v11 }
 0x16b   :  { %v674_v12 = vpop.f32.mrf.mxu0  ;;  %v802_v13 = vpop.f32.mrf.mxu1 }
 0x16d   :  { %v675_v14 = vpop.f32.mrf.mxu0  ;;  %v803_v15 = vpop.f32.mrf.mxu1 }
 0x16e   :  { %v676_v18 = vadd.f32 %v1988_v19, %v675_v14  ;;  %v804_v20 = vadd.f32 %v1988_v19, %v803_v15 }
 0x16f   :  { %v677_v21 = vpop.f32.mrf.mxu0  ;;  %v805_v22 = vpop.f32.mrf.mxu1 }
 0x170   :  { %v1424_v23 = vpack.c.bf16 %v676_v18, %v673_v16  ;;  %v1504_v24 = vpack.c.bf16 %v804_v20, %v801_v17 }
 0x171   :  { %v680_v25 = vpop.f32.mrf.mxu0  ;;  %v808_v26 = vpop.f32.mrf.mxu1 }
 0x172   :  { %1528 = vst [vmem:[%s2153_s3 + $0x68] sm:$0xff] %v1424_v23   ;;  %1544 = vst [vmem:[%s2153_s3 + $0xe8] sm:$0xff] %v1504_v24   ;;  %v681_v31 = vadd.f32 %v1988_v19, %v680_v25  ;;  %v809_v32 = vadd.f32 %v1988_v19, %v808_v26 }
 0x173   :  { %v682_v27 = vpop.f32.mrf.mxu0  ;;  %v810_v28 = vpop.f32.mrf.mxu1 }
 0x175   :  { %v683_v29 = vpop.f32.mrf.mxu0  ;;  %v811_v30 = vpop.f32.mrf.mxu1 }
 0x176   :  { %v684_v33 = vadd.f32 %v1988_v19, %v683_v29  ;;  %v812_v34 = vadd.f32 %v1988_v19, %v811_v30 }
 0x177   :  { %v685_v35 = vpop.f32.mrf.mxu0  ;;  %v813_v36 = vpop.f32.mrf.mxu1 }
 0x178   :  { %v1429_v37 = vpack.c.bf16 %v684_v33, %v681_v31  ;;  %v1509_v38 = vpack.c.bf16 %v812_v34, %v809_v32 }
 0x179   :  { %v688_v39 = vpop.f32.mrf.mxu0  ;;  %v816_v40 = vpop.f32.mrf.mxu1 }
 0x17a   :  { %1529 = vst [vmem:[%s2153_s3 + $0x70] sm:$0xff] %v1429_v37   ;;  %1545 = vst [vmem:[%s2153_s3 + $0xf0] sm:$0xff] %v1509_v38   ;;  %v689_v45 = vadd.f32 %v1988_v19, %v688_v39  ;;  %v817_v46 = vadd.f32 %v1988_v19, %v816_v40 }
 0x17b   :  { %v690_v41 = vpop.f32.mrf.mxu0  ;;  %v818_v42 = vpop.f32.mrf.mxu1 }
 0x17d   :  { %v691_v43 = vpop.f32.mrf.mxu0  ;;  %v819_v44 = vpop.f32.mrf.mxu1 }
 0x17e   :  { %v692_v47 = vadd.f32 %v1988_v19, %v691_v43  ;;  %v820_v48 = vadd.f32 %v1988_v19, %v819_v44 }
 0x17f   :  { %v693_v49 = vpop.f32.mrf.mxu0  ;;  %v821_v50 = vpop.f32.mrf.mxu1 }
 0x180   :  { %v1434_v51 = vpack.c.bf16 %v692_v47, %v689_v45  ;;  %v1514_v52 = vpack.c.bf16 %v820_v48, %v817_v46 }
 0x182   :  { %1530 = vst [vmem:[%s2153_s3 + $0x78] sm:$0xff] %v1434_v51   ;;  %1546 = vst [vmem:[%s2153_s3 + $0xf8] sm:$0xff] %v1514_v52  }

// kernel: gcn_forward.9
= control target key start
LH: loop header
LB: loop body
LE: loop exit
PB: predicated region body
PF: predicated region fallthrough
CT: control target
= control target key end

     0   :  { %v2477_v0 = vmov 0   ;;  %s3488_s2 = inlined_call_operand.vmem [shape: f32[512,1], index: 2, kind: input, shape index: {}, may-alias: {2,3}]   ;;  %s3489_s1 = inlined_call_operand.vmem [shape: bf16[512,128], index: 1, kind: input, shape index: {}]   ;;  %s3490_s0 = inlined_call_operand.vmem [shape: s8[512,512], index: 0, kind: input, shape index: {}]   ;;  %s3491_s3 = inlined_call_operand.vmem [shape: f32[512,1], index: 3, kind: input, shape index: {}, may-alias: {2,3}]   ;;  %s3492_s4 = inlined_call_operand.vmem [shape: f32[1,128], index: 4, kind: input, shape index: {}]   ;;  %s3493_s5 = inlined_call_operand.vmem [shape: f32[512,128], index: 5, kind: output, shape index: {}]  }
   0x1   :  { %2475 = vset.pattern.permute.xlu1 %v2477_v0  ;;  %2474 = vset.pattern.permute.xlu0 %v2477_v0  ;;  %v455_v1 = vld [vmem:[%s3488_s2 + $0x170] sm:$0xff]  ;;  %v456_v3 = vld [vmem:[%s3488_s2 + $0x178] sm:$0xff]  ;;  %v422_v5 = vld [vmem:[%s3488_s2 + $0x68] sm:$0xff] }
   0x2   :  { %v423_v2 = vld [vmem:[%s3488_s2 + $0x70] sm:$0xff]  ;;  %705 = vperm.xlu1 %2475, %v455_v1   ;;  %v424_v4 = vld [vmem:[%s3488_s2 + $0x78] sm:$0xff]  ;;  %953 = vmatprep.subr.bf16.mxu0 %v2477_v0  ;;  %v421_v6 = vld [vmem:[%s3488_s2 + $0x60] sm:$0xff] }
   0x3   :  { %545 = vperm.xlu0 %2474, %v423_v2   ;;  %1242 = vmatprep.subr.bf16.mxu1 %v2477_v0  ;;  %v454_v7 = vld [vmem:[%s3488_s2 + $0x168] sm:$0xff]  ;;  %v453_v8 = vld [vmem:[%s3488_s2 + $0x160] sm:$0xff]  ;;  %v420_v9 = vld [vmem:[%s3488_s2 + $0x58] sm:$0xff] }
   0x4   :  { %v419_v10 = vld [vmem:[%s3488_s2 + $0x50] sm:$0xff]  ;;  %v452_v11 = vld [vmem:[%s3488_s2 + $0x158] sm:$0xff]  ;;  %v418_v13 = vld [vmem:[%s3488_s2 + $0x48] sm:$0xff] }
   0x5   :  { %v451_v12 = vld [vmem:[%s3488_s2 + $0x150] sm:$0xff]  ;;  %v417_v14 = vld [vmem:[%s3488_s2 + $0x40] sm:$0xff]  ;;  %v450_v15 = vld [vmem:[%s3488_s2 + $0x148] sm:$0xff] }
   0x6   :  { %710 = vperm.xlu1 %2475, %v456_v3   ;;  %v449_v16 = vld [vmem:[%s3488_s2 + $0x140] sm:$0xff]  ;;  %v416_v17 = vld [vmem:[%s3488_s2 + $0x38] sm:$0xff]  ;;  %v415_v18 = vld [vmem:[%s3488_s2 + $0x30] sm:$0xff] }
   0x7   :  { %550 = vperm.xlu0 %2474, %v424_v4   ;;  %v448_v19 = vld [vmem:[%s3488_s2 + $0x138] sm:$0xff]  ;;  %v447_v20 = vld [vmem:[%s3488_s2 + $0x130] sm:$0xff]  ;;  %v414_v21 = vld [vmem:[%s3488_s2 + $0x28] sm:$0xff] }
   0x8   :  { %v413_v22 = vld [vmem:[%s3488_s2 + $0x20] sm:$0xff]  ;;  %v446_v23 = vld [vmem:[%s3488_s2 + $0x128] sm:$0xff]  ;;  %v412_v25 = vld [vmem:[%s3488_s2 + $0x18] sm:$0xff] }
   0x9   :  { %v445_v24 = vld [vmem:[%s3488_s2 + $0x120] sm:$0xff]  ;;  %v411_v26 = vld [vmem:[%s3488_s2 + $0x10] sm:$0xff]  ;;  %v444_v27 = vld [vmem:[%s3488_s2 + $0x118] sm:$0xff] }
   0xa   :  { %540 = vperm.xlu1 %2475, %v422_v5   ;;  %v443_v28 = vld [vmem:[%s3488_s2 + $0x110] sm:$0xff]  ;;  %v410_v29 = vld [vmem:[%s3488_s2 + $0x8] sm:$0xff]  ;;  %v409_v30 = vld [vmem:[%s3488_s2] sm:$0xff] }
   0xb   :  { %535 = vperm.xlu0 %2474, %v421_v6   ;;  %v442_v31 = vld [vmem:[%s3488_s2 + $0x108] sm:$0xff]  ;;  %v441_v32 = vld [vmem:[%s3488_s2 + $0x100] sm:$0xff]  ;;  %v440_v33 = vld [vmem:[%s3488_s2 + $0xf8] sm:$0xff] }
   0xc   :  { %v439_v34 = vld [vmem:[%s3488_s2 + $0xf0] sm:$0xff]  ;;  %v472_v35 = vld [vmem:[%s3488_s2 + $0x1f8] sm:$0xff]  ;;  %v438_v37 = vld [vmem:[%s3488_s2 + $0xe8] sm:$0xff] }
   0xd   :  { %v471_v36 = vld [vmem:[%s3488_s2 + $0x1f0] sm:$0xff]  ;;  %v437_v38 = vld [vmem:[%s3488_s2 + $0xe0] sm:$0xff]  ;;  %v470_v39 = vld [vmem:[%s3488_s2 + $0x1e8] sm:$0xff] }
   0xe   :  { %700 = vperm.xlu1 %2475, %v454_v7   ;;  %v469_v40 = vld [vmem:[%s3488_s2 + $0x1e0] sm:$0xff]  ;;  %v436_v41 = vld [vmem:[%s3488_s2 + $0xd8] sm:$0xff]  ;;  %v435_v42 = vld [vmem:[%s3488_s2 + $0xd0] sm:$0xff] }
   0xf   :  { %695 = vperm.xlu0 %2474, %v453_v8   ;;  %v468_v43 = vld [vmem:[%s3488_s2 + $0x1d8] sm:$0xff]  ;;  %v467_v44 = vld [vmem:[%s3488_s2 + $0x1d0] sm:$0xff]  ;;  %v434_v45 = vld [vmem:[%s3488_s2 + $0xc8] sm:$0xff] }
  0x10   :  { %v433_v46 = vld [vmem:[%s3488_s2 + $0xc0] sm:$0xff]  ;;  %v466_v47 = vld [vmem:[%s3488_s2 + $0x1c8] sm:$0xff]  ;;  %v432_v49 = vld [vmem:[%s3488_s2 + $0xb8] sm:$0xff] }
  0x11   :  { %v465_v48 = vld [vmem:[%s3488_s2 + $0x1c0] sm:$0xff]  ;;  %v431_v50 = vld [vmem:[%s3488_s2 + $0xb0] sm:$0xff]  ;;  %v464_v51 = vld [vmem:[%s3488_s2 + $0x1b8] sm:$0xff] }
  0x12   :  { %530 = vperm.xlu1 %2475, %v420_v9   ;;  %v463_v52 = vld [vmem:[%s3488_s2 + $0x1b0] sm:$0xff]  ;;  %v430_v53 = vld [vmem:[%s3488_s2 + $0xa8] sm:$0xff]  ;;  %v429_v54 = vld [vmem:[%s3488_s2 + $0xa0] sm:$0xff] }
  0x13   :  { %525 = vperm.xlu0 %2474, %v419_v10   ;;  %v462_v55 = vld [vmem:[%s3488_s2 + $0x1a8] sm:$0xff]  ;;  %v461_v56 = vld [vmem:[%s3488_s2 + $0x1a0] sm:$0xff]  ;;  %v428_v57 = vld [vmem:[%s3488_s2 + $0x98] sm:$0xff] }
  0x14   :  { %v427_v58 = vld [vmem:[%s3488_s2 + $0x90] sm:$0xff]  ;;  %v460_v59 = vld [vmem:[%s3488_s2 + $0x198] sm:$0xff]  ;;  %v426_v61 = vld [vmem:[%s3488_s2 + $0x88] sm:$0xff] }
  0x15   :  { %v459_v60 = vld [vmem:[%s3488_s2 + $0x190] sm:$0xff]  ;;  %v425_v62 = vld [vmem:[%s3488_s2 + $0x80] sm:$0xff]  ;;  %v2464_v63 = vld [vmem:[%s3489_s1 + $0xb8] sm:$0xff]  }
  0x16   :  { %690 = vperm.xlu1 %2475, %v452_v11   ;;  %v2704_v1 = vld [vmem:[%s3490_s0 + $0x8] sm:$0xff]  ;;  %v2448_v2 = vld [vmem:[%s3489_s1 + $0x38] sm:$0xff]   ;;  %v457_v4 = vld [vmem:[%s3488_s2 + $0x180] sm:$0xff]  ;;  %v2408_v7 = vunpack.c.l.bf16 %v2464_v63  ;;  %v2409_v10 = vunpack.c.h.bf16 %v2464_v63 }
  0x17   :  { %685 = vperm.xlu0 %2474, %v451_v12   ;;  %v458_v3 = vld [vmem:[%s3488_s2 + $0x188] sm:$0xff]  ;;  %v154_v5 = vunpack.c.l.s8.bf16 %v2704_v1  ;;  %v2344_v9 = vunpack.c.l.bf16 %v2448_v2  ;;  %v2345_v11 = vunpack.c.h.bf16 %v2448_v2  ;;  %v2447_v12 = vld [vmem:[%s3489_s1 + $0x30] sm:$0xff]  }
  0x19   :  { %985 = vmatprep.mubr.bf16.mxu0 %v154_v5  ;;  %v1736_v5 = vld [vmem:[%s3491_s3 + $0x50] sm:$0xff] }
  0x1a   :  { %520 = vperm.xlu1 %2475, %v418_v13   ;;  %v2722_v13 = vld [vmem:[%s3490_s0 + $0x18] sm:$0xff] }
  0x1b   :  { %515 = vperm.xlu0 %2474, %v417_v14   ;;  %v1727_v14 = vld [vmem:[%s3491_s3 + $0x8] sm:$0xff] }
  0x1e   :  { %680 = vperm.xlu1 %2475, %v450_v15   ;;  %v1726_v15 = vld [vmem:[%s3491_s3] sm:$0xff] }
  0x1f   :  { %675 = vperm.xlu0 %2474, %v449_v16   ;;  %v156_v16 = vunpack.c.l.s8.bf16 %v2722_v13 }
  0x21   :  { %1274 = vmatprep.mubr.bf16.mxu1 %v156_v16  ;;  %v1738_v16 = vld [vmem:[%s3491_s3 + $0x60] sm:$0xff] }
  0x22   :  { %510 = vperm.xlu1 %2475, %v416_v17  }
  0x23   :  { %505 = vperm.xlu0 %2474, %v415_v18  }
  0x26   :  { %670 = vperm.xlu1 %2475, %v448_v19  }
  0x27   :  { %665 = vperm.xlu0 %2474, %v447_v20   ;;  %v2341_v20 = vunpack.c.h.bf16 %v2447_v12 }
  0x2a   :  { %500 = vperm.xlu1 %2475, %v414_v21  }
  0x2b   :  { %495 = vperm.xlu0 %2474, %v413_v22  }
  0x2e   :  { %660 = vperm.xlu1 %2475, %v446_v23  }
  0x2f   :  { %655 = vperm.xlu0 %2474, %v445_v24   ;;  %v2340_v24 = vunpack.c.l.bf16 %v2447_v12 }
  0x32   :  { %490 = vperm.xlu1 %2475, %v412_v25   ;;  %v1729_v25 = vld [vmem:[%s3491_s3 + $0x18] sm:$0xff] }
  0x33   :  { %485 = vperm.xlu0 %2474, %v411_v26   ;;  %v1728_v26 = vld [vmem:[%s3491_s3 + $0x10] sm:$0xff] }
  0x36   :  { %650 = vperm.xlu1 %2475, %v444_v27   ;;  %v2463_v27 = vld [vmem:[%s3489_s1 + $0xb0] sm:$0xff]  }
  0x37   :  { %645 = vperm.xlu0 %2474, %v443_v28  }
  0x3a   :  { %480 = vperm.xlu1 %2475, %v410_v29  }
  0x3b   :  { %475 = vperm.xlu0 %2474, %v409_v30  }
  0x3e   :  { %640 = vperm.xlu1 %2475, %v442_v31  }
  0x3f   :  { %635 = vperm.xlu0 %2474, %v441_v32  }
  0x42   :  { %630 = vperm.xlu1 %2475, %v440_v33  }
  0x43   :  { %625 = vperm.xlu0 %2474, %v439_v34   ;;  %v2405_v34 = vunpack.c.h.bf16 %v2463_v27 }
  0x46   :  { %790 = vperm.xlu1 %2475, %v472_v35   ;;  %v2404_v35 = vunpack.c.l.bf16 %v2463_v27  ;;  %v2460_v27 = vld [vmem:[%s3489_s1 + $0x98] sm:$0xff]  }
  0x47   :  { %785 = vperm.xlu0 %2474, %v471_v36   ;;  %v1731_v36 = vld [vmem:[%s3491_s3 + $0x28] sm:$0xff] }
  0x4a   :  { %620 = vperm.xlu1 %2475, %v438_v37   ;;  %v1730_v37 = vld [vmem:[%s3491_s3 + $0x20] sm:$0xff] }
  0x4b   :  { %615 = vperm.xlu0 %2474, %v437_v38   ;;  %v2446_v38 = vld [vmem:[%s3489_s1 + $0x28] sm:$0xff]  }
  0x4e   :  { %780 = vperm.xlu1 %2475, %v470_v39  }
  0x4f   :  { %775 = vperm.xlu0 %2474, %v469_v40  }
  0x52   :  { %610 = vperm.xlu1 %2475, %v436_v41  }
  0x53   :  { %605 = vperm.xlu0 %2474, %v435_v42  }
  0x56   :  { %770 = vperm.xlu1 %2475, %v468_v43  }
  0x57   :  { %765 = vperm.xlu0 %2474, %v467_v44   ;;  %v2337_v44 = vunpack.c.h.bf16 %v2446_v38 }
  0x5a   :  { %600 = vperm.xlu1 %2475, %v434_v45   ;;  %v2336_v45 = vunpack.c.l.bf16 %v2446_v38 }
  0x5b   :  { %595 = vperm.xlu0 %2474, %v433_v46   ;;  %v1733_v46 = vld [vmem:[%s3491_s3 + $0x38] sm:$0xff] }
  0x5e   :  { %760 = vperm.xlu1 %2475, %v466_v47   ;;  %v1732_v47 = vld [vmem:[%s3491_s3 + $0x30] sm:$0xff] }
  0x5f   :  { %755 = vperm.xlu0 %2474, %v465_v48   ;;  %v2462_v48 = vld [vmem:[%s3489_s1 + $0xa8] sm:$0xff]  }
  0x62   :  { %590 = vperm.xlu1 %2475, %v432_v49  }
  0x63   :  { %585 = vperm.xlu0 %2474, %v431_v50  }
  0x66   :  { %750 = vperm.xlu1 %2475, %v464_v51  }
  0x67   :  { %745 = vperm.xlu0 %2474, %v463_v52  }
  0x6a   :  { %580 = vperm.xlu1 %2475, %v430_v53  }
  0x6b   :  { %575 = vperm.xlu0 %2474, %v429_v54   ;;  %v2401_v54 = vunpack.c.h.bf16 %v2462_v48 }
  0x6e   :  { %740 = vperm.xlu1 %2475, %v462_v55   ;;  %v2400_v55 = vunpack.c.l.bf16 %v2462_v48 }
  0x6f   :  { %735 = vperm.xlu0 %2474, %v461_v56   ;;  %v1735_v56 = vld [vmem:[%s3491_s3 + $0x48] sm:$0xff] }
  0x72   :  { %570 = vperm.xlu1 %2475, %v428_v57   ;;  %v1734_v57 = vld [vmem:[%s3491_s3 + $0x40] sm:$0xff] }
  0x73   :  { %565 = vperm.xlu0 %2474, %v427_v58   ;;  %v2445_v58 = vld [vmem:[%s3489_s1 + $0x20] sm:$0xff]  }
  0x74   :  { %v2333_v2 = vunpack.c.h.bf16 %v2445_v58 }
  0x76   :  { %730 = vperm.xlu1 %2475, %v460_v59  }
  0x77   :  { %725 = vperm.xlu0 %2474, %v459_v60  }
  0x7a   :  { %560 = vperm.xlu1 %2475, %v426_v61  }
  0x7b   :  { %555 = vperm.xlu0 %2474, %v425_v62  }
  0x7d   :  { %v706_v6 = vpop.permute.xlu1 %705 }
  0x7e   :  { %v546_v8 = vpop.permute.xlu0 %545  ;;  %720 = vperm.xlu1 %2475, %v458_v3   ;;  %v839_v17 = vmul.f32 %v2408_v7, %v706_v6  ;;  %v2332_v3 = vunpack.c.l.bf16 %v2445_v58  ;;  %v2461_v6 = vld [vmem:[%s3489_s1 + $0xa0] sm:$0xff]  }
  0x7f   :  { %715 = vperm.xlu0 %2474, %v457_v4   ;;  %v807_v21 = vmul.f32 %v2344_v9, %v546_v8  ;;  %v1737_v4 = vld [vmem:[%s3491_s3 + $0x58] sm:$0xff]  ;;  %v2397_v12 = vunpack.c.h.bf16 %v2461_v6 }
  0x81   :  { %v711_v18 = vpop.permute.xlu1 %710 }
  0x82   :  { %v551_v19 = vpop.permute.xlu0 %550  ;;  %v840_v22 = vmul.f32 %v2409_v10, %v711_v18  ;;  %1797 = vperm.xlu1 %2475, %v1727_v14   ;;  %v2396_v14 = vunpack.c.l.bf16 %v2461_v6 }
  0x83   :  { %v808_v23 = vmul.f32 %v2345_v11, %v551_v19  ;;  %1792 = vperm.xlu0 %2474, %v1726_v15   ;;  %v1739_v15 = vld [vmem:[%s3491_s3 + $0x68] sm:$0xff] }
  0x84   :  { %v880_v29 = vpack.c.bf16 %v840_v22, %v839_v17  ;;  %v2444_v17 = vld [vmem:[%s3489_s1 + $0x18] sm:$0xff]  }
  0x85   :  { %v864_v28 = vpack.c.bf16 %v808_v23, %v807_v21  ;;  %v541_v30 = vpop.permute.xlu1 %540  ;;  %v2329_v23 = vunpack.c.h.bf16 %v2444_v17 }
  0x86   :  { %v536_v31 = vpop.permute.xlu0 %535  ;;  %v806_v32 = vmul.f32 %v2341_v20, %v541_v30  ;;  %1807 = vperm.xlu1 %2475, %v1729_v25   ;;  %1243 = vmatpush1.bf16.msra.mxu1 %v880_v29  ;;  %v1741_v25 = vld [vmem:[%s3491_s3 + $0x78] sm:$0xff] }
  0x87   :  { %v805_v33 = vmul.f32 %v2340_v24, %v536_v31  ;;  %1802 = vperm.xlu0 %2474, %v1728_v26   ;;  %954 = vmatpush1.bf16.msra.mxu0 %v864_v28  ;;  %v2328_v24 = vunpack.c.l.bf16 %v2444_v17  ;;  %v1740_v26 = vld [vmem:[%s3491_s3 + $0x70] sm:$0xff] }
  0x88   :  { %955 = vmatprep.subr.bf16.mxu0 %v2477_v0  ;;  %1244 = vmatprep.subr.bf16.mxu1 %v2477_v0 }
  0x89   :  { %v863_v39 = vpack.c.bf16 %v806_v32, %v805_v33  ;;  %v701_v40 = vpop.permute.xlu1 %700  ;;  %v2393_v33 = vunpack.c.h.bf16 %v2460_v27 }
  0x8a   :  { %v696_v41 = vpop.permute.xlu0 %695  ;;  %v838_v42 = vmul.f32 %v2405_v34, %v701_v40  ;;  %1817 = vperm.xlu1 %2475, %v1731_v36   ;;  %v2392_v34 = vunpack.c.l.bf16 %v2460_v27  ;;  %v1742_v36 = vld [vmem:[%s3491_s3 + $0x80] sm:$0xff] }
  0x8b   :  { %v837_v43 = vmul.f32 %v2404_v35, %v696_v41  ;;  %1812 = vperm.xlu0 %2474, %v1730_v37   ;;  %956 = vmatpush1.bf16.msra.mxu0 %v863_v39  ;;  %v1743_v35 = vld [vmem:[%s3491_s3 + $0x88] sm:$0xff]  ;;  %v2443_v37 = vld [vmem:[%s3489_s1 + $0x10] sm:$0xff]  }
  0x8c   :  { %957 = vmatprep.subr.bf16.mxu0 %v2477_v0 }
  0x8d   :  { %v879_v49 = vpack.c.bf16 %v838_v42, %v837_v43  ;;  %v531_v50 = vpop.permute.xlu1 %530  ;;  %v2325_v43 = vunpack.c.h.bf16 %v2443_v37 }
  0x8e   :  { %v526_v51 = vpop.permute.xlu0 %525  ;;  %v804_v52 = vmul.f32 %v2337_v44, %v531_v50  ;;  %1827 = vperm.xlu1 %2475, %v1733_v46   ;;  %v2324_v44 = vunpack.c.l.bf16 %v2443_v37  ;;  %v1744_v46 = vld [vmem:[%s3491_s3 + $0x90] sm:$0xff] }
  0x8f   :  { %v803_v53 = vmul.f32 %v2336_v45, %v526_v51  ;;  %1822 = vperm.xlu0 %2474, %v1732_v47   ;;  %1245 = vmatpush1.bf16.msra.mxu1 %v879_v49  ;;  %v1745_v45 = vld [vmem:[%s3491_s3 + $0x98] sm:$0xff]  ;;  %v2459_v47 = vld [vmem:[%s3489_s1 + $0x90] sm:$0xff]  }
  0x90   :  { %1246 = vmatprep.subr.bf16.mxu1 %v2477_v0 }
  0x91   :  { %v862_v59 = vpack.c.bf16 %v804_v52, %v803_v53  ;;  %v691_v60 = vpop.permute.xlu1 %690  ;;  %v2389_v53 = vunpack.c.h.bf16 %v2459_v47 }
  0x92   :  { %v686_v61 = vpop.permute.xlu0 %685  ;;  %v836_v62 = vmul.f32 %v2401_v54, %v691_v60  ;;  %1837 = vperm.xlu1 %2475, %v1735_v56   ;;  %v2388_v54 = vunpack.c.l.bf16 %v2459_v47  ;;  %v1746_v56 = vld [vmem:[%s3491_s3 + $0xa0] sm:$0xff] }
  0x93   :  { %v835_v63 = vmul.f32 %v2400_v55, %v686_v61  ;;  %1832 = vperm.xlu0 %2474, %v1734_v57   ;;  %958 = vmatpush1.bf16.msra.mxu0 %v862_v59  ;;  %v1747_v55 = vld [vmem:[%s3491_s3 + $0xa8] sm:$0xff] }
  0x94   :  { %959 = vmatprep.subr.bf16.mxu0 %v2477_v0  ;;  %v2442_v57 = vld [vmem:[%s3489_s1 + $0x8] sm:$0xff]  }
  0x95   :  { %v878_v7 = vpack.c.bf16 %v836_v62, %v835_v63  ;;  %v521_v8 = vpop.permute.xlu1 %520  ;;  %v2321_v63 = vunpack.c.h.bf16 %v2442_v57 }
  0x96   :  { %v516_v9 = vpop.permute.xlu0 %515  ;;  %v802_v10 = vmul.f32 %v2333_v2, %v521_v8  ;;  %1847 = vperm.xlu1 %2475, %v1737_v4   ;;  %v2320_v2 = vunpack.c.l.bf16 %v2442_v57  ;;  %v1748_v4 = vld [vmem:[%s3491_s3 + $0xb0] sm:$0xff] }
  0x97   :  { %v801_v11 = vmul.f32 %v2332_v3, %v516_v9  ;;  %1842 = vperm.xlu0 %2474, %v1736_v5   ;;  %1247 = vmatpush1.bf16.msra.mxu1 %v878_v7  ;;  %v1749_v3 = vld [vmem:[%s3491_s3 + $0xb8] sm:$0xff]  ;;  %v2458_v5 = vld [vmem:[%s3489_s1 + $0x88] sm:$0xff]  }
  0x98   :  { %1248 = vmatprep.subr.bf16.mxu1 %v2477_v0 }
  0x99   :  { %v861_v18 = vpack.c.bf16 %v802_v10, %v801_v11  ;;  %v681_v19 = vpop.permute.xlu1 %680  ;;  %v2385_v11 = vunpack.c.h.bf16 %v2458_v5 }
  0x9a   :  { %v676_v20 = vpop.permute.xlu0 %675  ;;  %v834_v21 = vmul.f32 %v2397_v12, %v681_v19  ;;  %1857 = vperm.xlu1 %2475, %v1739_v15   ;;  %v2384_v12 = vunpack.c.l.bf16 %v2458_v5  ;;  %v1750_v15 = vld [vmem:[%s3491_s3 + $0xc0] sm:$0xff] }
  0x9b   :  { %v833_v22 = vmul.f32 %v2396_v14, %v676_v20  ;;  %1852 = vperm.xlu0 %2474, %v1738_v16   ;;  %960 = vmatpush1.bf16.msra.mxu0 %v861_v18  ;;  %v1751_v14 = vld [vmem:[%s3491_s3 + $0xc8] sm:$0xff]  ;;  %v2315_v16 = vld [vmem:[%s3489_s1] sm:$0xff]  }
  0x9c   :  { %961 = vmatprep.subr.bf16.mxu0 %v2477_v0 }
  0x9d   :  { %v877_v28 = vpack.c.bf16 %v834_v21, %v833_v22  ;;  %v511_v29 = vpop.permute.xlu1 %510  ;;  %v2317_v22 = vunpack.c.h.bf16 %v2315_v16 }
  0x9e   :  { %v506_v30 = vpop.permute.xlu0 %505  ;;  %v800_v31 = vmul.f32 %v2329_v23, %v511_v29  ;;  %1867 = vperm.xlu1 %2475, %v1741_v25   ;;  %v2316_v23 = vunpack.c.l.bf16 %v2315_v16  ;;  %v1752_v25 = vld [vmem:[%s3491_s3 + $0xd0] sm:$0xff] }
  0x9f   :  { %v799_v32 = vmul.f32 %v2328_v24, %v506_v30  ;;  %1862 = vperm.xlu0 %2474, %v1740_v26   ;;  %1249 = vmatpush1.bf16.msra.mxu1 %v877_v28  ;;  %v1753_v24 = vld [vmem:[%s3491_s3 + $0xd8] sm:$0xff]  ;;  %v2457_v26 = vld [vmem:[%s3489_s1 + $0x80] sm:$0xff]  }
  0xa0   :  { %1250 = vmatprep.subr.bf16.mxu1 %v2477_v0 }
  0xa1   :  { %v860_v38 = vpack.c.bf16 %v800_v31, %v799_v32  ;;  %v671_v39 = vpop.permute.xlu1 %670  ;;  %v2381_v32 = vunpack.c.h.bf16 %v2457_v26 }
  0xa2   :  { %v666_v40 = vpop.permute.xlu0 %665  ;;  %v832_v41 = vmul.f32 %v2393_v33, %v671_v39  ;;  %1877 = vperm.xlu1 %2475, %v1743_v35   ;;  %v2380_v33 = vunpack.c.l.bf16 %v2457_v26  ;;  %v1754_v35 = vld [vmem:[%s3491_s3 + $0xe0] sm:$0xff] }
  0xa3   :  { %v831_v42 = vmul.f32 %v2392_v34, %v666_v40  ;;  %1872 = vperm.xlu0 %2474, %v1742_v36   ;;  %962 = vmatpush1.bf16.msra.mxu0 %v860_v38  ;;  %v1755_v34 = vld [vmem:[%s3491_s3 + $0xe8] sm:$0xff]  ;;  %v2456_v36 = vld [vmem:[%s3489_s1 + $0x78] sm:$0xff]  }
  0xa4   :  { %963 = vmatprep.subr.bf16.mxu0 %v2477_v0 }
  0xa5   :  { %v876_v48 = vpack.c.bf16 %v832_v41, %v831_v42  ;;  %v501_v49 = vpop.permute.xlu1 %500  ;;  %v2377_v42 = vunpack.c.h.bf16 %v2456_v36 }
  0xa6   :  { %v496_v50 = vpop.permute.xlu0 %495  ;;  %v798_v51 = vmul.f32 %v2325_v43, %v501_v49  ;;  %1887 = vperm.xlu1 %2475, %v1745_v45   ;;  %v2376_v43 = vunpack.c.l.bf16 %v2456_v36  ;;  %v1756_v45 = vld [vmem:[%s3491_s3 + $0xf0] sm:$0xff] }
  0xa7   :  { %v797_v52 = vmul.f32 %v2324_v44, %v496_v50  ;;  %1882 = vperm.xlu0 %2474, %v1744_v46   ;;  %1251 = vmatpush1.bf16.msra.mxu1 %v876_v48  ;;  %v1757_v44 = vld [vmem:[%s3491_s3 + $0xf8] sm:$0xff] }
  0xa8   :  { %1252 = vmatprep.subr.bf16.mxu1 %v2477_v0  ;;  %v2472_v46 = vld [vmem:[%s3489_s1 + $0xf8] sm:$0xff]  }
  0xa9   :  { %v859_v58 = vpack.c.bf16 %v798_v51, %v797_v52  ;;  %v661_v59 = vpop.permute.xlu1 %660  ;;  %v2441_v52 = vunpack.c.h.bf16 %v2472_v46 }
  0xaa   :  { %v656_v60 = vpop.permute.xlu0 %655  ;;  %v830_v61 = vmul.f32 %v2389_v53, %v661_v59  ;;  %1897 = vperm.xlu1 %2475, %v1747_v55   ;;  %v2440_v53 = vunpack.c.l.bf16 %v2472_v46  ;;  %v1758_v55 = vld [vmem:[%s3491_s3 + $0x100] sm:$0xff] }
  0xab   :  { %v829_v62 = vmul.f32 %v2388_v54, %v656_v60  ;;  %1892 = vperm.xlu0 %2474, %v1746_v56   ;;  %964 = vmatpush1.bf16.msra.mxu0 %v859_v58  ;;  %v1759_v54 = vld [vmem:[%s3491_s3 + $0x108] sm:$0xff]  ;;  %v2455_v56 = vld [vmem:[%s3489_s1 + $0x70] sm:$0xff]  }
  0xac   :  { %965 = vmatprep.subr.bf16.mxu0 %v2477_v0 }
  0xad   :  { %v875_v6 = vpack.c.bf16 %v830_v61, %v829_v62  ;;  %v491_v7 = vpop.permute.xlu1 %490  ;;  %v2373_v62 = vunpack.c.h.bf16 %v2455_v56 }
  0xae   :  { %v486_v8 = vpop.permute.xlu0 %485  ;;  %v796_v9 = vmul.f32 %v2321_v63, %v491_v7  ;;  %1907 = vperm.xlu1 %2475, %v1749_v3   ;;  %v2372_v63 = vunpack.c.l.bf16 %v2455_v56  ;;  %v1760_v3 = vld [vmem:[%s3491_s3 + $0x110] sm:$0xff] }
  0xaf   :  { %v795_v10 = vmul.f32 %v2320_v2, %v486_v8  ;;  %1902 = vperm.xlu0 %2474, %v1748_v4   ;;  %1253 = vmatpush1.bf16.msra.mxu1 %v875_v6  ;;  %v1761_v2 = vld [vmem:[%s3491_s3 + $0x118] sm:$0xff]  ;;  %v2471_v4 = vld [vmem:[%s3489_s1 + $0xf0] sm:$0xff]  }
  0xb0   :  { %1254 = vmatprep.subr.bf16.mxu1 %v2477_v0 }
  0xb1   :  { %v858_v17 = vpack.c.bf16 %v796_v9, %v795_v10  ;;  %v651_v18 = vpop.permute.xlu1 %650  ;;  %v2437_v10 = vunpack.c.h.bf16 %v2471_v4 }
  0xb2   :  { %v646_v19 = vpop.permute.xlu0 %645  ;;  %v828_v20 = vmul.f32 %v2385_v11, %v651_v18  ;;  %1917 = vperm.xlu1 %2475, %v1751_v14   ;;  %v2436_v11 = vunpack.c.l.bf16 %v2471_v4  ;;  %v1762_v14 = vld [vmem:[%s3491_s3 + $0x120] sm:$0xff] }
  0xb3   :  { %v827_v21 = vmul.f32 %v2384_v12, %v646_v19  ;;  %1912 = vperm.xlu0 %2474, %v1750_v15   ;;  %966 = vmatpush1.bf16.msra.mxu0 %v858_v17  ;;  %v1763_v12 = vld [vmem:[%s3491_s3 + $0x128] sm:$0xff] }
  0xb4   :  { %967 = vmatprep.subr.bf16.mxu0 %v2477_v0  ;;  %v2454_v15 = vld [vmem:[%s3489_s1 + $0x68] sm:$0xff]  }
  0xb5   :  { %v874_v27 = vpack.c.bf16 %v828_v20, %v827_v21  ;;  %v481_v28 = vpop.permute.xlu1 %480  ;;  %v2369_v21 = vunpack.c.h.bf16 %v2454_v15 }
  0xb6   :  { %v476_v29 = vpop.permute.xlu0 %475  ;;  %v794_v30 = vmul.f32 %v2317_v22, %v481_v28  ;;  %1927 = vperm.xlu1 %2475, %v1753_v24   ;;  %v2368_v22 = vunpack.c.l.bf16 %v2454_v15  ;;  %v1764_v24 = vld [vmem:[%s3491_s3 + $0x130] sm:$0xff] }
  0xb7   :  { %v793_v31 = vmul.f32 %v2316_v23, %v476_v29  ;;  %1922 = vperm.xlu0 %2474, %v1752_v25   ;;  %1255 = vmatpush1.bf16.msra.mxu1 %v874_v27  ;;  %v1765_v23 = vld [vmem:[%s3491_s3 + $0x138] sm:$0xff]  ;;  %v2470_v25 = vld [vmem:[%s3489_s1 + $0xe8] sm:$0xff]  }
  0xb8   :  { %1256 = vmatprep.subr.bf16.mxu1 %v2477_v0 }
  0xb9   :  { %v857_v37 = vpack.c.bf16 %v794_v30, %v793_v31  ;;  %v641_v38 = vpop.permute.xlu1 %640  ;;  %v2433_v31 = vunpack.c.h.bf16 %v2470_v25 }
  0xba   :  { %v636_v39 = vpop.permute.xlu0 %635  ;;  %v826_v40 = vmul.f32 %v2381_v32, %v641_v38  ;;  %1937 = vperm.xlu1 %2475, %v1755_v34   ;;  %v2432_v32 = vunpack.c.l.bf16 %v2470_v25  ;;  %v1766_v34 = vld [vmem:[%s3491_s3 + $0x140] sm:$0xff] }
  0xbb   :  { %v825_v41 = vmul.f32 %v2380_v33, %v636_v39  ;;  %1932 = vperm.xlu0 %2474, %v1754_v35   ;;  %968 = vmatpush1.bf16.msra.mxu0 %v857_v37  ;;  %v1767_v33 = vld [vmem:[%s3491_s3 + $0x148] sm:$0xff]  ;;  %v2453_v35 = vld [vmem:[%s3489_s1 + $0x60] sm:$0xff]  }
  0xbc   :  { %969 = vmatprep.subr.bf16.mxu0 %v2477_v0 }
  0xbd   :  { %v873_v47 = vpack.c.bf16 %v826_v40, %v825_v41  ;;  %v631_v48 = vpop.permute.xlu1 %630  ;;  %v2365_v41 = vunpack.c.h.bf16 %v2453_v35 }
  0xbe   :  { %v626_v49 = vpop.permute.xlu0 %625  ;;  %v824_v50 = vmul.f32 %v2377_v42, %v631_v48  ;;  %1947 = vperm.xlu1 %2475, %v1757_v44   ;;  %v2364_v42 = vunpack.c.l.bf16 %v2453_v35  ;;  %v1768_v44 = vld [vmem:[%s3491_s3 + $0x150] sm:$0xff] }
  0xbf   :  { %v823_v51 = vmul.f32 %v2376_v43, %v626_v49  ;;  %1942 = vperm.xlu0 %2474, %v1756_v45   ;;  %1257 = vmatpush1.bf16.msra.mxu1 %v873_v47  ;;  %v1769_v43 = vld [vmem:[%s3491_s3 + $0x158] sm:$0xff]  ;;  %v2469_v45 = vld [vmem:[%s3489_s1 + $0xe0] sm:$0xff]  }
  0xc0   :  { %1258 = vmatprep.subr.bf16.mxu1 %v2477_v0 }
  0xc1   :  { %v872_v57 = vpack.c.bf16 %v824_v50, %v823_v51  ;;  %v791_v58 = vpop.permute.xlu1 %790  ;;  %v2429_v51 = vunpack.c.h.bf16 %v2469_v45 }
  0xc2   :  { %v786_v59 = vpop.permute.xlu0 %785  ;;  %v856_v60 = vmul.f32 %v2441_v52, %v791_v58  ;;  %1957 = vperm.xlu1 %2475, %v1759_v54   ;;  %v2428_v52 = vunpack.c.l.bf16 %v2469_v45  ;;  %v1770_v54 = vld [vmem:[%s3491_s3 + $0x160] sm:$0xff] }
  0xc3   :  { %v855_v61 = vmul.f32 %v2440_v53, %v786_v59  ;;  %1952 = vperm.xlu0 %2474, %v1758_v55   ;;  %970 = vmatpush2.bf16.msra.mxu0 %v872_v57  ;;  %v1771_v53 = vld [vmem:[%s3491_s3 + $0x168] sm:$0xff]  ;;  %v2452_v55 = vld [vmem:[%s3489_s1 + $0x58] sm:$0xff]  }
  0xc4   :  { %971 = vmatprep.subr.bf16.mxu0 %v2477_v0 }
  0xc5   :  { %v888_v5 = vpack.c.bf16 %v856_v60, %v855_v61  ;;  %v621_v6 = vpop.permute.xlu1 %620  ;;  %v2361_v61 = vunpack.c.h.bf16 %v2452_v55 }
  0xc6   :  { %v616_v7 = vpop.permute.xlu0 %615  ;;  %v822_v8 = vmul.f32 %v2373_v62, %v621_v6  ;;  %1967 = vperm.xlu1 %2475, %v1761_v2   ;;  %v2360_v62 = vunpack.c.l.bf16 %v2452_v55  ;;  %v1772_v2 = vld [vmem:[%s3491_s3 + $0x170] sm:$0xff] }
  0xc7   :  { %v821_v9 = vmul.f32 %v2372_v63, %v616_v7  ;;  %1962 = vperm.xlu0 %2474, %v1760_v3   ;;  %1259 = vmatpush2.bf16.msra.mxu1 %v888_v5  ;;  %v1773_v63 = vld [vmem:[%s3491_s3 + $0x178] sm:$0xff] }
  0xc8   :  { %1260 = vmatprep.subr.bf16.mxu1 %v2477_v0  ;;  %v2468_v3 = vld [vmem:[%s3489_s1 + $0xd8] sm:$0xff]  }
  0xc9   :  { %v871_v16 = vpack.c.bf16 %v822_v8, %v821_v9  ;;  %v781_v17 = vpop.permute.xlu1 %780  ;;  %v2425_v9 = vunpack.c.h.bf16 %v2468_v3 }
  0xca   :  { %v776_v18 = vpop.permute.xlu0 %775  ;;  %v854_v19 = vmul.f32 %v2437_v10, %v781_v17  ;;  %1977 = vperm.xlu1 %2475, %v1763_v12   ;;  %v2424_v10 = vunpack.c.l.bf16 %v2468_v3  ;;  %v1774_v12 = vld [vmem:[%s3491_s3 + $0x180] sm:$0xff] }
  0xcb   :  { %v853_v20 = vmul.f32 %v2436_v11, %v776_v18  ;;  %1972 = vperm.xlu0 %2474, %v1762_v14   ;;  %972 = vmatpush2.bf16.msra.mxu0 %v871_v16  ;;  %v1775_v11 = vld [vmem:[%s3491_s3 + $0x188] sm:$0xff]  ;;  %v2451_v14 = vld [vmem:[%s3489_s1 + $0x50] sm:$0xff]  }
  0xcc   :  { %973 = vmatprep.subr.bf16.mxu0 %v2477_v0 }
  0xcd   :  { %v887_v26 = vpack.c.bf16 %v854_v19, %v853_v20  ;;  %v611_v27 = vpop.permute.xlu1 %610  ;;  %v2357_v20 = vunpack.c.h.bf16 %v2451_v14 }
  0xce   :  { %v606_v28 = vpop.permute.xlu0 %605  ;;  %v820_v29 = vmul.f32 %v2369_v21, %v611_v27  ;;  %1987 = vperm.xlu1 %2475, %v1765_v23   ;;  %v2356_v21 = vunpack.c.l.bf16 %v2451_v14  ;;  %v1776_v23 = vld [vmem:[%s3491_s3 + $0x190] sm:$0xff] }
  0xcf   :  { %v819_v30 = vmul.f32 %v2368_v22, %v606_v28  ;;  %1982 = vperm.xlu0 %2474, %v1764_v24   ;;  %1261 = vmatpush2.bf16.msra.mxu1 %v887_v26  ;;  %v1777_v22 = vld [vmem:[%s3491_s3 + $0x198] sm:$0xff]  ;;  %v2467_v24 = vld [vmem:[%s3489_s1 + $0xd0] sm:$0xff]  }
  0xd0   :  { %1262 = vmatprep.subr.bf16.mxu1 %v2477_v0 }
  0xd1   :  { %v870_v36 = vpack.c.bf16 %v820_v29, %v819_v30  ;;  %v771_v37 = vpop.permute.xlu1 %770  ;;  %v2421_v30 = vunpack.c.h.bf16 %v2467_v24 }
  0xd2   :  { %v766_v38 = vpop.permute.xlu0 %765  ;;  %v852_v39 = vmul.f32 %v2433_v31, %v771_v37  ;;  %1997 = vperm.xlu1 %2475, %v1767_v33   ;;  %v2420_v31 = vunpack.c.l.bf16 %v2467_v24  ;;  %v1778_v33 = vld [vmem:[%s3491_s3 + $0x1a0] sm:$0xff] }
  0xd3   :  { %v851_v40 = vmul.f32 %v2432_v32, %v766_v38  ;;  %1992 = vperm.xlu0 %2474, %v1766_v34   ;;  %974 = vmatpush2.bf16.msra.mxu0 %v870_v36  ;;  %v1779_v32 = vld [vmem:[%s3491_s3 + $0x1a8] sm:$0xff] }
  0xd4   :  { %975 = vmatprep.subr.bf16.mxu0 %v2477_v0  ;;  %v2450_v34 = vld [vmem:[%s3489_s1 + $0x48] sm:$0xff]  }
  0xd5   :  { %v886_v46 = vpack.c.bf16 %v852_v39, %v851_v40  ;;  %v601_v47 = vpop.permute.xlu1 %600  ;;  %v2353_v40 = vunpack.c.h.bf16 %v2450_v34 }
  0xd6   :  { %v596_v48 = vpop.permute.xlu0 %595  ;;  %v818_v49 = vmul.f32 %v2365_v41, %v601_v47  ;;  %2007 = vperm.xlu1 %2475, %v1769_v43   ;;  %v2352_v41 = vunpack.c.l.bf16 %v2450_v34  ;;  %v1780_v43 = vld [vmem:[%s3491_s3 + $0x1b0] sm:$0xff] }
  0xd7   :  { %v817_v50 = vmul.f32 %v2364_v42, %v596_v48  ;;  %2002 = vperm.xlu0 %2474, %v1768_v44   ;;  %1263 = vmatpush2.bf16.msra.mxu1 %v886_v46  ;;  %v1781_v42 = vld [vmem:[%s3491_s3 + $0x1b8] sm:$0xff]  ;;  %v2466_v44 = vld [vmem:[%s3489_s1 + $0xc8] sm:$0xff]  }
  0xd8   :  { %1264 = vmatprep.subr.bf16.mxu1 %v2477_v0 }
  0xd9   :  { %v869_v56 = vpack.c.bf16 %v818_v49, %v817_v50  ;;  %v761_v57 = vpop.permute.xlu1 %760  ;;  %v2417_v50 = vunpack.c.h.bf16 %v2466_v44 }
  0xda   :  { %v756_v58 = vpop.permute.xlu0 %755  ;;  %v850_v59 = vmul.f32 %v2429_v51, %v761_v57  ;;  %2017 = vperm.xlu1 %2475, %v1771_v53   ;;  %v2416_v51 = vunpack.c.l.bf16 %v2466_v44  ;;  %v1782_v53 = vld [vmem:[%s3491_s3 + $0x1c0] sm:$0xff]  ;;  %v99_v44 = vld [vmem:[%s3490_s0 + $0x50] sm:$0xff] }
  0xdb   :  { %v849_v60 = vmul.f32 %v2428_v52, %v756_v58  ;;  %2012 = vperm.xlu0 %2474, %v1770_v54   ;;  %976 = vmatpush2.bf16.msra.mxu0 %v869_v56  ;;  %v1783_v52 = vld [vmem:[%s3491_s3 + $0x1c8] sm:$0xff]  ;;  %v2449_v54 = vld [vmem:[%s3489_s1 + $0x40] sm:$0xff]  }
  0xdc   :  { %977 = vmatprep.subr.bf16.mxu0 %v2477_v0 }
  0xdd   :  { %v885_v4 = vpack.c.bf16 %v850_v59, %v849_v60  ;;  %v591_v5 = vpop.permute.xlu1 %590  ;;  %v2349_v60 = vunpack.c.h.bf16 %v2449_v54 }
  0xde   :  { %v586_v6 = vpop.permute.xlu0 %585  ;;  %v816_v7 = vmul.f32 %v2361_v61, %v591_v5  ;;  %2027 = vperm.xlu1 %2475, %v1773_v63   ;;  %v2348_v61 = vunpack.c.l.bf16 %v2449_v54  ;;  %v1784_v63 = vld [vmem:[%s3491_s3 + $0x1d0] sm:$0xff] }
  0xdf   :  { %v815_v8 = vmul.f32 %v2360_v62, %v586_v6  ;;  %2022 = vperm.xlu0 %2474, %v1772_v2   ;;  %1265 = vmatpush2.bf16.msra.mxu1 %v885_v4  ;;  %v1785_v62 = vld [vmem:[%s3491_s3 + $0x1d8] sm:$0xff]  ;;  %v2465_v2 = vld [vmem:[%s3489_s1 + $0xc0] sm:$0xff]  }
  0xe0   :  { %1266 = vmatprep.subr.bf16.mxu1 %v2477_v0 }
  0xe1   :  { %v868_v15 = vpack.c.bf16 %v816_v7, %v815_v8  ;;  %v751_v16 = vpop.permute.xlu1 %750  ;;  %v2413_v8 = vunpack.c.h.bf16 %v2465_v2 }
  0xe2   :  { %v746_v17 = vpop.permute.xlu0 %745  ;;  %v848_v18 = vmul.f32 %v2425_v9, %v751_v16  ;;  %2037 = vperm.xlu1 %2475, %v1775_v11   ;;  %v2412_v9 = vunpack.c.l.bf16 %v2465_v2  ;;  %v1786_v11 = vld [vmem:[%s3491_s3 + $0x1e0] sm:$0xff] }
  0xe3   :  { %v847_v19 = vmul.f32 %v2424_v10, %v746_v17  ;;  %2032 = vperm.xlu0 %2474, %v1774_v12   ;;  %978 = vmatpush2.bf16.msra.mxu0 %v868_v15  ;;  %v1787_v10 = vld [vmem:[%s3491_s3 + $0x1e8] sm:$0xff]  ;;  %v89_v12 = vld [vmem:[%s3490_s0] sm:$0xff] }
  0xe4   :  { %979 = vmatprep.subr.bf16.mxu0 %v2477_v0 }
  0xe5   :  { %v884_v25 = vpack.c.bf16 %v848_v18, %v847_v19  ;;  %v581_v26 = vpop.permute.xlu1 %580  ;;  %v153_v19 = vunpack.c.l.s8.bf16 %v89_v12 }
  0xe6   :  { %v576_v27 = vpop.permute.xlu0 %575  ;;  %v814_v28 = vmul.f32 %v2357_v20, %v581_v26  ;;  %2047 = vperm.xlu1 %2475, %v1777_v22   ;;  %v1789_v20 = vld [vmem:[%s3491_s3 + $0x1f8] sm:$0xff]  ;;  %v94_v26 = vld [vmem:[%s3490_s0 + $0x28] sm:$0xff] }
  0xe7   :  { %v813_v29 = vmul.f32 %v2356_v21, %v576_v27  ;;  %2042 = vperm.xlu0 %2474, %v1776_v23   ;;  %1267 = vmatpush2.bf16.msra.mxu1 %v884_v25  ;;  %v91_v21 = vld [vmem:[%s3490_s0 + $0x10] sm:$0xff]  ;;  %v158_v23 = vunpack.c.h.s8.bf16 %v2704_v1  ;;  %v160_v25 = vunpack.c.h.s8.bf16 %v2722_v13  ;;  %v157_v27 = vunpack.c.h.s8.bf16 %v89_v12  ;;  %v93_v13 = vld [vmem:[%s3490_s0 + $0x20] sm:$0xff] }
  0xe8   :  { %1268 = vmatprep.subr.bf16.mxu1 %v2477_v0  ;;  %v155_v24 = vunpack.c.l.s8.bf16 %v91_v21  ;;  %v162_v1 = vunpack.c.l.s8.bf16 %v94_v26 }
  0xe9   :  { %v867_v35 = vpack.c.bf16 %v814_v28, %v813_v29  ;;  %v741_v36 = vpop.permute.xlu1 %740  ;;  %v96_v28 = vld [vmem:[%s3490_s0 + $0x38] sm:$0xff]  ;;  %v159_v29 = vunpack.c.h.s8.bf16 %v91_v21 }
  0xea   :  { %v736_v37 = vpop.permute.xlu0 %735  ;;  %v846_v38 = vmul.f32 %v2421_v30, %v741_v36  ;;  %2057 = vperm.xlu1 %2475, %v1779_v32   ;;  %v164_v30 = vunpack.c.l.s8.bf16 %v96_v28  ;;  %v95_v32 = vld [vmem:[%s3490_s0 + $0x30] sm:$0xff]  ;;  %v98_v36 = vld [vmem:[%s3490_s0 + $0x48] sm:$0xff] }
  0xeb   :  { %v845_v39 = vmul.f32 %v2420_v31, %v736_v37  ;;  %2052 = vperm.xlu0 %2474, %v1778_v33   ;;  %980 = vmatpush2.bf16.msra.mxu0 %v867_v35  ;;  %v161_v31 = vunpack.c.l.s8.bf16 %v93_v13  ;;  %v166_v33 = vunpack.c.h.s8.bf16 %v94_v26  ;;  %v163_v34 = vunpack.c.l.s8.bf16 %v95_v32 }
  0xec   :  { %981 = vmatprep.subr.bf16.mxu0 %v2477_v0  ;;  %v168_v35 = vunpack.c.h.s8.bf16 %v96_v28  ;;  %v165_v37 = vunpack.c.h.s8.bf16 %v93_v13 }
  0xed   :  { %v883_v45 = vpack.c.bf16 %v846_v38, %v845_v39  ;;  %v571_v46 = vpop.permute.xlu1 %570  ;;  %v170_v38 = vunpack.c.l.s8.bf16 %v98_v36  ;;  %v100_v39 = vld [vmem:[%s3490_s0 + $0x58] sm:$0xff] }
  0xee   :  { %v566_v47 = vpop.permute.xlu0 %565  ;;  %v812_v48 = vmul.f32 %v2353_v40, %v571_v46  ;;  %2067 = vperm.xlu1 %2475, %v1781_v42   ;;  %v167_v40 = vunpack.c.h.s8.bf16 %v95_v32  ;;  %v172_v42 = vunpack.c.l.s8.bf16 %v100_v39  ;;  %v171_v46 = vunpack.c.l.s8.bf16 %v99_v44  ;;  %v118_v32 = vld [vmem:[%s3490_s0 + $0xe8] sm:$0xff] }
  0xef   :  { %v811_v49 = vmul.f32 %v2352_v41, %v566_v47  ;;  %2062 = vperm.xlu0 %2474, %v1780_v43   ;;  %1269 = vmatpush2.bf16.msra.mxu1 %v883_v45  ;;  %v97_v41 = vld [vmem:[%s3490_s0 + $0x40] sm:$0xff]  ;;  %v174_v45 = vunpack.c.h.s8.bf16 %v98_v36  ;;  %v176_v47 = vunpack.c.h.s8.bf16 %v100_v39 }
  0xf0   :  { %1270 = vmatprep.subr.bf16.mxu1 %v2477_v0  ;;  %v169_v43 = vunpack.c.l.s8.bf16 %v97_v41 }
  0xf1   :  { %v866_v55 = vpack.c.bf16 %v812_v48, %v811_v49  ;;  %v731_v56 = vpop.permute.xlu1 %730  ;;  %v102_v48 = vld [vmem:[%s3490_s0 + $0x68] sm:$0xff]  ;;  %v173_v49 = vunpack.c.h.s8.bf16 %v97_v41  ;;  %v214_v41 = vunpack.c.h.s8.bf16 %v118_v32 }
  0xf2   :  { %v726_v57 = vpop.permute.xlu0 %725  ;;  %v844_v58 = vmul.f32 %v2417_v50, %v731_v56  ;;  %2077 = vperm.xlu1 %2475, %v1783_v52   ;;  %v178_v50 = vunpack.c.l.s8.bf16 %v102_v48  ;;  %v175_v52 = vunpack.c.h.s8.bf16 %v99_v44  ;;  %v103_v56 = vld [vmem:[%s3490_s0 + $0x70] sm:$0xff]  ;;  %v122_v44 = vld [vmem:[%s3490_s0 + $0x108] sm:$0xff] }
  0xf3   :  { %v843_v59 = vmul.f32 %v2416_v51, %v726_v57  ;;  %2072 = vperm.xlu0 %2474, %v1782_v53   ;;  %982 = vmatpush2.bf16.msra.mxu0 %v866_v55  ;;  %v104_v51 = vld [vmem:[%s3490_s0 + $0x78] sm:$0xff]  ;;  %v101_v53 = vld [vmem:[%s3490_s0 + $0x60] sm:$0xff]  ;;  %v182_v57 = vunpack.c.h.s8.bf16 %v102_v48  ;;  %v183_v2 = vunpack.c.h.s8.bf16 %v103_v56 }
  0xf4   :  { %983 = vmatprep.subr.bf16.mxu0 %v2477_v0  ;;  %v180_v54 = vunpack.c.l.s8.bf16 %v104_v51  ;;  %v177_v55 = vunpack.c.l.s8.bf16 %v101_v53 }
  0xf5   :  { %v882_v3 = vpack.c.bf16 %v844_v58, %v843_v59  ;;  %v561_v4 = vpop.permute.xlu1 %560  ;;  %v179_v58 = vunpack.c.l.s8.bf16 %v103_v56  ;;  %v184_v59 = vunpack.c.h.s8.bf16 %v104_v51  ;;  %v126_v56 = vld [vmem:[%s3490_s0 + $0x128] sm:$0xff] }
  0xf6   :  { %v556_v5 = vpop.permute.xlu0 %555  ;;  %v810_v6 = vmul.f32 %v2349_v60, %v561_v4  ;;  %2087 = vperm.xlu1 %2475, %v1785_v62   ;;  %v106_v60 = vld [vmem:[%s3490_s0 + $0x88] sm:$0xff] }
  0xf7   :  { %v809_v7 = vmul.f32 %v2348_v61, %v556_v5  ;;  %2082 = vperm.xlu0 %2474, %v1784_v63   ;;  %1271 = vmatpush2.bf16.msra.mxu1 %v882_v3  ;;  %v181_v61 = vunpack.c.h.s8.bf16 %v101_v53  ;;  %v186_v62 = vunpack.c.l.s8.bf16 %v106_v60  ;;  %v108_v63 = vld [vmem:[%s3490_s0 + $0x98] sm:$0xff]  ;;  %v105_v3 = vld [vmem:[%s3490_s0 + $0x80] sm:$0xff]  ;;  %v222_v53 = vunpack.c.h.s8.bf16 %v122_v44 }
  0xf8   :  { %1272 = vmatprep.subr.bf16.mxu1 %v2477_v0  ;;  %v1788_v0 = vld [vmem:[%s3491_s3 + $0x1f0] sm:$0xff]  ;;  %v188_v4 = vunpack.c.l.s8.bf16 %v108_v63  ;;  %v185_v5 = vunpack.c.l.s8.bf16 %v105_v3 }
  0xf9   :  { %v865_v14 = vpack.c.bf16 %v810_v6, %v809_v7  ;;  %v721_v15 = vpop.permute.xlu1 %720  ;;  %v107_v6 = vld [vmem:[%s3490_s0 + $0x90] sm:$0xff]  ;;  %v190_v7 = vunpack.c.h.s8.bf16 %v106_v60 }
  0xfa   :  { %v716_v16 = vpop.permute.xlu0 %715  ;;  %v842_v17 = vmul.f32 %v2413_v8, %v721_v15  ;;  %2097 = vperm.xlu1 %2475, %v1787_v10   ;;  %v187_v8 = vunpack.c.l.s8.bf16 %v107_v6  ;;  %v110_v10 = vld [vmem:[%s3490_s0 + $0xa8] sm:$0xff]  ;;  %v191_v15 = vunpack.c.h.s8.bf16 %v107_v6 }
  0xfb   :  { %v841_v18 = vmul.f32 %v2412_v9, %v716_v16  ;;  %2092 = vperm.xlu0 %2474, %v1786_v11   ;;  %984 = vmatpush2.bf16.msra.mxu0 %v865_v14  ;;  %v192_v9 = vunpack.c.h.s8.bf16 %v108_v63  ;;  %v189_v11 = vunpack.c.h.s8.bf16 %v105_v3  ;;  %v194_v12 = vunpack.c.l.s8.bf16 %v110_v10  ;;  %v112_v14 = vld [vmem:[%s3490_s0 + $0xb8] sm:$0xff]  ;;  %v109_v16 = vld [vmem:[%s3490_s0 + $0xa0] sm:$0xff]  ;;  %v130_v6 = vld [vmem:[%s3490_s0 + $0x148] sm:$0xff] }
  0xfc   :  { %v230_v3 = vunpack.c.h.s8.bf16 %v126_v56 }
  0xfd   :  { %v881_v22 = vpack.c.bf16 %v842_v17, %v841_v18  ;;  %v196_v17 = vunpack.c.l.s8.bf16 %v112_v14  ;;  %v193_v18 = vunpack.c.l.s8.bf16 %v109_v16 }
  0xfe   :  { %986 = vmatmul.mubr.bf16.vlgmr.msra.gmra.mxu0 %v153_v19  ;;  %2107 = vperm.xlu1 %2475, %v1789_v20   ;;  %v111_v19 = vld [vmem:[%s3490_s0 + $0xb0] sm:$0xff]  ;;  %v198_v20 = vunpack.c.h.s8.bf16 %v110_v10 }
  0xff   :  { %2102 = vperm.xlu0 %2474, %v1788_v0   ;;  %1273 = vmatpush2.bf16.msra.mxu1 %v881_v22  ;;  %v195_v21 = vunpack.c.l.s8.bf16 %v111_v19  ;;  %v200_v22 = vunpack.c.h.s8.bf16 %v112_v14  ;;  %v197_v0 = vunpack.c.h.s8.bf16 %v109_v16  ;;  %v199_v26 = vunpack.c.h.s8.bf16 %v111_v19  ;;  %v134_v19 = vld [vmem:[%s3490_s0 + $0x168] sm:$0xff] }
 0x100   :  { %993 = vmatprep.mubr.bf16.mxu0 %v158_v23  ;;  %v114_v23 = vld [vmem:[%s3490_s0 + $0xc8] sm:$0xff]  ;;  %v238_v16 = vunpack.c.h.s8.bf16 %v130_v6 }
 0x101   :  { %v206_v13 = vunpack.c.h.s8.bf16 %v114_v23 }
 0x102   :  { %1275 = vmatmul.mubr.bf16.vlgmr.msra.gmra.mxu1 %v155_v24  ;;  %v202_v24 = vunpack.c.l.s8.bf16 %v114_v23 }
 0x103   :  { %1282 = vmatprep.mubr.bf16.mxu1 %v160_v25  ;;  %v116_v25 = vld [vmem:[%s3490_s0 + $0xd8] sm:$0xff] }
 0x106   :  { %994 = vmatmul.mubr.bf16.gmra.mxu0 %v157_v27  ;;  %v113_v27 = vld [vmem:[%s3490_s0 + $0xc0] sm:$0xff] }
 0x107   :  { %1001 = vmatprep.mubr.bf16.mxu0 %v162_v1  ;;  %v204_v1 = vunpack.c.l.s8.bf16 %v116_v25  ;;  %v201_v28 = vunpack.c.l.s8.bf16 %v113_v27 }
 0x10a   :  { %1283 = vmatmul.mubr.bf16.gmra.mxu1 %v159_v29  ;;  %v115_v29 = vld [vmem:[%s3490_s0 + $0xd0] sm:$0xff] }
 0x10b   :  { %1290 = vmatprep.mubr.bf16.mxu1 %v164_v30  ;;  %v203_v30 = vunpack.c.l.s8.bf16 %v115_v29  ;;  %v207_v36 = vunpack.c.h.s8.bf16 %v115_v29  ;;  %v138_v29 = vld [vmem:[%s3490_s0 + $0x188] sm:$0xff] }
 0x10e   :  { %1002 = vmatmul.mubr.bf16.gmra.mxu0 %v161_v31  ;;  %v208_v31 = vunpack.c.h.s8.bf16 %v116_v25 }
 0x10f   :  { %1009 = vmatprep.mubr.bf16.mxu0 %v166_v33  ;;  %v205_v33 = vunpack.c.h.s8.bf16 %v113_v27  ;;  %v246_v27 = vunpack.c.h.s8.bf16 %v134_v19 }
 0x112   :  { %1291 = vmatmul.mubr.bf16.gmra.mxu1 %v163_v34  ;;  %v210_v34 = vunpack.c.l.s8.bf16 %v118_v32 }
 0x113   :  { %1298 = vmatprep.mubr.bf16.mxu1 %v168_v35  ;;  %v120_v35 = vld [vmem:[%s3490_s0 + $0xf8] sm:$0xff] }
 0x116   :  { %1010 = vmatmul.mubr.bf16.gmra.mxu0 %v165_v37  ;;  %v117_v37 = vld [vmem:[%s3490_s0 + $0xe0] sm:$0xff] }
 0x117   :  { %1017 = vmatprep.mubr.bf16.mxu0 %v170_v38  ;;  %v212_v38 = vunpack.c.l.s8.bf16 %v120_v35  ;;  %v209_v39 = vunpack.c.l.s8.bf16 %v117_v37 }
 0x11a   :  { %1299 = vmatmul.mubr.bf16.gmra.mxu1 %v167_v40  ;;  %v119_v40 = vld [vmem:[%s3490_s0 + $0xf0] sm:$0xff] }
 0x11b   :  { %1306 = vmatprep.mubr.bf16.mxu1 %v172_v42  ;;  %v211_v42 = vunpack.c.l.s8.bf16 %v119_v40  ;;  %v215_v48 = vunpack.c.h.s8.bf16 %v119_v40 }
 0x11e   :  { %1018 = vmatmul.mubr.bf16.gmra.mxu0 %v169_v43  ;;  %v216_v43 = vunpack.c.h.s8.bf16 %v120_v35 }
 0x11f   :  { %1025 = vmatprep.mubr.bf16.mxu0 %v174_v45  ;;  %v213_v45 = vunpack.c.h.s8.bf16 %v117_v37  ;;  %v254_v37 = vunpack.c.h.s8.bf16 %v138_v29 }
 0x122   :  { %1307 = vmatmul.mubr.bf16.gmra.mxu1 %v171_v46  ;;  %v218_v46 = vunpack.c.l.s8.bf16 %v122_v44 }
 0x123   :  { %1314 = vmatprep.mubr.bf16.mxu1 %v176_v47  ;;  %v124_v47 = vld [vmem:[%s3490_s0 + $0x118] sm:$0xff] }
 0x126   :  { %1026 = vmatmul.mubr.bf16.gmra.mxu0 %v173_v49  ;;  %v121_v49 = vld [vmem:[%s3490_s0 + $0x100] sm:$0xff] }
 0x127   :  { %1033 = vmatprep.mubr.bf16.mxu0 %v178_v50  ;;  %v220_v50 = vunpack.c.l.s8.bf16 %v124_v47  ;;  %v217_v51 = vunpack.c.l.s8.bf16 %v121_v49 }
 0x12a   :  { %1315 = vmatmul.mubr.bf16.gmra.mxu1 %v175_v52  ;;  %v123_v52 = vld [vmem:[%s3490_s0 + $0x110] sm:$0xff] }
 0x12b   :  { %1322 = vmatprep.mubr.bf16.mxu1 %v180_v54  ;;  %v219_v54 = vunpack.c.l.s8.bf16 %v123_v52  ;;  %v223_v60 = vunpack.c.h.s8.bf16 %v123_v52  ;;  %v144_v52 = vld [vmem:[%s3490_s0 + $0x1b8] sm:$0xff] }
 0x12e   :  { %1034 = vmatmul.mubr.bf16.gmra.mxu0 %v177_v55  ;;  %v224_v55 = vunpack.c.h.s8.bf16 %v124_v47 }
 0x12f   :  { %1041 = vmatprep.mubr.bf16.mxu0 %v182_v57  ;;  %v221_v57 = vunpack.c.h.s8.bf16 %v121_v49  ;;  %v3192_v49 = vld [vmem:[%s3492_s4] ss:$0 sm:$0xff] }
 0x132   :  { %1323 = vmatmul.mubr.bf16.gmra.mxu1 %v179_v58  ;;  %v226_v58 = vunpack.c.l.s8.bf16 %v126_v56 }
 0x133   :  { %1330 = vmatprep.mubr.bf16.mxu1 %v184_v59  ;;  %v128_v59 = vld [vmem:[%s3490_s0 + $0x138] sm:$0xff] }
 0x136   :  { %1042 = vmatmul.mubr.bf16.gmra.mxu0 %v181_v61  ;;  %v125_v61 = vld [vmem:[%s3490_s0 + $0x120] sm:$0xff] }
 0x137   :  { %1049 = vmatprep.mubr.bf16.mxu0 %v186_v62  ;;  %v228_v62 = vunpack.c.l.s8.bf16 %v128_v59  ;;  %v225_v63 = vunpack.c.l.s8.bf16 %v125_v61 }
 0x13a   :  { %1331 = vmatmul.mubr.bf16.gmra.mxu1 %v183_v2  ;;  %v127_v2 = vld [vmem:[%s3490_s0 + $0x130] sm:$0xff] }
 0x13b   :  { %1338 = vmatprep.mubr.bf16.mxu1 %v188_v4  ;;  %v227_v4 = vunpack.c.l.s8.bf16 %v127_v2  ;;  %v231_v10 = vunpack.c.h.s8.bf16 %v127_v2 }
 0x13e   :  { %1050 = vmatmul.mubr.bf16.gmra.mxu0 %v185_v5  ;;  %v232_v5 = vunpack.c.h.s8.bf16 %v128_v59 }
 0x13f   :  { %1057 = vmatprep.mubr.bf16.mxu0 %v190_v7  ;;  %v229_v7 = vunpack.c.h.s8.bf16 %v125_v61  ;;  %v260_v61 = vunpack.c.l.s8.bf16 %v144_v52 }
 0x142   :  { %1339 = vmatmul.mubr.bf16.gmra.mxu1 %v187_v8  ;;  %v234_v8 = vunpack.c.l.s8.bf16 %v130_v6 }
 0x143   :  { %1346 = vmatprep.mubr.bf16.mxu1 %v192_v9  ;;  %v132_v9 = vld [vmem:[%s3490_s0 + $0x158] sm:$0xff] }
 0x146   :  { %1058 = vmatmul.mubr.bf16.gmra.mxu0 %v189_v11  ;;  %v129_v11 = vld [vmem:[%s3490_s0 + $0x140] sm:$0xff] }
 0x147   :  { %1065 = vmatprep.mubr.bf16.mxu0 %v194_v12  ;;  %v236_v12 = vunpack.c.l.s8.bf16 %v132_v9  ;;  %v233_v14 = vunpack.c.l.s8.bf16 %v129_v11 }
 0x14a   :  { %1347 = vmatmul.mubr.bf16.gmra.mxu1 %v191_v15  ;;  %v131_v15 = vld [vmem:[%s3490_s0 + $0x150] sm:$0xff] }
 0x14b   :  { %1354 = vmatprep.mubr.bf16.mxu1 %v196_v17  ;;  %v235_v17 = vunpack.c.l.s8.bf16 %v131_v15  ;;  %v239_v23 = vunpack.c.h.s8.bf16 %v131_v15 }
 0x14e   :  { %1066 = vmatmul.mubr.bf16.gmra.mxu0 %v193_v18  ;;  %v240_v18 = vunpack.c.h.s8.bf16 %v132_v9  ;;  %v143_v9 = vld [vmem:[%s3490_s0 + $0x1b0] sm:$0xff] }
 0x14f   :  { %1073 = vmatprep.mubr.bf16.mxu0 %v198_v20  ;;  %v237_v20 = vunpack.c.h.s8.bf16 %v129_v11 }
 0x152   :  { %1355 = vmatmul.mubr.bf16.gmra.mxu1 %v195_v21  ;;  %v242_v21 = vunpack.c.l.s8.bf16 %v134_v19 }
 0x153   :  { %1362 = vmatprep.mubr.bf16.mxu1 %v200_v22  ;;  %v136_v22 = vld [vmem:[%s3490_s0 + $0x178] sm:$0xff] }
 0x156   :  { %1074 = vmatmul.mubr.bf16.gmra.mxu0 %v197_v0  ;;  %v133_v0 = vld [vmem:[%s3490_s0 + $0x160] sm:$0xff] }
 0x157   :  { %1081 = vmatprep.mubr.bf16.mxu0 %v202_v24  ;;  %v244_v24 = vunpack.c.l.s8.bf16 %v136_v22  ;;  %v241_v25 = vunpack.c.l.s8.bf16 %v133_v0 }
 0x15a   :  { %1363 = vmatmul.mubr.bf16.gmra.mxu1 %v199_v26  ;;  %v135_v26 = vld [vmem:[%s3490_s0 + $0x170] sm:$0xff] }
 0x15b   :  { %1370 = vmatprep.mubr.bf16.mxu1 %v204_v1  ;;  %v243_v1 = vunpack.c.l.s8.bf16 %v135_v26  ;;  %v247_v32 = vunpack.c.h.s8.bf16 %v135_v26 }
 0x15e   :  { %1082 = vmatmul.mubr.bf16.gmra.mxu0 %v201_v28  ;;  %v248_v28 = vunpack.c.h.s8.bf16 %v136_v22 }
 0x15f   :  { %1089 = vmatprep.mubr.bf16.mxu0 %v206_v13  ;;  %v245_v13 = vunpack.c.h.s8.bf16 %v133_v0  ;;  %v146_v0 = vld [vmem:[%s3490_s0 + $0x1c8] sm:$0xff] }
 0x162   :  { %1371 = vmatmul.mubr.bf16.gmra.mxu1 %v203_v30  ;;  %v250_v30 = vunpack.c.l.s8.bf16 %v138_v29 }
 0x163   :  { %1378 = vmatprep.mubr.bf16.mxu1 %v208_v31  ;;  %v140_v31 = vld [vmem:[%s3490_s0 + $0x198] sm:$0xff] }
 0x164   :  { %v256_v40 = vunpack.c.h.s8.bf16 %v140_v31 }
 0x166   :  { %1090 = vmatmul.mubr.bf16.gmra.mxu0 %v205_v33  ;;  %v137_v33 = vld [vmem:[%s3490_s0 + $0x180] sm:$0xff] }
 0x167   :  { %1097 = vmatprep.mubr.bf16.mxu0 %v210_v34  ;;  %v252_v34 = vunpack.c.l.s8.bf16 %v140_v31  ;;  %v249_v35 = vunpack.c.l.s8.bf16 %v137_v33 }
 0x16a   :  { %1379 = vmatmul.mubr.bf16.gmra.mxu1 %v207_v36  ;;  %v139_v36 = vld [vmem:[%s3490_s0 + $0x190] sm:$0xff] }
 0x16b   :  { %1386 = vmatprep.mubr.bf16.mxu1 %v212_v38  ;;  %v255_v56 = vunpack.c.h.s8.bf16 %v139_v36 }
 0x16e   :  { %1098 = vmatmul.mubr.bf16.gmra.mxu0 %v209_v39  ;;  %v251_v39 = vunpack.c.l.s8.bf16 %v139_v36  ;;  %v263_v36 = vunpack.c.h.s8.bf16 %v143_v9 }
 0x16f   :  { %1105 = vmatprep.mubr.bf16.mxu0 %v214_v41 }
 0x172   :  { %1387 = vmatmul.mubr.bf16.gmra.mxu1 %v211_v42  ;;  %v142_v42 = vld [vmem:[%s3490_s0 + $0x1a8] sm:$0xff] }
 0x173   :  { %1394 = vmatprep.mubr.bf16.mxu1 %v216_v43 }
 0x176   :  { %1106 = vmatmul.mubr.bf16.gmra.mxu0 %v213_v45  ;;  %v253_v45 = vunpack.c.h.s8.bf16 %v137_v33 }
 0x177   :  { %1113 = vmatprep.mubr.bf16.mxu0 %v218_v46  ;;  %v1793_v46 = vpop.permute.xlu0 %1792 }
 0x17a   :  { %1395 = vmatmul.mubr.bf16.gmra.mxu1 %v215_v48  ;;  %v258_v48 = vunpack.c.l.s8.bf16 %v142_v42 }
 0x17b   :  { %1402 = vmatprep.mubr.bf16.mxu1 %v220_v50  ;;  %v1803_v6 = vpop.permute.xlu0 %1802 }
 0x17e   :  { %1114 = vmatmul.mubr.bf16.gmra.mxu0 %v217_v51 }
 0x17f   :  { %1121 = vmatprep.mubr.bf16.mxu0 %v222_v53 }
 0x182   :  { %1403 = vmatmul.mubr.bf16.gmra.mxu1 %v219_v54 }
 0x183   :  { %1410 = vmatprep.mubr.bf16.mxu1 %v224_v55 }
 0x186   :  { %1122 = vmatmul.mubr.bf16.gmra.mxu0 %v221_v57  ;;  %v1798_v57 = vpop.permute.xlu1 %1797 }
 0x187   :  { %1129 = vmatprep.mubr.bf16.mxu0 %v226_v58 }
 0x18a   :  { %1411 = vmatmul.mubr.bf16.gmra.mxu1 %v223_v60  ;;  %v141_v60 = vld [vmem:[%s3490_s0 + $0x1a0] sm:$0xff] }
 0x18b   :  { %1418 = vmatprep.mubr.bf16.mxu1 %v228_v62 }
 0x18e   :  { %1130 = vmatmul.mubr.bf16.gmra.mxu0 %v225_v63 }
 0x18f   :  { %1137 = vmatprep.mubr.bf16.mxu0 %v230_v3 }
 0x192   :  { %1419 = vmatmul.mubr.bf16.gmra.mxu1 %v227_v4 }
 0x193   :  { %1426 = vmatprep.mubr.bf16.mxu1 %v232_v5  ;;  %v257_v5 = vunpack.c.l.s8.bf16 %v141_v60 }
 0x196   :  { %1138 = vmatmul.mubr.bf16.gmra.mxu0 %v229_v7 }
 0x197   :  { %1145 = vmatprep.mubr.bf16.mxu0 %v234_v8 }
 0x19a   :  { %1427 = vmatmul.mubr.bf16.gmra.mxu1 %v231_v10  ;;  %v262_v10 = vunpack.c.h.s8.bf16 %v142_v42 }
 0x19b   :  { %1434 = vmatprep.mubr.bf16.mxu1 %v236_v12 }
 0x19e   :  { %1146 = vmatmul.mubr.bf16.gmra.mxu0 %v233_v14 }
 0x19f   :  { %1153 = vmatprep.mubr.bf16.mxu0 %v238_v16 }
 0x1a2   :  { %1435 = vmatmul.mubr.bf16.gmra.mxu1 %v235_v17  ;;  %v259_v17 = vunpack.c.l.s8.bf16 %v143_v9 }
 0x1a3   :  { %1442 = vmatprep.mubr.bf16.mxu1 %v240_v18  ;;  %v1808_v18 = vpop.permute.xlu1 %1807 }
 0x1a6   :  { %1154 = vmatmul.mubr.bf16.gmra.mxu0 %v237_v20 }
 0x1a7   :  { %1161 = vmatprep.mubr.bf16.mxu0 %v242_v21  ;;  %v264_v21 = vunpack.c.h.s8.bf16 %v144_v52  ;;  %v147_v52 = vld [vmem:[%s3490_s0 + $0x1d0] sm:$0xff] }
 0x1aa   :  { %1443 = vmatmul.mubr.bf16.gmra.mxu1 %v239_v23 }
 0x1ab   :  { %1450 = vmatprep.mubr.bf16.mxu1 %v244_v24 }
 0x1ae   :  { %1162 = vmatmul.mubr.bf16.gmra.mxu0 %v241_v25 }
 0x1af   :  { %1169 = vmatprep.mubr.bf16.mxu0 %v246_v27  ;;  %v261_v27 = vunpack.c.h.s8.bf16 %v141_v60 }
 0x1b2   :  { %1451 = vmatmul.mubr.bf16.gmra.mxu1 %v243_v1  ;;  %v1813_v1 = vpop.permute.xlu0 %1812 }
 0x1b3   :  { %1458 = vmatprep.mubr.bf16.mxu1 %v248_v28 }
 0x1b6   :  { %1170 = vmatmul.mubr.bf16.gmra.mxu0 %v245_v13  ;;  %v266_v13 = vunpack.c.l.s8.bf16 %v146_v0 }
 0x1b7   :  { %1177 = vmatprep.mubr.bf16.mxu0 %v250_v30 }
 0x1ba   :  { %1459 = vmatmul.mubr.bf16.gmra.mxu1 %v247_v32  ;;  %v148_v32 = vld [vmem:[%s3490_s0 + $0x1d8] sm:$0xff] }
 0x1bb   :  { %1466 = vmatprep.mubr.bf16.mxu1 %v252_v34 }
 0x1be   :  { %v987_v38 = vpop.f32.mrf.mxu0  ;;  %1178 = vmatmul.mubr.bf16.gmra.mxu0 %v249_v35 }
 0x1bf   :  { %1185 = vmatprep.mubr.bf16.mxu0 %v254_v37  ;;  %v1818_v37 = vpop.permute.xlu1 %1817 }
 0x1c0   :  { %v989_v41 = vpop.f32.mrf.mxu0 }
 0x1c1   :  { %v268_v41 = vunpack.c.l.s8.bf16 %v148_v32 }
 0x1c2   :  { %v990_v43 = vpop.f32.mrf.mxu0  ;;  %v1276_v44 = vpop.f32.mrf.mxu1  ;;  %1467 = vmatmul.mubr.bf16.gmra.mxu1 %v251_v39 }
 0x1c3   :  { %v1277_v47 = vadd.f32 %v1276_v44, %v987_v38  ;;  %1474 = vmatprep.mubr.bf16.mxu1 %v256_v40  ;;  %v145_v40 = vld [vmem:[%s3490_s0 + $0x1c0] sm:$0xff]  ;;  %v1828_v60 = vpop.permute.xlu1 %1827 }
 0x1c4   :  { %v992_v50 = vpop.f32.mrf.mxu0  ;;  %v1278_v51 = vpop.f32.mrf.mxu1 }
 0x1c5   :  { %v2110_v53 = vmul.f32 %v1793_v46, %v1277_v47  ;;  %v265_v47 = vunpack.c.l.s8.bf16 %v145_v40 }
 0x1c6   :  { %v995_v54 = vpop.f32.mrf.mxu0  ;;  %1186 = vmatmul.mubr.bf16.gmra.mxu0 %v253_v45  ;;  %v1279_v55 = vpop.f32.mrf.mxu1 }
 0x1c7   :  { %v2181_v58 = vadd.f32 %v3192_v49, %v2110_v53  ;;  %v1280_v59 = vadd.f32 %v1279_v55, %v990_v43  ;;  %1193 = vmatprep.mubr.bf16.mxu0 %v258_v48  ;;  %v1823_v48 = vpop.permute.xlu0 %1822  ;;  %v270_v53 = vunpack.c.h.s8.bf16 %v146_v0  ;;  %v149_v0 = vld [vmem:[%s3490_s0 + $0x1e0] sm:$0xff] }
 0x1c8   :  { %v997_v62 = vpop.f32.mrf.mxu0  ;;  %v1281_v63 = vpop.f32.mrf.mxu1 }
 0x1c9   :  { %2245 = vst [vmem:[%s3493_s5] sm:$0xff] %v2181_v58  ;;  %v2111_v2 = vmul.f32 %v1798_v57, %v1280_v59  ;;  %v267_v59 = vunpack.c.l.s8.bf16 %v147_v52  ;;  %v272_v63 = vunpack.c.h.s8.bf16 %v148_v32  ;;  %v151_v32 = vld [vmem:[%s3490_s0 + $0x1f0] sm:$0xff] }
 0x1ca   :  { %v998_v3 = vpop.f32.mrf.mxu0  ;;  %v1284_v4 = vpop.f32.mrf.mxu1  ;;  %1475 = vmatmul.mubr.bf16.gmra.mxu1 %v255_v56 }
 0x1cb   :  { %v2182_v7 = vadd.f32 %v3192_v49, %v2111_v2  ;;  %v1285_v8 = vadd.f32 %v1284_v4, %v995_v54  ;;  %1482 = vmatprep.mubr.bf16.mxu1 %v260_v61  ;;  %v150_v4 = vld [vmem:[%s3490_s0 + $0x1e8] sm:$0xff]  ;;  %v1833_v9 = vpop.permute.xlu0 %1832 }
 0x1cc   :  { %v1000_v11 = vpop.f32.mrf.mxu0  ;;  %v1286_v12 = vpop.f32.mrf.mxu1 }
 0x1cd   :  { %2246 = vst [vmem:[%s3493_s5 + $0x8] sm:$0xff] %v2182_v7  ;;  %v2112_v14 = vmul.f32 %v1803_v6, %v1285_v8  ;;  %v269_v8 = vunpack.c.h.s8.bf16 %v145_v40  ;;  %v274_v12 = vunpack.c.l.s8.bf16 %v150_v4 }
 0x1ce   :  { %v1003_v15 = vpop.f32.mrf.mxu0  ;;  %1194 = vmatmul.mubr.bf16.gmra.mxu0 %v257_v5  ;;  %v1287_v16 = vpop.f32.mrf.mxu1 }
 0x1cf   :  { %v2183_v19 = vadd.f32 %v3192_v49, %v2112_v14  ;;  %v1288_v20 = vadd.f32 %v1287_v16, %v998_v3  ;;  %1201 = vmatprep.mubr.bf16.mxu0 %v262_v10  ;;  %v152_v16 = vld [vmem:[%s3490_s0 + $0x1f8] sm:$0xff] }
 0x1d0   :  { %v1005_v22 = vpop.f32.mrf.mxu0  ;;  %v1289_v23 = vpop.f32.mrf.mxu1 }
 0x1d1   :  { %2247 = vst [vmem:[%s3493_s5 + $0x10] sm:$0xff] %v2183_v19  ;;  %v2113_v24 = vmul.f32 %v1808_v18, %v1288_v20  ;;  %v271_v20 = vunpack.c.h.s8.bf16 %v147_v52 }
 0x1d2   :  { %v1006_v25 = vpop.f32.mrf.mxu0  ;;  %v1292_v26 = vpop.f32.mrf.mxu1  ;;  %1483 = vmatmul.mubr.bf16.gmra.mxu1 %v259_v17 }
 0x1d3   :  { %v2184_v28 = vadd.f32 %v3192_v49, %v2113_v24  ;;  %v1293_v29 = vadd.f32 %v1292_v26, %v1003_v15  ;;  %1490 = vmatprep.mubr.bf16.mxu1 %v264_v21  ;;  %v1838_v21 = vpop.permute.xlu1 %1837  ;;  %v276_v24 = vunpack.c.l.s8.bf16 %v152_v16 }
 0x1d4   :  { %v1008_v30 = vpop.f32.mrf.mxu0  ;;  %v1294_v31 = vpop.f32.mrf.mxu1 }
 0x1d5   :  { %2248 = vst [vmem:[%s3493_s5 + $0x18] sm:$0xff] %v2184_v28  ;;  %v2114_v33 = vmul.f32 %v1813_v1, %v1293_v29  ;;  %v273_v29 = vunpack.c.l.s8.bf16 %v149_v0 }
 0x1d6   :  { %v1011_v34 = vpop.f32.mrf.mxu0  ;;  %1202 = vmatmul.mubr.bf16.gmra.mxu0 %v261_v27  ;;  %v1295_v35 = vpop.f32.mrf.mxu1 }
 0x1d7   :  { %v2185_v38 = vadd.f32 %v3192_v49, %v2114_v33  ;;  %v1296_v39 = vadd.f32 %v1295_v35, %v1006_v25  ;;  %1209 = vmatprep.mubr.bf16.mxu0 %v266_v13  ;;  %v1843_v13 = vpop.permute.xlu0 %1842  ;;  %v278_v33 = vunpack.c.h.s8.bf16 %v150_v4  ;;  %v1848_v40 = vpop.permute.xlu1 %1847 }
 0x1d8   :  { %v1013_v42 = vpop.f32.mrf.mxu0  ;;  %v1297_v43 = vpop.f32.mrf.mxu1 }
 0x1d9   :  { %2249 = vst [vmem:[%s3493_s5 + $0x20] sm:$0xff] %v2185_v38  ;;  %v2115_v44 = vmul.f32 %v1818_v37, %v1296_v39  ;;  %v275_v39 = vunpack.c.l.s8.bf16 %v151_v32  ;;  %v280_v43 = vunpack.c.h.s8.bf16 %v152_v16 }
 0x1da   :  { %v1014_v45 = vpop.f32.mrf.mxu0  ;;  %v1300_v46 = vpop.f32.mrf.mxu1  ;;  %1491 = vmatmul.mubr.bf16.gmra.mxu1 %v263_v36 }
 0x1db   :  { %v2186_v50 = vadd.f32 %v3192_v49, %v2115_v44  ;;  %v1301_v51 = vadd.f32 %v1300_v46, %v1011_v34  ;;  %1498 = vmatprep.mubr.bf16.mxu1 %v268_v41 }
 0x1dc   :  { %v1016_v54 = vpop.f32.mrf.mxu0  ;;  %v1302_v55 = vpop.f32.mrf.mxu1 }
 0x1dd   :  { %2250 = vst [vmem:[%s3493_s5 + $0x28] sm:$0xff] %v2186_v50  ;;  %v2116_v56 = vmul.f32 %v1823_v48, %v1301_v51  ;;  %v277_v50 = vunpack.c.h.s8.bf16 %v149_v0  ;;  %v1853_v51 = vpop.permute.xlu0 %1852 }
 0x1de   :  { %v1019_v57 = vpop.f32.mrf.mxu0  ;;  %1210 = vmatmul.mubr.bf16.gmra.mxu0 %v265_v47  ;;  %v1303_v58 = vpop.f32.mrf.mxu1 }
 0x1df   :  { %v2187_v61 = vadd.f32 %v3192_v49, %v2116_v56  ;;  %v1304_v62 = vadd.f32 %v1303_v58, %v1014_v45  ;;  %1217 = vmatprep.mubr.bf16.mxu0 %v270_v53 }
 0x1e0   :  { %v1021_v2 = vpop.f32.mrf.mxu0  ;;  %v1305_v3 = vpop.f32.mrf.mxu1 }
 0x1e1   :  { %2251 = vst [vmem:[%s3493_s5 + $0x30] sm:$0xff] %v2187_v61  ;;  %v2117_v5 = vmul.f32 %v1828_v60, %v1304_v62  ;;  %v1858_v60 = vpop.permute.xlu1 %1857 }
 0x1e2   :  { %v1022_v6 = vpop.f32.mrf.mxu0  ;;  %v1308_v7 = vpop.f32.mrf.mxu1  ;;  %1499 = vmatmul.mubr.bf16.gmra.mxu1 %v267_v59  ;;  %v279_v59 = vunpack.c.h.s8.bf16 %v151_v32 }
 0x1e3   :  { %v2188_v10 = vadd.f32 %v3192_v49, %v2117_v5  ;;  %v1309_v11 = vadd.f32 %v1308_v7, %v1019_v57  ;;  %1506 = vmatprep.mubr.bf16.mxu1 %v272_v63 }
 0x1e4   :  { %v1024_v14 = vpop.f32.mrf.mxu0  ;;  %v1310_v15 = vpop.f32.mrf.mxu1 }
 0x1e5   :  { %2252 = vst [vmem:[%s3493_s5 + $0x38] sm:$0xff] %v2188_v10  ;;  %v2118_v17 = vmul.f32 %v1833_v9, %v1309_v11  ;;  %v1868_v15 = vpop.permute.xlu1 %1867 }
 0x1e6   :  { %v1027_v18 = vpop.f32.mrf.mxu0  ;;  %1218 = vmatmul.mubr.bf16.gmra.mxu0 %v269_v8  ;;  %v1311_v19 = vpop.f32.mrf.mxu1 }
 0x1e7   :  { %v2189_v22 = vadd.f32 %v3192_v49, %v2118_v17  ;;  %v1312_v23 = vadd.f32 %v1311_v19, %v1022_v6  ;;  %1225 = vmatprep.mubr.bf16.mxu0 %v274_v12  ;;  %v1863_v6 = vpop.permute.xlu0 %1862 }
 0x1e8   :  { %v1029_v25 = vpop.f32.mrf.mxu0  ;;  %v1313_v26 = vpop.f32.mrf.mxu1 }
 0x1e9   :  { %2253 = vst [vmem:[%s3493_s5 + $0x40] sm:$0xff] %v2189_v22  ;;  %v2119_v27 = vmul.f32 %v1838_v21, %v1312_v23 }
 0x1ea   :  { %v1030_v1 = vpop.f32.mrf.mxu0  ;;  %v1316_v28 = vpop.f32.mrf.mxu1  ;;  %1507 = vmatmul.mubr.bf16.gmra.mxu1 %v271_v20 }
 0x1eb   :  { %v2190_v30 = vadd.f32 %v3192_v49, %v2119_v27  ;;  %v1317_v31 = vadd.f32 %v1316_v28, %v1027_v18  ;;  %1514 = vmatprep.mubr.bf16.mxu1 %v276_v24  ;;  %v1873_v23 = vpop.permute.xlu0 %1872 }
 0x1ec   :  { %v1032_v34 = vpop.f32.mrf.mxu0  ;;  %v1318_v35 = vpop.f32.mrf.mxu1 }
 0x1ed   :  { %2254 = vst [vmem:[%s3493_s5 + $0x48] sm:$0xff] %v2190_v30  ;;  %v2120_v36 = vmul.f32 %v1843_v13, %v1317_v31 }
 0x1ee   :  { %v1035_v37 = vpop.f32.mrf.mxu0  ;;  %1226 = vmatmul.mubr.bf16.gmra.mxu0 %v273_v29  ;;  %v1319_v38 = vpop.f32.mrf.mxu1 }
 0x1ef   :  { %v2191_v41 = vadd.f32 %v3192_v49, %v2120_v36  ;;  %v1320_v42 = vadd.f32 %v1319_v38, %v1030_v1  ;;  %1233 = vmatprep.mubr.bf16.mxu0 %v278_v33  ;;  %v1878_v29 = vpop.permute.xlu1 %1877  ;;  %v1883_v36 = vpop.permute.xlu0 %1882 }
 0x1f0   :  { %v1037_v44 = vpop.f32.mrf.mxu0  ;;  %v1321_v45 = vpop.f32.mrf.mxu1 }
 0x1f1   :  { %2255 = vst [vmem:[%s3493_s5 + $0x50] sm:$0xff] %v2191_v41  ;;  %v2121_v46 = vmul.f32 %v1848_v40, %v1320_v42 }
 0x1f2   :  { %v1038_v47 = vpop.f32.mrf.mxu0  ;;  %v1324_v48 = vpop.f32.mrf.mxu1  ;;  %1515 = vmatmul.mubr.bf16.gmra.mxu1 %v275_v39 }
 0x1f3   :  { %v2192_v52 = vadd.f32 %v3192_v49, %v2121_v46  ;;  %v1325_v53 = vadd.f32 %v1324_v48, %v1035_v37  ;;  %1522 = vmatprep.mubr.bf16.mxu1 %v280_v43  ;;  %v1888_v44 = vpop.permute.xlu1 %1887 }
 0x1f4   :  { %v1040_v54 = vpop.f32.mrf.mxu0  ;;  %v1326_v55 = vpop.f32.mrf.mxu1 }
 0x1f5   :  { %2256 = vst [vmem:[%s3493_s5 + $0x58] sm:$0xff] %v2192_v52  ;;  %v2122_v56 = vmul.f32 %v1853_v51, %v1325_v53  ;;  %v1893_v53 = vpop.permute.xlu0 %1892 }
 0x1f6   :  { %v1043_v57 = vpop.f32.mrf.mxu0  ;;  %1234 = vmatmul.mubr.bf16.gmra.mxu0 %v277_v50  ;;  %v1327_v58 = vpop.f32.mrf.mxu1 }
 0x1f7   :  { %v2193_v61 = vadd.f32 %v3192_v49, %v2122_v56  ;;  %v1328_v62 = vadd.f32 %v1327_v58, %v1038_v47 }
 0x1f8   :  { %v1045_v63 = vpop.f32.mrf.mxu0  ;;  %v1329_v2 = vpop.f32.mrf.mxu1 }
 0x1f9   :  { %2257 = vst [vmem:[%s3493_s5 + $0x60] sm:$0xff] %v2193_v61  ;;  %v2123_v3 = vmul.f32 %v1858_v60, %v1328_v62  ;;  %v1898_v61 = vpop.permute.xlu1 %1897 }
 0x1fa   :  { %v1046_v4 = vpop.f32.mrf.mxu0  ;;  %v1332_v5 = vpop.f32.mrf.mxu1  ;;  %1523 = vmatmul.mubr.bf16.gmra.mxu1 %v279_v59 }
 0x1fb   :  { %v2194_v7 = vadd.f32 %v3192_v49, %v2123_v3  ;;  %v1333_v8 = vadd.f32 %v1332_v5, %v1043_v57 }
 0x1fc   :  { %v1048_v9 = vpop.f32.mrf.mxu0  ;;  %v1334_v10 = vpop.f32.mrf.mxu1 }
 0x1fd   :  { %2258 = vst [vmem:[%s3493_s5 + $0x68] sm:$0xff] %v2194_v7  ;;  %v2124_v11 = vmul.f32 %v1863_v6, %v1333_v8  ;;  %v1903_v7 = vpop.permute.xlu0 %1902 }
 0x1fe   :  { %v1051_v12 = vpop.f32.mrf.mxu0  ;;  %v1335_v14 = vpop.f32.mrf.mxu1 }
 0x1ff   :  { %v2195_v16 = vadd.f32 %v3192_v49, %v2124_v11  ;;  %v1336_v17 = vadd.f32 %v1335_v14, %v1046_v4 }
 0x200   :  { %v1053_v18 = vpop.f32.mrf.mxu0  ;;  %v1337_v19 = vpop.f32.mrf.mxu1 }
 0x201   :  { %2259 = vst [vmem:[%s3493_s5 + $0x70] sm:$0xff] %v2195_v16  ;;  %v2125_v20 = vmul.f32 %v1868_v15, %v1336_v17  ;;  %v1908_v16 = vpop.permute.xlu1 %1907 }
 0x202   :  { %v1054_v21 = vpop.f32.mrf.mxu0  ;;  %v1340_v22 = vpop.f32.mrf.mxu1 }
 0x203   :  { %v2196_v0 = vadd.f32 %v3192_v49, %v2125_v20  ;;  %v1341_v24 = vadd.f32 %v1340_v22, %v1051_v12 }
 0x204   :  { %v1056_v25 = vpop.f32.mrf.mxu0  ;;  %v1342_v26 = vpop.f32.mrf.mxu1 }
 0x205   :  { %2260 = vst [vmem:[%s3493_s5 + $0x78] sm:$0xff] %v2196_v0  ;;  %v2126_v27 = vmul.f32 %v1873_v23, %v1341_v24  ;;  %v1913_v0 = vpop.permute.xlu0 %1912 }
 0x206   :  { %v1059_v1 = vpop.f32.mrf.mxu0  ;;  %v1343_v28 = vpop.f32.mrf.mxu1 }
 0x207   :  { %v2197_v13 = vadd.f32 %v3192_v49, %v2126_v27  ;;  %v1344_v30 = vadd.f32 %v1343_v28, %v1054_v21 }
 0x208   :  { %v1061_v31 = vpop.f32.mrf.mxu0  ;;  %v1345_v32 = vpop.f32.mrf.mxu1 }
 0x209   :  { %2261 = vst [vmem:[%s3493_s5 + $0x80] sm:$0xff] %v2197_v13  ;;  %v2127_v33 = vmul.f32 %v1878_v29, %v1344_v30  ;;  %v1918_v13 = vpop.permute.xlu1 %1917 }
 0x20a   :  { %v1062_v34 = vpop.f32.mrf.mxu0  ;;  %v1348_v35 = vpop.f32.mrf.mxu1 }
 0x20b   :  { %v2198_v37 = vadd.f32 %v3192_v49, %v2127_v33  ;;  %v1349_v38 = vadd.f32 %v1348_v35, %v1059_v1 }
 0x20c   :  { %v1064_v39 = vpop.f32.mrf.mxu0  ;;  %v1350_v40 = vpop.f32.mrf.mxu1 }
 0x20d   :  { %2262 = vst [vmem:[%s3493_s5 + $0x88] sm:$0xff] %v2198_v37  ;;  %v2128_v41 = vmul.f32 %v1883_v36, %v1349_v38  ;;  %v1923_v37 = vpop.permute.xlu0 %1922 }
 0x20e   :  { %v1067_v42 = vpop.f32.mrf.mxu0  ;;  %v1351_v43 = vpop.f32.mrf.mxu1 }
 0x20f   :  { %v2199_v45 = vadd.f32 %v3192_v49, %v2128_v41  ;;  %v1352_v46 = vadd.f32 %v1351_v43, %v1062_v34 }
 0x210   :  { %v1069_v47 = vpop.f32.mrf.mxu0  ;;  %v1353_v48 = vpop.f32.mrf.mxu1 }
 0x211   :  { %2263 = vst [vmem:[%s3493_s5 + $0x90] sm:$0xff] %v2199_v45  ;;  %v2129_v50 = vmul.f32 %v1888_v44, %v1352_v46  ;;  %v1928_v45 = vpop.permute.xlu1 %1927 }
 0x212   :  { %v1070_v51 = vpop.f32.mrf.mxu0  ;;  %v1356_v52 = vpop.f32.mrf.mxu1 }
 0x213   :  { %v2200_v54 = vadd.f32 %v3192_v49, %v2129_v50  ;;  %v1357_v55 = vadd.f32 %v1356_v52, %v1067_v42 }
 0x214   :  { %v1072_v56 = vpop.f32.mrf.mxu0  ;;  %v1358_v57 = vpop.f32.mrf.mxu1 }
 0x215   :  { %2264 = vst [vmem:[%s3493_s5 + $0x98] sm:$0xff] %v2200_v54  ;;  %v2130_v58 = vmul.f32 %v1893_v53, %v1357_v55  ;;  %v1933_v54 = vpop.permute.xlu0 %1932 }
 0x216   :  { %v1075_v59 = vpop.f32.mrf.mxu0  ;;  %v1359_v60 = vpop.f32.mrf.mxu1 }
 0x217   :  { %v2201_v62 = vadd.f32 %v3192_v49, %v2130_v58  ;;  %v1360_v63 = vadd.f32 %v1359_v60, %v1070_v51 }
 0x218   :  { %v1077_v2 = vpop.f32.mrf.mxu0  ;;  %v1361_v3 = vpop.f32.mrf.mxu1 }
 0x219   :  { %2265 = vst [vmem:[%s3493_s5 + $0xa0] sm:$0xff] %v2201_v62  ;;  %v2131_v4 = vmul.f32 %v1898_v61, %v1360_v63  ;;  %v1938_v62 = vpop.permute.xlu1 %1937 }
 0x21a   :  { %v1078_v5 = vpop.f32.mrf.mxu0  ;;  %v1364_v6 = vpop.f32.mrf.mxu1 }
 0x21b   :  { %v2202_v8 = vadd.f32 %v3192_v49, %v2131_v4  ;;  %v1365_v9 = vadd.f32 %v1364_v6, %v1075_v59 }
 0x21c   :  { %v1080_v10 = vpop.f32.mrf.mxu0  ;;  %v1366_v11 = vpop.f32.mrf.mxu1 }
 0x21d   :  { %2266 = vst [vmem:[%s3493_s5 + $0xa8] sm:$0xff] %v2202_v8  ;;  %v2132_v12 = vmul.f32 %v1903_v7, %v1365_v9  ;;  %v1943_v8 = vpop.permute.xlu0 %1942 }
 0x21e   :  { %v1083_v14 = vpop.f32.mrf.mxu0  ;;  %v1367_v15 = vpop.f32.mrf.mxu1 }
 0x21f   :  { %v2203_v17 = vadd.f32 %v3192_v49, %v2132_v12  ;;  %v1368_v18 = vadd.f32 %v1367_v15, %v1078_v5 }
 0x220   :  { %v1085_v19 = vpop.f32.mrf.mxu0  ;;  %v1369_v20 = vpop.f32.mrf.mxu1 }
 0x221   :  { %2267 = vst [vmem:[%s3493_s5 + $0xb0] sm:$0xff] %v2203_v17  ;;  %v2133_v21 = vmul.f32 %v1908_v16, %v1368_v18  ;;  %v1948_v17 = vpop.permute.xlu1 %1947 }
 0x222   :  { %v1086_v22 = vpop.f32.mrf.mxu0  ;;  %v1372_v23 = vpop.f32.mrf.mxu1 }
 0x223   :  { %v2204_v24 = vadd.f32 %v3192_v49, %v2133_v21  ;;  %v1373_v25 = vadd.f32 %v1372_v23, %v1083_v14 }
 0x224   :  { %v1088_v26 = vpop.f32.mrf.mxu0  ;;  %v1374_v27 = vpop.f32.mrf.mxu1 }
 0x225   :  { %2268 = vst [vmem:[%s3493_s5 + $0xb8] sm:$0xff] %v2204_v24  ;;  %v2134_v1 = vmul.f32 %v1913_v0, %v1373_v25  ;;  %v1953_v24 = vpop.permute.xlu0 %1952 }
 0x226   :  { %v1091_v28 = vpop.f32.mrf.mxu0  ;;  %v1375_v29 = vpop.f32.mrf.mxu1 }
 0x227   :  { %v2205_v30 = vadd.f32 %v3192_v49, %v2134_v1  ;;  %v1376_v31 = vadd.f32 %v1375_v29, %v1086_v22 }
 0x228   :  { %v1093_v32 = vpop.f32.mrf.mxu0  ;;  %v1377_v33 = vpop.f32.mrf.mxu1 }
 0x229   :  { %2269 = vst [vmem:[%s3493_s5 + $0xc0] sm:$0xff] %v2205_v30  ;;  %v2135_v34 = vmul.f32 %v1918_v13, %v1376_v31  ;;  %v1958_v30 = vpop.permute.xlu1 %1957 }
 0x22a   :  { %v1094_v35 = vpop.f32.mrf.mxu0  ;;  %v1380_v36 = vpop.f32.mrf.mxu1 }
 0x22b   :  { %v2206_v38 = vadd.f32 %v3192_v49, %v2135_v34  ;;  %v1381_v39 = vadd.f32 %v1380_v36, %v1091_v28 }
 0x22c   :  { %v1096_v40 = vpop.f32.mrf.mxu0  ;;  %v1382_v41 = vpop.f32.mrf.mxu1 }
 0x22d   :  { %2270 = vst [vmem:[%s3493_s5 + $0xc8] sm:$0xff] %v2206_v38  ;;  %v2136_v42 = vmul.f32 %v1923_v37, %v1381_v39  ;;  %v1963_v38 = vpop.permute.xlu0 %1962 }
 0x22e   :  { %v1099_v43 = vpop.f32.mrf.mxu0  ;;  %v1383_v44 = vpop.f32.mrf.mxu1 }
 0x22f   :  { %v2207_v46 = vadd.f32 %v3192_v49, %v2136_v42  ;;  %v1384_v47 = vadd.f32 %v1383_v44, %v1094_v35 }
 0x230   :  { %v1101_v48 = vpop.f32.mrf.mxu0  ;;  %v1385_v50 = vpop.f32.mrf.mxu1 }
 0x231   :  { %2271 = vst [vmem:[%s3493_s5 + $0xd0] sm:$0xff] %v2207_v46  ;;  %v2137_v51 = vmul.f32 %v1928_v45, %v1384_v47  ;;  %v1968_v46 = vpop.permute.xlu1 %1967 }
 0x232   :  { %v1102_v52 = vpop.f32.mrf.mxu0  ;;  %v1388_v53 = vpop.f32.mrf.mxu1 }
 0x233   :  { %v2208_v55 = vadd.f32 %v3192_v49, %v2137_v51  ;;  %v1389_v56 = vadd.f32 %v1388_v53, %v1099_v43 }
 0x234   :  { %v1104_v57 = vpop.f32.mrf.mxu0  ;;  %v1390_v58 = vpop.f32.mrf.mxu1 }
 0x235   :  { %2272 = vst [vmem:[%s3493_s5 + $0xd8] sm:$0xff] %v2208_v55  ;;  %v2138_v59 = vmul.f32 %v1933_v54, %v1389_v56  ;;  %v1973_v55 = vpop.permute.xlu0 %1972 }
 0x236   :  { %v1107_v60 = vpop.f32.mrf.mxu0  ;;  %v1391_v61 = vpop.f32.mrf.mxu1 }
 0x237   :  { %v2209_v63 = vadd.f32 %v3192_v49, %v2138_v59  ;;  %v1392_v2 = vadd.f32 %v1391_v61, %v1102_v52 }
 0x238   :  { %v1109_v3 = vpop.f32.mrf.mxu0  ;;  %v1393_v4 = vpop.f32.mrf.mxu1 }
 0x239   :  { %2273 = vst [vmem:[%s3493_s5 + $0xe0] sm:$0xff] %v2209_v63  ;;  %v2139_v5 = vmul.f32 %v1938_v62, %v1392_v2  ;;  %v1978_v63 = vpop.permute.xlu1 %1977 }
 0x23a   :  { %v1110_v6 = vpop.f32.mrf.mxu0  ;;  %v1396_v7 = vpop.f32.mrf.mxu1 }
 0x23b   :  { %v2210_v9 = vadd.f32 %v3192_v49, %v2139_v5  ;;  %v1397_v10 = vadd.f32 %v1396_v7, %v1107_v60 }
 0x23c   :  { %v1112_v11 = vpop.f32.mrf.mxu0  ;;  %v1398_v12 = vpop.f32.mrf.mxu1 }
 0x23d   :  { %2274 = vst [vmem:[%s3493_s5 + $0xe8] sm:$0xff] %v2210_v9  ;;  %v2140_v14 = vmul.f32 %v1943_v8, %v1397_v10  ;;  %v1983_v9 = vpop.permute.xlu0 %1982 }
 0x23e   :  { %v1115_v15 = vpop.f32.mrf.mxu0  ;;  %v1399_v16 = vpop.f32.mrf.mxu1 }
 0x23f   :  { %v2211_v18 = vadd.f32 %v3192_v49, %v2140_v14  ;;  %v1400_v19 = vadd.f32 %v1399_v16, %v1110_v6 }
 0x240   :  { %v1117_v20 = vpop.f32.mrf.mxu0  ;;  %v1401_v21 = vpop.f32.mrf.mxu1 }
 0x241   :  { %2275 = vst [vmem:[%s3493_s5 + $0xf0] sm:$0xff] %v2211_v18  ;;  %v2141_v22 = vmul.f32 %v1948_v17, %v1400_v19  ;;  %v1988_v18 = vpop.permute.xlu1 %1987 }
 0x242   :  { %v1118_v23 = vpop.f32.mrf.mxu0  ;;  %v1404_v0 = vpop.f32.mrf.mxu1 }
 0x243   :  { %v2212_v25 = vadd.f32 %v3192_v49, %v2141_v22  ;;  %v1405_v26 = vadd.f32 %v1404_v0, %v1115_v15 }
 0x244   :  { %v1120_v27 = vpop.f32.mrf.mxu0  ;;  %v1406_v1 = vpop.f32.mrf.mxu1 }
 0x245   :  { %2276 = vst [vmem:[%s3493_s5 + $0xf8] sm:$0xff] %v2212_v25  ;;  %v2142_v28 = vmul.f32 %v1953_v24, %v1405_v26  ;;  %v1993_v25 = vpop.permute.xlu0 %1992 }
 0x246   :  { %v1123_v29 = vpop.f32.mrf.mxu0  ;;  %v1407_v13 = vpop.f32.mrf.mxu1 }
 0x247   :  { %v2213_v31 = vadd.f32 %v3192_v49, %v2142_v28  ;;  %v1408_v32 = vadd.f32 %v1407_v13, %v1118_v23 }
 0x248   :  { %v1125_v33 = vpop.f32.mrf.mxu0  ;;  %v1409_v34 = vpop.f32.mrf.mxu1 }
 0x249   :  { %2277 = vst [vmem:[%s3493_s5 + $0x100] sm:$0xff] %v2213_v31  ;;  %v2143_v35 = vmul.f32 %v1958_v30, %v1408_v32  ;;  %v1998_v31 = vpop.permute.xlu1 %1997 }
 0x24a   :  { %v1126_v36 = vpop.f32.mrf.mxu0  ;;  %v1412_v37 = vpop.f32.mrf.mxu1 }
 0x24b   :  { %v2214_v39 = vadd.f32 %v3192_v49, %v2143_v35  ;;  %v1413_v40 = vadd.f32 %v1412_v37, %v1123_v29 }
 0x24c   :  { %v1128_v41 = vpop.f32.mrf.mxu0  ;;  %v1414_v42 = vpop.f32.mrf.mxu1 }
 0x24d   :  { %2278 = vst [vmem:[%s3493_s5 + $0x108] sm:$0xff] %v2214_v39  ;;  %v2144_v43 = vmul.f32 %v1963_v38, %v1413_v40  ;;  %v2003_v39 = vpop.permute.xlu0 %2002 }
 0x24e   :  { %v1131_v44 = vpop.f32.mrf.mxu0  ;;  %v1415_v45 = vpop.f32.mrf.mxu1 }
 0x24f   :  { %v2215_v47 = vadd.f32 %v3192_v49, %v2144_v43  ;;  %v1416_v48 = vadd.f32 %v1415_v45, %v1126_v36 }
 0x250   :  { %v1133_v50 = vpop.f32.mrf.mxu0  ;;  %v1417_v51 = vpop.f32.mrf.mxu1 }
 0x251   :  { %2279 = vst [vmem:[%s3493_s5 + $0x110] sm:$0xff] %v2215_v47  ;;  %v2145_v52 = vmul.f32 %v1968_v46, %v1416_v48  ;;  %v2008_v47 = vpop.permute.xlu1 %2007 }
 0x252   :  { %v1134_v53 = vpop.f32.mrf.mxu0  ;;  %v1420_v54 = vpop.f32.mrf.mxu1 }
 0x253   :  { %v2216_v56 = vadd.f32 %v3192_v49, %v2145_v52  ;;  %v1421_v57 = vadd.f32 %v1420_v54, %v1131_v44 }
 0x254   :  { %v1136_v58 = vpop.f32.mrf.mxu0  ;;  %v1422_v59 = vpop.f32.mrf.mxu1 }
 0x255   :  { %2280 = vst [vmem:[%s3493_s5 + $0x118] sm:$0xff] %v2216_v56  ;;  %v2146_v60 = vmul.f32 %v1973_v55, %v1421_v57  ;;  %v2013_v56 = vpop.permute.xlu0 %2012 }
 0x256   :  { %v1139_v61 = vpop.f32.mrf.mxu0  ;;  %v1423_v62 = vpop.f32.mrf.mxu1 }
 0x257   :  { %v2217_v2 = vadd.f32 %v3192_v49, %v2146_v60  ;;  %v1424_v3 = vadd.f32 %v1423_v62, %v1134_v53 }
 0x258   :  { %v1141_v4 = vpop.f32.mrf.mxu0  ;;  %v1425_v5 = vpop.f32.mrf.mxu1 }
 0x259   :  { %2281 = vst [vmem:[%s3493_s5 + $0x120] sm:$0xff] %v2217_v2  ;;  %v2147_v6 = vmul.f32 %v1978_v63, %v1424_v3  ;;  %v2018_v2 = vpop.permute.xlu1 %2017 }
 0x25a   :  { %v1142_v7 = vpop.f32.mrf.mxu0  ;;  %v1428_v8 = vpop.f32.mrf.mxu1 }
 0x25b   :  { %v2218_v10 = vadd.f32 %v3192_v49, %v2147_v6  ;;  %v1429_v11 = vadd.f32 %v1428_v8, %v1139_v61 }
 0x25c   :  { %v1144_v12 = vpop.f32.mrf.mxu0  ;;  %v1430_v14 = vpop.f32.mrf.mxu1 }
 0x25d   :  { %2282 = vst [vmem:[%s3493_s5 + $0x128] sm:$0xff] %v2218_v10  ;;  %v2148_v15 = vmul.f32 %v1983_v9, %v1429_v11  ;;  %v2023_v10 = vpop.permute.xlu0 %2022 }
 0x25e   :  { %v1147_v16 = vpop.f32.mrf.mxu0  ;;  %v1431_v17 = vpop.f32.mrf.mxu1 }
 0x25f   :  { %v2219_v19 = vadd.f32 %v3192_v49, %v2148_v15  ;;  %v1432_v20 = vadd.f32 %v1431_v17, %v1142_v7 }
 0x260   :  { %v1149_v21 = vpop.f32.mrf.mxu0  ;;  %v1433_v22 = vpop.f32.mrf.mxu1 }
 0x261   :  { %2283 = vst [vmem:[%s3493_s5 + $0x130] sm:$0xff] %v2219_v19  ;;  %v2149_v23 = vmul.f32 %v1988_v18, %v1432_v20  ;;  %v2028_v19 = vpop.permute.xlu1 %2027 }
 0x262   :  { %v1150_v0 = vpop.f32.mrf.mxu0  ;;  %v1436_v24 = vpop.f32.mrf.mxu1 }
 0x263   :  { %v2220_v26 = vadd.f32 %v3192_v49, %v2149_v23  ;;  %v1437_v27 = vadd.f32 %v1436_v24, %v1147_v16 }
 0x264   :  { %v1152_v1 = vpop.f32.mrf.mxu0  ;;  %v1438_v28 = vpop.f32.mrf.mxu1 }
 0x265   :  { %2284 = vst [vmem:[%s3493_s5 + $0x138] sm:$0xff] %v2220_v26  ;;  %v2150_v29 = vmul.f32 %v1993_v25, %v1437_v27  ;;  %v2033_v26 = vpop.permute.xlu0 %2032 }
 0x266   :  { %v1155_v13 = vpop.f32.mrf.mxu0  ;;  %v1439_v30 = vpop.f32.mrf.mxu1 }
 0x267   :  { %v2221_v32 = vadd.f32 %v3192_v49, %v2150_v29  ;;  %v1440_v33 = vadd.f32 %v1439_v30, %v1150_v0 }
 0x268   :  { %v1157_v34 = vpop.f32.mrf.mxu0  ;;  %v1441_v35 = vpop.f32.mrf.mxu1 }
 0x269   :  { %2285 = vst [vmem:[%s3493_s5 + $0x140] sm:$0xff] %v2221_v32  ;;  %v2151_v36 = vmul.f32 %v1998_v31, %v1440_v33  ;;  %v2038_v32 = vpop.permute.xlu1 %2037 }
 0x26a   :  { %v1158_v37 = vpop.f32.mrf.mxu0  ;;  %v1444_v38 = vpop.f32.mrf.mxu1 }
 0x26b   :  { %v2222_v40 = vadd.f32 %v3192_v49, %v2151_v36  ;;  %v1445_v41 = vadd.f32 %v1444_v38, %v1155_v13 }
 0x26c   :  { %v1160_v42 = vpop.f32.mrf.mxu0  ;;  %v1446_v43 = vpop.f32.mrf.mxu1 }
 0x26d   :  { %2286 = vst [vmem:[%s3493_s5 + $0x148] sm:$0xff] %v2222_v40  ;;  %v2152_v44 = vmul.f32 %v2003_v39, %v1445_v41  ;;  %v2043_v40 = vpop.permute.xlu0 %2042 }
 0x26e   :  { %v1163_v45 = vpop.f32.mrf.mxu0  ;;  %v1447_v46 = vpop.f32.mrf.mxu1 }
 0x26f   :  { %v2223_v48 = vadd.f32 %v3192_v49, %v2152_v44  ;;  %v1448_v50 = vadd.f32 %v1447_v46, %v1158_v37 }
 0x270   :  { %v1165_v51 = vpop.f32.mrf.mxu0  ;;  %v1449_v52 = vpop.f32.mrf.mxu1 }
 0x271   :  { %2287 = vst [vmem:[%s3493_s5 + $0x150] sm:$0xff] %v2223_v48  ;;  %v2153_v53 = vmul.f32 %v2008_v47, %v1448_v50  ;;  %v2048_v48 = vpop.permute.xlu1 %2047  ;;  %v3430_v50 = vld [vmem:[%s3492_s4] ss:$0 sm:$0xff] }
 0x272   :  { %v1166_v54 = vpop.f32.mrf.mxu0  ;;  %v1452_v55 = vpop.f32.mrf.mxu1 }
 0x273   :  { %v2224_v57 = vadd.f32 %v3192_v49, %v2153_v53  ;;  %v1453_v58 = vadd.f32 %v1452_v55, %v1163_v45 }
 0x274   :  { %v1168_v59 = vpop.f32.mrf.mxu0  ;;  %v1454_v60 = vpop.f32.mrf.mxu1 }
 0x275   :  { %2288 = vst [vmem:[%s3493_s5 + $0x158] sm:$0xff] %v2224_v57  ;;  %v2154_v61 = vmul.f32 %v2013_v56, %v1453_v58  ;;  %v2053_v57 = vpop.permute.xlu0 %2052 }
 0x276   :  { %v1171_v62 = vpop.f32.mrf.mxu0  ;;  %v1455_v63 = vpop.f32.mrf.mxu1 }
 0x277   :  { %v2225_v3 = vadd.f32 %v3192_v49, %v2154_v61  ;;  %v1456_v4 = vadd.f32 %v1455_v63, %v1166_v54 }
 0x278   :  { %v1173_v5 = vpop.f32.mrf.mxu0  ;;  %v1457_v6 = vpop.f32.mrf.mxu1 }
 0x279   :  { %2289 = vst [vmem:[%s3493_s5 + $0x160] sm:$0xff] %v2225_v3  ;;  %v2155_v7 = vmul.f32 %v2018_v2, %v1456_v4  ;;  %v2058_v3 = vpop.permute.xlu1 %2057 }
 0x27a   :  { %v1174_v8 = vpop.f32.mrf.mxu0  ;;  %v1460_v9 = vpop.f32.mrf.mxu1 }
 0x27b   :  { %v2226_v11 = vadd.f32 %v3192_v49, %v2155_v7  ;;  %v1461_v12 = vadd.f32 %v1460_v9, %v1171_v62 }
 0x27c   :  { %v1176_v14 = vpop.f32.mrf.mxu0  ;;  %v1462_v15 = vpop.f32.mrf.mxu1 }
 0x27d   :  { %2290 = vst [vmem:[%s3493_s5 + $0x168] sm:$0xff] %v2226_v11  ;;  %v2156_v16 = vmul.f32 %v2023_v10, %v1461_v12  ;;  %v2063_v11 = vpop.permute.xlu0 %2062 }
 0x27e   :  { %v1179_v17 = vpop.f32.mrf.mxu0  ;;  %v1463_v18 = vpop.f32.mrf.mxu1 }
 0x27f   :  { %v2227_v20 = vadd.f32 %v3192_v49, %v2156_v16  ;;  %v1464_v21 = vadd.f32 %v1463_v18, %v1174_v8 }
 0x280   :  { %v1181_v22 = vpop.f32.mrf.mxu0  ;;  %v1465_v23 = vpop.f32.mrf.mxu1 }
 0x281   :  { %2291 = vst [vmem:[%s3493_s5 + $0x170] sm:$0xff] %v2227_v20  ;;  %v2157_v0 = vmul.f32 %v2028_v19, %v1464_v21  ;;  %v2068_v20 = vpop.permute.xlu1 %2067 }
 0x282   :  { %v1182_v24 = vpop.f32.mrf.mxu0  ;;  %v1468_v25 = vpop.f32.mrf.mxu1 }
 0x283   :  { %v2228_v27 = vadd.f32 %v3192_v49, %v2157_v0  ;;  %v1469_v1 = vadd.f32 %v1468_v25, %v1179_v17 }
 0x284   :  { %v1184_v28 = vpop.f32.mrf.mxu0  ;;  %v1470_v29 = vpop.f32.mrf.mxu1 }
 0x285   :  { %2292 = vst [vmem:[%s3493_s5 + $0x178] sm:$0xff] %v2228_v27  ;;  %v2158_v13 = vmul.f32 %v2033_v26, %v1469_v1  ;;  %v2073_v27 = vpop.permute.xlu0 %2072 }
 0x286   :  { %v1187_v30 = vpop.f32.mrf.mxu0  ;;  %v1471_v31 = vpop.f32.mrf.mxu1 }
 0x287   :  { %v2229_v33 = vadd.f32 %v3192_v49, %v2158_v13  ;;  %v1472_v34 = vadd.f32 %v1471_v31, %v1182_v24 }
 0x288   :  { %v1189_v35 = vpop.f32.mrf.mxu0  ;;  %v1473_v36 = vpop.f32.mrf.mxu1 }
 0x289   :  { %2293 = vst [vmem:[%s3493_s5 + $0x180] sm:$0xff] %v2229_v33  ;;  %v2159_v37 = vmul.f32 %v2038_v32, %v1472_v34  ;;  %v2078_v33 = vpop.permute.xlu1 %2077 }
 0x28a   :  { %v1190_v38 = vpop.f32.mrf.mxu0  ;;  %v1476_v39 = vpop.f32.mrf.mxu1 }
 0x28b   :  { %v2230_v41 = vadd.f32 %v3192_v49, %v2159_v37  ;;  %v1477_v42 = vadd.f32 %v1476_v39, %v1187_v30 }
 0x28c   :  { %v1192_v43 = vpop.f32.mrf.mxu0  ;;  %v1478_v44 = vpop.f32.mrf.mxu1 }
 0x28d   :  { %2294 = vst [vmem:[%s3493_s5 + $0x188] sm:$0xff] %v2230_v41  ;;  %v2160_v45 = vmul.f32 %v2043_v40, %v1477_v42  ;;  %v2083_v41 = vpop.permute.xlu0 %2082 }
 0x28e   :  { %v1195_v46 = vpop.f32.mrf.mxu0  ;;  %v1479_v47 = vpop.f32.mrf.mxu1 }
 0x28f   :  { %v2231_v51 = vadd.f32 %v3430_v50, %v2160_v45  ;;  %v1480_v52 = vadd.f32 %v1479_v47, %v1190_v38 }
 0x290   :  { %v1197_v49 = vpop.f32.mrf.mxu0  ;;  %v1481_v53 = vpop.f32.mrf.mxu1 }
 0x291   :  { %2295 = vst [vmem:[%s3493_s5 + $0x190] sm:$0xff] %v2231_v51  ;;  %v2161_v54 = vmul.f32 %v2048_v48, %v1480_v52  ;;  %v2088_v51 = vpop.permute.xlu1 %2087 }
 0x292   :  { %v1198_v55 = vpop.f32.mrf.mxu0  ;;  %v1484_v56 = vpop.f32.mrf.mxu1 }
 0x293   :  { %v2232_v58 = vadd.f32 %v3430_v50, %v2161_v54  ;;  %v1485_v59 = vadd.f32 %v1484_v56, %v1195_v46 }
 0x294   :  { %v1200_v60 = vpop.f32.mrf.mxu0  ;;  %v1486_v61 = vpop.f32.mrf.mxu1 }
 0x295   :  { %2296 = vst [vmem:[%s3493_s5 + $0x198] sm:$0xff] %v2232_v58  ;;  %v2162_v62 = vmul.f32 %v2053_v57, %v1485_v59  ;;  %v2093_v58 = vpop.permute.xlu0 %2092 }
 0x296   :  { %v1203_v63 = vpop.f32.mrf.mxu0  ;;  %v1487_v2 = vpop.f32.mrf.mxu1 }
 0x297   :  { %v2233_v4 = vadd.f32 %v3430_v50, %v2162_v62  ;;  %v1488_v5 = vadd.f32 %v1487_v2, %v1198_v55 }
 0x298   :  { %v1205_v6 = vpop.f32.mrf.mxu0  ;;  %v1489_v7 = vpop.f32.mrf.mxu1 }
 0x299   :  { %2297 = vst [vmem:[%s3493_s5 + $0x1a0] sm:$0xff] %v2233_v4  ;;  %v2163_v8 = vmul.f32 %v2058_v3, %v1488_v5  ;;  %v2098_v4 = vpop.permute.xlu1 %2097 }
 0x29a   :  { %v1206_v9 = vpop.f32.mrf.mxu0  ;;  %v1492_v10 = vpop.f32.mrf.mxu1 }
 0x29b   :  { %v2234_v12 = vadd.f32 %v3430_v50, %v2163_v8  ;;  %v1493_v14 = vadd.f32 %v1492_v10, %v1203_v63 }
 0x29c   :  { %v1208_v15 = vpop.f32.mrf.mxu0  ;;  %v1494_v16 = vpop.f32.mrf.mxu1 }
 0x29d   :  { %2298 = vst [vmem:[%s3493_s5 + $0x1a8] sm:$0xff] %v2234_v12  ;;  %v2164_v17 = vmul.f32 %v2063_v11, %v1493_v14  ;;  %v2103_v12 = vpop.permute.xlu0 %2102 }
 0x29e   :  { %v1211_v18 = vpop.f32.mrf.mxu0  ;;  %v1495_v19 = vpop.f32.mrf.mxu1 }
 0x29f   :  { %v2235_v21 = vadd.f32 %v3430_v50, %v2164_v17  ;;  %v1496_v22 = vadd.f32 %v1495_v19, %v1206_v9 }
 0x2a0   :  { %v1213_v23 = vpop.f32.mrf.mxu0  ;;  %v1497_v0 = vpop.f32.mrf.mxu1 }
 0x2a1   :  { %2299 = vst [vmem:[%s3493_s5 + $0x1b0] sm:$0xff] %v2235_v21  ;;  %v2165_v24 = vmul.f32 %v2068_v20, %v1496_v22  ;;  %v2108_v22 = vpop.permute.xlu1 %2107 }
 0x2a2   :  { %v1214_v25 = vpop.f32.mrf.mxu0  ;;  %v1500_v26 = vpop.f32.mrf.mxu1 }
 0x2a3   :  { %v2236_v1 = vadd.f32 %v3430_v50, %v2165_v24  ;;  %v1501_v28 = vadd.f32 %v1500_v26, %v1211_v18 }
 0x2a4   :  { %v1216_v29 = vpop.f32.mrf.mxu0  ;;  %v1502_v13 = vpop.f32.mrf.mxu1 }
 0x2a5   :  { %2300 = vst [vmem:[%s3493_s5 + $0x1b8] sm:$0xff] %v2236_v1  ;;  %v2166_v30 = vmul.f32 %v2073_v27, %v1501_v28 }
 0x2a6   :  { %v1219_v31 = vpop.f32.mrf.mxu0  ;;  %v1503_v32 = vpop.f32.mrf.mxu1 }
 0x2a7   :  { %v2237_v34 = vadd.f32 %v3430_v50, %v2166_v30  ;;  %v1504_v35 = vadd.f32 %v1503_v32, %v1214_v25 }
 0x2a8   :  { %v1221_v36 = vpop.f32.mrf.mxu0  ;;  %v1505_v37 = vpop.f32.mrf.mxu1 }
 0x2a9   :  { %2301 = vst [vmem:[%s3493_s5 + $0x1c0] sm:$0xff] %v2237_v34  ;;  %v2167_v38 = vmul.f32 %v2078_v33, %v1504_v35 }
 0x2aa   :  { %v1222_v39 = vpop.f32.mrf.mxu0  ;;  %v1508_v40 = vpop.f32.mrf.mxu1 }
 0x2ab   :  { %v2238_v42 = vadd.f32 %v3430_v50, %v2167_v38  ;;  %v1509_v43 = vadd.f32 %v1508_v40, %v1219_v31 }
 0x2ac   :  { %v1224_v44 = vpop.f32.mrf.mxu0  ;;  %v1510_v45 = vpop.f32.mrf.mxu1 }
 0x2ad   :  { %2302 = vst [vmem:[%s3493_s5 + $0x1c8] sm:$0xff] %v2238_v42  ;;  %v2168_v46 = vmul.f32 %v2083_v41, %v1509_v43 }
 0x2ae   :  { %v1227_v47 = vpop.f32.mrf.mxu0  ;;  %v1511_v48 = vpop.f32.mrf.mxu1 }
 0x2af   :  { %v2239_v52 = vadd.f32 %v3430_v50, %v2168_v46  ;;  %v1512_v49 = vadd.f32 %v1511_v48, %v1222_v39 }
 0x2b0   :  { %v1229_v53 = vpop.f32.mrf.mxu0  ;;  %v1513_v54 = vpop.f32.mrf.mxu1 }
 0x2b1   :  { %2303 = vst [vmem:[%s3493_s5 + $0x1d0] sm:$0xff] %v2239_v52  ;;  %v2169_v55 = vmul.f32 %v2088_v51, %v1512_v49 }
 0x2b2   :  { %v1230_v56 = vpop.f32.mrf.mxu0  ;;  %v1516_v57 = vpop.f32.mrf.mxu1 }
 0x2b3   :  { %v2240_v59 = vadd.f32 %v3430_v50, %v2169_v55  ;;  %v1517_v60 = vadd.f32 %v1516_v57, %v1227_v47 }
 0x2b4   :  { %v1232_v61 = vpop.f32.mrf.mxu0  ;;  %v1518_v62 = vpop.f32.mrf.mxu1 }
 0x2b5   :  { %2304 = vst [vmem:[%s3493_s5 + $0x1d8] sm:$0xff] %v2240_v59  ;;  %v2170_v63 = vmul.f32 %v2093_v58, %v1517_v60 }
 0x2b6   :  { %v1235_v2 = vpop.f32.mrf.mxu0  ;;  %v1519_v3 = vpop.f32.mrf.mxu1 }
 0x2b7   :  { %v2241_v5 = vadd.f32 %v3430_v50, %v2170_v63  ;;  %v1520_v6 = vadd.f32 %v1519_v3, %v1230_v56 }
 0x2b8   :  { %v1237_v7 = vpop.f32.mrf.mxu0  ;;  %v1521_v8 = vpop.f32.mrf.mxu1 }
 0x2b9   :  { %2305 = vst [vmem:[%s3493_s5 + $0x1e0] sm:$0xff] %v2241_v5  ;;  %v2171_v9 = vmul.f32 %v2098_v4, %v1520_v6 }
 0x2ba   :  { %v1238_v10 = vpop.f32.mrf.mxu0  ;;  %v1524_v11 = vpop.f32.mrf.mxu1 }
 0x2bb   :  { %v2242_v14 = vadd.f32 %v3430_v50, %v2171_v9  ;;  %v1525_v15 = vadd.f32 %v1524_v11, %v1235_v2 }
 0x2bc   :  { %v1240_v16 = vpop.f32.mrf.mxu0  ;;  %v1526_v17 = vpop.f32.mrf.mxu1 }
 0x2bd   :  { %2306 = vst [vmem:[%s3493_s5 + $0x1e8] sm:$0xff] %v2242_v14  ;;  %v2172_v18 = vmul.f32 %v2103_v12, %v1525_v15 }
 0x2be   :  { %v1527_v19 = vpop.f32.mrf.mxu1 }
 0x2bf   :  { %v2243_v20 = vadd.f32 %v3430_v50, %v2172_v18  ;;  %v1528_v21 = vadd.f32 %v1527_v19, %v1238_v10 }
 0x2c0   :  { %v1529_v23 = vpop.f32.mrf.mxu1 }
 0x2c1   :  { %2307 = vst [vmem:[%s3493_s5 + $0x1f0] sm:$0xff] %v2243_v20  ;;  %v2173_v0 = vmul.f32 %v2108_v22, %v1528_v21 }
 0x2c3   :  { %v2244_v24 = vadd.f32 %v3430_v50, %v2173_v0 }
 0x2c5   :  { %2308 = vst [vmem:[%s3493_s5 + $0x1f8] sm:$0xff] %v2244_v24 }

// kernel: gcn_forward.6
= control target key start
LH: loop header
LB: loop body
LE: loop exit
PB: predicated region body
PF: predicated region fallthrough
CT: control target
= control target key end

     0   :  { %v4292_v0 = vmov 0   ;;  %s6039_s2 = inlined_call_operand.vmem [shape: f32[512,1], index: 2, kind: input, shape index: {}, may-alias: {2,3}]   ;;  %s6040_s0 = inlined_call_operand.vmem [shape: s8[512,512], index: 0, kind: input, shape index: {}]   ;;  %s6041_s1 = inlined_call_operand.vmem [shape: bf16[512,256], index: 1, kind: input, shape index: {}]   ;;  %s6042_s3 = inlined_call_operand.vmem [shape: f32[512,1], index: 3, kind: input, shape index: {}, may-alias: {2,3}]   ;;  %s6043_s4 = inlined_call_operand.vmem [shape: bf16[256,256], index: 4, kind: input, shape index: {}]   ;;  %s6044_s5 = inlined_call_operand.vmem [shape: f32[1,256], index: 5, kind: input, shape index: {}]   ;;  %s6045_s6 = inlined_call_operand.vmem [shape: bf16[512,256], index: 6, kind: output, shape index: {}]  }
   0x1   :  { %4243 = vset.pattern.permute.xlu1 %v4292_v0  ;;  %4242 = vset.pattern.permute.xlu0 %v4292_v0  ;;  %v553_v1 = vld [vmem:[%s6039_s2 + $0x70] sm:$0xff]  ;;  %v551_v2 = vld [vmem:[%s6039_s2 + $0x60] sm:$0xff]  ;;  %v554_v3 = vld [vmem:[%s6039_s2 + $0x78] sm:$0xff] }
   0x2   :  { %675 = vperm.xlu0 %4242, %v553_v1   ;;  %665 = vperm.xlu1 %4243, %v551_v2   ;;  %v552_v4 = vld [vmem:[%s6039_s2 + $0x68] sm:$0xff]  ;;  %v550_v5 = vld [vmem:[%s6039_s2 + $0x58] sm:$0xff]  ;;  %v549_v6 = vld [vmem:[%s6039_s2 + $0x50] sm:$0xff] }
   0x3   :  { %v548_v7 = vld [vmem:[%s6039_s2 + $0x48] sm:$0xff]  ;;  %v547_v8 = vld [vmem:[%s6039_s2 + $0x40] sm:$0xff]  ;;  %v546_v9 = vld [vmem:[%s6039_s2 + $0x38] sm:$0xff] }
   0x4   :  { %v545_v10 = vld [vmem:[%s6039_s2 + $0x30] sm:$0xff]  ;;  %v544_v11 = vld [vmem:[%s6039_s2 + $0x28] sm:$0xff]  ;;  %v543_v12 = vld [vmem:[%s6039_s2 + $0x20] sm:$0xff] }
   0x5   :  { %v542_v13 = vld [vmem:[%s6039_s2 + $0x18] sm:$0xff]  ;;  %v541_v14 = vld [vmem:[%s6039_s2 + $0x10] sm:$0xff]  ;;  %v540_v15 = vld [vmem:[%s6039_s2 + $0x8] sm:$0xff] }
   0x6   :  { %680 = vperm.xlu0 %4242, %v554_v3   ;;  %670 = vperm.xlu1 %4243, %v552_v4   ;;  %v539_v16 = vld [vmem:[%s6039_s2] sm:$0xff]  ;;  %v570_v17 = vld [vmem:[%s6039_s2 + $0xf8] sm:$0xff]  ;;  %v569_v18 = vld [vmem:[%s6039_s2 + $0xf0] sm:$0xff] }
   0x7   :  { %v568_v19 = vld [vmem:[%s6039_s2 + $0xe8] sm:$0xff]  ;;  %v567_v20 = vld [vmem:[%s6039_s2 + $0xe0] sm:$0xff]  ;;  %v566_v21 = vld [vmem:[%s6039_s2 + $0xd8] sm:$0xff] }
   0x8   :  { %v565_v22 = vld [vmem:[%s6039_s2 + $0xd0] sm:$0xff]  ;;  %v564_v23 = vld [vmem:[%s6039_s2 + $0xc8] sm:$0xff]  ;;  %v563_v24 = vld [vmem:[%s6039_s2 + $0xc0] sm:$0xff] }
   0x9   :  { %v562_v25 = vld [vmem:[%s6039_s2 + $0xb8] sm:$0xff]  ;;  %v561_v26 = vld [vmem:[%s6039_s2 + $0xb0] sm:$0xff]  ;;  %v560_v27 = vld [vmem:[%s6039_s2 + $0xa8] sm:$0xff] }
   0xa   :  { %660 = vperm.xlu1 %4243, %v550_v5   ;;  %655 = vperm.xlu0 %4242, %v549_v6   ;;  %v559_v28 = vld [vmem:[%s6039_s2 + $0xa0] sm:$0xff]  ;;  %v558_v29 = vld [vmem:[%s6039_s2 + $0x98] sm:$0xff]  ;;  %v557_v30 = vld [vmem:[%s6039_s2 + $0x90] sm:$0xff] }
   0xb   :  { %v556_v31 = vld [vmem:[%s6039_s2 + $0x88] sm:$0xff]  ;;  %v555_v32 = vld [vmem:[%s6039_s2 + $0x80] sm:$0xff]  ;;  %v586_v33 = vld [vmem:[%s6039_s2 + $0x178] sm:$0xff] }
   0xc   :  { %v585_v34 = vld [vmem:[%s6039_s2 + $0x170] sm:$0xff]  ;;  %v584_v35 = vld [vmem:[%s6039_s2 + $0x168] sm:$0xff]  ;;  %v583_v36 = vld [vmem:[%s6039_s2 + $0x160] sm:$0xff] }
   0xd   :  { %v4439_v37 = vld [vmem:[%s6040_s0 + $0x108] sm:$0xff]  ;;  %v582_v39 = vld [vmem:[%s6039_s2 + $0x158] sm:$0xff]  ;;  %v581_v40 = vld [vmem:[%s6039_s2 + $0x150] sm:$0xff] }
   0xe   :  { %650 = vperm.xlu1 %4243, %v548_v7   ;;  %645 = vperm.xlu0 %4242, %v547_v8   ;;  %v284_v38 = vunpack.c.l.s8.bf16 %v4439_v37  ;;  %v580_v41 = vld [vmem:[%s6039_s2 + $0x148] sm:$0xff]  ;;  %v579_v42 = vld [vmem:[%s6039_s2 + $0x140] sm:$0xff]  ;;  %v578_v43 = vld [vmem:[%s6039_s2 + $0x138] sm:$0xff] }
   0xf   :  { %v577_v44 = vld [vmem:[%s6039_s2 + $0x130] sm:$0xff]  ;;  %v576_v45 = vld [vmem:[%s6039_s2 + $0x128] sm:$0xff]  ;;  %v575_v46 = vld [vmem:[%s6039_s2 + $0x120] sm:$0xff] }
  0x10   :  { %1435 = vmatprep.mubr.bf16.mxu1 %v284_v38  ;;  %v574_v47 = vld [vmem:[%s6039_s2 + $0x118] sm:$0xff]  ;;  %v573_v48 = vld [vmem:[%s6039_s2 + $0x110] sm:$0xff]  ;;  %v572_v49 = vld [vmem:[%s6039_s2 + $0x108] sm:$0xff] }
  0x11   :  { %v571_v50 = vld [vmem:[%s6039_s2 + $0x100] sm:$0xff]  ;;  %v602_v51 = vld [vmem:[%s6039_s2 + $0x1f8] sm:$0xff]  ;;  %v601_v52 = vld [vmem:[%s6039_s2 + $0x1f0] sm:$0xff] }
  0x12   :  { %640 = vperm.xlu1 %4243, %v546_v9   ;;  %635 = vperm.xlu0 %4242, %v545_v10   ;;  %v600_v53 = vld [vmem:[%s6039_s2 + $0x1e8] sm:$0xff]  ;;  %v599_v54 = vld [vmem:[%s6039_s2 + $0x1e0] sm:$0xff]  ;;  %v598_v55 = vld [vmem:[%s6039_s2 + $0x1d8] sm:$0xff] }
  0x13   :  { %v597_v56 = vld [vmem:[%s6039_s2 + $0x1d0] sm:$0xff]  ;;  %v596_v57 = vld [vmem:[%s6039_s2 + $0x1c8] sm:$0xff]  ;;  %v595_v58 = vld [vmem:[%s6039_s2 + $0x1c0] sm:$0xff] }
  0x14   :  { %v594_v59 = vld [vmem:[%s6039_s2 + $0x1b8] sm:$0xff]  ;;  %v593_v60 = vld [vmem:[%s6039_s2 + $0x1b0] sm:$0xff]  ;;  %v592_v61 = vld [vmem:[%s6039_s2 + $0x1a8] sm:$0xff] }
  0x15   :  { %v591_v62 = vld [vmem:[%s6039_s2 + $0x1a0] sm:$0xff]  ;;  %v590_v63 = vld [vmem:[%s6039_s2 + $0x198] sm:$0xff]  ;;  %v589_v0 = vld [vmem:[%s6039_s2 + $0x190] sm:$0xff] }
  0x16   :  { %630 = vperm.xlu1 %4243, %v544_v11   ;;  %625 = vperm.xlu0 %4242, %v543_v12   ;;  %v588_v1 = vld [vmem:[%s6039_s2 + $0x188] sm:$0xff]  ;;  %v587_v2 = vld [vmem:[%s6039_s2 + $0x180] sm:$0xff]  ;;  %v361_v3 = vld [vmem:[%s6041_s1 + $0x70] sm:$0xff] }
  0x17   :  { %v362_v4 = vld [vmem:[%s6041_s1 + $0x78] sm:$0xff]  ;;  %v359_v5 = vld [vmem:[%s6041_s1 + $0x60] sm:$0xff]  ;;  %v360_v6 = vld [vmem:[%s6041_s1 + $0x68] sm:$0xff]  ;;  %v440_v10 = vunpack.c.h.bf16 %v361_v3 }
  0x18   :  { %v2337_v9 = vld [vmem:[%s6042_s3 + $0x8] sm:$0xff]  ;;  %v442_v11 = vunpack.c.h.bf16 %v362_v4  ;;  %v436_v12 = vunpack.c.h.bf16 %v359_v5 }
  0x1a   :  { %620 = vperm.xlu1 %4243, %v542_v13   ;;  %615 = vperm.xlu0 %4242, %v541_v14   ;;  %v438_v13 = vunpack.c.h.bf16 %v360_v6  ;;  %v2336_v14 = vld [vmem:[%s6042_s3] sm:$0xff] }
  0x1e   :  { %610 = vperm.xlu1 %4243, %v540_v15   ;;  %605 = vperm.xlu0 %4242, %v539_v16   ;;  %v358_v15 = vld [vmem:[%s6041_s1 + $0x58] sm:$0xff]  ;;  %v357_v16 = vld [vmem:[%s6041_s1 + $0x50] sm:$0xff] }
  0x1f   :  { %v433_v38 = vunpack.c.l.bf16 %v358_v15 }
  0x22   :  { %760 = vperm.xlu1 %4243, %v570_v17   ;;  %755 = vperm.xlu0 %4242, %v569_v18   ;;  %v439_v17 = vunpack.c.l.bf16 %v361_v3  ;;  %v441_v18 = vunpack.c.l.bf16 %v362_v4  ;;  %v2342_v3 = vld [vmem:[%s6042_s3 + $0x30] sm:$0xff]  ;;  %v351_v4 = vld [vmem:[%s6041_s1 + $0x20] sm:$0xff] }
  0x26   :  { %750 = vperm.xlu1 %4243, %v568_v19   ;;  %745 = vperm.xlu0 %4242, %v567_v20   ;;  %v435_v19 = vunpack.c.l.bf16 %v359_v5 }
  0x2a   :  { %740 = vperm.xlu1 %4243, %v566_v21   ;;  %735 = vperm.xlu0 %4242, %v565_v22   ;;  %v437_v22 = vunpack.c.l.bf16 %v360_v6 }
  0x2e   :  { %730 = vperm.xlu1 %4243, %v564_v23   ;;  %725 = vperm.xlu0 %4242, %v563_v24   ;;  %v434_v23 = vunpack.c.h.bf16 %v358_v15  ;;  %v432_v24 = vunpack.c.h.bf16 %v357_v16 }
  0x32   :  { %720 = vperm.xlu1 %4243, %v562_v25   ;;  %715 = vperm.xlu0 %4242, %v561_v26  }
  0x36   :  { %710 = vperm.xlu1 %4243, %v560_v27   ;;  %705 = vperm.xlu0 %4242, %v559_v28  }
  0x3a   :  { %700 = vperm.xlu1 %4243, %v558_v29   ;;  %695 = vperm.xlu0 %4242, %v557_v30   ;;  %v2339_v29 = vld [vmem:[%s6042_s3 + $0x18] sm:$0xff] }
  0x3e   :  { %690 = vperm.xlu1 %4243, %v556_v31   ;;  %685 = vperm.xlu0 %4242, %v555_v32   ;;  %v356_v32 = vld [vmem:[%s6041_s1 + $0x48] sm:$0xff] }
  0x42   :  { %840 = vperm.xlu1 %4243, %v586_v33   ;;  %835 = vperm.xlu0 %4242, %v585_v34   ;;  %v2338_v33 = vld [vmem:[%s6042_s3 + $0x10] sm:$0xff] }
  0x46   :  { %830 = vperm.xlu1 %4243, %v584_v35   ;;  %825 = vperm.xlu0 %4242, %v583_v36   ;;  %v355_v35 = vld [vmem:[%s6041_s1 + $0x40] sm:$0xff] }
  0x4a   :  { %820 = vperm.xlu1 %4243, %v582_v39   ;;  %815 = vperm.xlu0 %4242, %v581_v40  }
  0x4e   :  { %810 = vperm.xlu1 %4243, %v580_v41   ;;  %805 = vperm.xlu0 %4242, %v579_v42  }
  0x52   :  { %800 = vperm.xlu1 %4243, %v578_v43   ;;  %795 = vperm.xlu0 %4242, %v577_v44   ;;  %v431_v43 = vunpack.c.l.bf16 %v357_v16  ;;  %v430_v44 = vunpack.c.h.bf16 %v356_v32  ;;  %v420_v16 = vunpack.c.h.bf16 %v351_v4 }
  0x56   :  { %790 = vperm.xlu1 %4243, %v576_v45   ;;  %785 = vperm.xlu0 %4242, %v575_v46  }
  0x5a   :  { %780 = vperm.xlu1 %4243, %v574_v47   ;;  %775 = vperm.xlu0 %4242, %v573_v48   ;;  %v428_v48 = vunpack.c.h.bf16 %v355_v35 }
  0x5e   :  { %770 = vperm.xlu1 %4243, %v572_v49   ;;  %765 = vperm.xlu0 %4242, %v571_v50   ;;  %v354_v49 = vld [vmem:[%s6041_s1 + $0x38] sm:$0xff]  ;;  %v2341_v50 = vld [vmem:[%s6042_s3 + $0x28] sm:$0xff] }
  0x5f   :  { %v425_v6 = vunpack.c.l.bf16 %v354_v49 }
  0x62   :  { %920 = vperm.xlu1 %4243, %v602_v51   ;;  %915 = vperm.xlu0 %4242, %v601_v52   ;;  %v2340_v51 = vld [vmem:[%s6042_s3 + $0x20] sm:$0xff]  ;;  %v353_v52 = vld [vmem:[%s6041_s1 + $0x30] sm:$0xff] }
  0x66   :  { %910 = vperm.xlu1 %4243, %v600_v53   ;;  %905 = vperm.xlu0 %4242, %v599_v54   ;;  %v429_v54 = vunpack.c.l.bf16 %v356_v32 }
  0x6a   :  { %900 = vperm.xlu1 %4243, %v598_v55   ;;  %895 = vperm.xlu0 %4242, %v597_v56   ;;  %v427_v56 = vunpack.c.l.bf16 %v355_v35  ;;  %v2346_v35 = vld [vmem:[%s6042_s3 + $0x50] sm:$0xff] }
  0x6e   :  { %890 = vperm.xlu1 %4243, %v596_v57   ;;  %885 = vperm.xlu0 %4242, %v595_v58  }
  0x72   :  { %880 = vperm.xlu1 %4243, %v594_v59   ;;  %875 = vperm.xlu0 %4242, %v593_v60   ;;  %v426_v60 = vunpack.c.h.bf16 %v354_v49 }
  0x76   :  { %870 = vperm.xlu1 %4243, %v592_v61   ;;  %865 = vperm.xlu0 %4242, %v591_v62  }
  0x7a   :  { %860 = vperm.xlu1 %4243, %v590_v63   ;;  %855 = vperm.xlu0 %4242, %v589_v0   ;;  %v424_v0 = vunpack.c.h.bf16 %v353_v52 }
  0x7d   :  { %v676_v7 = vpop.permute.xlu0 %675  ;;  %v666_v8 = vpop.permute.xlu1 %665 }
  0x7e   :  { %850 = vperm.xlu1 %4243, %v588_v1   ;;  %845 = vperm.xlu0 %4242, %v587_v2   ;;  %v952_v25 = vmul.f32 %v676_v7, %v440_v10  ;;  %v948_v27 = vmul.f32 %v666_v8, %v436_v12  ;;  %v951_v30 = vmul.f32 %v676_v7, %v439_v17  ;;  %v352_v1 = vld [vmem:[%s6041_s1 + $0x28] sm:$0xff]  ;;  %v2343_v2 = vld [vmem:[%s6042_s3 + $0x38] sm:$0xff] }
  0x7f   :  { %v947_v41 = vmul.f32 %v666_v8, %v435_v19  ;;  %v423_v8 = vunpack.c.l.bf16 %v353_v52  ;;  %v422_v12 = vunpack.c.h.bf16 %v352_v1  ;;  %v350_v17 = vld [vmem:[%s6041_s1 + $0x18] sm:$0xff]  ;;  %v2344_v19 = vld [vmem:[%s6042_s3 + $0x40] sm:$0xff] }
  0x80   :  { %v2348_v52 = vld [vmem:[%s6042_s3 + $0x60] sm:$0xff] }
  0x81   :  { %v681_v20 = vpop.permute.xlu0 %680  ;;  %v671_v21 = vpop.permute.xlu1 %670 }
  0x82   :  { %2407 = vperm.xlu1 %4243, %v2337_v9   ;;  %2402 = vperm.xlu0 %4242, %v2336_v14   ;;  %v954_v26 = vmul.f32 %v681_v20, %v442_v11  ;;  %v950_v28 = vmul.f32 %v671_v21, %v438_v13  ;;  %v953_v31 = vmul.f32 %v681_v20, %v441_v18  ;;  %v2345_v18 = vld [vmem:[%s6042_s3 + $0x48] sm:$0xff]  ;;  %v349_v20 = vld [vmem:[%s6041_s1 + $0x10] sm:$0xff] }
  0x83   :  { %v949_v42 = vmul.f32 %v671_v21, %v437_v22  ;;  %v421_v22 = vunpack.c.l.bf16 %v352_v1  ;;  %v416_v32 = vunpack.c.h.bf16 %v349_v20 }
  0x84   :  { %v1066_v34 = vpack.c.bf16 %v954_v26, %v952_v25  ;;  %v1065_v40 = vpack.c.bf16 %v953_v31, %v951_v30  ;;  %v1064_v47 = vpack.c.bf16 %v950_v28, %v948_v27  ;;  %v418_v28 = vunpack.c.h.bf16 %v350_v17 }
  0x85   :  { %v661_v36 = vpop.permute.xlu1 %660  ;;  %v656_v39 = vpop.permute.xlu0 %655  ;;  %v1063_v59 = vpack.c.bf16 %v949_v42, %v947_v41  ;;  %v415_v41 = vunpack.c.l.bf16 %v349_v20  ;;  %v2352_v20 = vld [vmem:[%s6042_s3 + $0x80] sm:$0xff] }
  0x86   :  { %2417 = vperm.xlu1 %4243, %v2339_v29   ;;  %v946_v45 = vmul.f32 %v661_v36, %v434_v23  ;;  %v944_v46 = vmul.f32 %v656_v39, %v432_v24  ;;  %2412 = vperm.xlu0 %4242, %v2338_v33   ;;  %v945_v57 = vmul.f32 %v661_v36, %v433_v38  ;;  %v419_v24 = vunpack.c.l.bf16 %v351_v4  ;;  %v348_v33 = vld [vmem:[%s6041_s1 + $0x8] sm:$0xff]  ;;  %v347_v36 = vld [vmem:[%s6041_s1] sm:$0xff]  ;;  %v2350_v4 = vld [vmem:[%s6042_s3 + $0x70] sm:$0xff] }
  0x87   :  { %1243 = vmatprep.subr.bf16.mxu0 %v1066_v34  ;;  %4209 = vmatprep.subr.bf16.mxu1 %v1066_v34  ;;  %v943_v58 = vmul.f32 %v656_v39, %v431_v43  ;;  %v2347_v34 = vld [vmem:[%s6042_s3 + $0x58] sm:$0xff]  ;;  %v417_v39 = vunpack.c.l.bf16 %v350_v17  ;;  %v412_v49 = vunpack.c.h.bf16 %v347_v36 }
  0x88   :  { %1244 = vmatpush1.bf16.msra.mxu0 %v1065_v40  ;;  %4225 = vmatpush1.bf16.msra.mxu1 %v1065_v40  ;;  %v1062_v63 = vpack.c.bf16 %v946_v45, %v944_v46  ;;  %v414_v45 = vunpack.c.h.bf16 %v348_v33 }
  0x89   :  { %1245 = vmatprep.subr.bf16.mxu0 %v1064_v47  ;;  %v651_v53 = vpop.permute.xlu1 %650  ;;  %v646_v55 = vpop.permute.xlu0 %645  ;;  %4210 = vmatprep.subr.bf16.mxu1 %v1064_v47  ;;  %v1061_v11 = vpack.c.bf16 %v945_v57, %v943_v58  ;;  %v411_v57 = vunpack.c.l.bf16 %v347_v36  ;;  %v2354_v36 = vld [vmem:[%s6042_s3 + $0x90] sm:$0xff] }
  0x8a   :  { %v942_v61 = vmul.f32 %v651_v53, %v430_v44  ;;  %v940_v62 = vmul.f32 %v646_v55, %v428_v48  ;;  %2427 = vperm.xlu1 %4243, %v2341_v50   ;;  %2422 = vperm.xlu0 %4242, %v2340_v51   ;;  %v941_v9 = vmul.f32 %v651_v53, %v429_v54  ;;  %v378_v50 = vld [vmem:[%s6041_s1 + $0xf8] sm:$0xff]  ;;  %v2349_v51 = vld [vmem:[%s6042_s3 + $0x68] sm:$0xff]  ;;  %v377_v53 = vld [vmem:[%s6041_s1 + $0xf0] sm:$0xff] }
  0x8b   :  { %v939_v10 = vmul.f32 %v646_v55, %v427_v56  ;;  %v413_v55 = vunpack.c.l.bf16 %v348_v33  ;;  %v472_v1 = vunpack.c.h.bf16 %v377_v53 }
  0x8c   :  { %1246 = vmatpush1.bf16.msra.mxu0 %v1063_v59  ;;  %4226 = vmatpush1.bf16.msra.mxu1 %v1063_v59  ;;  %v1060_v15 = vpack.c.bf16 %v942_v61, %v940_v62  ;;  %v474_v61 = vunpack.c.h.bf16 %v378_v50 }
  0x8d   :  { %1247 = vmatprep.subr.bf16.mxu0 %v1062_v63  ;;  %v641_v5 = vpop.permute.xlu1 %640  ;;  %v636_v7 = vpop.permute.xlu0 %635  ;;  %4211 = vmatprep.subr.bf16.mxu1 %v1062_v63  ;;  %v1059_v27 = vpack.c.bf16 %v941_v9, %v939_v10  ;;  %v471_v9 = vunpack.c.l.bf16 %v377_v53  ;;  %v2356_v53 = vld [vmem:[%s6042_s3 + $0xa0] sm:$0xff] }
  0x8e   :  { %v938_v13 = vmul.f32 %v641_v5, %v426_v60  ;;  %v936_v14 = vmul.f32 %v636_v7, %v424_v0  ;;  %2437 = vperm.xlu1 %4243, %v2343_v2   ;;  %2432 = vperm.xlu0 %4242, %v2342_v3   ;;  %v937_v25 = vmul.f32 %v641_v5, %v425_v6  ;;  %v376_v2 = vld [vmem:[%s6041_s1 + $0xe8] sm:$0xff]  ;;  %v2351_v3 = vld [vmem:[%s6042_s3 + $0x78] sm:$0xff]  ;;  %v375_v5 = vld [vmem:[%s6041_s1 + $0xe0] sm:$0xff] }
  0x8f   :  { %v935_v26 = vmul.f32 %v636_v7, %v423_v8  ;;  %v473_v7 = vunpack.c.l.bf16 %v378_v50  ;;  %v468_v17 = vunpack.c.h.bf16 %v375_v5 }
  0x90   :  { %1248 = vmatpush1.bf16.msra.mxu0 %v1061_v11  ;;  %4227 = vmatpush1.bf16.msra.mxu1 %v1061_v11  ;;  %v1058_v31 = vpack.c.bf16 %v938_v13, %v936_v14  ;;  %v470_v13 = vunpack.c.h.bf16 %v376_v2 }
  0x91   :  { %1249 = vmatprep.subr.bf16.mxu0 %v1060_v15  ;;  %v631_v21 = vpop.permute.xlu1 %630  ;;  %v626_v23 = vpop.permute.xlu0 %625  ;;  %4212 = vmatprep.subr.bf16.mxu1 %v1060_v15  ;;  %v1057_v44 = vpack.c.bf16 %v937_v25, %v935_v26  ;;  %v467_v25 = vunpack.c.l.bf16 %v375_v5  ;;  %v2358_v5 = vld [vmem:[%s6042_s3 + $0xb0] sm:$0xff] }
  0x92   :  { %v934_v29 = vmul.f32 %v631_v21, %v422_v12  ;;  %v932_v30 = vmul.f32 %v626_v23, %v420_v16  ;;  %2447 = vperm.xlu1 %4243, %v2345_v18   ;;  %2442 = vperm.xlu0 %4242, %v2344_v19   ;;  %v933_v42 = vmul.f32 %v631_v21, %v421_v22  ;;  %v374_v18 = vld [vmem:[%s6041_s1 + $0xd8] sm:$0xff]  ;;  %v2353_v19 = vld [vmem:[%s6042_s3 + $0x88] sm:$0xff]  ;;  %v373_v21 = vld [vmem:[%s6041_s1 + $0xd0] sm:$0xff] }
  0x93   :  { %v931_v43 = vmul.f32 %v626_v23, %v419_v24  ;;  %v469_v23 = vunpack.c.l.bf16 %v376_v2  ;;  %v464_v33 = vunpack.c.h.bf16 %v373_v21 }
  0x94   :  { %1250 = vmatpush1.bf16.msra.mxu0 %v1059_v27  ;;  %4228 = vmatpush1.bf16.msra.mxu1 %v1059_v27  ;;  %v1056_v48 = vpack.c.bf16 %v934_v29, %v932_v30  ;;  %v466_v29 = vunpack.c.h.bf16 %v374_v18 }
  0x95   :  { %1251 = vmatprep.subr.bf16.mxu0 %v1058_v31  ;;  %v621_v38 = vpop.permute.xlu1 %620  ;;  %v616_v40 = vpop.permute.xlu0 %615  ;;  %4213 = vmatprep.subr.bf16.mxu1 %v1058_v31  ;;  %v1055_v60 = vpack.c.bf16 %v933_v42, %v931_v43  ;;  %v463_v42 = vunpack.c.l.bf16 %v373_v21  ;;  %v2360_v21 = vld [vmem:[%s6042_s3 + $0xc0] sm:$0xff] }
  0x96   :  { %v930_v46 = vmul.f32 %v621_v38, %v418_v28  ;;  %v928_v47 = vmul.f32 %v616_v40, %v416_v32  ;;  %2457 = vperm.xlu1 %4243, %v2347_v34   ;;  %2452 = vperm.xlu0 %4242, %v2346_v35   ;;  %v929_v58 = vmul.f32 %v621_v38, %v417_v39  ;;  %v372_v34 = vld [vmem:[%s6041_s1 + $0xc8] sm:$0xff]  ;;  %v2355_v35 = vld [vmem:[%s6042_s3 + $0x98] sm:$0xff]  ;;  %v371_v38 = vld [vmem:[%s6041_s1 + $0xc0] sm:$0xff] }
  0x97   :  { %v927_v59 = vmul.f32 %v616_v40, %v415_v41  ;;  %v465_v40 = vunpack.c.l.bf16 %v374_v18  ;;  %v460_v50 = vunpack.c.h.bf16 %v371_v38 }
  0x98   :  { %1252 = vmatpush1.bf16.msra.mxu0 %v1057_v44  ;;  %4229 = vmatpush1.bf16.msra.mxu1 %v1057_v44  ;;  %v1054_v0 = vpack.c.bf16 %v930_v46, %v928_v47  ;;  %v462_v46 = vunpack.c.h.bf16 %v372_v34 }
  0x99   :  { %1253 = vmatprep.subr.bf16.mxu0 %v1056_v48  ;;  %v611_v54 = vpop.permute.xlu1 %610  ;;  %v606_v56 = vpop.permute.xlu0 %605  ;;  %4214 = vmatprep.subr.bf16.mxu1 %v1056_v48  ;;  %v1053_v12 = vpack.c.bf16 %v929_v58, %v927_v59  ;;  %v459_v58 = vunpack.c.l.bf16 %v371_v38  ;;  %v2362_v38 = vld [vmem:[%s6042_s3 + $0xd0] sm:$0xff] }
  0x9a   :  { %v926_v62 = vmul.f32 %v611_v54, %v414_v45  ;;  %v924_v63 = vmul.f32 %v606_v56, %v412_v49  ;;  %2467 = vperm.xlu1 %4243, %v2349_v51   ;;  %2462 = vperm.xlu0 %4242, %v2348_v52   ;;  %v925_v10 = vmul.f32 %v611_v54, %v413_v55  ;;  %v370_v51 = vld [vmem:[%s6041_s1 + $0xb8] sm:$0xff]  ;;  %v2357_v52 = vld [vmem:[%s6042_s3 + $0xa8] sm:$0xff]  ;;  %v369_v54 = vld [vmem:[%s6041_s1 + $0xb0] sm:$0xff] }
  0x9b   :  { %v923_v11 = vmul.f32 %v606_v56, %v411_v57  ;;  %v461_v56 = vunpack.c.l.bf16 %v372_v34  ;;  %v456_v2 = vunpack.c.h.bf16 %v369_v54 }
  0x9c   :  { %1254 = vmatpush1.bf16.msra.mxu0 %v1055_v60  ;;  %4230 = vmatpush1.bf16.msra.mxu1 %v1055_v60  ;;  %v1052_v16 = vpack.c.bf16 %v926_v62, %v924_v63  ;;  %v458_v62 = vunpack.c.h.bf16 %v370_v51 }
  0x9d   :  { %1255 = vmatprep.subr.bf16.mxu0 %v1054_v0  ;;  %v761_v6 = vpop.permute.xlu1 %760  ;;  %v756_v8 = vpop.permute.xlu0 %755  ;;  %4215 = vmatprep.subr.bf16.mxu1 %v1054_v0  ;;  %v1051_v28 = vpack.c.bf16 %v925_v10, %v923_v11  ;;  %v455_v10 = vunpack.c.l.bf16 %v369_v54 }
  0x9e   :  { %v986_v14 = vmul.f32 %v761_v6, %v474_v61  ;;  %v984_v15 = vmul.f32 %v756_v8, %v472_v1  ;;  %2477 = vperm.xlu1 %4243, %v2351_v3   ;;  %2472 = vperm.xlu0 %4242, %v2350_v4   ;;  %v985_v26 = vmul.f32 %v761_v6, %v473_v7  ;;  %v368_v3 = vld [vmem:[%s6041_s1 + $0xa8] sm:$0xff]  ;;  %v2359_v4 = vld [vmem:[%s6042_s3 + $0xb8] sm:$0xff]  ;;  %v367_v6 = vld [vmem:[%s6041_s1 + $0xa0] sm:$0xff] }
  0x9f   :  { %v983_v27 = vmul.f32 %v756_v8, %v471_v9  ;;  %v457_v8 = vunpack.c.l.bf16 %v370_v51  ;;  %v452_v18 = vunpack.c.h.bf16 %v367_v6 }
  0xa0   :  { %1256 = vmatpush1.bf16.msra.mxu0 %v1053_v12  ;;  %4231 = vmatpush1.bf16.msra.mxu1 %v1053_v12  ;;  %v1082_v32 = vpack.c.bf16 %v986_v14, %v984_v15  ;;  %v454_v14 = vunpack.c.h.bf16 %v368_v3 }
  0xa1   :  { %1257 = vmatprep.subr.bf16.mxu0 %v1052_v16  ;;  %v751_v22 = vpop.permute.xlu1 %750  ;;  %v746_v24 = vpop.permute.xlu0 %745  ;;  %4216 = vmatprep.subr.bf16.mxu1 %v1052_v16  ;;  %v1081_v45 = vpack.c.bf16 %v985_v26, %v983_v27  ;;  %v451_v26 = vunpack.c.l.bf16 %v367_v6  ;;  %v4727_v6 = vld [vmem:[%s6041_s1 + $0x168] sm:$0xff] }
  0xa2   :  { %v982_v30 = vmul.f32 %v751_v22, %v470_v13  ;;  %v980_v31 = vmul.f32 %v746_v24, %v468_v17  ;;  %2487 = vperm.xlu1 %4243, %v2353_v19   ;;  %2482 = vperm.xlu0 %4242, %v2352_v20   ;;  %v981_v43 = vmul.f32 %v751_v22, %v469_v23  ;;  %v366_v19 = vld [vmem:[%s6041_s1 + $0x98] sm:$0xff]  ;;  %v2361_v20 = vld [vmem:[%s6042_s3 + $0xc8] sm:$0xff]  ;;  %v365_v22 = vld [vmem:[%s6041_s1 + $0x90] sm:$0xff] }
  0xa3   :  { %v979_v44 = vmul.f32 %v746_v24, %v467_v25  ;;  %v453_v24 = vunpack.c.l.bf16 %v368_v3  ;;  %v448_v34 = vunpack.c.h.bf16 %v365_v22 }
  0xa4   :  { %1258 = vmatpush1.bf16.msra.mxu0 %v1051_v28  ;;  %4232 = vmatpush1.bf16.msra.mxu1 %v1051_v28  ;;  %v1080_v49 = vpack.c.bf16 %v982_v30, %v980_v31  ;;  %v450_v30 = vunpack.c.h.bf16 %v366_v19 }
  0xa5   :  { %1259 = vmatprep.subr.bf16.mxu0 %v1082_v32  ;;  %v741_v39 = vpop.permute.xlu1 %740  ;;  %v736_v41 = vpop.permute.xlu0 %735  ;;  %4217 = vmatprep.subr.bf16.mxu1 %v1082_v32  ;;  %v1079_v61 = vpack.c.bf16 %v981_v43, %v979_v44  ;;  %v447_v43 = vunpack.c.l.bf16 %v365_v22 }
  0xa6   :  { %v978_v47 = vmul.f32 %v741_v39, %v466_v29  ;;  %v976_v48 = vmul.f32 %v736_v41, %v464_v33  ;;  %2497 = vperm.xlu1 %4243, %v2355_v35   ;;  %2492 = vperm.xlu0 %4242, %v2354_v36   ;;  %v977_v59 = vmul.f32 %v741_v39, %v465_v40  ;;  %v364_v35 = vld [vmem:[%s6041_s1 + $0x88] sm:$0xff]  ;;  %v2363_v36 = vld [vmem:[%s6042_s3 + $0xd8] sm:$0xff]  ;;  %v363_v39 = vld [vmem:[%s6041_s1 + $0x80] sm:$0xff] }
  0xa7   :  { %v975_v60 = vmul.f32 %v736_v41, %v463_v42  ;;  %v449_v41 = vunpack.c.l.bf16 %v366_v19  ;;  %v444_v51 = vunpack.c.h.bf16 %v363_v39  ;;  %v4744_v19 = vld [vmem:[%s6041_s1 + $0x158] sm:$0xff] }
  0xa8   :  { %1260 = vmatpush2.bf16.msra.mxu0 %v1081_v45  ;;  %4233 = vmatpush2.bf16.msra.mxu1 %v1081_v45  ;;  %v1078_v1 = vpack.c.bf16 %v978_v47, %v976_v48  ;;  %v446_v47 = vunpack.c.h.bf16 %v364_v35 }
  0xa9   :  { %1261 = vmatprep.subr.bf16.mxu0 %v1080_v49  ;;  %v731_v55 = vpop.permute.xlu1 %730  ;;  %v726_v57 = vpop.permute.xlu0 %725  ;;  %4218 = vmatprep.subr.bf16.mxu1 %v1080_v49  ;;  %v1077_v13 = vpack.c.bf16 %v977_v59, %v975_v60 }
  0xaa   :  { %v974_v63 = vmul.f32 %v731_v55, %v462_v46  ;;  %v972_v0 = vmul.f32 %v726_v57, %v460_v50  ;;  %2507 = vperm.xlu1 %4243, %v2357_v52   ;;  %2502 = vperm.xlu0 %4242, %v2356_v53   ;;  %v973_v11 = vmul.f32 %v731_v55, %v461_v56  ;;  %v2365_v52 = vld [vmem:[%s6042_s3 + $0xe8] sm:$0xff]  ;;  %v2364_v53 = vld [vmem:[%s6042_s3 + $0xe0] sm:$0xff]  ;;  %v445_v55 = vunpack.c.l.bf16 %v364_v35 }
  0xab   :  { %v971_v12 = vmul.f32 %v726_v57, %v459_v58  ;;  %v394_v57 = vld [vmem:[%s6041_s1 + $0x178] sm:$0xff]  ;;  %v393_v58 = vld [vmem:[%s6041_s1 + $0x170] sm:$0xff] }
  0xac   :  { %1262 = vmatpush2.bf16.msra.mxu0 %v1079_v61  ;;  %4234 = vmatpush2.bf16.msra.mxu1 %v1079_v61  ;;  %v1076_v17 = vpack.c.bf16 %v974_v63, %v972_v0  ;;  %v443_v61 = vunpack.c.l.bf16 %v363_v39  ;;  %v504_v3 = vunpack.c.h.bf16 %v393_v58  ;;  %v4772_v39 = vld [vmem:[%s6041_s1 + $0x148] sm:$0xff] }
  0xad   :  { %1263 = vmatprep.subr.bf16.mxu0 %v1078_v1  ;;  %v721_v7 = vpop.permute.xlu1 %720  ;;  %v716_v9 = vpop.permute.xlu0 %715  ;;  %4219 = vmatprep.subr.bf16.mxu1 %v1078_v1  ;;  %v1075_v29 = vpack.c.bf16 %v973_v11, %v971_v12 }
  0xae   :  { %v970_v15 = vmul.f32 %v721_v7, %v458_v62  ;;  %v968_v16 = vmul.f32 %v716_v9, %v456_v2  ;;  %2517 = vperm.xlu1 %4243, %v2359_v4   ;;  %2512 = vperm.xlu0 %4242, %v2358_v5   ;;  %v969_v27 = vmul.f32 %v721_v7, %v457_v8  ;;  %v506_v2 = vunpack.c.h.bf16 %v394_v57  ;;  %v2367_v4 = vld [vmem:[%s6042_s3 + $0xf8] sm:$0xff]  ;;  %v2366_v5 = vld [vmem:[%s6042_s3 + $0xf0] sm:$0xff] }
  0xaf   :  { %v967_v28 = vmul.f32 %v716_v9, %v455_v10  ;;  %v391_v9 = vld [vmem:[%s6041_s1 + $0x160] sm:$0xff] }
  0xb0   :  { %1264 = vmatpush2.bf16.msra.mxu0 %v1077_v13  ;;  %4235 = vmatpush2.bf16.msra.mxu1 %v1077_v13  ;;  %v1074_v33 = vpack.c.bf16 %v970_v15, %v968_v16  ;;  %v4735_v13 = vld [vmem:[%s6040_s0 + $0x8] sm:$0xff]  ;;  %v505_v15 = vunpack.c.l.bf16 %v394_v57  ;;  %v503_v16 = vunpack.c.l.bf16 %v393_v58  ;;  %v500_v22 = vunpack.c.h.bf16 %v391_v9  ;;  %v4794_v57 = vld [vmem:[%s6041_s1 + $0x138] sm:$0xff] }
  0xb1   :  { %1265 = vmatprep.subr.bf16.mxu0 %v1076_v17  ;;  %v711_v23 = vpop.permute.xlu1 %710  ;;  %v706_v25 = vpop.permute.xlu0 %705  ;;  %4220 = vmatprep.subr.bf16.mxu1 %v1076_v17  ;;  %v1073_v46 = vpack.c.bf16 %v969_v27, %v967_v28  ;;  %v502_v17 = vunpack.c.h.bf16 %v4727_v6 }
  0xb2   :  { %v966_v31 = vmul.f32 %v711_v23, %v454_v14  ;;  %v964_v32 = vmul.f32 %v706_v25, %v452_v18  ;;  %2527 = vperm.xlu1 %4243, %v2361_v20   ;;  %2522 = vperm.xlu0 %4242, %v2360_v21   ;;  %v965_v44 = vmul.f32 %v711_v23, %v453_v24  ;;  %v2369_v18 = vld [vmem:[%s6042_s3 + $0x108] sm:$0xff]  ;;  %v2368_v23 = vld [vmem:[%s6042_s3 + $0x100] sm:$0xff]  ;;  %v4752_v24 = vld [vmem:[%s6041_s1 + $0x150] sm:$0xff] }
  0xb3   :  { %v963_v45 = vmul.f32 %v706_v25, %v451_v26  ;;  %v4757_v25 = vld [vmem:[%s6040_s0 + $0x100] sm:$0xff]  ;;  %v220_v26 = vunpack.c.l.s8.bf16 %v4735_v13 }
  0xb4   :  { %1266 = vmatpush2.bf16.msra.mxu0 %v1075_v29  ;;  %4236 = vmatpush2.bf16.msra.mxu1 %v1075_v29  ;;  %v1072_v50 = vpack.c.bf16 %v966_v31, %v964_v32  ;;  %v4763_v29 = vld [vmem:[%s6040_s0] sm:$0xff]  ;;  %v501_v31 = vunpack.c.l.bf16 %v4727_v6  ;;  %v499_v32 = vunpack.c.l.bf16 %v391_v9  ;;  %v4815_v6 = vld [vmem:[%s6040_s0 + $0x128] sm:$0xff] }
  0xb5   :  { %1267 = vmatprep.subr.bf16.mxu0 %v1074_v33  ;;  %v701_v40 = vpop.permute.xlu1 %700  ;;  %v696_v42 = vpop.permute.xlu0 %695  ;;  %4221 = vmatprep.subr.bf16.mxu1 %v1074_v33  ;;  %v1071_v62 = vpack.c.bf16 %v965_v44, %v963_v45  ;;  %v498_v33 = vunpack.c.h.bf16 %v4744_v19  ;;  %v2370_v44 = vld [vmem:[%s6042_s3 + $0x110] sm:$0xff]  ;;  %v4783_v45 = vld [vmem:[%s6041_s1 + $0x140] sm:$0xff] }
  0xb6   :  { %v962_v48 = vmul.f32 %v701_v40, %v450_v30  ;;  %v960_v49 = vmul.f32 %v696_v42, %v448_v34  ;;  %2537 = vperm.xlu1 %4243, %v2363_v36   ;;  %2532 = vperm.xlu0 %4242, %v2362_v38   ;;  %v961_v59 = vmul.f32 %v701_v40, %v449_v41  ;;  %v496_v36 = vunpack.c.h.bf16 %v4752_v24 }
  0xb7   :  { %v959_v60 = vmul.f32 %v696_v42, %v447_v43  ;;  %v283_v38 = vunpack.c.l.s8.bf16 %v4757_v25  ;;  %v2371_v43 = vld [vmem:[%s6042_s3 + $0x118] sm:$0xff]  ;;  %1275 = vmatprep.mubr.bf16.mxu0 %v220_v26 }
  0xb8   :  { %1268 = vmatpush2.bf16.msra.mxu0 %v1073_v46  ;;  %4237 = vmatpush2.bf16.msra.mxu1 %v1073_v46  ;;  %v1070_v1 = vpack.c.bf16 %v962_v48, %v960_v49  ;;  %v219_v46 = vunpack.c.l.s8.bf16 %v4763_v29  ;;  %v288_v49 = vunpack.c.h.s8.bf16 %v4439_v37  ;;  %v4799_v37 = vld [vmem:[%s6041_s1 + $0x130] sm:$0xff] }
  0xb9   :  { %1269 = vmatprep.subr.bf16.mxu0 %v1072_v50  ;;  %v691_v54 = vpop.permute.xlu1 %690  ;;  %v686_v56 = vpop.permute.xlu0 %685  ;;  %4222 = vmatprep.subr.bf16.mxu1 %v1072_v50  ;;  %v1069_v12 = vpack.c.bf16 %v961_v59, %v959_v60  ;;  %v497_v50 = vunpack.c.l.bf16 %v4744_v19 }
  0xba   :  { %v958_v63 = vmul.f32 %v691_v54, %v446_v47  ;;  %v956_v0 = vmul.f32 %v686_v56, %v444_v51  ;;  %2547 = vperm.xlu1 %4243, %v2365_v52   ;;  %2542 = vperm.xlu0 %4242, %v2364_v53   ;;  %v957_v10 = vmul.f32 %v691_v54, %v445_v55  ;;  %v495_v51 = vunpack.c.l.bf16 %v4752_v24 }
  0xbb   :  { %v955_v11 = vmul.f32 %v686_v56, %v443_v61  ;;  %v494_v52 = vunpack.c.h.bf16 %v4772_v39  ;;  %v492_v56 = vunpack.c.h.bf16 %v4783_v45  ;;  %v2373_v61 = vld [vmem:[%s6042_s3 + $0x128] sm:$0xff] }
  0xbc   :  { %1270 = vmatpush2.bf16.msra.mxu0 %v1071_v62  ;;  %4238 = vmatpush2.bf16.msra.mxu1 %v1071_v62  ;;  %v1068_v14 = vpack.c.bf16 %v958_v63, %v956_v0  ;;  %v2372_v62 = vld [vmem:[%s6042_s3 + $0x120] sm:$0xff]  ;;  %v224_v63 = vunpack.c.h.s8.bf16 %v4735_v13 }
  0xbd   :  { %1271 = vmatprep.subr.bf16.mxu0 %v1070_v1  ;;  %v841_v7 = vpop.permute.xlu1 %840  ;;  %v836_v8 = vpop.permute.xlu0 %835  ;;  %4223 = vmatprep.subr.bf16.mxu1 %v1070_v1  ;;  %v1067_v30 = vpack.c.bf16 %v957_v10, %v955_v11  ;;  %v287_v10 = vunpack.c.h.s8.bf16 %v4757_v25  ;;  %v4821_v11 = vld [vmem:[%s6041_s1 + $0x128] sm:$0xff] }
  0xbe   :  { %2557 = vperm.xlu1 %4243, %v2367_v4   ;;  %2552 = vperm.xlu0 %4242, %v2366_v5   ;;  %v1018_v20 = vmul.f32 %v841_v7, %v506_v2  ;;  %v1016_v21 = vmul.f32 %v836_v8, %v504_v3  ;;  %v1017_v34 = vmul.f32 %v841_v7, %v505_v15  ;;  %v493_v2 = vunpack.c.l.bf16 %v4772_v39  ;;  %v2375_v15 = vld [vmem:[%s6042_s3 + $0x138] sm:$0xff]  ;;  %v4842_v25 = vld [vmem:[%s6040_s0 + $0x28] sm:$0xff] }
  0xbf   :  { %v1015_v35 = vmul.f32 %v836_v8, %v503_v16  ;;  %v491_v3 = vunpack.c.l.bf16 %v4783_v45  ;;  %v490_v4 = vunpack.c.h.bf16 %v4794_v57  ;;  %v488_v5 = vunpack.c.h.bf16 %v4799_v37  ;;  %v2374_v16 = vld [vmem:[%s6042_s3 + $0x130] sm:$0xff] }
  0xc0   :  { %1272 = vmatpush2.bf16.msra.mxu0 %v1069_v12  ;;  %4239 = vmatpush2.bf16.msra.mxu1 %v1069_v12  ;;  %v1098_v40 = vpack.c.bf16 %v1018_v20, %v1016_v21  ;;  %v292_v21 = vunpack.c.l.s8.bf16 %v4815_v6  ;;  %v486_v24 = vunpack.c.h.bf16 %v4821_v11  ;;  %v228_v39 = vunpack.c.l.s8.bf16 %v4842_v25 }
  0xc1   :  { %1273 = vmatprep.subr.bf16.mxu0 %v1068_v14  ;;  %v831_v27 = vpop.permute.xlu1 %830  ;;  %v826_v28 = vpop.permute.xlu0 %825  ;;  %4224 = vmatprep.subr.bf16.mxu1 %v1068_v14  ;;  %v1097_v53 = vpack.c.bf16 %v1017_v34, %v1015_v35  ;;  %v2377_v35 = vld [vmem:[%s6042_s3 + $0x148] sm:$0xff] }
  0xc2   :  { %2567 = vperm.xlu1 %4243, %v2369_v18   ;;  %2562 = vperm.xlu0 %4242, %v2368_v23   ;;  %v1014_v41 = vmul.f32 %v831_v27, %v502_v17  ;;  %v1012_v42 = vmul.f32 %v826_v28, %v500_v22  ;;  %v1013_v54 = vmul.f32 %v831_v27, %v501_v31  ;;  %v4832_v17 = vld [vmem:[%s6041_s1 + $0x120] sm:$0xff]  ;;  %v223_v18 = vunpack.c.h.s8.bf16 %v4763_v29  ;;  %v4853_v31 = vld [vmem:[%s6041_s1 + $0x110] sm:$0xff] }
  0xc3   :  { %v1011_v55 = vmul.f32 %v826_v28, %v499_v32  ;;  %v489_v22 = vunpack.c.l.bf16 %v4794_v57  ;;  %v487_v23 = vunpack.c.l.bf16 %v4799_v37  ;;  %v484_v29 = vunpack.c.h.bf16 %v4832_v17  ;;  %v4891_v57 = vld [vmem:[%s6041_s1 + $0x100] sm:$0xff] }
  0xc4   :  { %1274 = vmatpush2.bf16.msra.mxu0 %v1067_v30  ;;  %4240 = vmatpush2.bf16.msra.mxu1 %v1067_v30  ;;  %v1096_v58 = vpack.c.bf16 %v1014_v41, %v1012_v42  ;;  %v4848_v30 = vld [vmem:[%s6041_s1 + $0x118] sm:$0xff]  ;;  %v4870_v42 = vld [vmem:[%s6040_s0 + $0x20] sm:$0xff] }
  0xc5   :  { %v821_v47 = vpop.permute.xlu1 %820  ;;  %v816_v48 = vpop.permute.xlu0 %815  ;;  %1596 = vmatprep.subr.bf16.mxu1 %v1098_v40  ;;  %v1095_v7 = vpack.c.bf16 %v1013_v54, %v1011_v55  ;;  %v482_v45 = vunpack.c.h.bf16 %v4848_v30  ;;  %v2379_v55 = vld [vmem:[%s6042_s3 + $0x158] sm:$0xff]  ;;  %v227_v37 = vunpack.c.l.s8.bf16 %v4870_v42 }
  0xc6   :  { %2577 = vperm.xlu1 %4243, %v2371_v43   ;;  %2572 = vperm.xlu0 %4242, %v2370_v44   ;;  %v1010_v59 = vmul.f32 %v821_v47, %v498_v33  ;;  %v1008_v60 = vmul.f32 %v816_v48, %v496_v36  ;;  %v1009_v8 = vmul.f32 %v821_v47, %v497_v50  ;;  %v2376_v36 = vld [vmem:[%s6042_s3 + $0x140] sm:$0xff]  ;;  %v485_v43 = vunpack.c.l.bf16 %v4821_v11 }
  0xc7   :  { %1436 = vmatmul.mubr.bf16.vlgmr.msra.gmra.mxu1 %v283_v38  ;;  %1276 = vmatmul.mubr.bf16.vlgmr.msra.gmra.mxu0 %v219_v46  ;;  %v1007_v9 = vmul.f32 %v816_v48, %v495_v51  ;;  %v4864_v38 = vld [vmem:[%s6040_s0 + $0x120] sm:$0xff]  ;;  %v483_v44 = vunpack.c.l.bf16 %v4832_v17  ;;  %v480_v46 = vunpack.c.h.bf16 %v4853_v31  ;;  %v4880_v51 = vld [vmem:[%s6041_s1 + $0x108] sm:$0xff]  ;;  %v232_v11 = vunpack.c.h.s8.bf16 %v4842_v25 }
  0xc8   :  { %1597 = vmatpush1.bf16.msra.mxu1 %v1097_v53  ;;  %1445 = vmatprep.mubr.bf16.mxu1 %v288_v49  ;;  %v1094_v12 = vpack.c.bf16 %v1010_v59, %v1008_v60  ;;  %v291_v50 = vunpack.c.l.s8.bf16 %v4864_v38  ;;  %v296_v60 = vunpack.c.h.s8.bf16 %v4815_v6 }
  0xc9   :  { %v811_v0 = vpop.permute.xlu1 %810  ;;  %v806_v1 = vpop.permute.xlu0 %805  ;;  %1598 = vmatprep.subr.bf16.mxu1 %v1096_v58  ;;  %1285 = vmatprep.mubr.bf16.mxu0 %v224_v63  ;;  %v1093_v26 = vpack.c.bf16 %v1009_v8, %v1007_v9  ;;  %v478_v63 = vunpack.c.h.bf16 %v4880_v51  ;;  %v2381_v9 = vld [vmem:[%s6042_s3 + $0x168] sm:$0xff] }
  0xca   :  { %2587 = vperm.xlu1 %4243, %v2373_v61   ;;  %2582 = vperm.xlu0 %4242, %v2372_v62   ;;  %v1006_v13 = vmul.f32 %v811_v0, %v494_v52  ;;  %v1004_v14 = vmul.f32 %v806_v1, %v492_v56  ;;  %v1005_v27 = vmul.f32 %v811_v0, %v493_v2  ;;  %v2378_v56 = vld [vmem:[%s6042_s3 + $0x150] sm:$0xff]  ;;  %v481_v61 = vunpack.c.l.bf16 %v4848_v30 }
  0xcb   :  { %v1003_v28 = vmul.f32 %v806_v1, %v491_v3  ;;  %v479_v62 = vunpack.c.l.bf16 %v4853_v31  ;;  %v476_v3 = vunpack.c.h.bf16 %v4891_v57  ;;  %v231_v30 = vunpack.c.h.s8.bf16 %v4870_v42 }
  0xcc   :  { %1599 = vmatpush1.bf16.msra.mxu1 %v1095_v7  ;;  %v1092_v32 = vpack.c.bf16 %v1006_v13, %v1004_v14  ;;  %v477_v14 = vunpack.c.l.bf16 %v4880_v51 }
  0xcd   :  { %v801_v19 = vpop.permute.xlu1 %800  ;;  %v796_v20 = vpop.permute.xlu0 %795  ;;  %1600 = vmatprep.subr.bf16.mxu1 %v1094_v12  ;;  %v1091_v47 = vpack.c.bf16 %v1005_v27, %v1003_v28  ;;  %v2383_v27 = vld [vmem:[%s6042_s3 + $0x178] sm:$0xff]  ;;  %v2382_v28 = vld [vmem:[%s6042_s3 + $0x170] sm:$0xff] }
  0xce   :  { %2597 = vperm.xlu1 %4243, %v2375_v15   ;;  %2592 = vperm.xlu0 %4242, %v2374_v16   ;;  %v1002_v33 = vmul.f32 %v801_v19, %v490_v4  ;;  %v1000_v34 = vmul.f32 %v796_v20, %v488_v5  ;;  %v1001_v48 = vmul.f32 %v801_v19, %v489_v22  ;;  %v4902_v4 = vld [vmem:[%s6041_s1 + $0x1f8] sm:$0xff]  ;;  %v4907_v5 = vld [vmem:[%s6041_s1 + $0x1f0] sm:$0xff]  ;;  %v475_v15 = vunpack.c.l.bf16 %v4891_v57 }
  0xcf   :  { %1446 = vmatmul.mubr.bf16.gmra.mxu1 %v287_v10  ;;  %1286 = vmatmul.mubr.bf16.gmra.mxu0 %v223_v18  ;;  %v999_v49 = vmul.f32 %v796_v20, %v487_v23  ;;  %v2380_v10 = vld [vmem:[%s6042_s3 + $0x160] sm:$0xff]  ;;  %v538_v16 = vunpack.c.h.bf16 %v4902_v4  ;;  %v536_v17 = vunpack.c.h.bf16 %v4907_v5  ;;  %v4923_v18 = vld [vmem:[%s6040_s0 + $0x148] sm:$0xff]  ;;  %v295_v22 = vunpack.c.h.s8.bf16 %v4864_v38 }
  0xd0   :  { %1601 = vmatpush1.bf16.msra.mxu1 %v1093_v26  ;;  %1455 = vmatprep.mubr.bf16.mxu1 %v292_v21  ;;  %v1090_v52 = vpack.c.bf16 %v1002_v33, %v1000_v34  ;;  %v4929_v23 = vld [vmem:[%s6041_s1 + $0x1e8] sm:$0xff]  ;;  %v300_v33 = vunpack.c.l.s8.bf16 %v4923_v18  ;;  %v537_v34 = vunpack.c.l.bf16 %v4902_v4  ;;  %v4999_v4 = vld [vmem:[%s6041_s1 + $0x1c0] sm:$0xff] }
  0xd1   :  { %v791_v40 = vpop.permute.xlu1 %790  ;;  %v786_v41 = vpop.permute.xlu0 %785  ;;  %1602 = vmatprep.subr.bf16.mxu1 %v1092_v32  ;;  %1295 = vmatprep.mubr.bf16.mxu0 %v228_v39  ;;  %v1089_v0 = vpack.c.bf16 %v1001_v48, %v999_v49  ;;  %v4950_v38 = vld [vmem:[%s6040_s0 + $0x48] sm:$0xff]  ;;  %v2384_v49 = vld [vmem:[%s6042_s3 + $0x180] sm:$0xff] }
  0xd2   :  { %2607 = vperm.xlu1 %4243, %v2377_v35   ;;  %2602 = vperm.xlu0 %4242, %v2376_v36   ;;  %v998_v53 = vmul.f32 %v791_v40, %v486_v24  ;;  %v996_v54 = vmul.f32 %v786_v41, %v484_v29  ;;  %v997_v1 = vmul.f32 %v791_v40, %v485_v43  ;;  %v4940_v29 = vld [vmem:[%s6041_s1 + $0x1e0] sm:$0xff]  ;;  %v535_v35 = vunpack.c.l.bf16 %v4907_v5  ;;  %v4956_v43 = vld [vmem:[%s6041_s1 + $0x1d8] sm:$0xff]  ;;  %v2385_v48 = vld [vmem:[%s6042_s3 + $0x188] sm:$0xff] }
  0xd3   :  { %v995_v2 = vmul.f32 %v786_v41, %v483_v44  ;;  %v534_v36 = vunpack.c.h.bf16 %v4929_v23  ;;  %v532_v42 = vunpack.c.h.bf16 %v4940_v29  ;;  %v4961_v44 = vld [vmem:[%s6041_s1 + $0x1d0] sm:$0xff]  ;;  %v236_v51 = vunpack.c.l.s8.bf16 %v4950_v38 }
  0xd4   :  { %1603 = vmatpush1.bf16.msra.mxu1 %v1091_v47  ;;  %v1088_v6 = vpack.c.bf16 %v998_v53, %v996_v54  ;;  %v4978_v54 = vld [vmem:[%s6040_s0 + $0x40] sm:$0xff]  ;;  %v530_v57 = vunpack.c.h.bf16 %v4956_v43 }
  0xd5   :  { %v781_v58 = vpop.permute.xlu1 %780  ;;  %v776_v59 = vpop.permute.xlu0 %775  ;;  %1604 = vmatprep.subr.bf16.mxu1 %v1090_v52  ;;  %v1087_v19 = vpack.c.bf16 %v997_v1, %v995_v2  ;;  %v2387_v2 = vld [vmem:[%s6042_s3 + $0x198] sm:$0xff]  ;;  %v235_v5 = vunpack.c.l.s8.bf16 %v4978_v54 }
  0xd6   :  { %2617 = vperm.xlu1 %4243, %v2379_v55   ;;  %2612 = vperm.xlu0 %4242, %v2378_v56   ;;  %v994_v7 = vmul.f32 %v781_v58, %v482_v45  ;;  %v992_v8 = vmul.f32 %v776_v59, %v480_v46  ;;  %v993_v20 = vmul.f32 %v781_v58, %v481_v61  ;;  %v533_v55 = vunpack.c.l.bf16 %v4929_v23 }
  0xd7   :  { %1456 = vmatmul.mubr.bf16.gmra.mxu1 %v291_v50  ;;  %1296 = vmatmul.mubr.bf16.gmra.mxu0 %v227_v37  ;;  %v991_v21 = vmul.f32 %v776_v59, %v479_v62  ;;  %v4972_v50 = vld [vmem:[%s6040_s0 + $0x140] sm:$0xff]  ;;  %v531_v56 = vunpack.c.l.bf16 %v4940_v29  ;;  %v528_v37 = vunpack.c.h.bf16 %v4961_v44  ;;  %v4988_v62 = vld [vmem:[%s6041_s1 + $0x1c8] sm:$0xff]  ;;  %v240_v23 = vunpack.c.h.s8.bf16 %v4950_v38 }
  0xd8   :  { %1605 = vmatpush1.bf16.msra.mxu1 %v1089_v0  ;;  %1465 = vmatprep.mubr.bf16.mxu1 %v296_v60  ;;  %v1086_v24 = vpack.c.bf16 %v994_v7, %v992_v8  ;;  %v299_v61 = vunpack.c.l.s8.bf16 %v4972_v50  ;;  %v304_v8 = vunpack.c.h.s8.bf16 %v4923_v18 }
  0xd9   :  { %v771_v12 = vpop.permute.xlu1 %770  ;;  %v766_v13 = vpop.permute.xlu0 %765  ;;  %1606 = vmatprep.subr.bf16.mxu1 %v1088_v6  ;;  %1305 = vmatprep.mubr.bf16.mxu0 %v232_v11  ;;  %v1085_v39 = vpack.c.bf16 %v993_v20, %v991_v21  ;;  %v526_v11 = vunpack.c.h.bf16 %v4988_v62  ;;  %v2389_v21 = vld [vmem:[%s6042_s3 + $0x1a8] sm:$0xff] }
  0xda   :  { %2627 = vperm.xlu1 %4243, %v2381_v9   ;;  %2622 = vperm.xlu0 %4242, %v2380_v10   ;;  %v990_v25 = vmul.f32 %v771_v12, %v478_v63  ;;  %v988_v26 = vmul.f32 %v766_v13, %v476_v3  ;;  %v989_v40 = vmul.f32 %v771_v12, %v477_v14  ;;  %v2386_v3 = vld [vmem:[%s6042_s3 + $0x190] sm:$0xff]  ;;  %v529_v9 = vunpack.c.l.bf16 %v4956_v43 }
  0xdb   :  { %v987_v41 = vmul.f32 %v766_v13, %v475_v15  ;;  %v527_v10 = vunpack.c.l.bf16 %v4961_v44  ;;  %v524_v15 = vunpack.c.h.bf16 %v4999_v4  ;;  %v239_v43 = vunpack.c.h.s8.bf16 %v4978_v54 }
  0xdc   :  { %1607 = vmatpush1.bf16.msra.mxu1 %v1087_v19  ;;  %v1084_v45 = vpack.c.bf16 %v990_v25, %v988_v26  ;;  %v525_v26 = vunpack.c.l.bf16 %v4988_v62 }
  0xdd   :  { %v921_v31 = vpop.permute.xlu1 %920  ;;  %v916_v32 = vpop.permute.xlu0 %915  ;;  %1608 = vmatprep.subr.bf16.mxu1 %v1086_v24  ;;  %v1083_v58 = vpack.c.bf16 %v989_v40, %v987_v41  ;;  %v2391_v40 = vld [vmem:[%s6042_s3 + $0x1b8] sm:$0xff]  ;;  %v2390_v41 = vld [vmem:[%s6042_s3 + $0x1b0] sm:$0xff] }
  0xde   :  { %2637 = vperm.xlu1 %4243, %v2383_v27   ;;  %2632 = vperm.xlu0 %4242, %v2382_v28   ;;  %v1050_v46 = vmul.f32 %v921_v31, %v538_v16  ;;  %v1048_v47 = vmul.f32 %v916_v32, %v536_v17  ;;  %v1049_v59 = vmul.f32 %v921_v31, %v537_v34  ;;  %v5010_v16 = vld [vmem:[%s6041_s1 + $0x1b8] sm:$0xff]  ;;  %v5015_v17 = vld [vmem:[%s6041_s1 + $0x1b0] sm:$0xff]  ;;  %v523_v27 = vunpack.c.l.bf16 %v4999_v4 }
  0xdf   :  { %1466 = vmatmul.mubr.bf16.gmra.mxu1 %v295_v22  ;;  %1306 = vmatmul.mubr.bf16.gmra.mxu0 %v231_v30  ;;  %v1047_v60 = vmul.f32 %v916_v32, %v535_v35  ;;  %v2388_v22 = vld [vmem:[%s6042_s3 + $0x1a0] sm:$0xff]  ;;  %v522_v28 = vunpack.c.h.bf16 %v5010_v16  ;;  %v520_v29 = vunpack.c.h.bf16 %v5015_v17  ;;  %v5031_v30 = vld [vmem:[%s6040_s0 + $0x168] sm:$0xff]  ;;  %v303_v34 = vunpack.c.h.s8.bf16 %v4972_v50 }
  0xe0   :  { %1609 = vmatpush1.bf16.msra.mxu1 %v1085_v39  ;;  %1475 = vmatprep.mubr.bf16.mxu1 %v300_v33  ;;  %v1114_v63 = vpack.c.bf16 %v1050_v46, %v1048_v47  ;;  %v5037_v35 = vld [vmem:[%s6041_s1 + $0x1a8] sm:$0xff]  ;;  %v308_v46 = vunpack.c.l.s8.bf16 %v5031_v30  ;;  %v521_v47 = vunpack.c.l.bf16 %v5010_v16  ;;  %v395_v16 = vld [vmem:[%s6041_s1 + $0x180] sm:$0xff] }
  0xe1   :  { %v911_v52 = vpop.permute.xlu1 %910  ;;  %v906_v53 = vpop.permute.xlu0 %905  ;;  %1610 = vmatprep.subr.bf16.mxu1 %v1084_v45  ;;  %1315 = vmatprep.mubr.bf16.mxu0 %v236_v51  ;;  %v1113_v12 = vpack.c.bf16 %v1049_v59, %v1047_v60  ;;  %v5058_v50 = vld [vmem:[%s6040_s0 + $0x68] sm:$0xff]  ;;  %v2392_v60 = vld [vmem:[%s6042_s3 + $0x1c0] sm:$0xff] }
  0xe2   :  { %2647 = vperm.xlu1 %4243, %v2385_v48   ;;  %2642 = vperm.xlu0 %4242, %v2384_v49   ;;  %v1046_v0 = vmul.f32 %v911_v52, %v534_v36  ;;  %v1044_v1 = vmul.f32 %v906_v53, %v532_v42  ;;  %v1045_v13 = vmul.f32 %v911_v52, %v533_v55  ;;  %v5048_v42 = vld [vmem:[%s6041_s1 + $0x1a0] sm:$0xff]  ;;  %v519_v48 = vunpack.c.l.bf16 %v5015_v17  ;;  %v5064_v55 = vld [vmem:[%s6041_s1 + $0x198] sm:$0xff]  ;;  %v2393_v59 = vld [vmem:[%s6042_s3 + $0x1c8] sm:$0xff] }
  0xe3   :  { %v1043_v14 = vmul.f32 %v906_v53, %v531_v56  ;;  %v518_v49 = vunpack.c.h.bf16 %v5037_v35  ;;  %v516_v54 = vunpack.c.h.bf16 %v5048_v42  ;;  %v5069_v56 = vld [vmem:[%s6041_s1 + $0x190] sm:$0xff]  ;;  %v244_v62 = vunpack.c.l.s8.bf16 %v5058_v50 }
  0xe4   :  { %1611 = vmatpush1.bf16.msra.mxu1 %v1083_v58  ;;  %v1112_v18 = vpack.c.bf16 %v1046_v0, %v1044_v1  ;;  %v5086_v1 = vld [vmem:[%s6040_s0 + $0x60] sm:$0xff]  ;;  %v514_v4 = vunpack.c.h.bf16 %v5064_v55 }
  0xe5   :  { %v901_v6 = vpop.permute.xlu1 %900  ;;  %v896_v7 = vpop.permute.xlu0 %895  ;;  %1612 = vmatprep.subr.bf16.mxu1 %v1114_v63  ;;  %v1111_v31 = vpack.c.bf16 %v1045_v13, %v1043_v14  ;;  %v2395_v14 = vld [vmem:[%s6042_s3 + $0x1d8] sm:$0xff]  ;;  %v243_v17 = vunpack.c.l.s8.bf16 %v5086_v1 }
  0xe6   :  { %2657 = vperm.xlu1 %4243, %v2387_v2   ;;  %2652 = vperm.xlu0 %4242, %v2386_v3   ;;  %v1042_v19 = vmul.f32 %v901_v6, %v530_v57  ;;  %v1040_v20 = vmul.f32 %v896_v7, %v528_v37  ;;  %v1041_v32 = vmul.f32 %v901_v6, %v529_v9  ;;  %v517_v2 = vunpack.c.l.bf16 %v5037_v35 }
  0xe7   :  { %1476 = vmatmul.mubr.bf16.gmra.mxu1 %v299_v61  ;;  %1316 = vmatmul.mubr.bf16.gmra.mxu0 %v235_v5  ;;  %v1039_v33 = vmul.f32 %v896_v7, %v527_v10  ;;  %v5080_v61 = vld [vmem:[%s6040_s0 + $0x160] sm:$0xff]  ;;  %v515_v3 = vunpack.c.l.bf16 %v5048_v42  ;;  %v512_v5 = vunpack.c.h.bf16 %v5069_v56  ;;  %v396_v10 = vld [vmem:[%s6041_s1 + $0x188] sm:$0xff] }
  0xe8   :  { %1613 = vmatpush2.bf16.msra.mxu1 %v1113_v12  ;;  %1485 = vmatprep.mubr.bf16.mxu1 %v304_v8  ;;  %v1110_v36 = vpack.c.bf16 %v1042_v19, %v1040_v20  ;;  %v307_v9 = vunpack.c.l.s8.bf16 %v5080_v61  ;;  %v312_v20 = vunpack.c.h.s8.bf16 %v5031_v30  ;;  %v2397_v30 = vld [vmem:[%s6042_s3 + $0x1e8] sm:$0xff] }
  0xe9   :  { %v891_v24 = vpop.permute.xlu1 %890  ;;  %v886_v25 = vpop.permute.xlu0 %885  ;;  %1614 = vmatprep.subr.bf16.mxu1 %v1112_v18  ;;  %1325 = vmatprep.mubr.bf16.mxu0 %v240_v23  ;;  %v1109_v51 = vpack.c.bf16 %v1041_v32, %v1039_v33  ;;  %v510_v23 = vunpack.c.h.bf16 %v396_v10  ;;  %v2396_v32 = vld [vmem:[%s6042_s3 + $0x1e0] sm:$0xff]  ;;  %v248_v33 = vunpack.c.h.s8.bf16 %v5058_v50 }
  0xea   :  { %2667 = vperm.xlu1 %4243, %v2389_v21   ;;  %2662 = vperm.xlu0 %4242, %v2388_v22   ;;  %v1038_v38 = vmul.f32 %v891_v24, %v526_v11  ;;  %v1036_v39 = vmul.f32 %v886_v25, %v524_v15  ;;  %v1037_v52 = vmul.f32 %v891_v24, %v525_v26  ;;  %v2394_v15 = vld [vmem:[%s6042_s3 + $0x1d0] sm:$0xff]  ;;  %v513_v21 = vunpack.c.l.bf16 %v5064_v55 }
  0xeb   :  { %v1035_v53 = vmul.f32 %v886_v25, %v523_v27  ;;  %v511_v22 = vunpack.c.l.bf16 %v5069_v56  ;;  %v508_v27 = vunpack.c.h.bf16 %v395_v16 }
  0xec   :  { %1615 = vmatpush2.bf16.msra.mxu1 %v1111_v31  ;;  %v1108_v57 = vpack.c.bf16 %v1038_v38, %v1036_v39  ;;  %v507_v38 = vunpack.c.l.bf16 %v395_v16  ;;  %v204_v39 = vld [vmem:[%s6040_s0 + $0x188] sm:$0xff] }
  0xed   :  { %v881_v44 = vpop.permute.xlu1 %880  ;;  %v876_v45 = vpop.permute.xlu0 %875  ;;  %1616 = vmatprep.subr.bf16.mxu1 %v1110_v36  ;;  %v1107_v6 = vpack.c.bf16 %v1037_v52, %v1035_v53  ;;  %v509_v36 = vunpack.c.l.bf16 %v396_v10  ;;  %v316_v50 = vunpack.c.l.s8.bf16 %v204_v39  ;;  %v4244_v10 = vld [vmem:[%s6043_s4 + $0x70] ss:$8 sps:$4 sm:$0xff]  }
  0xee   :  { %2677 = vperm.xlu1 %4243, %v2391_v40   ;;  %2672 = vperm.xlu0 %4242, %v2390_v41   ;;  %v1034_v37 = vmul.f32 %v881_v44, %v522_v28  ;;  %v1032_v58 = vmul.f32 %v876_v45, %v520_v29  ;;  %v1033_v7 = vmul.f32 %v881_v44, %v521_v47  ;;  %v2399_v47 = vld [vmem:[%s6042_s3 + $0x1f8] sm:$0xff] }
  0xef   :  { %1486 = vmatmul.mubr.bf16.gmra.mxu1 %v303_v34  ;;  %1326 = vmatmul.mubr.bf16.gmra.mxu0 %v239_v43  ;;  %v1031_v8 = vmul.f32 %v876_v45, %v519_v48  ;;  %v311_v43 = vunpack.c.h.s8.bf16 %v5080_v61  ;;  %v2398_v48 = vld [vmem:[%s6042_s3 + $0x1f0] sm:$0xff]  ;;  %v320_v61 = vunpack.c.h.s8.bf16 %v204_v39  ;;  %v183_v39 = vld [vmem:[%s6040_s0 + $0xe0] sm:$0xff] }
  0xf0   :  { %1617 = vmatpush2.bf16.msra.mxu1 %v1109_v51  ;;  %1495 = vmatprep.mubr.bf16.mxu1 %v308_v46  ;;  %v1106_v11 = vpack.c.bf16 %v1034_v37, %v1032_v58  ;;  %v172_v51 = vld [vmem:[%s6040_s0 + $0x88] sm:$0xff]  ;;  %v171_v37 = vld [vmem:[%s6040_s0 + $0x80] sm:$0xff] }
  0xf1   :  { %v871_v63 = vpop.permute.xlu1 %870  ;;  %v866_v0 = vpop.permute.xlu0 %865  ;;  %1618 = vmatprep.subr.bf16.mxu1 %v1108_v57  ;;  %1335 = vmatprep.mubr.bf16.mxu0 %v244_v62  ;;  %v1105_v24 = vpack.c.bf16 %v1033_v7, %v1031_v8  ;;  %v252_v55 = vunpack.c.l.s8.bf16 %v172_v51  ;;  %v203_v57 = vld [vmem:[%s6040_s0 + $0x180] sm:$0xff]  ;;  %v256_v62 = vunpack.c.h.s8.bf16 %v172_v51 }
  0xf2   :  { %2687 = vperm.xlu1 %4243, %v2393_v59   ;;  %2682 = vperm.xlu0 %4242, %v2392_v60   ;;  %v1030_v12 = vmul.f32 %v871_v63, %v518_v49  ;;  %v1028_v13 = vmul.f32 %v866_v0, %v516_v54  ;;  %v1029_v25 = vmul.f32 %v871_v63, %v517_v2  ;;  %v247_v49 = vunpack.c.h.s8.bf16 %v5086_v1  ;;  %v208_v63 = vld [vmem:[%s6040_s0 + $0x1a8] sm:$0xff] }
  0xf3   :  { %v1027_v26 = vmul.f32 %v866_v0, %v515_v3  ;;  %v315_v59 = vunpack.c.l.s8.bf16 %v203_v57  ;;  %v251_v60 = vunpack.c.l.s8.bf16 %v171_v37  ;;  %v319_v0 = vunpack.c.h.s8.bf16 %v203_v57  ;;  %v176_v3 = vld [vmem:[%s6040_s0 + $0xa8] sm:$0xff]  ;;  %v162_v57 = vld [vmem:[%s6040_s0 + $0x38] sm:$0xff] }
  0xf4   :  { %1619 = vmatpush2.bf16.msra.mxu1 %v1107_v6  ;;  %v1104_v28 = vpack.c.bf16 %v1030_v12, %v1028_v13  ;;  %v255_v1 = vunpack.c.h.s8.bf16 %v171_v37  ;;  %v324_v2 = vunpack.c.l.s8.bf16 %v208_v63  ;;  %v175_v6 = vld [vmem:[%s6040_s0 + $0xa0] sm:$0xff]  ;;  %v212_v12 = vld [vmem:[%s6040_s0 + $0x1c8] sm:$0xff]  ;;  %v4246_v13 = vld [vmem:[%s6043_s4 + $0x74] ss:$8 sps:$4 sm:$0xff]  }
  0xf5   :  { %v861_v18 = vpop.permute.xlu1 %860  ;;  %v856_v19 = vpop.permute.xlu0 %855  ;;  %1620 = vmatprep.subr.bf16.mxu1 %v1106_v11  ;;  %v1103_v40 = vpack.c.bf16 %v1029_v25, %v1027_v26  ;;  %v259_v8 = vunpack.c.l.s8.bf16 %v175_v6  ;;  %v264_v11 = vunpack.c.h.s8.bf16 %v176_v3  ;;  %3116 = vmatprep.subr.bf16.mxu0 %v4246_v13  ;;  %v332_v16 = vunpack.c.l.s8.bf16 %v212_v12  ;;  %v4250_v26 = vld [vmem:[%s6043_s4 + $0x50] ss:$8 sps:$4 sm:$0xff]   ;;  %v4261_v51 = vld [vmem:[%s6043_s4 + $0x24] ss:$8 sps:$4 sm:$0xff]  }
  0xf6   :  { %2697 = vperm.xlu1 %4243, %v2395_v14   ;;  %2692 = vperm.xlu0 %4242, %v2394_v15   ;;  %v1026_v29 = vmul.f32 %v861_v18, %v514_v4  ;;  %v1024_v31 = vmul.f32 %v856_v19, %v512_v5  ;;  %v1025_v41 = vmul.f32 %v861_v18, %v513_v21  ;;  %v260_v4 = vunpack.c.l.s8.bf16 %v176_v3  ;;  %v207_v5 = vld [vmem:[%s6040_s0 + $0x1a0] sm:$0xff] }
  0xf7   :  { %1496 = vmatmul.mubr.bf16.gmra.mxu1 %v307_v9  ;;  %1336 = vmatmul.mubr.bf16.gmra.mxu0 %v243_v17  ;;  %v1023_v42 = vmul.f32 %v856_v19, %v511_v22  ;;  %v323_v7 = vunpack.c.l.s8.bf16 %v207_v5  ;;  %v328_v9 = vunpack.c.h.s8.bf16 %v208_v63  ;;  %v327_v14 = vunpack.c.h.s8.bf16 %v207_v5  ;;  %v4247_v17 = vld [vmem:[%s6043_s4 + $0x60] ss:$8 sps:$4 sm:$0xff]   ;;  %v4249_v18 = vld [vmem:[%s6043_s4 + $0x64] ss:$8 sps:$4 sm:$0xff]  }
  0xf8   :  { %1621 = vmatpush2.bf16.msra.mxu1 %v1105_v24  ;;  %1505 = vmatprep.mubr.bf16.mxu1 %v312_v20  ;;  %v1102_v44 = vpack.c.bf16 %v1026_v29, %v1024_v31  ;;  %v263_v15 = vunpack.c.h.s8.bf16 %v175_v6  ;;  %v180_v19 = vld [vmem:[%s6040_s0 + $0xc8] sm:$0xff]  ;;  %v211_v20 = vld [vmem:[%s6040_s0 + $0x1c0] sm:$0xff]  ;;  %v336_v25 = vunpack.c.h.s8.bf16 %v212_v12  ;;  %v234_v63 = vunpack.c.h.s8.bf16 %v162_v57  ;;  %v170_v12 = vld [vmem:[%s6040_s0 + $0x78] sm:$0xff] }
  0xf9   :  { %v851_v34 = vpop.permute.xlu1 %850  ;;  %v846_v35 = vpop.permute.xlu0 %845  ;;  %1622 = vmatprep.subr.bf16.mxu1 %v1104_v28  ;;  %1345 = vmatprep.mubr.bf16.mxu0 %v248_v33  ;;  %v1101_v52 = vpack.c.bf16 %v1025_v41, %v1023_v42  ;;  %v268_v21 = vunpack.c.l.s8.bf16 %v180_v19  ;;  %v179_v22 = vld [vmem:[%s6040_s0 + $0xc0] sm:$0xff]  ;;  %v272_v28 = vunpack.c.h.s8.bf16 %v180_v19  ;;  %v216_v29 = vld [vmem:[%s6040_s0 + $0x1e8] sm:$0xff]  ;;  %v335_v31 = vunpack.c.h.s8.bf16 %v211_v20 }
  0xfa   :  { %2707 = vperm.xlu1 %4243, %v2397_v30   ;;  %2702 = vperm.xlu0 %4242, %v2396_v32   ;;  %v1022_v45 = vmul.f32 %v851_v34, %v510_v23  ;;  %v1020_v46 = vmul.f32 %v846_v35, %v508_v27  ;;  %v1021_v53 = vmul.f32 %v851_v34, %v509_v36  ;;  %v331_v23 = vunpack.c.l.s8.bf16 %v211_v20  ;;  %v4252_v27 = vld [vmem:[%s6043_s4 + $0x54] ss:$8 sps:$4 sm:$0xff]   ;;  %v4253_v33 = vld [vmem:[%s6043_s4 + $0x40] ss:$8 sps:$4 sm:$0xff]   ;;  %v4255_v34 = vld [vmem:[%s6043_s4 + $0x44] ss:$8 sps:$4 sm:$0xff]  }
  0xfb   :  { %v1019_v54 = vmul.f32 %v846_v35, %v507_v38  ;;  %3117 = vmatpush1.bf16.msra.mxu0 %v4244_v10  ;;  %v267_v24 = vunpack.c.l.s8.bf16 %v179_v22  ;;  %v271_v30 = vunpack.c.h.s8.bf16 %v179_v22  ;;  %v340_v32 = vunpack.c.l.s8.bf16 %v216_v29  ;;  %v184_v35 = vld [vmem:[%s6040_s0 + $0xe8] sm:$0xff]  ;;  %v215_v38 = vld [vmem:[%s6040_s0 + $0x1e0] sm:$0xff]  ;;  %v4274_v10 = vld [vmem:[%s6043_s4 + $0xd0] ss:$8 sps:$4 sm:$0xff]  }
  0xfc   :  { %1623 = vmatpush2.bf16.msra.mxu1 %v1103_v40  ;;  %v1100_v56 = vpack.c.bf16 %v1022_v45, %v1020_v46  ;;  %3118 = vmatprep.subr.bf16.mxu0 %v4249_v18  ;;  %v276_v36 = vunpack.c.l.s8.bf16 %v184_v35  ;;  %v339_v40 = vunpack.c.l.s8.bf16 %v215_v38  ;;  %v275_v41 = vunpack.c.l.s8.bf16 %v183_v39  ;;  %v158_v46 = vld [vmem:[%s6040_s0 + $0x18] sm:$0xff]  ;;  %v4271_v5 = vld [vmem:[%s6043_s4 + $0xe0] ss:$8 sps:$4 sm:$0xff]   ;;  %v4273_v6 = vld [vmem:[%s6043_s4 + $0xe4] ss:$8 sps:$4 sm:$0xff]  }
  0xfd   :  { %1624 = vmatprep.subr.bf16.mxu1 %v1102_v44  ;;  %v1099_v58 = vpack.c.bf16 %v1021_v53, %v1019_v54  ;;  %v344_v42 = vunpack.c.h.s8.bf16 %v216_v29  ;;  %v4258_v44 = vld [vmem:[%s6043_s4 + $0x34] ss:$8 sps:$4 sm:$0xff]   ;;  %v280_v45 = vunpack.c.h.s8.bf16 %v184_v35  ;;  %v226_v54 = vunpack.c.h.s8.bf16 %v158_v46  ;;  %v4280_v20 = vld [vmem:[%s6043_s4 + $0xb0] ss:$8 sps:$4 sm:$0xff]  }
  0xfe   :  { %2717 = vperm.xlu1 %4243, %v2399_v47   ;;  %2712 = vperm.xlu0 %4242, %v2398_v48   ;;  %v343_v47 = vunpack.c.h.s8.bf16 %v215_v38  ;;  %v279_v48 = vunpack.c.h.s8.bf16 %v183_v39  ;;  %v250_v19 = vunpack.c.h.s8.bf16 %v170_v12  ;;  %v174_v22 = vld [vmem:[%s6040_s0 + $0x98] sm:$0xff] }
  0xff   :  { %1506 = vmatmul.mubr.bf16.gmra.mxu1 %v311_v43  ;;  %1346 = vmatmul.mubr.bf16.gmra.mxu0 %v247_v49  ;;  %v4256_v43 = vld [vmem:[%s6043_s4 + $0x30] ss:$8 sps:$4 sm:$0xff]   ;;  %v222_v49 = vunpack.c.l.s8.bf16 %v158_v46  ;;  %v258_v29 = vunpack.c.h.s8.bf16 %v174_v22 }
 0x100   :  { %1625 = vmatpush2.bf16.msra.mxu1 %v1101_v52  ;;  %1515 = vmatprep.mubr.bf16.mxu1 %v316_v50  ;;  %v4259_v50 = vld [vmem:[%s6043_s4 + $0x20] ss:$8 sps:$4 sm:$0xff]   ;;  %v157_v52 = vld [vmem:[%s6040_s0 + $0x10] sm:$0xff] }
 0x101   :  { %1626 = vmatprep.subr.bf16.mxu1 %v1100_v56  ;;  %1355 = vmatprep.mubr.bf16.mxu0 %v252_v55  ;;  %v221_v53 = vunpack.c.l.s8.bf16 %v157_v52  ;;  %v4262_v55 = vld [vmem:[%s6043_s4 + $0x10] ss:$8 sps:$4 sm:$0xff]   ;;  %v4264_v56 = vld [vmem:[%s6043_s4 + $0x14] ss:$8 sps:$4 sm:$0xff]   ;;  %v225_v37 = vunpack.c.h.s8.bf16 %v157_v52 }
 0x102   :  { %3119 = vmatpush1.bf16.msra.mxu0 %v4247_v17  ;;  %v169_v17 = vld [vmem:[%s6040_s0 + $0x70] sm:$0xff] }
 0x103   :  { %3120 = vmatprep.subr.bf16.mxu0 %v4252_v27  ;;  %v245_v18 = vunpack.c.l.s8.bf16 %v169_v17  ;;  %v173_v27 = vld [vmem:[%s6040_s0 + $0x90] sm:$0xff] }
 0x104   :  { %1627 = vmatpush2.bf16.msra.mxu1 %v1099_v58  ;;  %v230_v58 = vunpack.c.l.s8.bf16 %v162_v57  ;;  %v257_v38 = vunpack.c.h.s8.bf16 %v173_v27 }
 0x106   :  { %3121 = vmatpush1.bf16.msra.mxu0 %v4250_v26  ;;  %v4285_v26 = vld [vmem:[%s6043_s4 + $0xa4] ss:$8 sps:$4 sm:$0xff]  }
 0x107   :  { %1516 = vmatmul.mubr.bf16.gmra.mxu1 %v315_v59  ;;  %1356 = vmatmul.mubr.bf16.gmra.mxu0 %v251_v60  ;;  %v4265_v59 = vld [vmem:[%s6043_s4] ss:$8 sps:$4 sm:$0xff]   ;;  %v4267_v60 = vld [vmem:[%s6043_s4 + $0x4] ss:$8 sps:$4 sm:$0xff]  }
 0x108   :  { %1525 = vmatprep.mubr.bf16.mxu1 %v320_v61  ;;  %1365 = vmatprep.mubr.bf16.mxu0 %v256_v62  ;;  %v161_v61 = vld [vmem:[%s6040_s0 + $0x30] sm:$0xff] }
 0x109   :  { %3122 = vmatprep.subr.bf16.mxu0 %v4255_v34  ;;  %v229_v62 = vunpack.c.l.s8.bf16 %v161_v61  ;;  %v233_v3 = vunpack.c.h.s8.bf16 %v161_v61  ;;  %v178_v34 = vld [vmem:[%s6040_s0 + $0xb8] sm:$0xff] }
 0x10a   :  { %3123 = vmatpush1.bf16.msra.mxu0 %v4253_v33  ;;  %v262_v39 = vunpack.c.l.s8.bf16 %v178_v34 }
 0x10b   :  { %3124 = vmatprep.subr.bf16.mxu0 %v4258_v44  ;;  %v177_v44 = vld [vmem:[%s6040_s0 + $0xb0] sm:$0xff] }
 0x10e   :  { %3125 = vmatpush1.bf16.msra.mxu0 %v4256_v43  ;;  %v4291_v43 = vld [vmem:[%s6043_s4 + $0x84] ss:$8 sps:$4 sm:$0xff]  }
 0x10f   :  { %1526 = vmatmul.mubr.bf16.gmra.mxu1 %v319_v0  ;;  %1366 = vmatmul.mubr.bf16.gmra.mxu0 %v255_v1  ;;  %v4268_v0 = vld [vmem:[%s6043_s4 + $0xf0] ss:$8 sps:$4 sm:$0xff]   ;;  %v4270_v1 = vld [vmem:[%s6043_s4 + $0xf4] ss:$8 sps:$4 sm:$0xff]  }
 0x110   :  { %1535 = vmatprep.mubr.bf16.mxu1 %v324_v2  ;;  %1375 = vmatprep.mubr.bf16.mxu0 %v260_v4  ;;  %v166_v2 = vld [vmem:[%s6040_s0 + $0x58] sm:$0xff] }
 0x111   :  { %3126 = vmatprep.subr.bf16.mxu0 %v4261_v51  ;;  %v238_v4 = vunpack.c.l.s8.bf16 %v166_v2 }
 0x112   :  { %3127 = vmatpush1.bf16.msra.mxu0 %v4259_v50  ;;  %v266_v50 = vunpack.c.h.s8.bf16 %v178_v34 }
 0x113   :  { %3128 = vmatprep.subr.bf16.mxu0 %v4264_v56 }
 0x116   :  { %3129 = vmatpush1.bf16.msra.mxu0 %v4262_v55  ;;  %v182_v55 = vld [vmem:[%s6040_s0 + $0xd8] sm:$0xff] }
 0x117   :  { %1536 = vmatmul.mubr.bf16.gmra.mxu1 %v323_v7  ;;  %1376 = vmatmul.mubr.bf16.gmra.mxu0 %v259_v8  ;;  %v165_v7 = vld [vmem:[%s6040_s0 + $0x50] sm:$0xff] }
 0x118   :  { %1545 = vmatprep.mubr.bf16.mxu1 %v328_v9  ;;  %1385 = vmatprep.mubr.bf16.mxu0 %v264_v11  ;;  %v237_v8 = vunpack.c.l.s8.bf16 %v165_v7  ;;  %v242_v9 = vunpack.c.h.s8.bf16 %v166_v2  ;;  %v4276_v11 = vld [vmem:[%s6043_s4 + $0xd4] ss:$8 sps:$4 sm:$0xff]   ;;  %v241_v13 = vunpack.c.h.s8.bf16 %v165_v7 }
 0x119   :  { %3130 = vmatprep.subr.bf16.mxu0 %v4267_v60 }
 0x11a   :  { %3131 = vmatpush1.bf16.msra.mxu0 %v4265_v59 }
 0x11b   :  { %3132 = vmatprep.subr.bf16.mxu0 %v4270_v1 }
 0x11e   :  { %3133 = vmatpush2.bf16.msra.mxu0 %v4268_v0 }
 0x11f   :  { %1546 = vmatmul.mubr.bf16.gmra.mxu1 %v327_v14  ;;  %1386 = vmatmul.mubr.bf16.gmra.mxu0 %v263_v15  ;;  %v246_v14 = vunpack.c.l.s8.bf16 %v170_v12  ;;  %v4277_v15 = vld [vmem:[%s6043_s4 + $0xc0] ss:$8 sps:$4 sm:$0xff]  }
 0x120   :  { %1555 = vmatprep.mubr.bf16.mxu1 %v332_v16  ;;  %1395 = vmatprep.mubr.bf16.mxu0 %v268_v21  ;;  %v4279_v16 = vld [vmem:[%s6043_s4 + $0xc4] ss:$8 sps:$4 sm:$0xff]   ;;  %v4282_v21 = vld [vmem:[%s6043_s4 + $0xb4] ss:$8 sps:$4 sm:$0xff]  }
 0x121   :  { %3134 = vmatprep.subr.bf16.mxu0 %v4273_v6 }
 0x122   :  { %3135 = vmatpush2.bf16.msra.mxu0 %v4271_v5 }
 0x123   :  { %3136 = vmatprep.subr.bf16.mxu0 %v4276_v11 }
 0x126   :  { %3137 = vmatpush2.bf16.msra.mxu0 %v4274_v10 }
 0x127   :  { %1556 = vmatmul.mubr.bf16.gmra.mxu1 %v331_v23  ;;  %1396 = vmatmul.mubr.bf16.gmra.mxu0 %v267_v24  ;;  %v249_v23 = vunpack.c.h.s8.bf16 %v169_v17  ;;  %v254_v24 = vunpack.c.l.s8.bf16 %v174_v22 }
 0x128   :  { %1565 = vmatprep.mubr.bf16.mxu1 %v336_v25  ;;  %1405 = vmatprep.mubr.bf16.mxu0 %v272_v28  ;;  %v4283_v25 = vld [vmem:[%s6043_s4 + $0xa0] ss:$8 sps:$4 sm:$0xff]   ;;  %v253_v28 = vunpack.c.l.s8.bf16 %v173_v27 }
 0x129   :  { %3138 = vmatprep.subr.bf16.mxu0 %v4279_v16  ;;  %v185_v16 = vld [vmem:[%s6040_s0 + $0xf0] sm:$0xff] }
 0x12a   :  { %3139 = vmatpush2.bf16.msra.mxu0 %v4277_v15 }
 0x12b   :  { %3140 = vmatprep.subr.bf16.mxu0 %v4282_v21 }
 0x12e   :  { %3141 = vmatpush2.bf16.msra.mxu0 %v4280_v20  ;;  %v277_v20 = vunpack.c.l.s8.bf16 %v185_v16 }
 0x12f   :  { %1566 = vmatmul.mubr.bf16.gmra.mxu1 %v335_v31  ;;  %1406 = vmatmul.mubr.bf16.gmra.mxu0 %v271_v30  ;;  %v4286_v31 = vld [vmem:[%s6043_s4 + $0x90] ss:$8 sps:$4 sm:$0xff]   ;;  %v4288_v30 = vld [vmem:[%s6043_s4 + $0x94] ss:$8 sps:$4 sm:$0xff]  }
 0x130   :  { %1575 = vmatprep.mubr.bf16.mxu1 %v340_v32  ;;  %1415 = vmatprep.mubr.bf16.mxu0 %v276_v36 }
 0x131   :  { %3142 = vmatprep.subr.bf16.mxu0 %v4285_v26  ;;  %v190_v26 = vld [vmem:[%s6040_s0 + $0x118] sm:$0xff] }
 0x132   :  { %3143 = vmatpush2.bf16.msra.mxu0 %v4283_v25 }
 0x133   :  { %3144 = vmatprep.subr.bf16.mxu0 %v4288_v30 }
 0x136   :  { %3145 = vmatpush2.bf16.msra.mxu0 %v4286_v31  ;;  %v286_v31 = vunpack.c.l.s8.bf16 %v190_v26 }
 0x137   :  { %1576 = vmatmul.mubr.bf16.gmra.mxu1 %v339_v40  ;;  %1416 = vmatmul.mubr.bf16.gmra.mxu0 %v275_v41 }
 0x138   :  { %1585 = vmatprep.mubr.bf16.mxu1 %v344_v42  ;;  %1425 = vmatprep.mubr.bf16.mxu0 %v280_v45  ;;  %v4289_v45 = vld [vmem:[%s6043_s4 + $0x80] ss:$8 sps:$4 sm:$0xff]  }
 0x139   :  { %3146 = vmatprep.subr.bf16.mxu0 %v4291_v43 }
 0x13a   :  { %3147 = vmatpush2.bf16.msra.mxu0 %v4289_v45 }
 0x13f   :  { %1586 = vmatmul.mubr.bf16.gmra.mxu1 %v343_v47  ;;  %1426 = vmatmul.mubr.bf16.gmra.mxu0 %v279_v48 }
 0x140   :  { %1628 = vmatprep.mubr.bf16.mxu1 %v222_v49  ;;  %v261_v49 = vunpack.c.l.s8.bf16 %v177_v44 }
 0x147   :  { %1629 = vmatmul.mubr.bf16.vlgmr.msra.gmra.mxu1 %v221_v53 }
 0x148   :  { %1638 = vmatprep.mubr.bf16.mxu1 %v226_v54 }
 0x14f   :  { %1639 = vmatmul.mubr.bf16.gmra.mxu1 %v225_v37  ;;  %v265_v37 = vunpack.c.h.s8.bf16 %v177_v44 }
 0x150   :  { %1648 = vmatprep.mubr.bf16.mxu1 %v230_v58  ;;  %v270_v58 = vunpack.c.l.s8.bf16 %v182_v55 }
 0x157   :  { %1649 = vmatmul.mubr.bf16.gmra.mxu1 %v229_v62  ;;  %v181_v62 = vld [vmem:[%s6040_s0 + $0xd0] sm:$0xff] }
 0x158   :  { %1658 = vmatprep.mubr.bf16.mxu1 %v234_v63  ;;  %v269_v2 = vunpack.c.l.s8.bf16 %v181_v62  ;;  %v273_v11 = vunpack.c.h.s8.bf16 %v181_v62 }
 0x15f   :  { %1659 = vmatmul.mubr.bf16.gmra.mxu1 %v233_v3  ;;  %v274_v3 = vunpack.c.h.s8.bf16 %v182_v55 }
 0x160   :  { %1668 = vmatprep.mubr.bf16.mxu1 %v238_v4 }
 0x167   :  { %1669 = vmatmul.mubr.bf16.gmra.mxu1 %v237_v8  ;;  %v186_v8 = vld [vmem:[%s6040_s0 + $0xf8] sm:$0xff] }
 0x168   :  { %1678 = vmatprep.mubr.bf16.mxu1 %v242_v9  ;;  %v278_v12 = vunpack.c.l.s8.bf16 %v186_v8  ;;  %v282_v21 = vunpack.c.h.s8.bf16 %v186_v8 }
 0x16f   :  { %1679 = vmatmul.mubr.bf16.gmra.mxu1 %v241_v13 }
 0x170   :  { %1688 = vmatprep.mubr.bf16.mxu1 %v246_v14 }
 0x177   :  { %1689 = vmatmul.mubr.bf16.gmra.mxu1 %v245_v18 }
 0x178   :  { %1698 = vmatprep.mubr.bf16.mxu1 %v250_v19 }
 0x17f   :  { %1699 = vmatmul.mubr.bf16.gmra.mxu1 %v249_v23 }
 0x180   :  { %1708 = vmatprep.mubr.bf16.mxu1 %v254_v24 }
 0x187   :  { %v5292_v32 = vpop.f32.mrf.mxu1  ;;  %1709 = vmatmul.mubr.bf16.gmra.mxu1 %v253_v28  ;;  %v5299_v35 = vpop.f32.mrf.mxu0 }
 0x188   :  { %1718 = vmatprep.mubr.bf16.mxu1 %v258_v29  ;;  %v281_v29 = vunpack.c.h.s8.bf16 %v185_v16 }
 0x189   :  { %v5294_v33 = vpop.f32.mrf.mxu1  ;;  %v5305_v41 = vpop.f32.mrf.mxu0 }
 0x18b   :  { %v5301_v36 = vpop.f32.mrf.mxu1  ;;  %v5320_v47 = vpop.f32.mrf.mxu0 }
 0x18d   :  { %v5303_v40 = vpop.f32.mrf.mxu1  ;;  %v5326_v52 = vpop.f32.mrf.mxu0 }
 0x18f   :  { %v5307_v42 = vpop.f32.mrf.mxu1  ;;  %1719 = vmatmul.mubr.bf16.gmra.mxu1 %v257_v38  ;;  %v5335_v56 = vpop.f32.mrf.mxu0 }
 0x190   :  { %1728 = vmatprep.mubr.bf16.mxu1 %v262_v39  ;;  %v189_v39 = vld [vmem:[%s6040_s0 + $0x110] sm:$0xff] }
 0x191   :  { %v5318_v46 = vpop.f32.mrf.mxu1  ;;  %v5341_v60 = vpop.f32.mrf.mxu0 }
 0x193   :  { %v5322_v48 = vpop.f32.mrf.mxu1  ;;  %v5350_v0 = vpop.f32.mrf.mxu0 }
 0x195   :  { %v5324_v51 = vpop.f32.mrf.mxu1  ;;  %v5356_v5 = vpop.f32.mrf.mxu0 }
 0x197   :  { %v5328_v53 = vpop.f32.mrf.mxu1  ;;  %1729 = vmatmul.mubr.bf16.gmra.mxu1 %v261_v49  ;;  %v5365_v9 = vpop.f32.mrf.mxu0  ;;  %v285_v49 = vunpack.c.l.s8.bf16 %v189_v39 }
 0x198   :  { %1738 = vmatprep.mubr.bf16.mxu1 %v266_v50  ;;  %v290_v50 = vunpack.c.h.s8.bf16 %v190_v26  ;;  %v193_v26 = vld [vmem:[%s6040_s0 + $0x130] sm:$0xff] }
 0x199   :  { %v5330_v54 = vpop.f32.mrf.mxu1  ;;  %v5371_v14 = vpop.f32.mrf.mxu0 }
 0x19b   :  { %v5337_v57 = vpop.f32.mrf.mxu1  ;;  %v5380_v18 = vpop.f32.mrf.mxu0 }
 0x19d   :  { %v5339_v59 = vpop.f32.mrf.mxu1  ;;  %v5386_v23 = vpop.f32.mrf.mxu0 }
 0x19e   :  { %6046 = vst [vmem:[#allocation3_spill] sm:$0xff] %v5339_v59 }
 0x19f   :  { %v5343_v61 = vpop.f32.mrf.mxu1  ;;  %1739 = vmatmul.mubr.bf16.gmra.mxu1 %v265_v37  ;;  %v5395_v27 = vpop.f32.mrf.mxu0 }
 0x1a0   :  { %6047 = vst [vmem:[#allocation4_spill] sm:$0xff] %v5343_v61  ;;  %1748 = vmatprep.mubr.bf16.mxu1 %v270_v58 }
 0x1a1   :  { %v5348_v63 = vpop.f32.mrf.mxu1  ;;  %v5401_v34 = vpop.f32.mrf.mxu0 }
 0x1a2   :  { %6048 = vst [vmem:[#allocation5_spill] sm:$0xff] %v5348_v63 }
 0x1a3   :  { %v5352_v1 = vpop.f32.mrf.mxu1  ;;  %v5410_v44 = vpop.f32.mrf.mxu0 }
 0x1a4   :  { %6049 = vst [vmem:[#allocation6_spill] sm:$0xff] %v5352_v1 }
 0x1a5   :  { %v5354_v4 = vpop.f32.mrf.mxu1  ;;  %v5416_v37 = vpop.f32.mrf.mxu0 }
 0x1a6   :  { %6050 = vst [vmem:[#allocation7_spill] sm:$0xff] %v5354_v4 }
 0x1a7   :  { %v5358_v6 = vpop.f32.mrf.mxu1  ;;  %1749 = vmatmul.mubr.bf16.gmra.mxu1 %v269_v2  ;;  %v194_v2 = vld [vmem:[%s6040_s0 + $0x138] sm:$0xff] }
 0x1a8   :  { %6051 = vst [vmem:[#allocation8_spill] sm:$0xff] %v5358_v6  ;;  %1758 = vmatprep.mubr.bf16.mxu1 %v274_v3  ;;  %v5425_v3 = vpop.f32.mrf.mxu0 }
 0x1a9   :  { %v5360_v7 = vpop.f32.mrf.mxu1 }
 0x1aa   :  { %6052 = vst [vmem:[#allocation9_spill] sm:$0xff] %v5360_v7  ;;  %v2403_v7 = vpop.permute.xlu0 %2402 }
 0x1ab   :  { %v5367_v10 = vpop.f32.mrf.mxu1 }
 0x1ac   :  { %6053 = vst [vmem:[#allocation10_spill] sm:$0xff] %v5367_v10 }
 0x1ad   :  { %v5369_v13 = vpop.f32.mrf.mxu1 }
 0x1ae   :  { %6054 = vst [vmem:[#allocation11_spill] sm:$0xff] %v5369_v13 }
 0x1af   :  { %v5373_v15 = vpop.f32.mrf.mxu1  ;;  %1759 = vmatmul.mubr.bf16.gmra.mxu1 %v273_v11  ;;  %v289_v11 = vunpack.c.h.s8.bf16 %v189_v39  ;;  %v293_v39 = vunpack.c.l.s8.bf16 %v193_v26 }
 0x1b0   :  { %6055 = vst [vmem:[#allocation12_spill] sm:$0xff] %v5373_v15  ;;  %1768 = vmatprep.mubr.bf16.mxu1 %v278_v12  ;;  %v294_v12 = vunpack.c.l.s8.bf16 %v194_v2 }
 0x1b1   :  { %v5378_v17 = vpop.f32.mrf.mxu1 }
 0x1b2   :  { %6056 = vst [vmem:[#allocation13_spill] sm:$0xff] %v5378_v17 }
 0x1b3   :  { %v5382_v19 = vpop.f32.mrf.mxu1 }
 0x1b4   :  { %6057 = vst [vmem:[#allocation14_spill] sm:$0xff] %v5382_v19 }
 0x1b5   :  { %v5384_v22 = vpop.f32.mrf.mxu1 }
 0x1b6   :  { %6058 = vst [vmem:[#allocation15_spill] sm:$0xff] %v5384_v22 }
 0x1b7   :  { %v5388_v24 = vpop.f32.mrf.mxu1  ;;  %1769 = vmatmul.mubr.bf16.gmra.mxu1 %v277_v20  ;;  %v5431_v20 = vpop.f32.mrf.mxu0 }
 0x1b8   :  { %6059 = vst [vmem:[#allocation16_spill] sm:$0xff] %v5388_v24  ;;  %1778 = vmatprep.mubr.bf16.mxu1 %v282_v21 }
 0x1b9   :  { %v5390_v25 = vpop.f32.mrf.mxu1 }
 0x1ba   :  { %6060 = vst [vmem:[#allocation17_spill] sm:$0xff] %v5390_v25 }
 0x1bb   :  { %v5397_v28 = vpop.f32.mrf.mxu1 }
 0x1bc   :  { %6061 = vst [vmem:[#allocation18_spill] sm:$0xff] %v5397_v28 }
 0x1bd   :  { %v5399_v30 = vpop.f32.mrf.mxu1 }
 0x1be   :  { %6062 = vst [vmem:[#allocation19_spill] sm:$0xff] %v5399_v30 }
 0x1bf   :  { %v5403_v38 = vpop.f32.mrf.mxu1  ;;  %1779 = vmatmul.mubr.bf16.gmra.mxu1 %v281_v29 }
 0x1c0   :  { %6063 = vst [vmem:[#allocation20_spill] sm:$0xff] %v5403_v38  ;;  %1788 = vmatprep.mubr.bf16.mxu1 %v286_v31  ;;  %v5440_v31 = vpop.f32.mrf.mxu0 }
 0x1c1   :  { %v5408_v43 = vpop.f32.mrf.mxu1 }
 0x1c2   :  { %6064 = vst [vmem:[#allocation21_spill] sm:$0xff] %v5408_v43 }
 0x1c3   :  { %v5412_v45 = vpop.f32.mrf.mxu1 }
 0x1c4   :  { %6065 = vst [vmem:[#allocation22_spill] sm:$0xff] %v5412_v45 }
 0x1c5   :  { %v5414_v55 = vpop.f32.mrf.mxu1 }
 0x1c6   :  { %6066 = vst [vmem:[#allocation23_spill] sm:$0xff] %v5414_v55 }
 0x1c7   :  { %v5418_v58 = vpop.f32.mrf.mxu1  ;;  %1789 = vmatmul.mubr.bf16.gmra.mxu1 %v285_v49 }
 0x1c8   :  { %6067 = vst [vmem:[#allocation24_spill] sm:$0xff] %v5418_v58  ;;  %1798 = vmatprep.mubr.bf16.mxu1 %v290_v50  ;;  %v298_v50 = vunpack.c.h.s8.bf16 %v194_v2 }
 0x1c9   :  { %v5420_v62 = vpop.f32.mrf.mxu1 }
 0x1ca   :  { %6068 = vst [vmem:[#allocation25_spill] sm:$0xff] %v5420_v62 }
 0x1cb   :  { %v5427_v8 = vpop.f32.mrf.mxu1 }
 0x1cc   :  { %6069 = vst [vmem:[#allocation26_spill] sm:$0xff] %v5427_v8 }
 0x1cd   :  { %v5429_v16 = vpop.f32.mrf.mxu1 }
 0x1ce   :  { %6070 = vst [vmem:[#allocation27_spill] sm:$0xff] %v5429_v16  ;;  %v5446_v16 = vpop.f32.mrf.mxu0 }
 0x1cf   :  { %v5433_v21 = vpop.f32.mrf.mxu1  ;;  %1799 = vmatmul.mubr.bf16.gmra.mxu1 %v289_v11 }
 0x1d0   :  { %6071 = vst [vmem:[#allocation28_spill] sm:$0xff] %v5433_v21  ;;  %1808 = vmatprep.mubr.bf16.mxu1 %v294_v12  ;;  %v198_v12 = vld [vmem:[%s6040_s0 + $0x158] sm:$0xff]  ;;  %v5455_v21 = vpop.f32.mrf.mxu0 }
 0x1d1   :  { %v5438_v29 = vpop.f32.mrf.mxu1  ;;  %v302_v2 = vunpack.c.l.s8.bf16 %v198_v12 }
 0x1d2   :  { %6072 = vst [vmem:[#allocation29_spill] sm:$0xff] %v5438_v29 }
 0x1d3   :  { %v5442_v49 = vpop.f32.mrf.mxu1 }
 0x1d4   :  { %6073 = vst [vmem:[#allocation30_spill] sm:$0xff] %v5442_v49  ;;  %v297_v49 = vunpack.c.h.s8.bf16 %v193_v26 }
 0x1d5   :  { %v5444_v58 = vpop.f32.mrf.mxu1 }
 0x1d6   :  { %6074 = vst [vmem:[#allocation31_spill] sm:$0xff] %v5444_v58  ;;  %v5461_v58 = vpop.f32.mrf.mxu0 }
 0x1d7   :  { %v5448_v8 = vpop.f32.mrf.mxu1  ;;  %1809 = vmatmul.mubr.bf16.gmra.mxu1 %v293_v39  ;;  %v197_v39 = vld [vmem:[%s6040_s0 + $0x150] sm:$0xff] }
 0x1d8   :  { %6075 = vst [vmem:[#allocation32_spill] sm:$0xff] %v5448_v8  ;;  %1818 = vmatprep.mubr.bf16.mxu1 %v298_v50  ;;  %v5470_v8 = vpop.f32.mrf.mxu0  ;;  %v301_v26 = vunpack.c.l.s8.bf16 %v197_v39 }
 0x1d9   :  { %v5450_v11 = vpop.f32.mrf.mxu1 }
 0x1da   :  { %6076 = vst [vmem:[#allocation33_spill] sm:$0xff] %v5450_v11 }
 0x1db   :  { %v5457_v29 = vpop.f32.mrf.mxu1 }
 0x1dc   :  { %6077 = vst [vmem:[#allocation34_spill] sm:$0xff] %v5457_v29  ;;  %v306_v29 = vunpack.c.h.s8.bf16 %v198_v12 }
 0x1dd   :  { %v5459_v62 = vpop.f32.mrf.mxu1 }
 0x1de   :  { %6078 = vst [vmem:[#allocation35_spill] sm:$0xff] %v5459_v62  ;;  %v5476_v62 = vpop.f32.mrf.mxu0 }
 0x1df   :  { %v5463_v55 = vpop.f32.mrf.mxu1  ;;  %1819 = vmatmul.mubr.bf16.gmra.mxu1 %v297_v49 }
 0x1e0   :  { %6079 = vst [vmem:[#allocation36_spill] sm:$0xff] %v5463_v55  ;;  %1828 = vmatprep.mubr.bf16.mxu1 %v302_v2  ;;  %v202_v2 = vld [vmem:[%s6040_s0 + $0x178] sm:$0xff]  ;;  %v5485_v55 = vpop.f32.mrf.mxu0 }
 0x1e1   :  { %v5468_v50 = vpop.f32.mrf.mxu1  ;;  %v310_v12 = vunpack.c.l.s8.bf16 %v202_v2 }
 0x1e2   :  { %6080 = vst [vmem:[#allocation37_spill] sm:$0xff] %v5468_v50 }
 0x1e3   :  { %v5472_v11 = vpop.f32.mrf.mxu1 }
 0x1e4   :  { %6081 = vst [vmem:[#allocation38_spill] sm:$0xff] %v5472_v11  ;;  %v305_v11 = vunpack.c.h.s8.bf16 %v197_v39 }
 0x1e5   :  { %v5474_v38 = vpop.f32.mrf.mxu1 }
 0x1e6   :  { %6082 = vst [vmem:[#allocation39_spill] sm:$0xff] %v5474_v38  ;;  %v5491_v38 = vpop.f32.mrf.mxu0 }
 0x1e7   :  { %v5478_v45 = vpop.f32.mrf.mxu1  ;;  %1829 = vmatmul.mubr.bf16.gmra.mxu1 %v301_v26 }
 0x1e8   :  { %6083 = vst [vmem:[#allocation40_spill] sm:$0xff] %v5478_v45  ;;  %1838 = vmatprep.mubr.bf16.mxu1 %v306_v29  ;;  %v201_v29 = vld [vmem:[%s6040_s0 + $0x170] sm:$0xff]  ;;  %v5500_v45 = vpop.f32.mrf.mxu0 }
 0x1e9   :  { %v5480_v49 = vpop.f32.mrf.mxu1  ;;  %v309_v39 = vunpack.c.l.s8.bf16 %v201_v29 }
 0x1ea   :  { %6084 = vst [vmem:[#allocation41_spill] sm:$0xff] %v5480_v49 }
 0x1eb   :  { %v5487_v50 = vpop.f32.mrf.mxu1 }
 0x1ec   :  { %6085 = vst [vmem:[#allocation42_spill] sm:$0xff] %v5487_v50  ;;  %v314_v50 = vunpack.c.h.s8.bf16 %v202_v2 }
 0x1ed   :  { %v5489_v43 = vpop.f32.mrf.mxu1 }
 0x1ee   :  { %6086 = vst [vmem:[#allocation43_spill] sm:$0xff] %v5489_v43  ;;  %v5506_v43 = vpop.f32.mrf.mxu0 }
 0x1ef   :  { %v5493_v30 = vpop.f32.mrf.mxu1  ;;  %1839 = vmatmul.mubr.bf16.gmra.mxu1 %v305_v11 }
 0x1f0   :  { %6087 = vst [vmem:[#allocation44_spill] sm:$0xff] %v5493_v30  ;;  %1848 = vmatprep.mubr.bf16.mxu1 %v310_v12  ;;  %v206_v12 = vld [vmem:[%s6040_s0 + $0x198] sm:$0xff]  ;;  %v5515_v30 = vpop.f32.mrf.mxu0 }
 0x1f1   :  { %v5498_v26 = vpop.f32.mrf.mxu1  ;;  %v318_v2 = vunpack.c.l.s8.bf16 %v206_v12 }
 0x1f2   :  { %6088 = vst [vmem:[#allocation45_spill] sm:$0xff] %v5498_v26 }
 0x1f3   :  { %v5502_v49 = vpop.f32.mrf.mxu1 }
 0x1f4   :  { %6089 = vst [vmem:[#allocation46_spill] sm:$0xff] %v5502_v49  ;;  %v313_v49 = vunpack.c.h.s8.bf16 %v201_v29 }
 0x1f5   :  { %v5504_v24 = vpop.f32.mrf.mxu1 }
 0x1f6   :  { %6090 = vst [vmem:[#allocation47_spill] sm:$0xff] %v5504_v24  ;;  %v5521_v24 = vpop.f32.mrf.mxu0 }
 0x1f7   :  { %v5508_v28 = vpop.f32.mrf.mxu1  ;;  %1849 = vmatmul.mubr.bf16.gmra.mxu1 %v309_v39 }
 0x1f8   :  { %6091 = vst [vmem:[#allocation48_spill] sm:$0xff] %v5508_v28  ;;  %1858 = vmatprep.mubr.bf16.mxu1 %v314_v50  ;;  %v205_v50 = vld [vmem:[%s6040_s0 + $0x190] sm:$0xff]  ;;  %v5530_v28 = vpop.f32.mrf.mxu0 }
 0x1f9   :  { %v5510_v11 = vpop.f32.mrf.mxu1  ;;  %v317_v29 = vunpack.c.l.s8.bf16 %v205_v50  ;;  %v321_v17 = vunpack.c.h.s8.bf16 %v205_v50 }
 0x1fa   :  { %6092 = vst [vmem:[#allocation49_spill] sm:$0xff] %v5510_v11 }
 0x1fb   :  { %v5517_v26 = vpop.f32.mrf.mxu1 }
 0x1fc   :  { %6093 = vst [vmem:[#allocation50_spill] sm:$0xff] %v5517_v26  ;;  %v322_v26 = vunpack.c.h.s8.bf16 %v206_v12 }
 0x1fd   :  { %v5519_v25 = vpop.f32.mrf.mxu1 }
 0x1fe   :  { %6094 = vst [vmem:[#allocation51_spill] sm:$0xff] %v5519_v25  ;;  %v5536_v25 = vpop.f32.mrf.mxu0 }
 0x1ff   :  { %v5523_v22 = vpop.f32.mrf.mxu1  ;;  %1859 = vmatmul.mubr.bf16.gmra.mxu1 %v313_v49 }
 0x200   :  { %6095 = vst [vmem:[#allocation52_spill] sm:$0xff] %v5523_v22  ;;  %1868 = vmatprep.mubr.bf16.mxu1 %v318_v2  ;;  %v210_v2 = vld [vmem:[%s6040_s0 + $0x1b8] sm:$0xff]  ;;  %v5541_v22 = vpop.f32.mrf.mxu0 }
 0x201   :  { %v5528_v39 = vpop.f32.mrf.mxu1  ;;  %v326_v13 = vunpack.c.l.s8.bf16 %v210_v2 }
 0x202   :  { %6096 = vst [vmem:[#allocation53_spill] sm:$0xff] %v5528_v39  ;;  %v5546_v10 = vpop.f32.mrf.mxu0 }
 0x203   :  { %v5532_v11 = vpop.f32.mrf.mxu1 }
 0x204   :  { %6097 = vst [vmem:[#allocation54_spill] sm:$0xff] %v5532_v11 }
 0x205   :  { %v5534_v15 = vpop.f32.mrf.mxu1 }
 0x206   :  { %6098 = vst [vmem:[#allocation55_spill] sm:$0xff] %v5534_v15 }
 0x207   :  { %v1630_v19 = vpop.f32.mrf.mxu1  ;;  %1869 = vmatmul.mubr.bf16.gmra.mxu1 %v317_v29 }
 0x208   :  { %1878 = vmatprep.mubr.bf16.mxu1 %v322_v26  ;;  %v1631_v15 = vadd.f32 %v1630_v19, %v5299_v35  ;;  %v2408_v26 = vpop.permute.xlu1 %2407  ;;  %v5552_v35 = vpop.f32.mrf.mxu0 }
 0x209   :  { %v1632_v49 = vpop.f32.mrf.mxu1 }
 0x20a   :  { %v1633_v11 = vadd.f32 %v1632_v49, %v5305_v41  ;;  %v209_v41 = vld [vmem:[%s6040_s0 + $0x1b0] sm:$0xff] }
 0x20b   :  { %v1634_v39 = vpop.f32.mrf.mxu1  ;;  %v325_v59 = vunpack.c.l.s8.bf16 %v209_v41 }
 0x20c   :  { %v1635_v12 = vadd.f32 %v1634_v39, %v5320_v47  ;;  %v2721_v1 = vmul.f32 %v2403_v7, %v1633_v11  ;;  %v2720_v47 = vmul.f32 %v2403_v7, %v1631_v15  ;;  %v2418_v7 = vpop.permute.xlu1 %2417 }
 0x20d   :  { %v1636_v6 = vpop.f32.mrf.mxu1 }
 0x20e   :  { %v1637_v29 = vadd.f32 %v1636_v6, %v5326_v52  ;;  %v2722_v4 = vmul.f32 %v2408_v26, %v1635_v12  ;;  %v5557_v12 = vpop.f32.mrf.mxu0 }
 0x20f   :  { %v1640_v61 = vpop.f32.mrf.mxu1  ;;  %1879 = vmatmul.mubr.bf16.gmra.mxu1 %v321_v17  ;;  %v330_v17 = vunpack.c.h.s8.bf16 %v210_v2 }
 0x210   :  { %v2723_v63 = vmul.f32 %v2408_v26, %v1637_v29  ;;  %1888 = vmatprep.mubr.bf16.mxu1 %v326_v13  ;;  %v2848_v39 = vpack.c.bf16 %v2722_v4, %v2720_v47  ;;  %v1641_v13 = vadd.f32 %v1640_v61, %v5335_v56  ;;  %v2413_v26 = vpop.permute.xlu0 %2412  ;;  %v214_v56 = vld [vmem:[%s6040_s0 + $0x1d8] sm:$0xff]  ;;  %v5563_v61 = vpop.f32.mrf.mxu0 }
 0x211   :  { %v1642_v50 = vpop.f32.mrf.mxu1 }
 0x212   :  { %v2849_v19 = vpack.c.bf16 %v2723_v63, %v2721_v1  ;;  %v1643_v52 = vadd.f32 %v1642_v50, %v5341_v60  ;;  %v2724_v60 = vmul.f32 %v2413_v26, %v1641_v13 }
 0x213   :  { %v1644_v49 = vpop.f32.mrf.mxu1 }
 0x214   :  { %v1645_v6 = vadd.f32 %v1644_v49, %v5350_v0  ;;  %3148 = vmatprep.mubr.bf16.mxu0 %v2849_v19  ;;  %v2725_v4 = vmul.f32 %v2413_v26, %v1643_v52  ;;  %v329_v19 = vunpack.c.h.s8.bf16 %v209_v41 }
 0x215   :  { %v1646_v11 = vpop.f32.mrf.mxu1  ;;  %3149 = vmatmul.mubr.bf16.vlgmr.msra.gmra.mxu0 %v2848_v39 }
 0x216   :  { %v1647_v15 = vadd.f32 %v1646_v11, %v5356_v5  ;;  %v2726_v63 = vmul.f32 %v2418_v7, %v1645_v6  ;;  %v5568_v6 = vpop.f32.mrf.mxu0  ;;  %v2423_v11 = vpop.permute.xlu0 %2422 }
 0x217   :  { %v1650_v1 = vpop.f32.mrf.mxu1  ;;  %1889 = vmatmul.mubr.bf16.gmra.mxu1 %v325_v59  ;;  %v334_v59 = vunpack.c.l.s8.bf16 %v214_v56 }
 0x218   :  { %v2727_v29 = vmul.f32 %v2418_v7, %v1647_v15  ;;  %1898 = vmatprep.mubr.bf16.mxu1 %v330_v17  ;;  %v2850_v50 = vpack.c.bf16 %v2726_v63, %v2724_v60  ;;  %v1651_v49 = vadd.f32 %v1650_v1, %v5365_v9  ;;  %v2428_v17 = vpop.permute.xlu1 %2427  ;;  %v5574_v63 = vpop.f32.mrf.mxu0 }
 0x219   :  { %v1652_v0 = vpop.f32.mrf.mxu1 }
 0x21a   :  { %v2851_v2 = vpack.c.bf16 %v2727_v29, %v2725_v4  ;;  %v1653_v5 = vadd.f32 %v1652_v0, %v5371_v14  ;;  %v213_v14 = vld [vmem:[%s6040_s0 + $0x1d0] sm:$0xff] }
 0x21b   :  { %v1654_v47 = vpop.f32.mrf.mxu1  ;;  %v333_v60 = vunpack.c.l.s8.bf16 %v213_v14 }
 0x21c   :  { %v1655_v39 = vadd.f32 %v1654_v47, %v5380_v18  ;;  %3158 = vmatprep.mubr.bf16.mxu0 %v2851_v2  ;;  %v2729_v41 = vmul.f32 %v2423_v11, %v1653_v5  ;;  %v2728_v18 = vmul.f32 %v2423_v11, %v1651_v49  ;;  %v338_v2 = vunpack.c.h.s8.bf16 %v214_v56  ;;  %v2438_v5 = vpop.permute.xlu1 %2437 }
 0x21d   :  { %v1656_v52 = vpop.f32.mrf.mxu1  ;;  %3159 = vmatmul.mubr.bf16.gmra.mxu0 %v2850_v50 }
 0x21e   :  { %v1657_v13 = vadd.f32 %v1656_v52, %v5386_v23  ;;  %v2730_v7 = vmul.f32 %v2428_v17, %v1655_v39 }
 0x21f   :  { %v1660_v15 = vpop.f32.mrf.mxu1  ;;  %1899 = vmatmul.mubr.bf16.gmra.mxu1 %v329_v19  ;;  %v5579_v19 = vpop.f32.mrf.mxu0 }
 0x220   :  { %v2731_v26 = vmul.f32 %v2428_v17, %v1657_v13  ;;  %1908 = vmatprep.mubr.bf16.mxu1 %v334_v59  ;;  %v2852_v29 = vpack.c.bf16 %v2730_v7, %v2728_v18  ;;  %v1661_v47 = vadd.f32 %v1660_v15, %v5395_v27  ;;  %v2433_v59 = vpop.permute.xlu0 %2432  ;;  %v218_v27 = vld [vmem:[%s6040_s0 + $0x1f8] sm:$0xff] }
 0x221   :  { %v1662_v9 = vpop.f32.mrf.mxu1  ;;  %v5585_v56 = vpop.f32.mrf.mxu0  ;;  %v342_v18 = vunpack.c.l.s8.bf16 %v218_v27 }
 0x222   :  { %v2853_v1 = vpack.c.bf16 %v2731_v26, %v2729_v41  ;;  %v1663_v23 = vadd.f32 %v1662_v9, %v5401_v34  ;;  %v2732_v34 = vmul.f32 %v2433_v59, %v1661_v47  ;;  %v337_v41 = vunpack.c.h.s8.bf16 %v213_v14 }
 0x223   :  { %v1664_v4 = vpop.f32.mrf.mxu1 }
 0x224   :  { %v1665_v0 = vadd.f32 %v1664_v4, %v5410_v44  ;;  %3168 = vmatprep.mubr.bf16.mxu0 %v2853_v1  ;;  %v2733_v17 = vmul.f32 %v2433_v59, %v1663_v23  ;;  %v5590_v4 = vpop.f32.mrf.mxu0  ;;  %v2443_v23 = vpop.permute.xlu0 %2442 }
 0x225   :  { %v1666_v50 = vpop.f32.mrf.mxu1  ;;  %3169 = vmatmul.mubr.bf16.gmra.mxu0 %v2852_v29  ;;  %v2448_v29 = vpop.permute.xlu1 %2447 }
 0x226   :  { %v1667_v39 = vadd.f32 %v1666_v50, %v5416_v37  ;;  %v2734_v49 = vmul.f32 %v2438_v5, %v1665_v0  ;;  %v5596_v50 = vpop.f32.mrf.mxu0 }
 0x227   :  { %v1670_v52 = vpop.f32.mrf.mxu1  ;;  %1909 = vmatmul.mubr.bf16.gmra.mxu1 %v333_v60 }
 0x228   :  { %v2735_v13 = vmul.f32 %v2438_v5, %v1667_v39  ;;  %1918 = vmatprep.mubr.bf16.mxu1 %v338_v2  ;;  %v2854_v15 = vpack.c.bf16 %v2734_v49, %v2732_v34  ;;  %v1671_v9 = vadd.f32 %v1670_v52, %v5425_v3 }
 0x229   :  { %v1672_v44 = vpop.f32.mrf.mxu1 }
 0x22a   :  { %v2855_v11 = vpack.c.bf16 %v2735_v13, %v2733_v17  ;;  %v1673_v37 = vadd.f32 %v1672_v44, %v5431_v20  ;;  %v217_v20 = vld [vmem:[%s6040_s0 + $0x1f0] sm:$0xff]  ;;  %v346_v17 = vunpack.c.h.s8.bf16 %v218_v27  ;;  %v5601_v44 = vpop.f32.mrf.mxu0 }
 0x22b   :  { %v1674_v7 = vpop.f32.mrf.mxu1  ;;  %v341_v49 = vunpack.c.l.s8.bf16 %v217_v20 }
 0x22c   :  { %v1675_v26 = vadd.f32 %v1674_v7, %v5440_v31  ;;  %3178 = vmatprep.mubr.bf16.mxu0 %v2855_v11  ;;  %v2737_v14 = vmul.f32 %v2443_v23, %v1673_v37  ;;  %v2736_v31 = vmul.f32 %v2443_v23, %v1671_v9  ;;  %v2458_v11 = vpop.permute.xlu1 %2457  ;;  %v5604_v9 = vpop.f32.mrf.mxu0 }
 0x22d   :  { %v1676_v1 = vpop.f32.mrf.mxu1  ;;  %3179 = vmatmul.mubr.bf16.gmra.mxu0 %v2854_v15  ;;  %v2453_v15 = vpop.permute.xlu0 %2452 }
 0x22e   :  { %v1677_v60 = vadd.f32 %v1676_v1, %v5446_v16  ;;  %v2738_v0 = vmul.f32 %v2448_v29, %v1675_v26 }
 0x22f   :  { %v1680_v2 = vpop.f32.mrf.mxu1  ;;  %1919 = vmatmul.mubr.bf16.gmra.mxu1 %v337_v41 }
 0x230   :  { %v2739_v47 = vmul.f32 %v2448_v29, %v1677_v60  ;;  %1928 = vmatprep.mubr.bf16.mxu1 %v342_v18  ;;  %v2856_v59 = vpack.c.bf16 %v2738_v0, %v2736_v31  ;;  %v1681_v13 = vadd.f32 %v1680_v2, %v5455_v21  ;;  %v345_v29 = vunpack.c.h.s8.bf16 %v217_v20  ;;  %v5609_v2 = vpop.f32.mrf.mxu0 }
 0x231   :  { %v1682_v3 = vpop.f32.mrf.mxu1  ;;  %v2463_v31 = vpop.permute.xlu0 %2462 }
 0x232   :  { %v2857_v5 = vpack.c.bf16 %v2739_v47, %v2737_v14  ;;  %v1683_v16 = vadd.f32 %v1682_v3, %v5461_v58  ;;  %v2740_v58 = vmul.f32 %v2453_v15, %v1681_v13  ;;  %v2468_v14 = vpop.permute.xlu1 %2467 }
 0x233   :  { %v1684_v39 = vpop.f32.mrf.mxu1 }
 0x234   :  { %v1685_v52 = vadd.f32 %v1684_v39, %v5470_v8  ;;  %3188 = vmatprep.mubr.bf16.mxu0 %v2857_v5  ;;  %v2741_v26 = vmul.f32 %v2453_v15, %v1683_v16 }
 0x235   :  { %v1686_v34 = vpop.f32.mrf.mxu1  ;;  %3189 = vmatmul.mubr.bf16.gmra.mxu0 %v2856_v59  ;;  %v2473_v15 = vpop.permute.xlu0 %2472 }
 0x236   :  { %v1687_v7 = vadd.f32 %v1686_v34, %v5476_v62  ;;  %v2742_v41 = vmul.f32 %v2458_v11, %v1685_v52 }
 0x237   :  { %v1690_v37 = vpop.f32.mrf.mxu1  ;;  %1929 = vmatmul.mubr.bf16.gmra.mxu1 %v341_v49  ;;  %v5612_v49 = vpop.f32.mrf.mxu0 }
 0x238   :  { %v2743_v18 = vmul.f32 %v2458_v11, %v1687_v7  ;;  %1938 = vmatprep.mubr.bf16.mxu1 %v346_v17  ;;  %v2858_v1 = vpack.c.bf16 %v2742_v41, %v2740_v58  ;;  %v1691_v62 = vadd.f32 %v1690_v37, %v5485_v55  ;;  %v2478_v11 = vpop.permute.xlu1 %2477 }
 0x239   :  { %v1692_v8 = vpop.f32.mrf.mxu1  ;;  %v5617_v34 = vpop.f32.mrf.mxu0 }
 0x23a   :  { %v2859_v27 = vpack.c.bf16 %v2743_v18, %v2741_v26  ;;  %v1693_v60 = vadd.f32 %v1692_v8, %v5491_v38  ;;  %v2744_v59 = vmul.f32 %v2463_v31, %v1691_v62 }
 0x23b   :  { %v1694_v21 = vpop.f32.mrf.mxu1 }
 0x23c   :  { %v1695_v23 = vadd.f32 %v1694_v21, %v5500_v45  ;;  %3198 = vmatprep.mubr.bf16.mxu0 %v2859_v27  ;;  %v2745_v39 = vmul.f32 %v2463_v31, %v1693_v60 }
 0x23d   :  { %v1696_v0 = vpop.f32.mrf.mxu1  ;;  %3199 = vmatmul.mubr.bf16.gmra.mxu0 %v2858_v1 }
 0x23e   :  { %v1697_v47 = vadd.f32 %v1696_v0, %v5506_v43  ;;  %v2746_v3 = vmul.f32 %v2468_v14, %v1695_v23  ;;  %v2488_v23 = vpop.permute.xlu1 %2487  ;;  %v2483_v0 = vpop.permute.xlu0 %2482 }
 0x23f   :  { %v1700_v5 = vpop.f32.mrf.mxu1  ;;  %1939 = vmatmul.mubr.bf16.gmra.mxu1 %v345_v29 }
 0x240   :  { %v2747_v20 = vmul.f32 %v2468_v14, %v1697_v47  ;;  %v2860_v55 = vpack.c.bf16 %v2746_v3, %v2744_v59  ;;  %v1701_v43 = vadd.f32 %v1700_v5, %v5515_v30 }
 0x241   :  { %v1702_v38 = vpop.f32.mrf.mxu1 }
 0x242   :  { %v2861_v45 = vpack.c.bf16 %v2747_v20, %v2745_v39  ;;  %v1703_v52 = vadd.f32 %v1702_v38, %v5521_v24  ;;  %v2748_v58 = vmul.f32 %v2473_v15, %v1701_v43  ;;  %v5620_v24 = vpop.f32.mrf.mxu0 }
 0x243   :  { %v1704_v16 = vpop.f32.mrf.mxu1 }
 0x244   :  { %v1705_v17 = vadd.f32 %v1704_v16, %v5530_v28  ;;  %3208 = vmatprep.mubr.bf16.mxu0 %v2861_v45  ;;  %v2749_v26 = vmul.f32 %v2473_v15, %v1703_v52  ;;  %v5625_v60 = vpop.f32.mrf.mxu0 }
 0x245   :  { %v1706_v13 = vpop.f32.mrf.mxu1  ;;  %3209 = vmatmul.mubr.bf16.gmra.mxu0 %v2860_v55  ;;  %v2498_v55 = vpop.permute.xlu1 %2497 }
 0x246   :  { %v1707_v7 = vadd.f32 %v1706_v13, %v5536_v25  ;;  %v2750_v41 = vmul.f32 %v2478_v11, %v1705_v17  ;;  %v2493_v17 = vpop.permute.xlu0 %2492 }
 0x247   :  { %v1710_v37 = vpop.f32.mrf.mxu1 }
 0x248   :  { %v2751_v18 = vmul.f32 %v2478_v11, %v1707_v7  ;;  %v2862_v21 = vpack.c.bf16 %v2750_v41, %v2748_v58  ;;  %v1711_v29 = vadd.f32 %v1710_v37, %v5541_v22 }
 0x249   :  { %v1712_v8 = vpop.f32.mrf.mxu1 }
 0x24a   :  { %v2863_v28 = vpack.c.bf16 %v2751_v18, %v2749_v26  ;;  %v1713_v30 = vadd.f32 %v1712_v8, %v5546_v10  ;;  %v2752_v5 = vmul.f32 %v2483_v0, %v1711_v29  ;;  %v5628_v10 = vpop.f32.mrf.mxu0 }
 0x24b   :  { %v1714_v27 = vpop.f32.mrf.mxu1 }
 0x24c   :  { %v1715_v1 = vadd.f32 %v1714_v27, %v5552_v35  ;;  %3218 = vmatprep.mubr.bf16.mxu0 %v2863_v28  ;;  %v2753_v31 = vmul.f32 %v2483_v0, %v1713_v30  ;;  %v1403_v16 = vpop.f32.mrf.mxu0  ;;  %v2508_v28 = vpop.permute.xlu1 %2507 }
 0x24d   :  { %v1716_v25 = vpop.f32.mrf.mxu1  ;;  %3219 = vmatmul.mubr.bf16.gmra.mxu0 %v2862_v21  ;;  %v2503_v21 = vpop.permute.xlu0 %2502 }
 0x24e   :  { %v1717_v62 = vadd.f32 %v1716_v25, %v5557_v12  ;;  %v2754_v14 = vmul.f32 %v2488_v23, %v1715_v1  ;;  %v5634_v37 = vpop.f32.mrf.mxu0 }
 0x24f   :  { %v1720_v47 = vpop.f32.mrf.mxu1 }
 0x250   :  { %v2755_v3 = vmul.f32 %v2488_v23, %v1717_v62  ;;  %v2864_v59 = vpack.c.bf16 %v2754_v14, %v2752_v5  ;;  %v1721_v45 = vadd.f32 %v1720_v47, %v5563_v61  ;;  %v1409_v8 = vpop.f32.mrf.mxu0  ;;  %v2518_v5 = vpop.permute.xlu1 %2517 }
 0x251   :  { %v1722_v39 = vpop.f32.mrf.mxu1 }
 0x252   :  { %v2865_v35 = vpack.c.bf16 %v2755_v3, %v2753_v31  ;;  %v1723_v22 = vadd.f32 %v1722_v39, %v5568_v6  ;;  %v2756_v15 = vmul.f32 %v2493_v17, %v1721_v45  ;;  %v1411_v0 = vpop.f32.mrf.mxu0 }
 0x253   :  { %v1724_v20 = vpop.f32.mrf.mxu1 }
 0x254   :  { %v1725_v38 = vadd.f32 %v1724_v20, %v5574_v63  ;;  %3228 = vmatprep.mubr.bf16.mxu0 %v2865_v35  ;;  %v2757_v11 = vmul.f32 %v2493_v17, %v1723_v22  ;;  %v2513_v35 = vpop.permute.xlu0 %2512 }
 0x255   :  { %v1726_v12 = vpop.f32.mrf.mxu1  ;;  %3229 = vmatmul.mubr.bf16.gmra.mxu0 %v2864_v59 }
 0x256   :  { %v1727_v52 = vadd.f32 %v1726_v12, %v5579_v19  ;;  %v2758_v43 = vmul.f32 %v2498_v55, %v1725_v38 }
 0x257   :  { %v1730_v13 = vpop.f32.mrf.mxu1 }
 0x258   :  { %v2759_v7 = vmul.f32 %v2498_v55, %v1727_v52  ;;  %v2866_v26 = vpack.c.bf16 %v2758_v43, %v2756_v15  ;;  %v1731_v58 = vadd.f32 %v1730_v13, %v5585_v56  ;;  %v2523_v15 = vpop.permute.xlu0 %2522 }
 0x259   :  { %v1732_v41 = vpop.f32.mrf.mxu1 }
 0x25a   :  { %v2867_v6 = vpack.c.bf16 %v2759_v7, %v2757_v11  ;;  %v1733_v61 = vadd.f32 %v1732_v41, %v5590_v4  ;;  %v2760_v23 = vmul.f32 %v2503_v21, %v1731_v58  ;;  %v2528_v11 = vpop.permute.xlu1 %2527 }
 0x25b   :  { %v1734_v63 = vpop.f32.mrf.mxu1 }
 0x25c   :  { %v1735_v18 = vadd.f32 %v1734_v63, %v5596_v50  ;;  %3238 = vmatprep.mubr.bf16.mxu0 %v2867_v6  ;;  %v2761_v29 = vmul.f32 %v2503_v21, %v1733_v61 }
 0x25d   :  { %v1736_v19 = vpop.f32.mrf.mxu1  ;;  %3239 = vmatmul.mubr.bf16.gmra.mxu0 %v2866_v26 }
 0x25e   :  { %v1737_v27 = vadd.f32 %v1736_v19, %v5601_v44  ;;  %v2762_v30 = vmul.f32 %v2508_v28, %v1735_v18  ;;  %v1413_v44 = vpop.f32.mrf.mxu0 }
 0x25f   :  { %v1740_v1 = vpop.f32.mrf.mxu1 }
 0x260   :  { %v2763_v25 = vmul.f32 %v2508_v28, %v1737_v27  ;;  %v2868_v50 = vpack.c.bf16 %v2762_v30, %v2760_v23  ;;  %v1741_v31 = vadd.f32 %v1740_v1, %v5604_v9  ;;  %v1417_v55 = vpop.f32.mrf.mxu0 }
 0x261   :  { %v1742_v62 = vpop.f32.mrf.mxu1 }
 0x262   :  { %v2869_v4 = vpack.c.bf16 %v2763_v25, %v2761_v29  ;;  %v1743_v47 = vadd.f32 %v1742_v62, %v5609_v2  ;;  %v2764_v45 = vmul.f32 %v2513_v35, %v1741_v31  ;;  %v2533_v29 = vpop.permute.xlu0 %2532 }
 0x263   :  { %v1744_v14 = vpop.f32.mrf.mxu1 }
 0x264   :  { %v1745_v56 = vadd.f32 %v1744_v14, %v5612_v49  ;;  %3248 = vmatprep.mubr.bf16.mxu0 %v2869_v4  ;;  %v2765_v22 = vmul.f32 %v2513_v35, %v1743_v47 }
 0x265   :  { %v1746_v3 = vpop.f32.mrf.mxu1  ;;  %3249 = vmatmul.mubr.bf16.gmra.mxu0 %v2868_v50 }
 0x266   :  { %v1747_v39 = vadd.f32 %v1746_v3, %v5617_v34  ;;  %v2766_v20 = vmul.f32 %v2518_v5, %v1745_v56  ;;  %v1419_v34 = vpop.f32.mrf.mxu0 }
 0x267   :  { %v1750_v59 = vpop.f32.mrf.mxu1 }
 0x268   :  { %v2767_v38 = vmul.f32 %v2518_v5, %v1747_v39  ;;  %v2870_v49 = vpack.c.bf16 %v2766_v20, %v2764_v45  ;;  %v1751_v43 = vadd.f32 %v1750_v59, %v5620_v24  ;;  %v1421_v58 = vpop.f32.mrf.mxu0  ;;  %v2543_v20 = vpop.permute.xlu0 %2542 }
 0x269   :  { %v1752_v12 = vpop.f32.mrf.mxu1 }
 0x26a   :  { %v2871_v2 = vpack.c.bf16 %v2767_v38, %v2765_v22  ;;  %v1753_v17 = vadd.f32 %v1752_v12, %v5625_v60  ;;  %v2768_v61 = vmul.f32 %v2523_v15, %v1751_v43  ;;  %v1423_v30 = vpop.f32.mrf.mxu0 }
 0x26b   :  { %v1754_v52 = vpop.f32.mrf.mxu1 }
 0x26c   :  { %v1755_v9 = vadd.f32 %v1754_v52, %v5628_v10  ;;  %3258 = vmatprep.mubr.bf16.mxu0 %v2871_v2  ;;  %v2769_v63 = vmul.f32 %v2523_v15, %v1753_v17  ;;  %v1427_v47 = vpop.f32.mrf.mxu0 }
 0x26d   :  { %v1756_v13 = vpop.f32.mrf.mxu1  ;;  %3259 = vmatmul.mubr.bf16.gmra.mxu0 %v2870_v49 }
 0x26e   :  { %v1757_v7 = vadd.f32 %v1756_v13, %v1403_v16  ;;  %v2770_v41 = vmul.f32 %v2528_v11, %v1755_v9  ;;  %v2538_v16 = vpop.permute.xlu1 %2537  ;;  %v1429_v5 = vpop.f32.mrf.mxu0 }
 0x26f   :  { %v1760_v6 = vpop.f32.mrf.mxu1 }
 0x270   :  { %v2771_v26 = vmul.f32 %v2528_v11, %v1757_v7  ;;  %v2872_v60 = vpack.c.bf16 %v2770_v41, %v2768_v61  ;;  %v1761_v24 = vadd.f32 %v1760_v6, %v5634_v37  ;;  %v1431_v2 = vpop.f32.mrf.mxu0  ;;  %v2553_v41 = vpop.permute.xlu0 %2552 }
 0x271   :  { %v1762_v18 = vpop.f32.mrf.mxu1 }
 0x272   :  { %v2873_v19 = vpack.c.bf16 %v2771_v26, %v2769_v63  ;;  %v1763_v10 = vadd.f32 %v1762_v18, %v1409_v8  ;;  %v2772_v14 = vmul.f32 %v2533_v29, %v1761_v24  ;;  %v2548_v35 = vpop.permute.xlu1 %2547 }
 0x273   :  { %v1764_v28 = vpop.f32.mrf.mxu1 }
 0x274   :  { %v1765_v27 = vadd.f32 %v1764_v28, %v1411_v0  ;;  %3268 = vmatprep.mubr.bf16.mxu0 %v2873_v19  ;;  %v2773_v62 = vmul.f32 %v2533_v29, %v1763_v10 }
 0x275   :  { %v1766_v21 = vpop.f32.mrf.mxu1  ;;  %3269 = vmatmul.mubr.bf16.gmra.mxu0 %v2872_v60 }
 0x276   :  { %v1767_v1 = vadd.f32 %v1766_v21, %v1413_v44  ;;  %v2774_v25 = vmul.f32 %v2538_v16, %v1765_v27  ;;  %v2558_v7 = vpop.permute.xlu1 %2557 }
 0x277   :  { %v1770_v23 = vpop.f32.mrf.mxu1 }
 0x278   :  { %v2775_v4 = vmul.f32 %v2538_v16, %v1767_v1  ;;  %v2874_v31 = vpack.c.bf16 %v2774_v25, %v2772_v14  ;;  %v1771_v37 = vadd.f32 %v1770_v23, %v1417_v55  ;;  %v2563_v1 = vpop.permute.xlu0 %2562 }
 0x279   :  { %v1772_v50 = vpop.f32.mrf.mxu1 }
 0x27a   :  { %v2875_v56 = vpack.c.bf16 %v2775_v4, %v2773_v62  ;;  %v1773_v0 = vadd.f32 %v1772_v50, %v1419_v34  ;;  %v2776_v12 = vmul.f32 %v2543_v20, %v1771_v37  ;;  %v1433_v34 = vpop.f32.mrf.mxu0 }
 0x27b   :  { %v1774_v8 = vpop.f32.mrf.mxu1 }
 0x27c   :  { %v1775_v3 = vadd.f32 %v1774_v8, %v1421_v58  ;;  %3278 = vmatprep.mubr.bf16.mxu0 %v2875_v56  ;;  %v2777_v38 = vmul.f32 %v2543_v20, %v1773_v0  ;;  %v2573_v0 = vpop.permute.xlu0 %2572 }
 0x27d   :  { %v1776_v39 = vpop.f32.mrf.mxu1  ;;  %3279 = vmatmul.mubr.bf16.gmra.mxu0 %v2874_v31 }
 0x27e   :  { %v1777_v44 = vadd.f32 %v1776_v39, %v1423_v30  ;;  %v2778_v59 = vmul.f32 %v2548_v35, %v1775_v3  ;;  %v2568_v30 = vpop.permute.xlu1 %2567 }
 0x27f   :  { %v1780_v22 = vpop.f32.mrf.mxu1 }
 0x280   :  { %v2779_v45 = vmul.f32 %v2548_v35, %v1777_v44  ;;  %v2876_v17 = vpack.c.bf16 %v2778_v59, %v2776_v12  ;;  %v1781_v55 = vadd.f32 %v1780_v22, %v1427_v47 }
 0x281   :  { %v1782_v52 = vpop.f32.mrf.mxu1 }
 0x282   :  { %v2877_v49 = vpack.c.bf16 %v2779_v45, %v2777_v38  ;;  %v1783_v43 = vadd.f32 %v1782_v52, %v1429_v5  ;;  %v2780_v18 = vmul.f32 %v2553_v41, %v1781_v55  ;;  %v6099_v45 = vld [vmem:[#allocation3_spill] sm:$0xff] }
 0x283   :  { %v1784_v9 = vpop.f32.mrf.mxu1 }
 0x284   :  { %v1785_v13 = vadd.f32 %v1784_v9, %v1431_v2  ;;  %3288 = vmatprep.mubr.bf16.mxu0 %v2877_v49  ;;  %v2781_v26 = vmul.f32 %v2553_v41, %v1783_v43  ;;  %v2583_v2 = vpop.permute.xlu0 %2582 }
 0x285   :  { %v1786_v11 = vpop.f32.mrf.mxu1  ;;  %3289 = vmatmul.mubr.bf16.gmra.mxu0 %v2876_v17 }
 0x286   :  { %v1787_v15 = vadd.f32 %v1786_v11, %v1433_v34  ;;  %v2782_v6 = vmul.f32 %v2558_v7, %v1785_v13  ;;  %v6100_v11 = vld [vmem:[#allocation5_spill] sm:$0xff] }
 0x287   :  { %v1790_v63 = vpop.f32.mrf.mxu1 }
 0x288   :  { %v2783_v61 = vmul.f32 %v2558_v7, %v1787_v15  ;;  %v2878_v60 = vpack.c.bf16 %v2782_v6, %v2780_v18  ;;  %v1791_v24 = vadd.f32 %v1790_v63, %v5292_v32  ;;  %v6101_v7 = vld [vmem:[#allocation6_spill] sm:$0xff]  ;;  %v2593_v18 = vpop.permute.xlu0 %2592 }
 0x289   :  { %v1792_v58 = vpop.f32.mrf.mxu1 }
 0x28a   :  { %v2879_v19 = vpack.c.bf16 %v2783_v61, %v2781_v26  ;;  %v1793_v10 = vadd.f32 %v1792_v58, %v5294_v33  ;;  %v2784_v4 = vmul.f32 %v2563_v1, %v1791_v24  ;;  %v6103_v26 = vld [vmem:[#allocation7_spill] sm:$0xff] }
 0x28b   :  { %v1794_v28 = vpop.f32.mrf.mxu1 }
 0x28c   :  { %v1795_v27 = vadd.f32 %v1794_v28, %v5301_v36  ;;  %3298 = vmatprep.mubr.bf16.mxu0 %v2879_v19  ;;  %v2785_v23 = vmul.f32 %v2563_v1, %v1793_v10 }
 0x28d   :  { %v1796_v21 = vpop.f32.mrf.mxu1  ;;  %3299 = vmatmul.mubr.bf16.gmra.mxu0 %v2878_v60 }
 0x28e   :  { %v1797_v16 = vadd.f32 %v1796_v21, %v5303_v40  ;;  %v2786_v29 = vmul.f32 %v2568_v30, %v1795_v27  ;;  %v2578_v40 = vpop.permute.xlu1 %2577 }
 0x28f   :  { %v1800_v25 = vpop.f32.mrf.mxu1 }
 0x290   :  { %v2787_v62 = vmul.f32 %v2568_v30, %v1797_v16  ;;  %v2880_v47 = vpack.c.bf16 %v2786_v29, %v2784_v4  ;;  %v1801_v32 = vadd.f32 %v1800_v25, %v5307_v42  ;;  %v6104_v16 = vld [vmem:[#allocation9_spill] sm:$0xff]  ;;  %v6105_v29 = vld [vmem:[#allocation10_spill] sm:$0xff] }
 0x291   :  { %v1802_v14 = vpop.f32.mrf.mxu1 }
 0x292   :  { %v2881_v50 = vpack.c.bf16 %v2787_v62, %v2785_v23  ;;  %v1803_v36 = vadd.f32 %v1802_v14, %v5318_v46  ;;  %v2788_v35 = vmul.f32 %v2573_v0, %v1801_v32  ;;  %v6106_v23 = vld [vmem:[#allocation8_spill] sm:$0xff] }
 0x293   :  { %v1804_v33 = vpop.f32.mrf.mxu1 }
 0x294   :  { %v1805_v56 = vadd.f32 %v1804_v33, %v5322_v48  ;;  %3308 = vmatprep.mubr.bf16.mxu0 %v2881_v50  ;;  %v2789_v5 = vmul.f32 %v2573_v0, %v1803_v36  ;;  %v6107_v50 = vld [vmem:[#allocation11_spill] sm:$0xff]  ;;  %v2603_v33 = vpop.permute.xlu0 %2602 }
 0x295   :  { %v1806_v31 = vpop.f32.mrf.mxu1  ;;  %3309 = vmatmul.mubr.bf16.gmra.mxu0 %v2880_v47 }
 0x296   :  { %v1807_v8 = vadd.f32 %v1806_v31, %v5324_v51  ;;  %v2790_v3 = vmul.f32 %v2578_v40, %v1805_v56  ;;  %v2588_v51 = vpop.permute.xlu1 %2587 }
 0x297   :  { %v1810_v37 = vpop.f32.mrf.mxu1 }
 0x298   :  { %v2791_v39 = vmul.f32 %v2578_v40, %v1807_v8  ;;  %v2882_v59 = vpack.c.bf16 %v2790_v3, %v2788_v35  ;;  %v1811_v42 = vadd.f32 %v1810_v37, %v5328_v53  ;;  %v6102_v53 = vld [vmem:[#allocation4_spill] sm:$0xff]  ;;  %v6109_v35 = vld [vmem:[#allocation14_spill] sm:$0xff] }
 0x299   :  { %v1812_v44 = vpop.f32.mrf.mxu1 }
 0x29a   :  { %v2883_v20 = vpack.c.bf16 %v2791_v39, %v2789_v5  ;;  %v1813_v48 = vadd.f32 %v1812_v44, %v5330_v54  ;;  %v2792_v43 = vmul.f32 %v2583_v2, %v1811_v42  ;;  %v2598_v63 = vpop.permute.xlu1 %2597  ;;  %v6108_v5 = vld [vmem:[#allocation13_spill] sm:$0xff] }
 0x29b   :  { %v1814_v46 = vpop.f32.mrf.mxu1 }
 0x29c   :  { %v1815_v22 = vadd.f32 %v1814_v46, %v5337_v57  ;;  %3318 = vmatprep.mubr.bf16.mxu0 %v2883_v20  ;;  %v2793_v17 = vmul.f32 %v2583_v2, %v1813_v48  ;;  %v6110_v20 = vld [vmem:[#allocation12_spill] sm:$0xff] }
 0x29d   :  { %v1816_v38 = vpop.f32.mrf.mxu1  ;;  %3319 = vmatmul.mubr.bf16.gmra.mxu0 %v2882_v59 }
 0x29e   :  { %v1817_v12 = vadd.f32 %v1816_v38, %v6099_v45  ;;  %v2794_v52 = vmul.f32 %v2588_v51, %v1815_v22  ;;  %v2608_v14 = vpop.permute.xlu1 %2607  ;;  %v6111_v22 = vld [vmem:[#allocation15_spill] sm:$0xff]  ;;  %v2613_v38 = vpop.permute.xlu0 %2612 }
 0x29f   :  { %v1820_v49 = vpop.f32.mrf.mxu1 }
 0x2a0   :  { %v2795_v9 = vmul.f32 %v2588_v51, %v1817_v12  ;;  %v2884_v34 = vpack.c.bf16 %v2794_v52, %v2792_v43  ;;  %v1821_v41 = vadd.f32 %v1820_v49, %v6102_v53  ;;  %v6115_v53 = vld [vmem:[#allocation19_spill] sm:$0xff] }
 0x2a1   :  { %v1822_v13 = vpop.f32.mrf.mxu1 }
 0x2a2   :  { %v2885_v55 = vpack.c.bf16 %v2795_v9, %v2793_v17  ;;  %v1823_v57 = vadd.f32 %v1822_v13, %v6100_v11  ;;  %v2796_v10 = vmul.f32 %v2593_v18, %v1821_v41  ;;  %v2618_v48 = vpop.permute.xlu1 %2617  ;;  %v6112_v13 = vld [vmem:[#allocation17_spill] sm:$0xff]  ;;  %v6114_v11 = vld [vmem:[#allocation16_spill] sm:$0xff] }
 0x2a3   :  { %v1824_v54 = vpop.f32.mrf.mxu1 }
 0x2a4   :  { %v1825_v15 = vadd.f32 %v1824_v54, %v6101_v7  ;;  %3328 = vmatprep.mubr.bf16.mxu0 %v2885_v55  ;;  %v2797_v60 = vmul.f32 %v2593_v18, %v1823_v57 }
 0x2a5   :  { %v1826_v6 = vpop.f32.mrf.mxu1  ;;  %3329 = vmatmul.mubr.bf16.gmra.mxu0 %v2884_v34  ;;  %v6113_v34 = vld [vmem:[#allocation18_spill] sm:$0xff] }
 0x2a6   :  { %v1827_v61 = vadd.f32 %v1826_v6, %v6103_v26  ;;  %v2798_v58 = vmul.f32 %v2598_v63, %v1825_v15  ;;  %v2628_v15 = vpop.permute.xlu1 %2627  ;;  %v2623_v6 = vpop.permute.xlu0 %2622 }
 0x2a7   :  { %v1830_v19 = vpop.f32.mrf.mxu1 }
 0x2a8   :  { %v2799_v28 = vmul.f32 %v2598_v63, %v1827_v61  ;;  %v2886_v21 = vpack.c.bf16 %v2798_v58, %v2796_v10  ;;  %v1831_v62 = vadd.f32 %v1830_v19, %v6106_v23  ;;  %v6119_v23 = vld [vmem:[#allocation23_spill] sm:$0xff] }
 0x2a9   :  { %v1832_v27 = vpop.f32.mrf.mxu1 }
 0x2aa   :  { %v2887_v24 = vpack.c.bf16 %v2799_v28, %v2797_v60  ;;  %v1833_v1 = vadd.f32 %v1832_v27, %v6104_v16  ;;  %v2800_v40 = vmul.f32 %v2603_v33, %v1831_v62  ;;  %v6116_v27 = vld [vmem:[#allocation21_spill] sm:$0xff]  ;;  %v6118_v16 = vld [vmem:[#allocation20_spill] sm:$0xff] }
 0x2ab   :  { %v1834_v30 = vpop.f32.mrf.mxu1 }
 0x2ac   :  { %v1835_v25 = vadd.f32 %v1834_v30, %v6105_v29  ;;  %3338 = vmatprep.mubr.bf16.mxu0 %v2887_v24  ;;  %v2801_v32 = vmul.f32 %v2603_v33, %v1833_v1 }
 0x2ad   :  { %v1836_v4 = vpop.f32.mrf.mxu1  ;;  %3339 = vmatmul.mubr.bf16.gmra.mxu0 %v2886_v21  ;;  %v6117_v21 = vld [vmem:[#allocation22_spill] sm:$0xff] }
 0x2ae   :  { %v1837_v47 = vadd.f32 %v1836_v4, %v6107_v50  ;;  %v2802_v36 = vmul.f32 %v2608_v14, %v1835_v25  ;;  %v2638_v25 = vpop.permute.xlu1 %2637  ;;  %v2633_v4 = vpop.permute.xlu0 %2632 }
 0x2af   :  { %v1840_v56 = vpop.f32.mrf.mxu1 }
 0x2b0   :  { %v2803_v31 = vmul.f32 %v2608_v14, %v1837_v47  ;;  %v2888_v3 = vpack.c.bf16 %v2802_v36, %v2800_v40  ;;  %v1841_v59 = vadd.f32 %v1840_v56, %v6110_v20  ;;  %v2946_v47 = vlaneseq }
 0x2b1   :  { %v1842_v8 = vpop.f32.mrf.mxu1 }
 0x2b2   :  { %v2889_v0 = vpack.c.bf16 %v2803_v31, %v2801_v32  ;;  %v1843_v39 = vadd.f32 %v1842_v8, %v6108_v5  ;;  %v2804_v52 = vmul.f32 %v2613_v38, %v1841_v59  ;;  %v6121_v5 = vld [vmem:[#allocation26_spill] sm:$0xff]  ;;  %v2648_v59 = vpop.permute.xlu1 %2647 }
 0x2b3   :  { %v1844_v37 = vpop.f32.mrf.mxu1 }
 0x2b4   :  { %v1845_v44 = vadd.f32 %v1844_v37, %v6109_v35  ;;  %3348 = vmatprep.mubr.bf16.mxu0 %v2889_v0  ;;  %v2805_v12 = vmul.f32 %v2613_v38, %v1843_v39  ;;  %v2947_v0 = vshrl.u32 %v2946_v47, 7  ;;  %v6122_v35 = vld [vmem:[#allocation24_spill] sm:$0xff] }
 0x2b5   :  { %v1846_v46 = vpop.f32.mrf.mxu1  ;;  %3349 = vmatmul.mubr.bf16.gmra.mxu0 %v2888_v3  ;;  %v6120_v3 = vld [vmem:[#allocation25_spill] sm:$0xff] }
 0x2b6   :  { %v1847_v42 = vadd.f32 %v1846_v46, %v6111_v22  ;;  %v2806_v51 = vmul.f32 %v2618_v48, %v1845_v44  ;;  %v6123_v46 = vld [vmem:[#allocation27_spill] sm:$0xff]  ;;  %v2643_v22 = vpop.permute.xlu0 %2642 }
 0x2b7   :  { %v1850_v45 = vpop.f32.mrf.mxu1 }
 0x2b8   :  { %v2807_v2 = vmul.f32 %v2618_v48, %v1847_v42  ;;  %v2890_v9 = vpack.c.bf16 %v2806_v51, %v2804_v52  ;;  %v1851_v57 = vadd.f32 %v1850_v45, %v6114_v11  ;;  %v2948_v51 = vsub.s32 0, %v2947_v0  ;;  %v6125_v11 = vld [vmem:[#allocation30_spill] sm:$0xff] }
 0x2b9   :  { %v1852_v49 = vpop.f32.mrf.mxu1 }
 0x2ba   :  { %v2891_v17 = vpack.c.bf16 %v2807_v2, %v2805_v12  ;;  %v1853_v55 = vadd.f32 %v1852_v49, %v6112_v13  ;;  %v2808_v58 = vmul.f32 %v2623_v6, %v1851_v57  ;;  %v2944_v2 = vld [vmem:[%s6044_s5] sm:$0x3] }
 0x2bb   :  { %v1854_v43 = vpop.f32.mrf.mxu1 }
 0x2bc   :  { %v1855_v54 = vadd.f32 %v1854_v43, %v6113_v34  ;;  %3358 = vmatprep.mubr.bf16.mxu0 %v2891_v17  ;;  %v2809_v61 = vmul.f32 %v2623_v6, %v1853_v55  ;;  %v2952_v17 = vsub.s32 1, %v2947_v0  ;;  %v5687_v55 = vrot.slane %v2944_v2, %v2948_v51  ;;  %v6124_v34 = vld [vmem:[#allocation29_spill] sm:$0xff] }
 0x2bd   :  { %v1856_v7 = vpop.f32.mrf.mxu1  ;;  %3359 = vmatmul.mubr.bf16.gmra.mxu0 %v2890_v9 }
 0x2be   :  { %v1857_v41 = vadd.f32 %v1856_v7, %v6115_v53  ;;  %v2810_v63 = vmul.f32 %v2628_v15, %v1855_v54  ;;  %v6126_v7 = vld [vmem:[#allocation28_spill] sm:$0xff]  ;;  %v5692_v6 = vrot.slane %v2944_v2, %v2952_v17 }
 0x2bf   :  { %v1860_v26 = vpop.f32.mrf.mxu1 }
 0x2c0   :  { %v2811_v18 = vmul.f32 %v2628_v15, %v1857_v41  ;;  %v2892_v28 = vpack.c.bf16 %v2810_v63, %v2808_v58  ;;  %v1861_v1 = vadd.f32 %v1860_v26, %v6118_v16  ;;  %v2658_v63 = vpop.permute.xlu1 %2657  ;;  %v2653_v26 = vpop.permute.xlu0 %2652 }
 0x2c1   :  { %v1862_v19 = vpop.f32.mrf.mxu1 }
 0x2c2   :  { %v2893_v60 = vpack.c.bf16 %v2811_v18, %v2809_v61  ;;  %v1863_v24 = vadd.f32 %v1862_v19, %v6116_v27  ;;  %v2812_v56 = vmul.f32 %v2633_v4, %v1861_v1  ;;  %v6127_v61 = vld [vmem:[#allocation31_spill] sm:$0xff] }
 0x2c3   :  { %v1864_v10 = vpop.f32.mrf.mxu1 }
 0x2c4   :  { %v1865_v30 = vadd.f32 %v1864_v10, %v6117_v21  ;;  %3368 = vmatprep.mubr.bf16.mxu0 %v2893_v60  ;;  %v2813_v33 = vmul.f32 %v2633_v4, %v1863_v24 }
 0x2c5   :  { %v1866_v29 = vpop.f32.mrf.mxu1  ;;  %3369 = vmatmul.mubr.bf16.gmra.mxu0 %v2892_v28 }
 0x2c6   :  { %v1867_v62 = vadd.f32 %v1866_v29, %v6119_v23  ;;  %v2814_v14 = vmul.f32 %v2638_v25, %v1865_v30 }
 0x2c7   :  { %v1870_v50 = vpop.f32.mrf.mxu1 }
 0x2c8   :  { %v2815_v36 = vmul.f32 %v2638_v25, %v1867_v62  ;;  %v2894_v40 = vpack.c.bf16 %v2814_v14, %v2812_v56  ;;  %v1871_v44 = vadd.f32 %v1870_v50, %v6122_v35  ;;  %v6128_v50 = vld [vmem:[#allocation33_spill] sm:$0xff]  ;;  %v6131_v35 = vld [vmem:[#allocation35_spill] sm:$0xff] }
 0x2c9   :  { %v1872_v32 = vpop.f32.mrf.mxu1 }
 0x2ca   :  { %v2895_v31 = vpack.c.bf16 %v2815_v36, %v2813_v33  ;;  %v1873_v37 = vadd.f32 %v1872_v32, %v6120_v3  ;;  %v2816_v52 = vmul.f32 %v2643_v22, %v1871_v44  ;;  %v6129_v33 = vld [vmem:[#allocation34_spill] sm:$0xff]  ;;  %v6130_v32 = vld [vmem:[#allocation32_spill] sm:$0xff]  ;;  %v2668_v3 = vpop.permute.xlu1 %2667 }
 0x2cb   :  { %v1874_v8 = vpop.f32.mrf.mxu1 }
 0x2cc   :  { %v1875_v39 = vadd.f32 %v1874_v8, %v6121_v5  ;;  %3378 = vmatprep.mubr.bf16.mxu0 %v2895_v31  ;;  %v2817_v45 = vmul.f32 %v2643_v22, %v1873_v37  ;;  %v2663_v37 = vpop.permute.xlu0 %2662 }
 0x2cd   :  { %v1876_v20 = vpop.f32.mrf.mxu1  ;;  %3379 = vmatmul.mubr.bf16.gmra.mxu0 %v2894_v40 }
 0x2ce   :  { %v1877_v48 = vadd.f32 %v1876_v20, %v6123_v46  ;;  %v2818_v42 = vmul.f32 %v2648_v59, %v1875_v39 }
 0x2cf   :  { %v1880_v38 = vpop.f32.mrf.mxu1 }
 0x2d0   :  { %v2819_v12 = vmul.f32 %v2648_v59, %v1877_v48  ;;  %v2896_v43 = vpack.c.bf16 %v2818_v42, %v2816_v52  ;;  %v1881_v15 = vadd.f32 %v1880_v38, %v6126_v7 }
 0x2d1   :  { %v1882_v49 = vpop.f32.mrf.mxu1 }
 0x2d2   :  { %v2897_v9 = vpack.c.bf16 %v2819_v12, %v2817_v45  ;;  %v1883_v54 = vadd.f32 %v1882_v49, %v6124_v34  ;;  %v2820_v24 = vmul.f32 %v2653_v26, %v1881_v15 }
 0x2d3   :  { %v1884_v13 = vpop.f32.mrf.mxu1 }
 0x2d4   :  { %v1885_v57 = vadd.f32 %v1884_v13, %v6125_v11  ;;  %3388 = vmatprep.mubr.bf16.mxu0 %v2897_v9  ;;  %v2821_v10 = vmul.f32 %v2653_v26, %v1883_v54  ;;  %v6132_v54 = vld [vmem:[#allocation37_spill] sm:$0xff] }
 0x2d5   :  { %v1886_v53 = vpop.f32.mrf.mxu1  ;;  %v3150_v41 = vpop.f32.mrf.mxu0  ;;  %3389 = vmatmul.mubr.bf16.gmra.mxu0 %v2896_v43 }
 0x2d6   :  { %v1887_v18 = vadd.f32 %v1886_v53, %v6127_v61  ;;  %v2822_v58 = vmul.f32 %v2658_v63, %v1885_v57  ;;  %v3151_v19 = vadd.f32 %v3150_v41, %v5687_v55  ;;  %v6133_v57 = vld [vmem:[#allocation38_spill] sm:$0xff]  ;;  %v6134_v53 = vld [vmem:[#allocation36_spill] sm:$0xff] }
 0x2d7   :  { %v1890_v60 = vpop.f32.mrf.mxu1  ;;  %v3152_v28 = vpop.f32.mrf.mxu0 }
 0x2d8   :  { %v2823_v27 = vmul.f32 %v2658_v63, %v1887_v18  ;;  %v3153_v21 = vadd.f32 %v3152_v28, %v5692_v6  ;;  %v2898_v25 = vpack.c.bf16 %v2822_v58, %v2820_v24  ;;  %v3469_v23 = vmax.f32 %v3151_v19, 0.0  ;;  %v2678_v18 = vpop.permute.xlu1 %2677  ;;  %v2673_v58 = vpop.permute.xlu0 %2672  ;;  %v6135_v28 = vld [vmem:[#allocation39_spill] sm:$0xff] }
 0x2d9   :  { %v1892_v30 = vpop.f32.mrf.mxu1  ;;  %v3154_v16 = vpop.f32.mrf.mxu0  ;;  %v1891_v31 = vadd.f32 %v1890_v60, %v6130_v32 }
 0x2da   :  { %v3155_v1 = vadd.f32 %v3154_v16, %v5687_v55  ;;  %v2899_v29 = vpack.c.bf16 %v2823_v27, %v2821_v10  ;;  %v3470_v62 = vmax.f32 %v3153_v21, 0.0  ;;  %v1893_v47 = vadd.f32 %v1892_v30, %v6128_v50 }
 0x2db   :  { %v1894_v4 = vpop.f32.mrf.mxu1  ;;  %v3156_v14 = vpop.f32.mrf.mxu0  ;;  %v2824_v51 = vmul.f32 %v2663_v37, %v1891_v31  ;;  %v6136_v31 = vld [vmem:[#allocation41_spill] sm:$0xff] }
 0x2dc   :  { %v1895_v36 = vadd.f32 %v1894_v4, %v6129_v33  ;;  %v3157_v56 = vadd.f32 %v3156_v14, %v5692_v6  ;;  %3398 = vmatprep.mubr.bf16.mxu0 %v2899_v29  ;;  %v4145_v40 = vpack.c.bf16 %v3470_v62, %v3469_v23  ;;  %v3471_v5 = vmax.f32 %v3155_v1, 0.0 }
 0x2dd   :  { %v1896_v8 = vpop.f32.mrf.mxu1  ;;  %v3160_v0 = vpop.f32.mrf.mxu0  ;;  %3399 = vmatmul.mubr.bf16.gmra.mxu0 %v2898_v25  ;;  %v2825_v22 = vmul.f32 %v2663_v37, %v1893_v47  ;;  %v6138_v37 = vld [vmem:[#allocation40_spill] sm:$0xff] }
 0x2de   :  { %v3472_v39 = vmax.f32 %v3157_v56, 0.0  ;;  %v1897_v44 = vadd.f32 %v1896_v8, %v6131_v35  ;;  %3981 = vst [vmem:[%s6045_s6] sm:$0xff] %v4145_v40  ;;  %v2826_v20 = vmul.f32 %v2668_v3, %v1895_v36  ;;  %v3161_v59 = vadd.f32 %v3160_v0, %v5687_v55  ;;  %v6137_v8 = vld [vmem:[#allocation42_spill] sm:$0xff] }
 0x2df   :  { %v1900_v46 = vpop.f32.mrf.mxu1  ;;  %v3162_v48 = vpop.f32.mrf.mxu0 }
 0x2e0   :  { %v4146_v42 = vpack.c.bf16 %v3472_v39, %v3471_v5  ;;  %v2827_v38 = vmul.f32 %v2668_v3, %v1897_v44  ;;  %v3163_v45 = vadd.f32 %v3162_v48, %v5692_v6  ;;  %v2900_v17 = vpack.c.bf16 %v2826_v20, %v2824_v51  ;;  %v2688_v20 = vpop.permute.xlu1 %2687 }
 0x2e1   :  { %v1902_v12 = vpop.f32.mrf.mxu1  ;;  %v3164_v2 = vpop.f32.mrf.mxu0  ;;  %v3473_v9 = vmax.f32 %v3161_v59, 0.0  ;;  %v1901_v41 = vadd.f32 %v1900_v46, %v6134_v53 }
 0x2e2   :  { %3982 = vst [vmem:[%s6045_s6 + $0x8] sm:$0xff] %v4146_v42  ;;  %v3165_v52 = vadd.f32 %v3164_v2, %v5687_v55  ;;  %v2901_v49 = vpack.c.bf16 %v2827_v38, %v2825_v22  ;;  %v3474_v43 = vmax.f32 %v3163_v45, 0.0  ;;  %v1903_v11 = vadd.f32 %v1902_v12, %v6132_v54  ;;  %v2683_v59 = vpop.permute.xlu0 %2682  ;;  %v6139_v22 = vld [vmem:[#allocation43_spill] sm:$0xff] }
 0x2e3   :  { %v1904_v13 = vpop.f32.mrf.mxu1  ;;  %v3166_v34 = vpop.f32.mrf.mxu0  ;;  %v2828_v25 = vmul.f32 %v2673_v58, %v1901_v41  ;;  %v6140_v41 = vld [vmem:[#allocation45_spill] sm:$0xff] }
 0x2e4   :  { %v1905_v7 = vadd.f32 %v1904_v13, %v6133_v57  ;;  %v3167_v15 = vadd.f32 %v3166_v34, %v5692_v6  ;;  %3408 = vmatprep.mubr.bf16.mxu0 %v2901_v49  ;;  %v4147_v63 = vpack.c.bf16 %v3474_v43, %v3473_v9  ;;  %v3475_v19 = vmax.f32 %v3165_v52, 0.0 }
 0x2e5   :  { %v1906_v26 = vpop.f32.mrf.mxu1  ;;  %v3170_v61 = vpop.f32.mrf.mxu0  ;;  %3409 = vmatmul.mubr.bf16.gmra.mxu0 %v2900_v17  ;;  %v2829_v16 = vmul.f32 %v2673_v58, %v1903_v11  ;;  %v6142_v58 = vld [vmem:[#allocation44_spill] sm:$0xff] }
 0x2e6   :  { %v3476_v60 = vmax.f32 %v3167_v15, 0.0  ;;  %v1907_v10 = vadd.f32 %v1906_v26, %v6135_v28  ;;  %3983 = vst [vmem:[%s6045_s6 + $0x10] sm:$0xff] %v4147_v63  ;;  %v2830_v27 = vmul.f32 %v2678_v18, %v1905_v7  ;;  %v3171_v24 = vadd.f32 %v3170_v61, %v5687_v55  ;;  %v6141_v26 = vld [vmem:[#allocation46_spill] sm:$0xff] }
 0x2e7   :  { %v1910_v21 = vpop.f32.mrf.mxu1  ;;  %v3172_v30 = vpop.f32.mrf.mxu0 }
 0x2e8   :  { %v4148_v1 = vpack.c.bf16 %v3476_v60, %v3475_v19  ;;  %v2831_v29 = vmul.f32 %v2678_v18, %v1907_v10  ;;  %v3173_v23 = vadd.f32 %v3172_v30, %v5692_v6  ;;  %v2902_v47 = vpack.c.bf16 %v2830_v27, %v2828_v25  ;;  %v2698_v27 = vpop.permute.xlu1 %2697 }
 0x2e9   :  { %v1912_v62 = vpop.f32.mrf.mxu1  ;;  %v3174_v4 = vpop.f32.mrf.mxu0  ;;  %v3477_v33 = vmax.f32 %v3171_v24, 0.0  ;;  %v1911_v5 = vadd.f32 %v1910_v21, %v6138_v37 }
 0x2ea   :  { %3984 = vst [vmem:[%s6045_s6 + $0x18] sm:$0xff] %v4148_v1  ;;  %v3175_v14 = vadd.f32 %v3174_v4, %v5687_v55  ;;  %v2903_v50 = vpack.c.bf16 %v2831_v29, %v2829_v16  ;;  %v3478_v36 = vmax.f32 %v3173_v23, 0.0  ;;  %v1913_v40 = vadd.f32 %v1912_v62, %v6136_v31  ;;  %v2693_v24 = vpop.permute.xlu0 %2692  ;;  %v6143_v16 = vld [vmem:[#allocation47_spill] sm:$0xff] }
 0x2eb   :  { %v1914_v56 = vpop.f32.mrf.mxu1  ;;  %v3176_v32 = vpop.f32.mrf.mxu0  ;;  %v2832_v17 = vmul.f32 %v2683_v59, %v1911_v5  ;;  %v6144_v5 = vld [vmem:[#allocation49_spill] sm:$0xff] }
 0x2ec   :  { %v1915_v0 = vadd.f32 %v1914_v56, %v6137_v8  ;;  %v3177_v3 = vadd.f32 %v3176_v32, %v5692_v6  ;;  %3418 = vmatprep.mubr.bf16.mxu0 %v2903_v50  ;;  %v4149_v39 = vpack.c.bf16 %v3478_v36, %v3477_v33  ;;  %v3479_v46 = vmax.f32 %v3175_v14, 0.0 }
 0x2ed   :  { %v1916_v35 = vpop.f32.mrf.mxu1  ;;  %v3180_v44 = vpop.f32.mrf.mxu0  ;;  %3419 = vmatmul.mubr.bf16.gmra.mxu0 %v2902_v47  ;;  %v2833_v2 = vmul.f32 %v2683_v59, %v1913_v40  ;;  %v6146_v59 = vld [vmem:[#allocation48_spill] sm:$0xff] }
 0x2ee   :  { %v3480_v48 = vmax.f32 %v3177_v3, 0.0  ;;  %v1917_v42 = vadd.f32 %v1916_v35, %v6139_v22  ;;  %3985 = vst [vmem:[%s6045_s6 + $0x20] sm:$0xff] %v4149_v39  ;;  %v2834_v38 = vmul.f32 %v2688_v20, %v1915_v0  ;;  %v3181_v51 = vadd.f32 %v3180_v44, %v5687_v55  ;;  %v6145_v35 = vld [vmem:[#allocation50_spill] sm:$0xff] }
 0x2ef   :  { %v1920_v45 = vpop.f32.mrf.mxu1  ;;  %v3182_v12 = vpop.f32.mrf.mxu0 }
 0x2f0   :  { %v4150_v52 = vpack.c.bf16 %v3480_v48, %v3479_v46  ;;  %v2835_v49 = vmul.f32 %v2688_v20, %v1917_v42  ;;  %v3183_v9 = vadd.f32 %v3182_v12, %v5692_v6  ;;  %v2904_v11 = vpack.c.bf16 %v2834_v38, %v2832_v17  ;;  %v2708_v38 = vpop.permute.xlu1 %2707 }
 0x2f1   :  { %v1922_v43 = vpop.f32.mrf.mxu1  ;;  %v3184_v13 = vpop.f32.mrf.mxu0  ;;  %v3481_v57 = vmax.f32 %v3181_v51, 0.0  ;;  %v1921_v19 = vadd.f32 %v1920_v45, %v6142_v58 }
 0x2f2   :  { %3986 = vst [vmem:[%s6045_s6 + $0x28] sm:$0xff] %v4150_v52  ;;  %v3185_v34 = vadd.f32 %v3184_v13, %v5687_v55  ;;  %v2905_v54 = vpack.c.bf16 %v2835_v49, %v2833_v2  ;;  %v3482_v7 = vmax.f32 %v3183_v9, 0.0  ;;  %v1923_v63 = vadd.f32 %v1922_v43, %v6140_v41  ;;  %v2703_v51 = vpop.permute.xlu0 %2702  ;;  %v6147_v2 = vld [vmem:[#allocation51_spill] sm:$0xff] }
 0x2f3   :  { %v1924_v15 = vpop.f32.mrf.mxu1  ;;  %v3186_v53 = vpop.f32.mrf.mxu0  ;;  %v2836_v47 = vmul.f32 %v2693_v24, %v1921_v19  ;;  %v6148_v19 = vld [vmem:[#allocation53_spill] sm:$0xff] }
 0x2f4   :  { %v1925_v61 = vadd.f32 %v1924_v15, %v6141_v26  ;;  %v3187_v18 = vadd.f32 %v3186_v53, %v5692_v6  ;;  %3428 = vmatprep.mubr.bf16.mxu0 %v2905_v54  ;;  %v4151_v60 = vpack.c.bf16 %v3482_v7, %v3481_v57  ;;  %v3483_v21 = vmax.f32 %v3185_v34, 0.0 }
 0x2f5   :  { %v1926_v28 = vpop.f32.mrf.mxu1  ;;  %v3190_v10 = vpop.f32.mrf.mxu0  ;;  %3429 = vmatmul.mubr.bf16.gmra.mxu0 %v2904_v11  ;;  %v2837_v4 = vmul.f32 %v2693_v24, %v1923_v63  ;;  %v6150_v24 = vld [vmem:[#allocation52_spill] sm:$0xff] }
 0x2f6   :  { %v3484_v30 = vmax.f32 %v3187_v18, 0.0  ;;  %v1927_v1 = vadd.f32 %v1926_v28, %v6143_v16  ;;  %3987 = vst [vmem:[%s6045_s6 + $0x30] sm:$0xff] %v4151_v60  ;;  %v2838_v29 = vmul.f32 %v2698_v27, %v1925_v61  ;;  %v3191_v25 = vadd.f32 %v3190_v10, %v5687_v55  ;;  %v6149_v28 = vld [vmem:[#allocation54_spill] sm:$0xff] }
 0x2f7   :  { %v1930_v23 = vpop.f32.mrf.mxu1  ;;  %v3192_v62 = vpop.f32.mrf.mxu0 }
 0x2f8   :  { %v4152_v14 = vpack.c.bf16 %v3484_v30, %v3483_v21  ;;  %v2839_v50 = vmul.f32 %v2698_v27, %v1927_v1  ;;  %v3193_v33 = vadd.f32 %v3192_v62, %v5692_v6  ;;  %v2906_v40 = vpack.c.bf16 %v2838_v29, %v2836_v47  ;;  %v2718_v29 = vpop.permute.xlu1 %2717  ;;  %v6151_v62 = vld [vmem:[#allocation55_spill] sm:$0xff] }
 0x2f9   :  { %v1932_v36 = vpop.f32.mrf.mxu1  ;;  %v3194_v56 = vpop.f32.mrf.mxu0  ;;  %v3485_v8 = vmax.f32 %v3191_v25, 0.0  ;;  %v1931_v46 = vadd.f32 %v1930_v23, %v6146_v59 }
 0x2fa   :  { %3988 = vst [vmem:[%s6045_s6 + $0x38] sm:$0xff] %v4152_v14  ;;  %v3195_v32 = vadd.f32 %v3194_v56, %v5687_v55  ;;  %v2907_v31 = vpack.c.bf16 %v2839_v50, %v2837_v4  ;;  %v3486_v0 = vmax.f32 %v3193_v33, 0.0  ;;  %v1933_v39 = vadd.f32 %v1932_v36, %v6144_v5  ;;  %v2713_v14 = vpop.permute.xlu0 %2712 }
 0x2fb   :  { %v1934_v3 = vpop.f32.mrf.mxu1  ;;  %v3196_v37 = vpop.f32.mrf.mxu0  ;;  %v2840_v11 = vmul.f32 %v2703_v51, %v1931_v46 }
 0x2fc   :  { %v1935_v44 = vadd.f32 %v1934_v3, %v6145_v35  ;;  %v3197_v20 = vadd.f32 %v3196_v37, %v5692_v6  ;;  %3438 = vmatprep.mubr.bf16.mxu0 %v2907_v31  ;;  %v4153_v48 = vpack.c.bf16 %v3486_v0, %v3485_v8  ;;  %v3487_v45 = vmax.f32 %v3195_v32, 0.0 }
 0x2fd   :  { %v1936_v22 = vpop.f32.mrf.mxu1  ;;  %v3200_v42 = vpop.f32.mrf.mxu0  ;;  %3439 = vmatmul.mubr.bf16.gmra.mxu0 %v2906_v40  ;;  %v2841_v13 = vmul.f32 %v2703_v51, %v1933_v39 }
 0x2fe   :  { %v3488_v12 = vmax.f32 %v3197_v20, 0.0  ;;  %v1937_v52 = vadd.f32 %v1936_v22, %v6147_v2  ;;  %3989 = vst [vmem:[%s6045_s6 + $0x40] sm:$0xff] %v4153_v48  ;;  %v2842_v49 = vmul.f32 %v2708_v38, %v1935_v44  ;;  %v3201_v17 = vadd.f32 %v3200_v42, %v5687_v55 }
 0x2ff   :  { %v1940_v9 = vpop.f32.mrf.mxu1  ;;  %v3202_v43 = vpop.f32.mrf.mxu0 }
 0x300   :  { %v4154_v34 = vpack.c.bf16 %v3488_v12, %v3487_v45  ;;  %v2843_v54 = vmul.f32 %v2708_v38, %v1937_v52  ;;  %v3203_v57 = vadd.f32 %v3202_v43, %v5692_v6  ;;  %v2908_v63 = vpack.c.bf16 %v2842_v49, %v2840_v11 }
 0x301   :  { %v1942_v7 = vpop.f32.mrf.mxu1  ;;  %v3204_v15 = vpop.f32.mrf.mxu0  ;;  %v3489_v26 = vmax.f32 %v3201_v17, 0.0  ;;  %v1941_v21 = vadd.f32 %v1940_v9, %v6150_v24 }
 0x302   :  { %3990 = vst [vmem:[%s6045_s6 + $0x48] sm:$0xff] %v4154_v34  ;;  %v3205_v53 = vadd.f32 %v3204_v15, %v5687_v55  ;;  %v2909_v41 = vpack.c.bf16 %v2843_v54, %v2841_v13  ;;  %v3490_v61 = vmax.f32 %v3203_v57, 0.0  ;;  %v1943_v60 = vadd.f32 %v1942_v7, %v6148_v19 }
 0x303   :  { %v1944_v18 = vpop.f32.mrf.mxu1  ;;  %v3206_v58 = vpop.f32.mrf.mxu0  ;;  %v2844_v31 = vmul.f32 %v2713_v14, %v1941_v21 }
 0x304   :  { %v1945_v10 = vadd.f32 %v1944_v18, %v6149_v28  ;;  %v3207_v27 = vadd.f32 %v3206_v58, %v5692_v6  ;;  %3448 = vmatprep.mubr.bf16.mxu0 %v2909_v41  ;;  %v4155_v30 = vpack.c.bf16 %v3490_v61, %v3489_v26  ;;  %v3491_v25 = vmax.f32 %v3205_v53, 0.0 }
 0x305   :  { %v1946_v16 = vpop.f32.mrf.mxu1  ;;  %v3210_v1 = vpop.f32.mrf.mxu0  ;;  %3449 = vmatmul.mubr.bf16.gmra.mxu0 %v2908_v63  ;;  %v2845_v36 = vmul.f32 %v2713_v14, %v1943_v60 }
 0x306   :  { %v3492_v23 = vmax.f32 %v3207_v27, 0.0  ;;  %v1947_v4 = vadd.f32 %v1946_v16, %v6151_v62  ;;  %3991 = vst [vmem:[%s6045_s6 + $0x50] sm:$0xff] %v4155_v30  ;;  %v2846_v50 = vmul.f32 %v2718_v29, %v1945_v10  ;;  %v3211_v47 = vadd.f32 %v3210_v1, %v5687_v55 }
 0x307   :  { %v3212_v33 = vpop.f32.mrf.mxu0 }
 0x308   :  { %v4156_v56 = vpack.c.bf16 %v3492_v23, %v3491_v25  ;;  %v2847_v32 = vmul.f32 %v2718_v29, %v1947_v4  ;;  %v3213_v40 = vadd.f32 %v3212_v33, %v5692_v6  ;;  %v2910_v37 = vpack.c.bf16 %v2846_v50, %v2844_v31 }
 0x309   :  { %v3214_v8 = vpop.f32.mrf.mxu0  ;;  %v3493_v5 = vmax.f32 %v3211_v47, 0.0 }
 0x30a   :  { %3992 = vst [vmem:[%s6045_s6 + $0x58] sm:$0xff] %v4156_v56  ;;  %v3215_v0 = vadd.f32 %v3214_v8, %v5687_v55  ;;  %v2911_v3 = vpack.c.bf16 %v2847_v32, %v2845_v36  ;;  %v3494_v39 = vmax.f32 %v3213_v40, 0.0 }
 0x30b   :  { %v3216_v35 = vpop.f32.mrf.mxu0 }
 0x30c   :  { %v3217_v44 = vadd.f32 %v3216_v35, %v5692_v6  ;;  %3458 = vmatprep.mubr.bf16.mxu0 %v2911_v3  ;;  %v4157_v20 = vpack.c.bf16 %v3494_v39, %v3493_v5  ;;  %v3495_v46 = vmax.f32 %v3215_v0, 0.0 }
 0x30d   :  { %v3220_v59 = vpop.f32.mrf.mxu0  ;;  %3459 = vmatmul.mubr.bf16.gmra.mxu0 %v2910_v37 }
 0x30e   :  { %v3496_v48 = vmax.f32 %v3217_v44, 0.0  ;;  %v3221_v22 = vadd.f32 %v3220_v59, %v5687_v55  ;;  %3993 = vst [vmem:[%s6045_s6 + $0x60] sm:$0xff] %v4157_v20 }
 0x30f   :  { %v3222_v42 = vpop.f32.mrf.mxu0 }
 0x310   :  { %v4158_v38 = vpack.c.bf16 %v3496_v48, %v3495_v46  ;;  %v3223_v51 = vadd.f32 %v3222_v42, %v5692_v6  ;;  %v3497_v12 = vmax.f32 %v3221_v22, 0.0 }
 0x311   :  { %v3224_v45 = vpop.f32.mrf.mxu0 }
 0x312   :  { %3994 = vst [vmem:[%s6045_s6 + $0x68] sm:$0xff] %v4158_v38  ;;  %v3498_v2 = vmax.f32 %v3223_v51, 0.0  ;;  %v3225_v52 = vadd.f32 %v3224_v45, %v5687_v55 }
 0x313   :  { %v3226_v49 = vpop.f32.mrf.mxu0 }
 0x314   :  { %v4159_v17 = vpack.c.bf16 %v3498_v2, %v3497_v12  ;;  %v3227_v9 = vadd.f32 %v3226_v49, %v5692_v6  ;;  %v3499_v13 = vmax.f32 %v3225_v52, 0.0 }
 0x315   :  { %v3230_v43 = vpop.f32.mrf.mxu0 }
 0x316   :  { %3995 = vst [vmem:[%s6045_s6 + $0x70] sm:$0xff] %v4159_v17  ;;  %v3500_v34 = vmax.f32 %v3227_v9, 0.0  ;;  %v3231_v54 = vadd.f32 %v3230_v43, %v5687_v55 }
 0x317   :  { %v3232_v11 = vpop.f32.mrf.mxu0 }
 0x318   :  { %v4160_v57 = vpack.c.bf16 %v3500_v34, %v3499_v13  ;;  %v3233_v7 = vadd.f32 %v3232_v11, %v5692_v6  ;;  %v3501_v53 = vmax.f32 %v3231_v54, 0.0 }
 0x319   :  { %v3234_v15 = vpop.f32.mrf.mxu0 }
 0x31a   :  { %3996 = vst [vmem:[%s6045_s6 + $0x78] sm:$0xff] %v4160_v57  ;;  %v3502_v41 = vmax.f32 %v3233_v7, 0.0  ;;  %v3235_v63 = vadd.f32 %v3234_v15, %v5687_v55 }
 0x31b   :  { %v3236_v26 = vpop.f32.mrf.mxu0 }
 0x31c   :  { %v4161_v61 = vpack.c.bf16 %v3502_v41, %v3501_v53  ;;  %v3237_v18 = vadd.f32 %v3236_v26, %v5692_v6  ;;  %v3503_v19 = vmax.f32 %v3235_v63, 0.0 }
 0x31d   :  { %v3240_v58 = vpop.f32.mrf.mxu0 }
 0x31e   :  { %3997 = vst [vmem:[%s6045_s6 + $0x80] sm:$0xff] %v4161_v61  ;;  %v3504_v60 = vmax.f32 %v3237_v18, 0.0  ;;  %v3241_v28 = vadd.f32 %v3240_v58, %v5687_v55 }
 0x31f   :  { %v3242_v10 = vpop.f32.mrf.mxu0 }
 0x320   :  { %v4162_v27 = vpack.c.bf16 %v3504_v60, %v3503_v19  ;;  %v3243_v24 = vadd.f32 %v3242_v10, %v5692_v6  ;;  %v3505_v30 = vmax.f32 %v3241_v28, 0.0 }
 0x321   :  { %v3244_v21 = vpop.f32.mrf.mxu0 }
 0x322   :  { %3998 = vst [vmem:[%s6045_s6 + $0x88] sm:$0xff] %v4162_v27  ;;  %v3506_v16 = vmax.f32 %v3243_v24, 0.0  ;;  %v3245_v1 = vadd.f32 %v3244_v21, %v5687_v55 }
 0x323   :  { %v3246_v29 = vpop.f32.mrf.mxu0 }
 0x324   :  { %v4163_v25 = vpack.c.bf16 %v3506_v16, %v3505_v30  ;;  %v3247_v23 = vadd.f32 %v3246_v29, %v5692_v6  ;;  %v3507_v4 = vmax.f32 %v3245_v1, 0.0 }
 0x325   :  { %v3250_v62 = vpop.f32.mrf.mxu0 }
 0x326   :  { %3999 = vst [vmem:[%s6045_s6 + $0x90] sm:$0xff] %v4163_v25  ;;  %v3508_v14 = vmax.f32 %v3247_v23, 0.0  ;;  %v3251_v50 = vadd.f32 %v3250_v62, %v5687_v55 }
 0x327   :  { %v3252_v47 = vpop.f32.mrf.mxu0 }
 0x328   :  { %v4164_v33 = vpack.c.bf16 %v3508_v14, %v3507_v4  ;;  %v3253_v36 = vadd.f32 %v3252_v47, %v5692_v6  ;;  %v3509_v32 = vmax.f32 %v3251_v50, 0.0 }
 0x329   :  { %v3254_v56 = vpop.f32.mrf.mxu0 }
 0x32a   :  { %4000 = vst [vmem:[%s6045_s6 + $0x98] sm:$0xff] %v4164_v33  ;;  %v3510_v31 = vmax.f32 %v3253_v36, 0.0  ;;  %v3255_v40 = vadd.f32 %v3254_v56, %v5687_v55 }
 0x32b   :  { %v3256_v8 = vpop.f32.mrf.mxu0 }
 0x32c   :  { %v4165_v0 = vpack.c.bf16 %v3510_v31, %v3509_v32  ;;  %v3257_v3 = vadd.f32 %v3256_v8, %v5692_v6  ;;  %v3511_v5 = vmax.f32 %v3255_v40, 0.0 }
 0x32d   :  { %v3260_v37 = vpop.f32.mrf.mxu0 }
 0x32e   :  { %4001 = vst [vmem:[%s6045_s6 + $0xa0] sm:$0xff] %v4165_v0  ;;  %v3512_v39 = vmax.f32 %v3257_v3, 0.0  ;;  %v3261_v35 = vadd.f32 %v3260_v37, %v5687_v55 }
 0x32f   :  { %v3262_v44 = vpop.f32.mrf.mxu0 }
 0x330   :  { %v4166_v20 = vpack.c.bf16 %v3512_v39, %v3511_v5  ;;  %v3263_v59 = vadd.f32 %v3262_v44, %v5692_v6  ;;  %v3513_v48 = vmax.f32 %v3261_v35, 0.0 }
 0x331   :  { %v3264_v46 = vpop.f32.mrf.mxu0 }
 0x332   :  { %4002 = vst [vmem:[%s6045_s6 + $0xa8] sm:$0xff] %v4166_v20  ;;  %v3514_v22 = vmax.f32 %v3263_v59, 0.0  ;;  %v3265_v42 = vadd.f32 %v3264_v46, %v5687_v55 }
 0x333   :  { %v3266_v38 = vpop.f32.mrf.mxu0 }
 0x334   :  { %v4167_v51 = vpack.c.bf16 %v3514_v22, %v3513_v48  ;;  %v3267_v45 = vadd.f32 %v3266_v38, %v5692_v6  ;;  %v3515_v2 = vmax.f32 %v3265_v42, 0.0 }
 0x335   :  { %v3270_v12 = vpop.f32.mrf.mxu0 }
 0x336   :  { %4003 = vst [vmem:[%s6045_s6 + $0xb0] sm:$0xff] %v4167_v51  ;;  %v3516_v52 = vmax.f32 %v3267_v45, 0.0  ;;  %v3271_v49 = vadd.f32 %v3270_v12, %v5687_v55 }
 0x337   :  { %v3272_v17 = vpop.f32.mrf.mxu0 }
 0x338   :  { %v4168_v9 = vpack.c.bf16 %v3516_v52, %v3515_v2  ;;  %v3273_v43 = vadd.f32 %v3272_v17, %v5692_v6  ;;  %v3517_v34 = vmax.f32 %v3271_v49, 0.0 }
 0x339   :  { %v3274_v13 = vpop.f32.mrf.mxu0 }
 0x33a   :  { %4004 = vst [vmem:[%s6045_s6 + $0xb8] sm:$0xff] %v4168_v9  ;;  %v3518_v54 = vmax.f32 %v3273_v43, 0.0  ;;  %v3275_v11 = vadd.f32 %v3274_v13, %v5687_v55 }
 0x33b   :  { %v3276_v57 = vpop.f32.mrf.mxu0 }
 0x33c   :  { %v4169_v7 = vpack.c.bf16 %v3518_v54, %v3517_v34  ;;  %v3277_v15 = vadd.f32 %v3276_v57, %v5692_v6  ;;  %v3519_v41 = vmax.f32 %v3275_v11, 0.0 }
 0x33d   :  { %v3280_v53 = vpop.f32.mrf.mxu0 }
 0x33e   :  { %4005 = vst [vmem:[%s6045_s6 + $0xc0] sm:$0xff] %v4169_v7  ;;  %v3520_v63 = vmax.f32 %v3277_v15, 0.0  ;;  %v3281_v26 = vadd.f32 %v3280_v53, %v5687_v55 }
 0x33f   :  { %v3282_v61 = vpop.f32.mrf.mxu0 }
 0x340   :  { %v4170_v18 = vpack.c.bf16 %v3520_v63, %v3519_v41  ;;  %v3283_v58 = vadd.f32 %v3282_v61, %v5692_v6  ;;  %v3521_v60 = vmax.f32 %v3281_v26, 0.0 }
 0x341   :  { %v3284_v19 = vpop.f32.mrf.mxu0 }
 0x342   :  { %4006 = vst [vmem:[%s6045_s6 + $0xc8] sm:$0xff] %v4170_v18  ;;  %v3522_v28 = vmax.f32 %v3283_v58, 0.0  ;;  %v3285_v10 = vadd.f32 %v3284_v19, %v5687_v55 }
 0x343   :  { %v3286_v27 = vpop.f32.mrf.mxu0 }
 0x344   :  { %v4171_v24 = vpack.c.bf16 %v3522_v28, %v3521_v60  ;;  %v3287_v21 = vadd.f32 %v3286_v27, %v5692_v6  ;;  %v3523_v16 = vmax.f32 %v3285_v10, 0.0 }
 0x345   :  { %v3290_v30 = vpop.f32.mrf.mxu0 }
 0x346   :  { %4007 = vst [vmem:[%s6045_s6 + $0xd0] sm:$0xff] %v4171_v24  ;;  %v3524_v1 = vmax.f32 %v3287_v21, 0.0  ;;  %v3291_v29 = vadd.f32 %v3290_v30, %v5687_v55 }
 0x347   :  { %v3292_v25 = vpop.f32.mrf.mxu0 }
 0x348   :  { %v4172_v23 = vpack.c.bf16 %v3524_v1, %v3523_v16  ;;  %v3293_v62 = vadd.f32 %v3292_v25, %v5692_v6  ;;  %v3525_v14 = vmax.f32 %v3291_v29, 0.0 }
 0x349   :  { %v3294_v4 = vpop.f32.mrf.mxu0 }
 0x34a   :  { %4008 = vst [vmem:[%s6045_s6 + $0xd8] sm:$0xff] %v4172_v23  ;;  %v3526_v50 = vmax.f32 %v3293_v62, 0.0  ;;  %v3295_v47 = vadd.f32 %v3294_v4, %v5687_v55 }
 0x34b   :  { %v3296_v33 = vpop.f32.mrf.mxu0 }
 0x34c   :  { %v4173_v36 = vpack.c.bf16 %v3526_v50, %v3525_v14  ;;  %v3297_v56 = vadd.f32 %v3296_v33, %v5692_v6  ;;  %v3527_v31 = vmax.f32 %v3295_v47, 0.0 }
 0x34d   :  { %v3300_v32 = vpop.f32.mrf.mxu0 }
 0x34e   :  { %4009 = vst [vmem:[%s6045_s6 + $0xe0] sm:$0xff] %v4173_v36  ;;  %v3528_v40 = vmax.f32 %v3297_v56, 0.0  ;;  %v3301_v8 = vadd.f32 %v3300_v32, %v5687_v55 }
 0x34f   :  { %v3302_v0 = vpop.f32.mrf.mxu0 }
 0x350   :  { %v4174_v3 = vpack.c.bf16 %v3528_v40, %v3527_v31  ;;  %v3303_v37 = vadd.f32 %v3302_v0, %v5692_v6  ;;  %v3529_v39 = vmax.f32 %v3301_v8, 0.0 }
 0x351   :  { %v3304_v5 = vpop.f32.mrf.mxu0 }
 0x352   :  { %4010 = vst [vmem:[%s6045_s6 + $0xe8] sm:$0xff] %v4174_v3  ;;  %v3530_v35 = vmax.f32 %v3303_v37, 0.0  ;;  %v3305_v44 = vadd.f32 %v3304_v5, %v5687_v55 }
 0x353   :  { %v3306_v20 = vpop.f32.mrf.mxu0 }
 0x354   :  { %v4175_v59 = vpack.c.bf16 %v3530_v35, %v3529_v39  ;;  %v3307_v46 = vadd.f32 %v3306_v20, %v5692_v6  ;;  %v3531_v22 = vmax.f32 %v3305_v44, 0.0 }
 0x355   :  { %v3310_v48 = vpop.f32.mrf.mxu0 }
 0x356   :  { %4011 = vst [vmem:[%s6045_s6 + $0xf0] sm:$0xff] %v4175_v59  ;;  %v3532_v42 = vmax.f32 %v3307_v46, 0.0  ;;  %v3311_v38 = vadd.f32 %v3310_v48, %v5687_v55 }
 0x357   :  { %v3312_v51 = vpop.f32.mrf.mxu0 }
 0x358   :  { %v4176_v45 = vpack.c.bf16 %v3532_v42, %v3531_v22  ;;  %v3313_v12 = vadd.f32 %v3312_v51, %v5692_v6  ;;  %v3533_v52 = vmax.f32 %v3311_v38, 0.0 }
 0x359   :  { %v3314_v2 = vpop.f32.mrf.mxu0 }
 0x35a   :  { %4012 = vst [vmem:[%s6045_s6 + $0xf8] sm:$0xff] %v4176_v45  ;;  %v3534_v49 = vmax.f32 %v3313_v12, 0.0  ;;  %v3315_v17 = vadd.f32 %v3314_v2, %v5687_v55 }
 0x35b   :  { %v3316_v9 = vpop.f32.mrf.mxu0 }
 0x35c   :  { %v4177_v43 = vpack.c.bf16 %v3534_v49, %v3533_v52  ;;  %v3317_v13 = vadd.f32 %v3316_v9, %v5692_v6  ;;  %v3535_v54 = vmax.f32 %v3315_v17, 0.0 }
 0x35d   :  { %v3320_v34 = vpop.f32.mrf.mxu0 }
 0x35e   :  { %4013 = vst [vmem:[%s6045_s6 + $0x100] sm:$0xff] %v4177_v43  ;;  %v3536_v11 = vmax.f32 %v3317_v13, 0.0  ;;  %v3321_v57 = vadd.f32 %v3320_v34, %v5687_v55 }
 0x35f   :  { %v3322_v7 = vpop.f32.mrf.mxu0 }
 0x360   :  { %v4178_v15 = vpack.c.bf16 %v3536_v11, %v3535_v54  ;;  %v3323_v53 = vadd.f32 %v3322_v7, %v5692_v6  ;;  %v3537_v63 = vmax.f32 %v3321_v57, 0.0 }
 0x361   :  { %v3324_v41 = vpop.f32.mrf.mxu0 }
 0x362   :  { %4014 = vst [vmem:[%s6045_s6 + $0x108] sm:$0xff] %v4178_v15  ;;  %v3538_v26 = vmax.f32 %v3323_v53, 0.0  ;;  %v3325_v61 = vadd.f32 %v3324_v41, %v5687_v55 }
 0x363   :  { %v3326_v18 = vpop.f32.mrf.mxu0 }
 0x364   :  { %v4179_v58 = vpack.c.bf16 %v3538_v26, %v3537_v63  ;;  %v3327_v19 = vadd.f32 %v3326_v18, %v5692_v6  ;;  %v3539_v28 = vmax.f32 %v3325_v61, 0.0 }
 0x365   :  { %v3330_v60 = vpop.f32.mrf.mxu0 }
 0x366   :  { %4015 = vst [vmem:[%s6045_s6 + $0x110] sm:$0xff] %v4179_v58  ;;  %v3540_v10 = vmax.f32 %v3327_v19, 0.0  ;;  %v3331_v27 = vadd.f32 %v3330_v60, %v5687_v55 }
 0x367   :  { %v3332_v24 = vpop.f32.mrf.mxu0 }
 0x368   :  { %v4180_v21 = vpack.c.bf16 %v3540_v10, %v3539_v28  ;;  %v3333_v30 = vadd.f32 %v3332_v24, %v5692_v6  ;;  %v3541_v1 = vmax.f32 %v3331_v27, 0.0 }
 0x369   :  { %v3334_v16 = vpop.f32.mrf.mxu0 }
 0x36a   :  { %4016 = vst [vmem:[%s6045_s6 + $0x118] sm:$0xff] %v4180_v21  ;;  %v3542_v29 = vmax.f32 %v3333_v30, 0.0  ;;  %v3335_v25 = vadd.f32 %v3334_v16, %v5687_v55 }
 0x36b   :  { %v3336_v23 = vpop.f32.mrf.mxu0 }
 0x36c   :  { %v4181_v62 = vpack.c.bf16 %v3542_v29, %v3541_v1  ;;  %v3337_v4 = vadd.f32 %v3336_v23, %v5692_v6  ;;  %v3543_v50 = vmax.f32 %v3335_v25, 0.0 }
 0x36d   :  { %v3340_v14 = vpop.f32.mrf.mxu0 }
 0x36e   :  { %4017 = vst [vmem:[%s6045_s6 + $0x120] sm:$0xff] %v4181_v62  ;;  %v3544_v47 = vmax.f32 %v3337_v4, 0.0  ;;  %v3341_v33 = vadd.f32 %v3340_v14, %v5687_v55 }
 0x36f   :  { %v3342_v36 = vpop.f32.mrf.mxu0 }
 0x370   :  { %v4182_v56 = vpack.c.bf16 %v3544_v47, %v3543_v50  ;;  %v3343_v32 = vadd.f32 %v3342_v36, %v5692_v6  ;;  %v3545_v40 = vmax.f32 %v3341_v33, 0.0 }
 0x371   :  { %v3344_v31 = vpop.f32.mrf.mxu0 }
 0x372   :  { %4018 = vst [vmem:[%s6045_s6 + $0x128] sm:$0xff] %v4182_v56  ;;  %v3546_v8 = vmax.f32 %v3343_v32, 0.0  ;;  %v3345_v0 = vadd.f32 %v3344_v31, %v5687_v55 }
 0x373   :  { %v3346_v3 = vpop.f32.mrf.mxu0 }
 0x374   :  { %v4183_v37 = vpack.c.bf16 %v3546_v8, %v3545_v40  ;;  %v3347_v5 = vadd.f32 %v3346_v3, %v5692_v6  ;;  %v3547_v35 = vmax.f32 %v3345_v0, 0.0 }
 0x375   :  { %v3350_v39 = vpop.f32.mrf.mxu0 }
 0x376   :  { %4019 = vst [vmem:[%s6045_s6 + $0x130] sm:$0xff] %v4183_v37  ;;  %v3548_v44 = vmax.f32 %v3347_v5, 0.0  ;;  %v3351_v20 = vadd.f32 %v3350_v39, %v5687_v55 }
 0x377   :  { %v3352_v59 = vpop.f32.mrf.mxu0 }
 0x378   :  { %v4184_v46 = vpack.c.bf16 %v3548_v44, %v3547_v35  ;;  %v3353_v48 = vadd.f32 %v3352_v59, %v5692_v6  ;;  %v3549_v42 = vmax.f32 %v3351_v20, 0.0 }
 0x379   :  { %v3354_v22 = vpop.f32.mrf.mxu0 }
 0x37a   :  { %4020 = vst [vmem:[%s6045_s6 + $0x138] sm:$0xff] %v4184_v46  ;;  %v3550_v38 = vmax.f32 %v3353_v48, 0.0  ;;  %v3355_v51 = vadd.f32 %v3354_v22, %v5687_v55 }
 0x37b   :  { %v3356_v45 = vpop.f32.mrf.mxu0 }
 0x37c   :  { %v4185_v12 = vpack.c.bf16 %v3550_v38, %v3549_v42  ;;  %v3357_v2 = vadd.f32 %v3356_v45, %v5692_v6  ;;  %v3551_v49 = vmax.f32 %v3355_v51, 0.0 }
 0x37d   :  { %v3360_v52 = vpop.f32.mrf.mxu0 }
 0x37e   :  { %4021 = vst [vmem:[%s6045_s6 + $0x140] sm:$0xff] %v4185_v12  ;;  %v3552_v17 = vmax.f32 %v3357_v2, 0.0  ;;  %v3361_v9 = vadd.f32 %v3360_v52, %v5687_v55 }
 0x37f   :  { %v3362_v43 = vpop.f32.mrf.mxu0 }
 0x380   :  { %v4186_v13 = vpack.c.bf16 %v3552_v17, %v3551_v49  ;;  %v3363_v34 = vadd.f32 %v3362_v43, %v5692_v6  ;;  %v3553_v11 = vmax.f32 %v3361_v9, 0.0 }
 0x381   :  { %v3364_v54 = vpop.f32.mrf.mxu0 }
 0x382   :  { %4022 = vst [vmem:[%s6045_s6 + $0x148] sm:$0xff] %v4186_v13  ;;  %v3554_v57 = vmax.f32 %v3363_v34, 0.0  ;;  %v3365_v7 = vadd.f32 %v3364_v54, %v5687_v55 }
 0x383   :  { %v3366_v15 = vpop.f32.mrf.mxu0 }
 0x384   :  { %v4187_v53 = vpack.c.bf16 %v3554_v57, %v3553_v11  ;;  %v3367_v41 = vadd.f32 %v3366_v15, %v5692_v6  ;;  %v3555_v26 = vmax.f32 %v3365_v7, 0.0 }
 0x385   :  { %v3370_v63 = vpop.f32.mrf.mxu0 }
 0x386   :  { %4023 = vst [vmem:[%s6045_s6 + $0x150] sm:$0xff] %v4187_v53  ;;  %v3556_v61 = vmax.f32 %v3367_v41, 0.0  ;;  %v3371_v18 = vadd.f32 %v3370_v63, %v5687_v55 }
 0x387   :  { %v3372_v58 = vpop.f32.mrf.mxu0 }
 0x388   :  { %v4188_v19 = vpack.c.bf16 %v3556_v61, %v3555_v26  ;;  %v3373_v60 = vadd.f32 %v3372_v58, %v5692_v6  ;;  %v3557_v10 = vmax.f32 %v3371_v18, 0.0 }
 0x389   :  { %v3374_v28 = vpop.f32.mrf.mxu0 }
 0x38a   :  { %4024 = vst [vmem:[%s6045_s6 + $0x158] sm:$0xff] %v4188_v19  ;;  %v3558_v27 = vmax.f32 %v3373_v60, 0.0  ;;  %v3375_v24 = vadd.f32 %v3374_v28, %v5687_v55 }
 0x38b   :  { %v3376_v21 = vpop.f32.mrf.mxu0 }
 0x38c   :  { %v4189_v30 = vpack.c.bf16 %v3558_v27, %v3557_v10  ;;  %v3377_v16 = vadd.f32 %v3376_v21, %v5692_v6  ;;  %v3559_v29 = vmax.f32 %v3375_v24, 0.0 }
 0x38d   :  { %v3380_v1 = vpop.f32.mrf.mxu0 }
 0x38e   :  { %4025 = vst [vmem:[%s6045_s6 + $0x160] sm:$0xff] %v4189_v30  ;;  %v3560_v25 = vmax.f32 %v3377_v16, 0.0  ;;  %v3381_v23 = vadd.f32 %v3380_v1, %v5687_v55 }
 0x38f   :  { %v3382_v62 = vpop.f32.mrf.mxu0 }
 0x390   :  { %v4190_v4 = vpack.c.bf16 %v3560_v25, %v3559_v29  ;;  %v3383_v14 = vadd.f32 %v3382_v62, %v5692_v6  ;;  %v3561_v47 = vmax.f32 %v3381_v23, 0.0 }
 0x391   :  { %v3384_v50 = vpop.f32.mrf.mxu0 }
 0x392   :  { %4026 = vst [vmem:[%s6045_s6 + $0x168] sm:$0xff] %v4190_v4  ;;  %v3562_v33 = vmax.f32 %v3383_v14, 0.0  ;;  %v3385_v36 = vadd.f32 %v3384_v50, %v5687_v55 }
 0x393   :  { %v3386_v56 = vpop.f32.mrf.mxu0 }
 0x394   :  { %v4191_v32 = vpack.c.bf16 %v3562_v33, %v3561_v47  ;;  %v3387_v31 = vadd.f32 %v3386_v56, %v5692_v6  ;;  %v3563_v8 = vmax.f32 %v3385_v36, 0.0 }
 0x395   :  { %v3390_v40 = vpop.f32.mrf.mxu0 }
 0x396   :  { %4027 = vst [vmem:[%s6045_s6 + $0x170] sm:$0xff] %v4191_v32  ;;  %v3564_v0 = vmax.f32 %v3387_v31, 0.0  ;;  %v3391_v3 = vadd.f32 %v3390_v40, %v5687_v55 }
 0x397   :  { %v3392_v37 = vpop.f32.mrf.mxu0 }
 0x398   :  { %v4192_v5 = vpack.c.bf16 %v3564_v0, %v3563_v8  ;;  %v3393_v39 = vadd.f32 %v3392_v37, %v5692_v6  ;;  %v3565_v44 = vmax.f32 %v3391_v3, 0.0 }
 0x399   :  { %v3394_v35 = vpop.f32.mrf.mxu0 }
 0x39a   :  { %4028 = vst [vmem:[%s6045_s6 + $0x178] sm:$0xff] %v4192_v5  ;;  %v3566_v20 = vmax.f32 %v3393_v39, 0.0  ;;  %v3395_v59 = vadd.f32 %v3394_v35, %v5687_v55 }
 0x39b   :  { %v3396_v46 = vpop.f32.mrf.mxu0 }
 0x39c   :  { %v4193_v48 = vpack.c.bf16 %v3566_v20, %v3565_v44  ;;  %v3397_v22 = vadd.f32 %v3396_v46, %v5692_v6  ;;  %v3567_v38 = vmax.f32 %v3395_v59, 0.0 }
 0x39d   :  { %v3400_v42 = vpop.f32.mrf.mxu0 }
 0x39e   :  { %4029 = vst [vmem:[%s6045_s6 + $0x180] sm:$0xff] %v4193_v48  ;;  %v3568_v51 = vmax.f32 %v3397_v22, 0.0  ;;  %v3401_v45 = vadd.f32 %v3400_v42, %v5687_v55 }
 0x39f   :  { %v3402_v12 = vpop.f32.mrf.mxu0 }
 0x3a0   :  { %v4194_v2 = vpack.c.bf16 %v3568_v51, %v3567_v38  ;;  %v3403_v52 = vadd.f32 %v3402_v12, %v5692_v6  ;;  %v3569_v17 = vmax.f32 %v3401_v45, 0.0 }
 0x3a1   :  { %v3404_v49 = vpop.f32.mrf.mxu0 }
 0x3a2   :  { %4030 = vst [vmem:[%s6045_s6 + $0x188] sm:$0xff] %v4194_v2  ;;  %v3570_v9 = vmax.f32 %v3403_v52, 0.0  ;;  %v3405_v43 = vadd.f32 %v3404_v49, %v5687_v55 }
 0x3a3   :  { %v3406_v13 = vpop.f32.mrf.mxu0 }
 0x3a4   :  { %v4195_v34 = vpack.c.bf16 %v3570_v9, %v3569_v17  ;;  %v3407_v54 = vadd.f32 %v3406_v13, %v5692_v6  ;;  %v3571_v57 = vmax.f32 %v3405_v43, 0.0 }
 0x3a5   :  { %v3410_v11 = vpop.f32.mrf.mxu0 }
 0x3a6   :  { %4031 = vst [vmem:[%s6045_s6 + $0x190] sm:$0xff] %v4195_v34  ;;  %v3572_v7 = vmax.f32 %v3407_v54, 0.0  ;;  %v3411_v15 = vadd.f32 %v3410_v11, %v5687_v55 }
 0x3a7   :  { %v3412_v53 = vpop.f32.mrf.mxu0 }
 0x3a8   :  { %v4196_v41 = vpack.c.bf16 %v3572_v7, %v3571_v57  ;;  %v3413_v63 = vadd.f32 %v3412_v53, %v5692_v6  ;;  %v3573_v61 = vmax.f32 %v3411_v15, 0.0 }
 0x3a9   :  { %v3414_v26 = vpop.f32.mrf.mxu0 }
 0x3aa   :  { %4032 = vst [vmem:[%s6045_s6 + $0x198] sm:$0xff] %v4196_v41  ;;  %v3574_v18 = vmax.f32 %v3413_v63, 0.0  ;;  %v3415_v58 = vadd.f32 %v3414_v26, %v5687_v55 }
 0x3ab   :  { %v3416_v19 = vpop.f32.mrf.mxu0 }
 0x3ac   :  { %v4197_v60 = vpack.c.bf16 %v3574_v18, %v3573_v61  ;;  %v3417_v28 = vadd.f32 %v3416_v19, %v5692_v6  ;;  %v3575_v27 = vmax.f32 %v3415_v58, 0.0 }
 0x3ad   :  { %v3420_v10 = vpop.f32.mrf.mxu0 }
 0x3ae   :  { %4033 = vst [vmem:[%s6045_s6 + $0x1a0] sm:$0xff] %v4197_v60  ;;  %v3576_v24 = vmax.f32 %v3417_v28, 0.0  ;;  %v3421_v21 = vadd.f32 %v3420_v10, %v5687_v55 }
 0x3af   :  { %v3422_v30 = vpop.f32.mrf.mxu0 }
 0x3b0   :  { %v4198_v16 = vpack.c.bf16 %v3576_v24, %v3575_v27  ;;  %v3423_v1 = vadd.f32 %v3422_v30, %v5692_v6  ;;  %v3577_v25 = vmax.f32 %v3421_v21, 0.0 }
 0x3b1   :  { %v3424_v29 = vpop.f32.mrf.mxu0 }
 0x3b2   :  { %4034 = vst [vmem:[%s6045_s6 + $0x1a8] sm:$0xff] %v4198_v16  ;;  %v3578_v23 = vmax.f32 %v3423_v1, 0.0  ;;  %v3425_v62 = vadd.f32 %v3424_v29, %v5687_v55 }
 0x3b3   :  { %v3426_v4 = vpop.f32.mrf.mxu0 }
 0x3b4   :  { %v4199_v14 = vpack.c.bf16 %v3578_v23, %v3577_v25  ;;  %v3427_v50 = vadd.f32 %v3426_v4, %v5692_v6  ;;  %v3579_v33 = vmax.f32 %v3425_v62, 0.0 }
 0x3b5   :  { %v3430_v47 = vpop.f32.mrf.mxu0 }
 0x3b6   :  { %4035 = vst [vmem:[%s6045_s6 + $0x1b0] sm:$0xff] %v4199_v14  ;;  %v3580_v36 = vmax.f32 %v3427_v50, 0.0  ;;  %v3431_v56 = vadd.f32 %v3430_v47, %v5687_v55 }
 0x3b7   :  { %v3432_v32 = vpop.f32.mrf.mxu0 }
 0x3b8   :  { %v4200_v31 = vpack.c.bf16 %v3580_v36, %v3579_v33  ;;  %v3433_v40 = vadd.f32 %v3432_v32, %v5692_v6  ;;  %v3581_v0 = vmax.f32 %v3431_v56, 0.0 }
 0x3b9   :  { %v3434_v8 = vpop.f32.mrf.mxu0 }
 0x3ba   :  { %4036 = vst [vmem:[%s6045_s6 + $0x1b8] sm:$0xff] %v4200_v31  ;;  %v3582_v3 = vmax.f32 %v3433_v40, 0.0  ;;  %v3435_v37 = vadd.f32 %v3434_v8, %v5687_v55 }
 0x3bb   :  { %v3436_v5 = vpop.f32.mrf.mxu0 }
 0x3bc   :  { %v4201_v39 = vpack.c.bf16 %v3582_v3, %v3581_v0  ;;  %v3437_v35 = vadd.f32 %v3436_v5, %v5692_v6  ;;  %v3583_v20 = vmax.f32 %v3435_v37, 0.0 }
 0x3bd   :  { %v3440_v44 = vpop.f32.mrf.mxu0 }
 0x3be   :  { %4037 = vst [vmem:[%s6045_s6 + $0x1c0] sm:$0xff] %v4201_v39  ;;  %v3584_v59 = vmax.f32 %v3437_v35, 0.0  ;;  %v3441_v46 = vadd.f32 %v3440_v44, %v5687_v55 }
 0x3bf   :  { %v3442_v48 = vpop.f32.mrf.mxu0 }
 0x3c0   :  { %v4202_v22 = vpack.c.bf16 %v3584_v59, %v3583_v20  ;;  %v3443_v42 = vadd.f32 %v3442_v48, %v5692_v6  ;;  %v3585_v51 = vmax.f32 %v3441_v46, 0.0 }
 0x3c1   :  { %v3444_v38 = vpop.f32.mrf.mxu0 }
 0x3c2   :  { %4038 = vst [vmem:[%s6045_s6 + $0x1c8] sm:$0xff] %v4202_v22  ;;  %v3586_v45 = vmax.f32 %v3443_v42, 0.0  ;;  %v3445_v12 = vadd.f32 %v3444_v38, %v5687_v55 }
 0x3c3   :  { %v3446_v2 = vpop.f32.mrf.mxu0 }
 0x3c4   :  { %v4203_v52 = vpack.c.bf16 %v3586_v45, %v3585_v51  ;;  %v3447_v49 = vadd.f32 %v3446_v2, %v5692_v6  ;;  %v3587_v9 = vmax.f32 %v3445_v12, 0.0 }
 0x3c5   :  { %v3450_v17 = vpop.f32.mrf.mxu0 }
 0x3c6   :  { %4039 = vst [vmem:[%s6045_s6 + $0x1d0] sm:$0xff] %v4203_v52  ;;  %v3588_v43 = vmax.f32 %v3447_v49, 0.0  ;;  %v3451_v13 = vadd.f32 %v3450_v17, %v5687_v55 }
 0x3c7   :  { %v3452_v34 = vpop.f32.mrf.mxu0 }
 0x3c8   :  { %v4204_v54 = vpack.c.bf16 %v3588_v43, %v3587_v9  ;;  %v3453_v11 = vadd.f32 %v3452_v34, %v5692_v6  ;;  %v3589_v7 = vmax.f32 %v3451_v13, 0.0 }
 0x3c9   :  { %v3454_v57 = vpop.f32.mrf.mxu0 }
 0x3ca   :  { %4040 = vst [vmem:[%s6045_s6 + $0x1d8] sm:$0xff] %v4204_v54  ;;  %v3590_v15 = vmax.f32 %v3453_v11, 0.0  ;;  %v3455_v53 = vadd.f32 %v3454_v57, %v5687_v55 }
 0x3cb   :  { %v3456_v41 = vpop.f32.mrf.mxu0 }
 0x3cc   :  { %v4205_v63 = vpack.c.bf16 %v3590_v15, %v3589_v7  ;;  %v3457_v26 = vadd.f32 %v3456_v41, %v5692_v6  ;;  %v3591_v18 = vmax.f32 %v3455_v53, 0.0 }
 0x3cd   :  { %v3460_v61 = vpop.f32.mrf.mxu0 }
 0x3ce   :  { %4041 = vst [vmem:[%s6045_s6 + $0x1e0] sm:$0xff] %v4205_v63  ;;  %v3592_v58 = vmax.f32 %v3457_v26, 0.0  ;;  %v3461_v19 = vadd.f32 %v3460_v61, %v5687_v55 }
 0x3cf   :  { %v3462_v60 = vpop.f32.mrf.mxu0 }
 0x3d0   :  { %v4206_v28 = vpack.c.bf16 %v3592_v58, %v3591_v18  ;;  %v3463_v10 = vadd.f32 %v3462_v60, %v5692_v6  ;;  %v3593_v24 = vmax.f32 %v3461_v19, 0.0 }
 0x3d1   :  { %v3464_v27 = vpop.f32.mrf.mxu0 }
 0x3d2   :  { %4042 = vst [vmem:[%s6045_s6 + $0x1e8] sm:$0xff] %v4206_v28  ;;  %v3594_v21 = vmax.f32 %v3463_v10, 0.0  ;;  %v3465_v30 = vadd.f32 %v3464_v27, %v5687_v55 }
 0x3d3   :  { %v3466_v16 = vpop.f32.mrf.mxu0 }
 0x3d4   :  { %v4207_v1 = vpack.c.bf16 %v3594_v21, %v3593_v24  ;;  %v3467_v29 = vadd.f32 %v3466_v16, %v5692_v6  ;;  %v3595_v25 = vmax.f32 %v3465_v30, 0.0 }
 0x3d6   :  { %4043 = vst [vmem:[%s6045_s6 + $0x1f0] sm:$0xff] %v4207_v1  ;;  %v3596_v23 = vmax.f32 %v3467_v29, 0.0 }
 0x3d8   :  { %v4208_v62 = vpack.c.bf16 %v3596_v23, %v3595_v25 }
 0x3da   :  { %4044 = vst [vmem:[%s6045_s6 + $0x1f8] sm:$0xff] %v4208_v62 }

</bundles_post_ra>
